<compile_context>
chip_gen: v7x
topology: tpu7x:2x2x1
jax: 0.10.0
libtpu: 0.0.40
codegen_flags: <defaults>
</compile_context>

<pallas_src>
import functools

import jax
import jax.numpy as jnp
from jax.experimental import pallas as pl
from jax.experimental.pallas import tpu as pltpu


_VMEM_LIMIT_BYTES = 48 * 1024 * 1024  # explicit limit, headroom under v7x 64 MiB


def _compiler_params():
    return pltpu.CompilerParams(
        dimension_semantics=("parallel",),
        vmem_limit_bytes=_VMEM_LIMIT_BYTES)


# -----------------------------------------------------------------------------
# Pallas kernels
# -----------------------------------------------------------------------------
def _matmul_bias_relu_kernel(x_ref, w_ref, b_ref, o_ref):
    """relu((M, K) @ (K, C) + bias) for one image (conv1 K-concatenated path)."""
    y = jnp.dot(x_ref[0], w_ref[...], preferred_element_type=jnp.float32)
    y = jnp.maximum(y + b_ref[...], 0.0)
    o_ref[0] = y.astype(o_ref.dtype)


def _maxpool_kernel(x_ref, o_ref, *, taps, s, Ho, Wo):
    """Max over kh*kw taps; x_ref is the phase-decomposed padded input."""
    out = None
    for (i, j) in taps:
        ph = (i % s) * s + (j % s)
        win = x_ref[0, ph, pl.ds(i // s, Ho), pl.ds(j // s, Wo), :]
        out = win if out is None else jnp.maximum(out, win)
    o_ref[0] = out


def _bottleneck_kernel(x_ref, w1_ref, b1_ref, w2_ref, b2_ref, w3_ref, b3_ref,
                       *rest, s, H, W, Ho, Wo, has_down):
    """Fully fused bottleneck block for one image.

    x_ref : s==1 -> (1, H, W, Cin)
            s==2 -> (1, s*s, H/s, W/s, Cin) unpadded phase decomposition
                    (x[n, a*s+b, q, r, :] == x[n, s*q+a, s*r+b, :])
    w*_ref: BN-scale-folded bf16 weights, b*_ref: folded f32 biases
    rest  : [wd_ref, bd_ref,] o_ref (1, Ho*Wo, Cout), h1_ref VMEM scratch
            (s*s, Hq, Wq, planes) f32 -- padded phase layout of the c1 output.
    """
    if has_down:
        wd_ref, bd_ref, o_ref, h1_ref = rest
    else:
        o_ref, h1_ref = rest
    cin = x_ref.shape[-1]
    planes = w1_ref.shape[-1]

    # --- conv1 (1x1) + BN + ReLU, scattered into a zero-padded phase scratch.
    # The untouched scratch halo stays 0, which is exactly conv2's zero padding
    # of the conv1 output (so no relu(bias)-in-the-halo artifacts).
    h1_ref[...] = jnp.zeros_like(h1_ref)
    if s == 1:
        a = x_ref[0].reshape(H * W, cin)
        h1 = jnp.maximum(
            jnp.dot(a, w1_ref[...], preferred_element_type=jnp.float32)
            + b1_ref[...], 0.0)
        h1_ref[0, pl.ds(1, H), pl.ds(1, W), :] = h1.reshape(H, W, planes)
    else:
        hh, ww = H // s, W // s
        for ph_h in range(s):
            for ph_w in range(s):
                xa = x_ref[0, ph_h * s + ph_w].reshape(hh * ww, cin)
                h1 = jnp.maximum(
                    jnp.dot(xa, w1_ref[...], preferred_element_type=jnp.float32)
                    + b1_ref[...], 0.0)
                # unpadded parity (a, b) lands at padded parity ((a+1)%s, (b+1)%s)
                # with a row/col offset of (a+1)//s, (b+1)//s   (pad = 1).
                pp = ((ph_h + 1) % s) * s + ((ph_w + 1) % s)
                ro, co = (ph_h + 1) // s, (ph_w + 1) // s
                h1_ref[pp, pl.ds(ro, hh), pl.ds(co, ww), :] = (
                    h1.reshape(hh, ww, planes))

    # --- conv2 (3x3, stride folded into the phase layout) + BN + ReLU --------
    taps = [(i, j) for i in range(3) for j in range(3)]
    acc = None
    for t, (i, j) in enumerate(taps):
        ph = (i % s) * s + (j % s)
        win = h1_ref[ph, pl.ds(i // s, Ho), pl.ds(j // s, Wo), :]
        a2 = win.reshape(Ho * Wo, planes).astype(w2_ref.dtype)
        contrib = jnp.dot(a2, w2_ref[t], preferred_element_type=jnp.float32)
        acc = contrib if acc is None else acc + contrib
    h2 = jnp.maximum(acc + b2_ref[...], 0.0)          # (Ho*Wo, planes) f32

    # --- conv3 (1x1) + BN + residual + ReLU (single epilogue) ----------------
    y = jnp.dot(h2.astype(w3_ref.dtype), w3_ref[...],
                preferred_element_type=jnp.float32) + b3_ref[...]
    if has_down:
        if s == 1:
            idn = x_ref[0].reshape(Ho * Wo, cin)
        else:
            idn = x_ref[0, 0].reshape(Ho * Wo, cin)    # x[::2, ::2] == phase (0,0)
        y = y + jnp.dot(idn, wd_ref[...], preferred_element_type=jnp.float32)
        y = y + bd_ref[...]
    else:
        y = y + x_ref[0].reshape(Ho * Wo, cin).astype(jnp.float32)
    o_ref[0] = jnp.maximum(y, 0.0).astype(o_ref.dtype)


# -----------------------------------------------------------------------------
# Wrappers around pallas_call
# -----------------------------------------------------------------------------
def conv1_7x7_s2(x, p):
    """7x7 / stride-2 / pad-3 conv + folded BN + ReLU as one K=147 matmul."""
    N, H, W, Cin = x.shape
    kh, kw, s, pad = 7, 7, 2, 3
    Ho = (H + 2 * pad - kh) // s + 1
    Wo = (W + 2 * pad - kw) // s + 1
    Cout = p["w"].shape[-1]
    xp = jnp.pad(x, ((0, 0), (pad, pad), (pad, pad), (0, 0)))
    # Tap-concatenation along K (tap-major, channel-minor -> matches the weight
    # flattening): one (Ho*Wo, 147) x (147, Cout) matmul instead of 49 K=3 ones.
    cols = [xp[:, i:i + s * (Ho - 1) + 1:s, j:j + s * (Wo - 1) + 1:s, :]
            for i in range(kh) for j in range(kw)]
    patches = jnp.concatenate(cols, axis=-1).reshape(N, Ho * Wo, kh * kw * Cin)
    w = p["w"].reshape(kh * kw * Cin, Cout)

    out = pl.pallas_call(
        _matmul_bias_relu_kernel,
        out_shape=jax.ShapeDtypeStruct((N, Ho * Wo, Cout), jnp.bfloat16),
        grid_spec=pltpu.PrefetchScalarGridSpec(
            num_scalar_prefetch=0, grid=(N,),
            in_specs=[pl.BlockSpec((1, Ho * Wo, kh * kw * Cin),
                                   lambda n: (n, 0, 0)),
                      pl.BlockSpec((kh * kw * Cin, Cout), lambda n: (0, 0)),
                      pl.BlockSpec((1, Cout), lambda n: (0, 0))],
            out_specs=pl.BlockSpec((1, Ho * Wo, Cout), lambda n: (n, 0, 0))),
        compiler_params=_compiler_params(),
    )(patches, w, p["bias"])
    return out.reshape(N, Ho, Wo, Cout)


def _phase_decompose(x, kh, kw, stride, pad, pad_value=0.0):
    """Pad NHWC once and split into s*s parity phases (unit-stride windows)."""
    N, H, W, C = x.shape
    s = stride
    Ho = (H + 2 * pad - kh) // s + 1
    Wo = (W + 2 * pad - kw) // s + 1
    Hq = Ho + (kh - 1) // s
    Wq = Wo + (kw - 1) // s
    Hp, Wp = s * Hq, s * Wq
    xp = jnp.pad(x, ((0, 0),
                     (pad, max(Hp - H - pad, 0)),
                     (pad, max(Wp - W - pad, 0)),
                     (0, 0)),
                 constant_values=pad_value)[:, :Hp, :Wp, :]
    xph = xp.reshape(N, Hq, s, Wq, s, C).transpose(0, 2, 4, 1, 3, 5)
    return xph.reshape(N, s * s, Hq, Wq, C), Ho, Wo, Hq, Wq


def maxpool_3x3_s2_p1(x):
    """nn.MaxPool2d(kernel_size=3, stride=2, padding=1) on NHWC (bf16)."""
    N, H, W, C = x.shape
    kh = kw = 3
    s, pad = 2, 1
    neg = float(jnp.finfo(x.dtype).min)
    xin, Ho, Wo, Hq, Wq = _phase_decompose(x, kh, kw, s, pad, pad_value=neg)
    taps = [(i, j) for i in range(kh) for j in range(kw)]
    return pl.pallas_call(
        functools.partial(_maxpool_kernel, taps=taps, s=s, Ho=Ho, Wo=Wo),
        out_shape=jax.ShapeDtypeStruct((N, Ho, Wo, C), x.dtype),
        grid_spec=pltpu.PrefetchScalarGridSpec(
            num_scalar_prefetch=0, grid=(N,),
            in_specs=[pl.BlockSpec((1, s * s, Hq, Wq, C),
                                   lambda n: (n, 0, 0, 0, 0))],
            out_specs=pl.BlockSpec((1, Ho, Wo, C), lambda n: (n, 0, 0, 0))),
        compiler_params=_compiler_params(),
    )(xin)


def bottleneck_block(x, blk):
    """One fully fused bottleneck block (c1 -> c2 -> c3 + residual + ReLU)."""
    s = blk["stride"]
    N, H, W, Cin = x.shape
    planes = blk["c1"]["w"].shape[-1]
    cout = blk["c3"]["w"].shape[-1]
    Ho = (H + 2 - 3) // s + 1
    Wo = (W + 2 - 3) // s + 1
    has_down = "down" in blk

    if s == 1:
        xin = x
        x_spec = pl.BlockSpec((1, H, W, Cin), lambda n: (n, 0, 0, 0))
        Hq, Wq = H + 2, W + 2
    else:
        assert H % s == 0 and W % s == 0
        # Unpadded phase decomposition (pure reshape/transpose, no jnp.pad):
        # xin[n, a*s+b, q, r, :] == x[n, s*q+a, s*r+b, :].
        xin = x.reshape(N, H // s, s, W // s, s, Cin)
        xin = xin.transpose(0, 2, 4, 1, 3, 5).reshape(N, s * s, H // s, W // s, Cin)
        x_spec = pl.BlockSpec((1, s * s, H // s, W // s, Cin),
                              lambda n: (n, 0, 0, 0, 0))
        Hq, Wq = Ho + 1, Wo + 1

    in_specs = [
        x_spec,
        pl.BlockSpec((Cin, planes), lambda n: (0, 0)),
        pl.BlockSpec((1, planes), lambda n: (0, 0)),
        pl.BlockSpec((9, planes, planes), lambda n: (0, 0, 0)),
        pl.BlockSpec((1, planes), lambda n: (0, 0)),
        pl.BlockSpec((planes, cout), lambda n: (0, 0)),
        pl.BlockSpec((1, cout), lambda n: (0, 0)),
    ]
    args = [xin, blk["c1"]["w"], blk["c1"]["bias"],
            blk["c2"]["w"], blk["c2"]["bias"],
            blk["c3"]["w"], blk["c3"]["bias"]]
    if has_down:
        in_specs += [pl.BlockSpec((Cin, cout), lambda n: (0, 0)),
                     pl.BlockSpec((1, cout), lambda n: (0, 0))]
        args += [blk["down"]["w"], blk["down"]["bias"]]

    out = pl.pallas_call(
        functools.partial(_bottleneck_kernel, s=s, H=H, W=W, Ho=Ho, Wo=Wo,
                          has_down=has_down),
        out_shape=jax.ShapeDtypeStruct((N, Ho * Wo, cout), jnp.bfloat16),
        grid_spec=pltpu.PrefetchScalarGridSpec(
            num_scalar_prefetch=0, grid=(N,),
            in_specs=in_specs,
            out_specs=pl.BlockSpec((1, Ho * Wo, cout), lambda n: (n, 0, 0)),
            scratch_shapes=[pltpu.VMEM((s * s, Hq, Wq, planes), jnp.float32)]),
        compiler_params=_compiler_params(),
    )(*args)
    return out.reshape(N, Ho, Wo, cout)


# -----------------------------------------------------------------------------
# Parameter construction (deterministic, synthetic; BN folded at build time)
# -----------------------------------------------------------------------------
def _make_conv_bn(key, kh, kw, cin, cout):
    k1, k2, k3, k4, k5 = jax.random.split(key, 5)
    fan_in = kh * kw * cin
    w = jax.random.normal(k1, (kh, kw, cin, cout), jnp.float32) / jnp.sqrt(fan_in)
    gamma = 1.0 + 0.1 * jax.random.normal(k2, (cout,), jnp.float32)
    beta = 0.1 * jax.random.normal(k3, (cout,), jnp.float32)
    mean = 0.1 * jax.random.normal(k4, (cout,), jnp.float32)
    var = jnp.abs(jax.random.normal(k5, (cout,), jnp.float32)) + 0.5
    eps = 1e-5  # PyTorch BatchNorm2d default
    scale = gamma / jnp.sqrt(var + eps)
    bias = beta - mean * scale
    wf = w * scale                              # fold BN scale into the weights
    if kh == 1 and kw == 1:
        wk = wf.reshape(cin, cout)
    else:
        wk = wf.reshape(kh * kw, cin, cout)     # (taps, Cin, Cout)
    return {"w": wk.astype(jnp.bfloat16),
            "bias": bias.reshape(1, cout).astype(jnp.float32),
            "kh": kh, "kw": kw}


def make_resnet_params(key, base=8, blocks=(1, 1, 1, 1), expansion=4):
    """Scaled-down bottleneck ResNet (structure of torchvision resnet/resnext)."""
    keys = iter(jax.random.split(key, 128))
    params = {"conv1": _make_conv_bn(next(keys), 7, 7, 3, base)}
    inplanes = base
    for li, nblocks in enumerate(blocks, start=1):
        planes = base * (2 ** (li - 1))
        stride_first = 1 if li == 1 else 2
        layer = []
        for bi in range(nblocks):
            stride = stride_first if bi == 0 else 1
            blk = {
                "stride": stride,
                "c1": _make_conv_bn(next(keys), 1, 1, inplanes, planes),
                "c2": _make_conv_bn(next(keys), 3, 3, planes, planes),
                "c3": _make_conv_bn(next(keys), 1, 1, planes, planes * expansion),
            }
            if stride != 1 or inplanes != planes * expansion:
                blk["down"] = _make_conv_bn(next(keys), 1, 1, inplanes,
                                            planes * expansion)
            layer.append(blk)
            inplanes = planes * expansion
        params[f"layer{li}"] = layer
    return params


# -----------------------------------------------------------------------------
# Forward pass (mirrors ResNet.forward)
# -----------------------------------------------------------------------------
# cfg.MODEL.BACKBONE.FEATURE_KEYS
KEY_FEATURES = ("res2", "res3", "res4", "res5")


def resnet_forward(x_nchw, params):
    # NCHW -> NHWC, activations kept bf16 end-to-end between kernels.
    x = jnp.transpose(x_nchw, (0, 2, 3, 1)).astype(jnp.bfloat16)
    # layer0 = conv1 + bn1 + relu + maxpool
    y = conv1_7x7_s2(x, params["conv1"])
    y = maxpool_3x3_s2_p1(y)
    out = {"res1": y}
    for li, name in zip(range(1, 5), ("res2", "res3", "res4", "res5")):
        for blk in params[f"layer{li}"]:
            y = bottleneck_block(y, blk)
        out[name] = y
    # filter to key_features, return NCHW f32 (PyTorch convention)
    return {k: jnp.transpose(out[k], (0, 3, 1, 2)).astype(jnp.float32)
            for k in out if k in KEY_FEATURES}


# -----------------------------------------------------------------------------
# Main
# -----------------------------------------------------------------------------
if __name__ == "__main__":
    key = jax.random.PRNGKey(0)
    kx, kp = jax.random.split(key)
    x = jax.random.normal(kx, (2, 3, 64, 64), jnp.float32)  # NCHW input
    params = make_resnet_params(kp)

    fwd = jax.jit(lambda inp: resnet_forward(inp, params))
    out = fwd(x)
    out = jax.block_until_ready(out)

    expected = {
        "res2": (2, 32, 16, 16),   # stride 4
        "res3": (2, 64, 8, 8),     # stride 8
        "res4": (2, 128, 4, 4),    # stride 16
        "res5": (2, 256, 2, 2),    # stride 32
    }
    for k, shp in expected.items():
        assert out[k].shape == shp, (k, out[k].shape, shp)
        assert out[k].dtype == jnp.float32
        assert bool(jnp.all(jnp.isfinite(out[k])))

    print("KERNEL_OK")
</pallas_src>

<mosaic_0001>
module attributes {stable_mosaic.version = 11 : i64} {
  func.func @_matmul_bias_relu_kernel(%arg0: i32, %arg1: memref<1x1024x147xbf16, #tpu.memory_space<vmem>>, %arg2: memref<147x8xbf16, #tpu.memory_space<vmem>>, %arg3: memref<1x8xf32, #tpu.memory_space<vmem>>, %arg4: memref<1x1024x8xbf16, #tpu.memory_space<vmem>>) attributes {dimension_semantics = [#tpu.dimension_semantics<parallel>], iteration_bounds = array<i64: 2>, scalar_prefetch = 0 : i64, scratch_operands = 0 : i64, tpu.core_type = #tpu.core_type<tc>, window_params = [{transform_indices = @transform_0, window_bounds = array<i64: 1, 1024, 147>}, {pipeline_mode = #tpu.pipeline_mode<synchronous>, transform_indices = @transform_1, window_bounds = array<i64: 147, 8>}, {pipeline_mode = #tpu.pipeline_mode<synchronous>, transform_indices = @transform_2, window_bounds = array<i64: 1, 8>}, {transform_indices = @transform_3, window_bounds = array<i64: 1, 1024, 8>}]} {
    %c0 = arith.constant 0 : index
    %c0_0 = arith.constant 0 : index
    %c0_1 = arith.constant 0 : index
    %0 = vector.load %arg1[%c0, %c0_0, %c0_1] : memref<1x1024x147xbf16, #tpu.memory_space<vmem>>, vector<1x1024x147xbf16>
    %1 = vector.shape_cast %0 : vector<1x1024x147xbf16> to vector<1024x147xbf16>
    %c0_2 = arith.constant 0 : index
    %c0_3 = arith.constant 0 : index
    %2 = vector.load %arg2[%c0_2, %c0_3] : memref<147x8xbf16, #tpu.memory_space<vmem>>, vector<147x8xbf16>
    %cst = arith.constant dense<0.000000e+00> : vector<1024x8xf32>
    %3 = tpu.matmul %1, %2, %cst {dimension_numbers = #tpu.dot_dimension_numbers<[1], [0], [0], [1], [0, 0, 1, 1], [], []>} : vector<1024x147xbf16>, vector<147x8xbf16>, vector<1024x8xf32> -> vector<1024x8xf32>
    %c0_4 = arith.constant 0 : index
    %c0_5 = arith.constant 0 : index
    %4 = vector.load %arg3[%c0_4, %c0_5] : memref<1x8xf32, #tpu.memory_space<vmem>>, vector<1x8xf32>
    %5 = vector.broadcast %4 : vector<1x8xf32> to vector<1024x8xf32>
    %6 = arith.addf %3, %5 : vector<1024x8xf32>
    %cst_6 = arith.constant 0.000000e+00 : f32
    %7 = vector.broadcast %cst_6 : f32 to vector<1024x8xf32>
    %8 = arith.maximumf %6, %7 : vector<1024x8xf32>
    %9 = arith.truncf %8 : vector<1024x8xf32> to vector<1024x8xbf16>
    %c0_7 = arith.constant 0 : index
    %c0_8 = arith.constant 0 : index
    %c0_9 = arith.constant 0 : index
    %10 = vector.load %arg4[%c0_7, %c0_8, %c0_9] : memref<1x1024x8xbf16, #tpu.memory_space<vmem>>, vector<1x1024x8xbf16>
    %11 = vector.shape_cast %10 : vector<1x1024x8xbf16> to vector<1024x8xbf16>
    %12 = vector.shape_cast %9 : vector<1024x8xbf16> to vector<1x1024x8xbf16>
    tpu.vector_store %arg4[%c0_7, %c0_8, %c0_9], %12 {strides = array<i32>} : memref<1x1024x8xbf16, #tpu.memory_space<vmem>>, vector<1x1024x8xbf16>,
    return
  }
  func.func @transform_0(%arg0: i32) -> (i32, i32, i32) {
    %c0_i32 = arith.constant 0 : i32
    %c0_i32_0 = arith.constant 0 : i32
    %c0_i32_1 = arith.constant 0 : i32
    return %arg0, %c0_i32, %c0_i32_0 : i32, i32, i32
  }
  func.func @transform_1(%arg0: i32) -> (i32, i32) {
    %c0_i32 = arith.constant 0 : i32
    %c0_i32_0 = arith.constant 0 : i32
    %c0_i32_1 = arith.constant 0 : i32
    return %c0_i32, %c0_i32_0 : i32, i32
  }
  func.func @transform_2(%arg0: i32) -> (i32, i32) {
    %c0_i32 = arith.constant 0 : i32
    %c0_i32_0 = arith.constant 0 : i32
    %c0_i32_1 = arith.constant 0 : i32
    return %c0_i32, %c0_i32_0 : i32, i32
  }
  func.func @transform_3(%arg0: i32) -> (i32, i32, i32) {
    %c0_i32 = arith.constant 0 : i32
    %c0_i32_0 = arith.constant 0 : i32
    %c0_i32_1 = arith.constant 0 : i32
    return %arg0, %c0_i32, %c0_i32_0 : i32, i32, i32
  }
}

module attributes {stable_mosaic.version = 11 : i64} {
  func.func @_maxpool_kernel(%arg0: i32, %arg1: memref<1x4x17x17x8xbf16, #tpu.memory_space<vmem>>, %arg2: memref<1x16x16x8xbf16, #tpu.memory_space<vmem>>) attributes {dimension_semantics = [#tpu.dimension_semantics<parallel>], iteration_bounds = array<i64: 2>, scalar_prefetch = 0 : i64, scratch_operands = 0 : i64, tpu.core_type = #tpu.core_type<tc>, window_params = [{transform_indices = @transform_0, window_bounds = array<i64: 1, 4, 17, 17, 8>}, {transform_indices = @transform_1, window_bounds = array<i64: 1, 16, 16, 8>}]} {
    %c0 = arith.constant 0 : index
    %c0_0 = arith.constant 0 : index
    %c0_1 = arith.constant 0 : index
    %c0_2 = arith.constant 0 : index
    %c0_3 = arith.constant 0 : index
    %0 = vector.load %arg1[%c0, %c0_0, %c0_1, %c0_2, %c0_3] : memref<1x4x17x17x8xbf16, #tpu.memory_space<vmem>>, vector<1x1x16x16x8xbf16>
    %1 = vector.shape_cast %0 : vector<1x1x16x16x8xbf16> to vector<16x16x8xbf16>
    %c0_4 = arith.constant 0 : index
    %c1 = arith.constant 1 : index
    %c0_5 = arith.constant 0 : index
    %c0_6 = arith.constant 0 : index
    %c0_7 = arith.constant 0 : index
    %2 = vector.load %arg1[%c0_4, %c1, %c0_5, %c0_6, %c0_7] : memref<1x4x17x17x8xbf16, #tpu.memory_space<vmem>>, vector<1x1x16x16x8xbf16>
    %3 = vector.shape_cast %2 : vector<1x1x16x16x8xbf16> to vector<16x16x8xbf16>
    %4 = arith.maximumf %1, %3 : vector<16x16x8xbf16>
    %c0_8 = arith.constant 0 : index
    %c0_9 = arith.constant 0 : index
    %c0_10 = arith.constant 0 : index
    %c1_11 = arith.constant 1 : index
    %c0_12 = arith.constant 0 : index
    %5 = vector.load %arg1[%c0_8, %c0_9, %c0_10, %c1_11, %c0_12] : memref<1x4x17x17x8xbf16, #tpu.memory_space<vmem>>, vector<1x1x16x16x8xbf16>
    %6 = vector.shape_cast %5 : vector<1x1x16x16x8xbf16> to vector<16x16x8xbf16>
    %7 = arith.maximumf %4, %6 : vector<16x16x8xbf16>
    %c0_13 = arith.constant 0 : index
    %c2 = arith.constant 2 : index
    %c0_14 = arith.constant 0 : index
    %c0_15 = arith.constant 0 : index
    %c0_16 = arith.constant 0 : index
    %8 = vector.load %arg1[%c0_13, %c2, %c0_14, %c0_15, %c0_16] : memref<1x4x17x17x8xbf16, #tpu.memory_space<vmem>>, vector<1x1x16x16x8xbf16>
    %9 = vector.shape_cast %8 : vector<1x1x16x16x8xbf16> to vector<16x16x8xbf16>
    %10 = arith.maximumf %7, %9 : vector<16x16x8xbf16>
    %c0_17 = arith.constant 0 : index
    %c3 = arith.constant 3 : index
    %c0_18 = arith.constant 0 : index
    %c0_19 = arith.constant 0 : index
    %c0_20 = arith.constant 0 : index
    %11 = vector.load %arg1[%c0_17, %c3, %c0_18, %c0_19, %c0_20] : memref<1x4x17x17x8xbf16, #tpu.memory_space<vmem>>, vector<1x1x16x16x8xbf16>
    %12 = vector.shape_cast %11 : vector<1x1x16x16x8xbf16> to vector<16x16x8xbf16>
    %13 = arith.maximumf %10, %12 : vector<16x16x8xbf16>
    %c0_21 = arith.constant 0 : index
    %c2_22 = arith.constant 2 : index
    %c0_23 = arith.constant 0 : index
    %c1_24 = arith.constant 1 : index
    %c0_25 = arith.constant 0 : index
    %14 = vector.load %arg1[%c0_21, %c2_22, %c0_23, %c1_24, %c0_25] : memref<1x4x17x17x8xbf16, #tpu.memory_space<vmem>>, vector<1x1x16x16x8xbf16>
    %15 = vector.shape_cast %14 : vector<1x1x16x16x8xbf16> to vector<16x16x8xbf16>
    %16 = arith.maximumf %13, %15 : vector<16x16x8xbf16>
    %c0_26 = arith.constant 0 : index
    %c0_27 = arith.constant 0 : index
    %c1_28 = arith.constant 1 : index
    %c0_29 = arith.constant 0 : index
    %c0_30 = arith.constant 0 : index
    %17 = vector.load %arg1[%c0_26, %c0_27, %c1_28, %c0_29, %c0_30] : memref<1x4x17x17x8xbf16, #tpu.memory_space<vmem>>, vector<1x1x16x16x8xbf16>
    %18 = vector.shape_cast %17 : vector<1x1x16x16x8xbf16> to vector<16x16x8xbf16>
    %19 = arith.maximumf %16, %18 : vector<16x16x8xbf16>
    %c0_31 = arith.constant 0 : index
    %c1_32 = arith.constant 1 : index
    %c1_33 = arith.constant 1 : index
    %c0_34 = arith.constant 0 : index
    %c0_35 = arith.constant 0 : index
    %20 = vector.load %arg1[%c0_31, %c1_32, %c1_33, %c0_34, %c0_35] : memref<1x4x17x17x8xbf16, #tpu.memory_space<vmem>>, vector<1x1x16x16x8xbf16>
    %21 = vector.shape_cast %20 : vector<1x1x16x16x8xbf16> to vector<16x16x8xbf16>
    %22 = arith.maximumf %19, %21 : vector<16x16x8xbf16>
    %c0_36 = arith.constant 0 : index
    %c0_37 = arith.constant 0 : index
    %c1_38 = arith.constant 1 : index
    %c1_39 = arith.constant 1 : index
    %c0_40 = arith.constant 0 : index
    %23 = vector.load %arg1[%c0_36, %c0_37, %c1_38, %c1_39, %c0_40] : memref<1x4x17x17x8xbf16, #tpu.memory_space<vmem>>, vector<1x1x16x16x8xbf16>
    %24 = vector.shape_cast %23 : vector<1x1x16x16x8xbf16> to vector<16x16x8xbf16>
    %25 = arith.maximumf %22, %24 : vector<16x16x8xbf16>
    %c0_41 = arith.constant 0 : index
    %c0_42 = arith.constant 0 : index
    %c0_43 = arith.constant 0 : index
    %c0_44 = arith.constant 0 : index
    %26 = vector.load %arg2[%c0_41, %c0_42, %c0_43, %c0_44] : memref<1x16x16x8xbf16, #tpu.memory_space<vmem>>, vector<1x16x16x8xbf16>
    %27 = vector.shape_cast %26 : vector<1x16x16x8xbf16> to vector<16x16x8xbf16>
    %28 = vector.shape_cast %25 : vector<16x16x8xbf16> to vector<1x16x16x8xbf16>
    tpu.vector_store %arg2[%c0_41, %c0_42, %c0_43, %c0_44], %28 {strides = array<i32>} : memref<1x16x16x8xbf16, #tpu.memory_space<vmem>>, vector<1x16x16x8xbf16>,
    return
  }
  func.func @transform_0(%arg0: i32) -> (i32, i32, i32, i32, i32) {
    %c0_i32 = arith.constant 0 : i32
    %c0_i32_0 = arith.constant 0 : i32
    %c0_i32_1 = arith.constant 0 : i32
    %c0_i32_2 = arith.constant 0 : i32
    %c0_i32_3 = arith.constant 0 : i32
    return %arg0, %c0_i32, %c0_i32_0, %c0_i32_1, %c0_i32_2 : i32, i32, i32, i32, i32
  }
  func.func @transform_1(%arg0: i32) -> (i32, i32, i32, i32) {
    %c0_i32 = arith.constant 0 : i32
    %c0_i32_0 = arith.constant 0 : i32
    %c0_i32_1 = arith.constant 0 : i32
    %c0_i32_2 = arith.constant 0 : i32
    return %arg0, %c0_i32, %c0_i32_0, %c0_i32_1 : i32, i32, i32, i32
  }
}

module attributes {stable_mosaic.version = 11 : i64} {
  func.func @_bottleneck_kernel(%arg0: i32, %arg1: memref<1x16x16x8xbf16, #tpu.memory_space<vmem>>, %arg2: memref<8x8xbf16, #tpu.memory_space<vmem>>, %arg3: memref<1x8xf32, #tpu.memory_space<vmem>>, %arg4: memref<9x8x8xbf16, #tpu.memory_space<vmem>>, %arg5: memref<1x8xf32, #tpu.memory_space<vmem>>, %arg6: memref<8x32xbf16, #tpu.memory_space<vmem>>, %arg7: memref<1x32xf32, #tpu.memory_space<vmem>>, %arg8: memref<8x32xbf16, #tpu.memory_space<vmem>>, %arg9: memref<1x32xf32, #tpu.memory_space<vmem>>, %arg10: memref<1x256x32xbf16, #tpu.memory_space<vmem>>, %arg11: memref<1x18x18x8xf32, #tpu.memory_space<vmem>>) attributes {dimension_semantics = [#tpu.dimension_semantics<parallel>], iteration_bounds = array<i64: 2>, scalar_prefetch = 0 : i64, scratch_operands = 1 : i64, tpu.core_type = #tpu.core_type<tc>, window_params = [{transform_indices = @transform_0, window_bounds = array<i64: 1, 16, 16, 8>}, {pipeline_mode = #tpu.pipeline_mode<synchronous>, transform_indices = @transform_1, window_bounds = array<i64: 8, 8>}, {pipeline_mode = #tpu.pipeline_mode<synchronous>, transform_indices = @transform_2, window_bounds = array<i64: 1, 8>}, {pipeline_mode = #tpu.pipeline_mode<synchronous>, transform_indices = @transform_3, window_bounds = array<i64: 9, 8, 8>}, {pipeline_mode = #tpu.pipeline_mode<synchronous>, transform_indices = @transform_4, window_bounds = array<i64: 1, 8>}, {pipeline_mode = #tpu.pipeline_mode<synchronous>, transform_indices = @transform_5, window_bounds = array<i64: 8, 32>}, {pipeline_mode = #tpu.pipeline_mode<synchronous>, transform_indices = @transform_6, window_bounds = array<i64: 1, 32>}, {pipeline_mode = #tpu.pipeline_mode<synchronous>, transform_indices = @transform_7, window_bounds = array<i64: 8, 32>}, {pipeline_mode = #tpu.pipeline_mode<synchronous>, transform_indices = @transform_8, window_bounds = array<i64: 1, 32>}, {transform_indices = @transform_9, window_bounds = array<i64: 1, 256, 32>}]} {
    %cst = arith.constant 0.000000e+00 : f32
    %0 = vector.broadcast %cst : f32 to vector<1x18x18x8xf32>
    %c0 = arith.constant 0 : index
    %c0_0 = arith.constant 0 : index
    %c0_1 = arith.constant 0 : index
    %c0_2 = arith.constant 0 : index
    %1 = vector.load %arg11[%c0, %c0_0, %c0_1, %c0_2] : memref<1x18x18x8xf32, #tpu.memory_space<vmem>>, vector<1x18x18x8xf32>
    tpu.vector_store %arg11[%c0, %c0_0, %c0_1, %c0_2], %0 {strides = array<i32>} : memref<1x18x18x8xf32, #tpu.memory_space<vmem>>, vector<1x18x18x8xf32>,
    %c0_3 = arith.constant 0 : index
    %c0_4 = arith.constant 0 : index
    %c0_5 = arith.constant 0 : index
    %c0_6 = arith.constant 0 : index
    %2 = vector.load %arg1[%c0_3, %c0_4, %c0_5, %c0_6] : memref<1x16x16x8xbf16, #tpu.memory_space<vmem>>, vector<1x16x16x8xbf16>
    %3 = vector.shape_cast %2 : vector<1x16x16x8xbf16> to vector<16x16x8xbf16>
    %4 = vector.shape_cast %3 : vector<16x16x8xbf16> to vector<256x8xbf16>
    %c0_7 = arith.constant 0 : index
    %c0_8 = arith.constant 0 : index
    %5 = vector.load %arg2[%c0_7, %c0_8] : memref<8x8xbf16, #tpu.memory_space<vmem>>, vector<8x8xbf16>
    %cst_9 = arith.constant dense<0.000000e+00> : vector<256x8xf32>
    %6 = tpu.matmul %4, %5, %cst_9 {dimension_numbers = #tpu.dot_dimension_numbers<[1], [0], [0], [1], [0, 0, 1, 1], [], []>} : vector<256x8xbf16>, vector<8x8xbf16>, vector<256x8xf32> -> vector<256x8xf32>
    %c0_10 = arith.constant 0 : index
    %c0_11 = arith.constant 0 : index
    %7 = vector.load %arg3[%c0_10, %c0_11] : memref<1x8xf32, #tpu.memory_space<vmem>>, vector<1x8xf32>
    %8 = vector.broadcast %7 : vector<1x8xf32> to vector<256x8xf32>
    %9 = arith.addf %6, %8 : vector<256x8xf32>
    %cst_12 = arith.constant 0.000000e+00 : f32
    %10 = vector.broadcast %cst_12 : f32 to vector<256x8xf32>
    %11 = arith.maximumf %9, %10 : vector<256x8xf32>
    %12 = vector.shape_cast %11 : vector<256x8xf32> to vector<16x16x8xf32>
    %c0_13 = arith.constant 0 : index
    %c1 = arith.constant 1 : index
    %c1_14 = arith.constant 1 : index
    %c0_15 = arith.constant 0 : index
    %13 = vector.load %arg11[%c0_13, %c1, %c1_14, %c0_15] : memref<1x18x18x8xf32, #tpu.memory_space<vmem>>, vector<1x16x16x8xf32>
    %14 = vector.shape_cast %13 : vector<1x16x16x8xf32> to vector<16x16x8xf32>
    %15 = vector.shape_cast %12 : vector<16x16x8xf32> to vector<1x16x16x8xf32>
    tpu.vector_store %arg11[%c0_13, %c1, %c1_14, %c0_15], %15 {strides = array<i32>} : memref<1x18x18x8xf32, #tpu.memory_space<vmem>>, vector<1x16x16x8xf32>,
    %c0_16 = arith.constant 0 : index
    %c0_17 = arith.constant 0 : index
    %c0_18 = arith.constant 0 : index
    %c0_19 = arith.constant 0 : index
    %16 = vector.load %arg11[%c0_16, %c0_17, %c0_18, %c0_19] : memref<1x18x18x8xf32, #tpu.memory_space<vmem>>, vector<1x16x16x8xf32>
    %17 = vector.shape_cast %16 : vector<1x16x16x8xf32> to vector<16x16x8xf32>
    %18 = vector.shape_cast %17 : vector<16x16x8xf32> to vector<256x8xf32>
    %19 = arith.truncf %18 : vector<256x8xf32> to vector<256x8xbf16>
    %c0_20 = arith.constant 0 : index
    %c0_21 = arith.constant 0 : index
    %c0_22 = arith.constant 0 : index
    %20 = vector.load %arg4[%c0_20, %c0_21, %c0_22] : memref<9x8x8xbf16, #tpu.memory_space<vmem>>, vector<1x8x8xbf16>
    %21 = vector.shape_cast %20 : vector<1x8x8xbf16> to vector<8x8xbf16>
    %cst_23 = arith.constant dense<0.000000e+00> : vector<256x8xf32>
    %22 = tpu.matmul %19, %21, %cst_23 {dimension_numbers = #tpu.dot_dimension_numbers<[1], [0], [0], [1], [0, 0, 1, 1], [], []>} : vector<256x8xbf16>, vector<8x8xbf16>, vector<256x8xf32> -> vector<256x8xf32>
    %c0_24 = arith.constant 0 : index
    %c0_25 = arith.constant 0 : index
    %c1_26 = arith.constant 1 : index
    %c0_27 = arith.constant 0 : index
    %23 = vector.load %arg11[%c0_24, %c0_25, %c1_26, %c0_27] : memref<1x18x18x8xf32, #tpu.memory_space<vmem>>, vector<1x16x16x8xf32>
    %24 = vector.shape_cast %23 : vector<1x16x16x8xf32> to vector<16x16x8xf32>
    %25 = vector.shape_cast %24 : vector<16x16x8xf32> to vector<256x8xf32>
    %26 = arith.truncf %25 : vector<256x8xf32> to vector<256x8xbf16>
    %c1_28 = arith.constant 1 : index
    %c0_29 = arith.constant 0 : index
    %c0_30 = arith.constant 0 : index
    %27 = vector.load %arg4[%c1_28, %c0_29, %c0_30] : memref<9x8x8xbf16, #tpu.memory_space<vmem>>, vector<1x8x8xbf16>
    %28 = vector.shape_cast %27 : vector<1x8x8xbf16> to vector<8x8xbf16>
    %cst_31 = arith.constant dense<0.000000e+00> : vector<256x8xf32>
    %29 = tpu.matmul %26, %28, %cst_31 {dimension_numbers = #tpu.dot_dimension_numbers<[1], [0], [0], [1], [0, 0, 1, 1], [], []>} : vector<256x8xbf16>, vector<8x8xbf16>, vector<256x8xf32> -> vector<256x8xf32>
    %30 = arith.addf %22, %29 : vector<256x8xf32>
    %c0_32 = arith.constant 0 : index
    %c0_33 = arith.constant 0 : index
    %c2 = arith.constant 2 : index
    %c0_34 = arith.constant 0 : index
    %31 = vector.load %arg11[%c0_32, %c0_33, %c2, %c0_34] : memref<1x18x18x8xf32, #tpu.memory_space<vmem>>, vector<1x16x16x8xf32>
    %32 = vector.shape_cast %31 : vector<1x16x16x8xf32> to vector<16x16x8xf32>
    %33 = vector.shape_cast %32 : vector<16x16x8xf32> to vector<256x8xf32>
    %34 = arith.truncf %33 : vector<256x8xf32> to vector<256x8xbf16>
    %c2_35 = arith.constant 2 : index
    %c0_36 = arith.constant 0 : index
    %c0_37 = arith.constant 0 : index
    %35 = vector.load %arg4[%c2_35, %c0_36, %c0_37] : memref<9x8x8xbf16, #tpu.memory_space<vmem>>, vector<1x8x8xbf16>
    %36 = vector.shape_cast %35 : vector<1x8x8xbf16> to vector<8x8xbf16>
    %cst_38 = arith.constant dense<0.000000e+00> : vector<256x8xf32>
    %37 = tpu.matmul %34, %36, %cst_38 {dimension_numbers = #tpu.dot_dimension_numbers<[1], [0], [0], [1], [0, 0, 1, 1], [], []>} : vector<256x8xbf16>, vector<8x8xbf16>, vector<256x8xf32> -> vector<256x8xf32>
    %38 = arith.addf %30, %37 : vector<256x8xf32>
    %c0_39 = arith.constant 0 : index
    %c1_40 = arith.constant 1 : index
    %c0_41 = arith.constant 0 : index
    %c0_42 = arith.constant 0 : index
    %39 = vector.load %arg11[%c0_39, %c1_40, %c0_41, %c0_42] : memref<1x18x18x8xf32, #tpu.memory_space<vmem>>, vector<1x16x16x8xf32>
    %40 = vector.shape_cast %39 : vector<1x16x16x8xf32> to vector<16x16x8xf32>
    %41 = vector.shape_cast %40 : vector<16x16x8xf32> to vector<256x8xf32>
    %42 = arith.truncf %41 : vector<256x8xf32> to vector<256x8xbf16>
    %c3 = arith.constant 3 : index
    %c0_43 = arith.constant 0 : index
    %c0_44 = arith.constant 0 : index
    %43 = vector.load %arg4[%c3, %c0_43, %c0_44] : memref<9x8x8xbf16, #tpu.memory_space<vmem>>, vector<1x8x8xbf16>
    %44 = vector.shape_cast %43 : vector<1x8x8xbf16> to vector<8x8xbf16>
    %cst_45 = arith.constant dense<0.000000e+00> : vector<256x8xf32>
    %45 = tpu.matmul %42, %44, %cst_45 {dimension_numbers = #tpu.dot_dimension_numbers<[1], [0], [0], [1], [0, 0, 1, 1], [], []>} : vector<256x8xbf16>, vector<8x8xbf16>, vector<256x8xf32> -> vector<256x8xf32>
    %46 = arith.addf %38, %45 : vector<256x8xf32>
    %c0_46 = arith.constant 0 : index
    %c1_47 = arith.constant 1 : index
    %c1_48 = arith.constant 1 : index
    %c0_49 = arith.constant 0 : index
    %47 = vector.load %arg11[%c0_46, %c1_47, %c1_48, %c0_49] : memref<1x18x18x8xf32, #tpu.memory_space<vmem>>, vector<1x16x16x8xf32>
    %48 = vector.shape_cast %47 : vector<1x16x16x8xf32> to vector<16x16x8xf32>
    %49 = vector.shape_cast %48 : vector<16x16x8xf32> to vector<256x8xf32>
    %50 = arith.truncf %49 : vector<256x8xf32> to vector<256x8xbf16>
    %c4 = arith.constant 4 : index
    %c0_50 = arith.constant 0 : index
    %c0_51 = arith.constant 0 : index
    %51 = vector.load %arg4[%c4, %c0_50, %c0_51] : memref<9x8x8xbf16, #tpu.memory_space<vmem>>, vector<1x8x8xbf16>
    %52 = vector.shape_cast %51 : vector<1x8x8xbf16> to vector<8x8xbf16>
    %cst_52 = arith.constant dense<0.000000e+00> : vector<256x8xf32>
    %53 = tpu.matmul %50, %52, %cst_52 {dimension_numbers = #tpu.dot_dimension_numbers<[1], [0], [0], [1], [0, 0, 1, 1], [], []>} : vector<256x8xbf16>, vector<8x8xbf16>, vector<256x8xf32> -> vector<256x8xf32>
    %54 = arith.addf %46, %53 : vector<256x8xf32>
    %c0_53 = arith.constant 0 : index
    %c1_54 = arith.constant 1 : index
    %c2_55 = arith.constant 2 : index
    %c0_56 = arith.constant 0 : index
    %55 = vector.load %arg11[%c0_53, %c1_54, %c2_55, %c0_56] : memref<1x18x18x8xf32, #tpu.memory_space<vmem>>, vector<1x16x16x8xf32>
    %56 = vector.shape_cast %55 : vector<1x16x16x8xf32> to vector<16x16x8xf32>
    %57 = vector.shape_cast %56 : vector<16x16x8xf32> to vector<256x8xf32>
    %58 = arith.truncf %57 : vector<256x8xf32> to vector<256x8xbf16>
    %c5 = arith.constant 5 : index
    %c0_57 = arith.constant 0 : index
    %c0_58 = arith.constant 0 : index
    %59 = vector.load %arg4[%c5, %c0_57, %c0_58] : memref<9x8x8xbf16, #tpu.memory_space<vmem>>, vector<1x8x8xbf16>
    %60 = vector.shape_cast %59 : vector<1x8x8xbf16> to vector<8x8xbf16>
    %cst_59 = arith.constant dense<0.000000e+00> : vector<256x8xf32>
    %61 = tpu.matmul %58, %60, %cst_59 {dimension_numbers = #tpu.dot_dimension_numbers<[1], [0], [0], [1], [0, 0, 1, 1], [], []>} : vector<256x8xbf16>, vector<8x8xbf16>, vector<256x8xf32> -> vector<256x8xf32>
    %62 = arith.addf %54, %61 : vector<256x8xf32>
    %c0_60 = arith.constant 0 : index
    %c2_61 = arith.constant 2 : index
    %c0_62 = arith.constant 0 : index
    %c0_63 = arith.constant 0 : index
    %63 = vector.load %arg11[%c0_60, %c2_61, %c0_62, %c0_63] : memref<1x18x18x8xf32, #tpu.memory_space<vmem>>, vector<1x16x16x8xf32>
    %64 = vector.shape_cast %63 : vector<1x16x16x8xf32> to vector<16x16x8xf32>
    %65 = vector.shape_cast %64 : vector<16x16x8xf32> to vector<256x8xf32>
    %66 = arith.truncf %65 : vector<256x8xf32> to vector<256x8xbf16>
    %c6 = arith.constant 6 : index
    %c0_64 = arith.constant 0 : index
    %c0_65 = arith.constant 0 : index
    %67 = vector.load %arg4[%c6, %c0_64, %c0_65] : memref<9x8x8xbf16, #tpu.memory_space<vmem>>, vector<1x8x8xbf16>
    %68 = vector.shape_cast %67 : vector<1x8x8xbf16> to vector<8x8xbf16>
    %cst_66 = arith.constant dense<0.000000e+00> : vector<256x8xf32>
    %69 = tpu.matmul %66, %68, %cst_66 {dimension_numbers = #tpu.dot_dimension_numbers<[1], [0], [0], [1], [0, 0, 1, 1], [], []>} : vector<256x8xbf16>, vector<8x8xbf16>, vector<256x8xf32> -> vector<256x8xf32>
    %70 = arith.addf %62, %69 : vector<256x8xf32>
    %c0_67 = arith.constant 0 : index
    %c2_68 = arith.constant 2 : index
    %c1_69 = arith.constant 1 : index
    %c0_70 = arith.constant 0 : index
    %71 = vector.load %arg11[%c0_67, %c2_68, %c1_69, %c0_70] : memref<1x18x18x8xf32, #tpu.memory_space<vmem>>, vector<1x16x16x8xf32>
    %72 = vector.shape_cast %71 : vector<1x16x16x8xf32> to vector<16x16x8xf32>
    %73 = vector.shape_cast %72 : vector<16x16x8xf32> to vector<256x8xf32>
    %74 = arith.truncf %73 : vector<256x8xf32> to vector<256x8xbf16>
    %c7 = arith.constant 7 : index
    %c0_71 = arith.constant 0 : index
    %c0_72 = arith.constant 0 : index
    %75 = vector.load %arg4[%c7, %c0_71, %c0_72] : memref<9x8x8xbf16, #tpu.memory_space<vmem>>, vector<1x8x8xbf16>
    %76 = vector.shape_cast %75 : vector<1x8x8xbf16> to vector<8x8xbf16>
    %cst_73 = arith.constant dense<0.000000e+00> : vector<256x8xf32>
    %77 = tpu.matmul %74, %76, %cst_73 {dimension_numbers = #tpu.dot_dimension_numbers<[1], [0], [0], [1], [0, 0, 1, 1], [], []>} : vector<256x8xbf16>, vector<8x8xbf16>, vector<256x8xf32> -> vector<256x8xf32>
    %78 = arith.addf %70, %77 : vector<256x8xf32>
    %c0_74 = arith.constant 0 : index
    %c2_75 = arith.constant 2 : index
    %c2_76 = arith.constant 2 : index
    %c0_77 = arith.constant 0 : index
    %79 = vector.load %arg11[%c0_74, %c2_75, %c2_76, %c0_77] : memref<1x18x18x8xf32, #tpu.memory_space<vmem>>, vector<1x16x16x8xf32>
    %80 = vector.shape_cast %79 : vector<1x16x16x8xf32> to vector<16x16x8xf32>
    %81 = vector.shape_cast %80 : vector<16x16x8xf32> to vector<256x8xf32>
    %82 = arith.truncf %81 : vector<256x8xf32> to vector<256x8xbf16>
    %c8 = arith.constant 8 : index
    %c0_78 = arith.constant 0 : index
    %c0_79 = arith.constant 0 : index
    %83 = vector.load %arg4[%c8, %c0_78, %c0_79] : memref<9x8x8xbf16, #tpu.memory_space<vmem>>, vector<1x8x8xbf16>
    %84 = vector.shape_cast %83 : vector<1x8x8xbf16> to vector<8x8xbf16>
    %cst_80 = arith.constant dense<0.000000e+00> : vector<256x8xf32>
    %85 = tpu.matmul %82, %84, %cst_80 {dimension_numbers = #tpu.dot_dimension_numbers<[1], [0], [0], [1], [0, 0, 1, 1], [], []>} : vector<256x8xbf16>, vector<8x8xbf16>, vector<256x8xf32> -> vector<256x8xf32>
    %86 = arith.addf %78, %85 : vector<256x8xf32>
    %c0_81 = arith.constant 0 : index
    %c0_82 = arith.constant 0 : index
    %87 = vector.load %arg5[%c0_81, %c0_82] : memref<1x8xf32, #tpu.memory_space<vmem>>, vector<1x8xf32>
    %88 = vector.broadcast %87 : vector<1x8xf32> to vector<256x8xf32>
    %89 = arith.addf %86, %88 : vector<256x8xf32>
    %cst_83 = arith.constant 0.000000e+00 : f32
    %90 = vector.broadcast %cst_83 : f32 to vector<256x8xf32>
    %91 = arith.maximumf %89, %90 : vector<256x8xf32>
    %92 = arith.truncf %91 : vector<256x8xf32> to vector<256x8xbf16>
    %c0_84 = arith.constant 0 : index
    %c0_85 = arith.constant 0 : index
    %93 = vector.load %arg6[%c0_84, %c0_85] : memref<8x32xbf16, #tpu.memory_space<vmem>>, vector<8x32xbf16>
    %cst_86 = arith.constant dense<0.000000e+00> : vector<256x32xf32>
    %94 = tpu.matmul %92, %93, %cst_86 {dimension_numbers = #tpu.dot_dimension_numbers<[1], [0], [0], [1], [0, 0, 1, 1], [], []>} : vector<256x8xbf16>, vector<8x32xbf16>, vector<256x32xf32> -> vector<256x32xf32>
    %c0_87 = arith.constant 0 : index
    %c0_88 = arith.constant 0 : index
    %95 = vector.load %arg7[%c0_87, %c0_88] : memref<1x32xf32, #tpu.memory_space<vmem>>, vector<1x32xf32>
    %96 = vector.broadcast %95 : vector<1x32xf32> to vector<256x32xf32>
    %97 = arith.addf %94, %96 : vector<256x32xf32>
    %c0_89 = arith.constant 0 : index
    %c0_90 = arith.constant 0 : index
    %c0_91 = arith.constant 0 : index
    %c0_92 = arith.constant 0 : index
    %98 = vector.load %arg1[%c0_89, %c0_90, %c0_91, %c0_92] : memref<1x16x16x8xbf16, #tpu.memory_space<vmem>>, vector<1x16x16x8xbf16>
    %99 = vector.shape_cast %98 : vector<1x16x16x8xbf16> to vector<16x16x8xbf16>
    %100 = vector.shape_cast %99 : vector<16x16x8xbf16> to vector<256x8xbf16>
    %c0_93 = arith.constant 0 : index
    %c0_94 = arith.constant 0 : index
    %101 = vector.load %arg8[%c0_93, %c0_94] : memref<8x32xbf16, #tpu.memory_space<vmem>>, vector<8x32xbf16>
    %cst_95 = arith.constant dense<0.000000e+00> : vector<256x32xf32>
    %102 = tpu.matmul %100, %101, %cst_95 {dimension_numbers = #tpu.dot_dimension_numbers<[1], [0], [0], [1], [0, 0, 1, 1], [], []>} : vector<256x8xbf16>, vector<8x32xbf16>, vector<256x32xf32> -> vector<256x32xf32>
    %103 = arith.addf %97, %102 : vector<256x32xf32>
    %c0_96 = arith.constant 0 : index
    %c0_97 = arith.constant 0 : index
    %104 = vector.load %arg9[%c0_96, %c0_97] : memref<1x32xf32, #tpu.memory_space<vmem>>, vector<1x32xf32>
    %105 = vector.broadcast %104 : vector<1x32xf32> to vector<256x32xf32>
    %106 = arith.addf %103, %105 : vector<256x32xf32>
    %cst_98 = arith.constant 0.000000e+00 : f32
    %107 = vector.broadcast %cst_98 : f32 to vector<256x32xf32>
    %108 = arith.maximumf %106, %107 : vector<256x32xf32>
    %109 = arith.truncf %108 : vector<256x32xf32> to vector<256x32xbf16>
    %c0_99 = arith.constant 0 : index
    %c0_100 = arith.constant 0 : index
    %c0_101 = arith.constant 0 : index
    %110 = vector.load %arg10[%c0_99, %c0_100, %c0_101] : memref<1x256x32xbf16, #tpu.memory_space<vmem>>, vector<1x256x32xbf16>
    %111 = vector.shape_cast %110 : vector<1x256x32xbf16> to vector<256x32xbf16>
    %112 = vector.shape_cast %109 : vector<256x32xbf16> to vector<1x256x32xbf16>
    tpu.vector_store %arg10[%c0_99, %c0_100, %c0_101], %112 {strides = array<i32>} : memref<1x256x32xbf16, #tpu.memory_space<vmem>>, vector<1x256x32xbf16>,
    return
  }
  func.func @transform_0(%arg0: i32) -> (i32, i32, i32, i32) {
    %c0_i32 = arith.constant 0 : i32
    %c0_i32_0 = arith.constant 0 : i32
    %c0_i32_1 = arith.constant 0 : i32
    %c0_i32_2 = arith.constant 0 : i32
    return %arg0, %c0_i32, %c0_i32_0, %c0_i32_1 : i32, i32, i32, i32
  }
  func.func @transform_1(%arg0: i32) -> (i32, i32) {
    %c0_i32 = arith.constant 0 : i32
    %c0_i32_0 = arith.constant 0 : i32
    %c0_i32_1 = arith.constant 0 : i32
    return %c0_i32, %c0_i32_0 : i32, i32
  }
  func.func @transform_2(%arg0: i32) -> (i32, i32) {
    %c0_i32 = arith.constant 0 : i32
    %c0_i32_0 = arith.constant 0 : i32
    %c0_i32_1 = arith.constant 0 : i32
    return %c0_i32, %c0_i32_0 : i32, i32
  }
  func.func @transform_3(%arg0: i32) -> (i32, i32, i32) {
    %c0_i32 = arith.constant 0 : i32
    %c0_i32_0 = arith.constant 0 : i32
    %c0_i32_1 = arith.constant 0 : i32
    %c0_i32_2 = arith.constant 0 : i32
    return %c0_i32, %c0_i32_0, %c0_i32_1 : i32, i32, i32
  }
  func.func @transform_4(%arg0: i32) -> (i32, i32) {
    %c0_i32 = arith.constant 0 : i32
    %c0_i32_0 = arith.constant 0 : i32
    %c0_i32_1 = arith.constant 0 : i32
    return %c0_i32, %c0_i32_0 : i32, i32
  }
  func.func @transform_5(%arg0: i32) -> (i32, i32) {
    %c0_i32 = arith.constant 0 : i32
    %c0_i32_0 = arith.constant 0 : i32
    %c0_i32_1 = arith.constant 0 : i32
    return %c0_i32, %c0_i32_0 : i32, i32
  }
  func.func @transform_6(%arg0: i32) -> (i32, i32) {
    %c0_i32 = arith.constant 0 : i32
    %c0_i32_0 = arith.constant 0 : i32
    %c0_i32_1 = arith.constant 0 : i32
    return %c0_i32, %c0_i32_0 : i32, i32
  }
  func.func @transform_7(%arg0: i32) -> (i32, i32) {
    %c0_i32 = arith.constant 0 : i32
    %c0_i32_0 = arith.constant 0 : i32
    %c0_i32_1 = arith.constant 0 : i32
    return %c0_i32, %c0_i32_0 : i32, i32
  }
  func.func @transform_8(%arg0: i32) -> (i32, i32) {
    %c0_i32 = arith.constant 0 : i32
    %c0_i32_0 = arith.constant 0 : i32
    %c0_i32_1 = arith.constant 0 : i32
    return %c0_i32, %c0_i32_0 : i32, i32
  }
  func.func @transform_9(%arg0: i32) -> (i32, i32, i32) {
    %c0_i32 = arith.constant 0 : i32
    %c0_i32_0 = arith.constant 0 : i32
    %c0_i32_1 = arith.constant 0 : i32
    return %arg0, %c0_i32, %c0_i32_0 : i32, i32, i32
  }
}

module attributes {stable_mosaic.version = 11 : i64} {
  func.func @_bottleneck_kernel(%arg0: i32, %arg1: memref<1x4x4x4x64xbf16, #tpu.memory_space<vmem>>, %arg2: memref<64x32xbf16, #tpu.memory_space<vmem>>, %arg3: memref<1x32xf32, #tpu.memory_space<vmem>>, %arg4: memref<9x32x32xbf16, #tpu.memory_space<vmem>>, %arg5: memref<1x32xf32, #tpu.memory_space<vmem>>, %arg6: memref<32x128xbf16, #tpu.memory_space<vmem>>, %arg7: memref<1x128xf32, #tpu.memory_space<vmem>>, %arg8: memref<64x128xbf16, #tpu.memory_space<vmem>>, %arg9: memref<1x128xf32, #tpu.memory_space<vmem>>, %arg10: memref<1x16x128xbf16, #tpu.memory_space<vmem>>, %arg11: memref<4x5x5x32xf32, #tpu.memory_space<vmem>>) attributes {dimension_semantics = [#tpu.dimension_semantics<parallel>], iteration_bounds = array<i64: 2>, scalar_prefetch = 0 : i64, scratch_operands = 1 : i64, tpu.core_type = #tpu.core_type<tc>, window_params = [{transform_indices = @transform_0, window_bounds = array<i64: 1, 4, 4, 4, 64>}, {pipeline_mode = #tpu.pipeline_mode<synchronous>, transform_indices = @transform_1, window_bounds = array<i64: 64, 32>}, {pipeline_mode = #tpu.pipeline_mode<synchronous>, transform_indices = @transform_2, window_bounds = array<i64: 1, 32>}, {pipeline_mode = #tpu.pipeline_mode<synchronous>, transform_indices = @transform_3, window_bounds = array<i64: 9, 32, 32>}, {pipeline_mode = #tpu.pipeline_mode<synchronous>, transform_indices = @transform_4, window_bounds = array<i64: 1, 32>}, {pipeline_mode = #tpu.pipeline_mode<synchronous>, transform_indices = @transform_5, window_bounds = array<i64: 32, 128>}, {pipeline_mode = #tpu.pipeline_mode<synchronous>, transform_indices = @transform_6, window_bounds = array<i64: 1, 128>}, {pipeline_mode = #tpu.pipeline_mode<synchronous>, transform_indices = @transform_7, window_bounds = array<i64: 64, 128>}, {pipeline_mode = #tpu.pipeline_mode<synchronous>, transform_indices = @transform_8, window_bounds = array<i64: 1, 128>}, {transform_indices = @transform_9, window_bounds = array<i64: 1, 16, 128>}]} {
    %cst = arith.constant 0.000000e+00 : f32
    %0 = vector.broadcast %cst : f32 to vector<4x5x5x32xf32>
    %c0 = arith.constant 0 : index
    %c0_0 = arith.constant 0 : index
    %c0_1 = arith.constant 0 : index
    %c0_2 = arith.constant 0 : index
    %1 = vector.load %arg11[%c0, %c0_0, %c0_1, %c0_2] : memref<4x5x5x32xf32, #tpu.memory_space<vmem>>, vector<4x5x5x32xf32>
    tpu.vector_store %arg11[%c0, %c0_0, %c0_1, %c0_2], %0 {strides = array<i32>} : memref<4x5x5x32xf32, #tpu.memory_space<vmem>>, vector<4x5x5x32xf32>,
    %c0_3 = arith.constant 0 : index
    %c0_4 = arith.constant 0 : index
    %c0_5 = arith.constant 0 : index
    %c0_6 = arith.constant 0 : index
    %c0_7 = arith.constant 0 : index
    %2 = vector.load %arg1[%c0_3, %c0_4, %c0_5, %c0_6, %c0_7] : memref<1x4x4x4x64xbf16, #tpu.memory_space<vmem>>, vector<1x1x4x4x64xbf16>
    %3 = vector.shape_cast %2 : vector<1x1x4x4x64xbf16> to vector<4x4x64xbf16>
    %4 = vector.shape_cast %3 : vector<4x4x64xbf16> to vector<16x64xbf16>
    %c0_8 = arith.constant 0 : index
    %c0_9 = arith.constant 0 : index
    %5 = vector.load %arg2[%c0_8, %c0_9] : memref<64x32xbf16, #tpu.memory_space<vmem>>, vector<64x32xbf16>
    %cst_10 = arith.constant dense<0.000000e+00> : vector<16x32xf32>
    %6 = tpu.matmul %4, %5, %cst_10 {dimension_numbers = #tpu.dot_dimension_numbers<[1], [0], [0], [1], [0, 0, 1, 1], [], []>} : vector<16x64xbf16>, vector<64x32xbf16>, vector<16x32xf32> -> vector<16x32xf32>
    %c0_11 = arith.constant 0 : index
    %c0_12 = arith.constant 0 : index
    %7 = vector.load %arg3[%c0_11, %c0_12] : memref<1x32xf32, #tpu.memory_space<vmem>>, vector<1x32xf32>
    %8 = vector.broadcast %7 : vector<1x32xf32> to vector<16x32xf32>
    %9 = arith.addf %6, %8 : vector<16x32xf32>
    %cst_13 = arith.constant 0.000000e+00 : f32
    %10 = vector.broadcast %cst_13 : f32 to vector<16x32xf32>
    %11 = arith.maximumf %9, %10 : vector<16x32xf32>
    %12 = vector.shape_cast %11 : vector<16x32xf32> to vector<4x4x32xf32>
    %c3 = arith.constant 3 : index
    %c0_14 = arith.constant 0 : index
    %c0_15 = arith.constant 0 : index
    %c0_16 = arith.constant 0 : index
    %13 = vector.load %arg11[%c3, %c0_14, %c0_15, %c0_16] : memref<4x5x5x32xf32, #tpu.memory_space<vmem>>, vector<1x4x4x32xf32>
    %14 = vector.shape_cast %13 : vector<1x4x4x32xf32> to vector<4x4x32xf32>
    %15 = vector.shape_cast %12 : vector<4x4x32xf32> to vector<1x4x4x32xf32>
    tpu.vector_store %arg11[%c3, %c0_14, %c0_15, %c0_16], %15 {strides = array<i32>} : memref<4x5x5x32xf32, #tpu.memory_space<vmem>>, vector<1x4x4x32xf32>,
    %c0_17 = arith.constant 0 : index
    %c1 = arith.constant 1 : index
    %c0_18 = arith.constant 0 : index
    %c0_19 = arith.constant 0 : index
    %c0_20 = arith.constant 0 : index
    %16 = vector.load %arg1[%c0_17, %c1, %c0_18, %c0_19, %c0_20] : memref<1x4x4x4x64xbf16, #tpu.memory_space<vmem>>, vector<1x1x4x4x64xbf16>
    %17 = vector.shape_cast %16 : vector<1x1x4x4x64xbf16> to vector<4x4x64xbf16>
    %18 = vector.shape_cast %17 : vector<4x4x64xbf16> to vector<16x64xbf16>
    %c0_21 = arith.constant 0 : index
    %c0_22 = arith.constant 0 : index
    %19 = vector.load %arg2[%c0_21, %c0_22] : memref<64x32xbf16, #tpu.memory_space<vmem>>, vector<64x32xbf16>
    %cst_23 = arith.constant dense<0.000000e+00> : vector<16x32xf32>
    %20 = tpu.matmul %18, %19, %cst_23 {dimension_numbers = #tpu.dot_dimension_numbers<[1], [0], [0], [1], [0, 0, 1, 1], [], []>} : vector<16x64xbf16>, vector<64x32xbf16>, vector<16x32xf32> -> vector<16x32xf32>
    %c0_24 = arith.constant 0 : index
    %c0_25 = arith.constant 0 : index
    %21 = vector.load %arg3[%c0_24, %c0_25] : memref<1x32xf32, #tpu.memory_space<vmem>>, vector<1x32xf32>
    %22 = vector.broadcast %21 : vector<1x32xf32> to vector<16x32xf32>
    %23 = arith.addf %20, %22 : vector<16x32xf32>
    %cst_26 = arith.constant 0.000000e+00 : f32
    %24 = vector.broadcast %cst_26 : f32 to vector<16x32xf32>
    %25 = arith.maximumf %23, %24 : vector<16x32xf32>
    %26 = vector.shape_cast %25 : vector<16x32xf32> to vector<4x4x32xf32>
    %c2 = arith.constant 2 : index
    %c0_27 = arith.constant 0 : index
    %c1_28 = arith.constant 1 : index
    %c0_29 = arith.constant 0 : index
    %27 = vector.load %arg11[%c2, %c0_27, %c1_28, %c0_29] : memref<4x5x5x32xf32, #tpu.memory_space<vmem>>, vector<1x4x4x32xf32>
    %28 = vector.shape_cast %27 : vector<1x4x4x32xf32> to vector<4x4x32xf32>
    %29 = vector.shape_cast %26 : vector<4x4x32xf32> to vector<1x4x4x32xf32>
    tpu.vector_store %arg11[%c2, %c0_27, %c1_28, %c0_29], %29 {strides = array<i32>} : memref<4x5x5x32xf32, #tpu.memory_space<vmem>>, vector<1x4x4x32xf32>,
    %c0_30 = arith.constant 0 : index
    %c2_31 = arith.constant 2 : index
    %c0_32 = arith.constant 0 : index
    %c0_33 = arith.constant 0 : index
    %c0_34 = arith.constant 0 : index
    %30 = vector.load %arg1[%c0_30, %c2_31, %c0_32, %c0_33, %c0_34] : memref<1x4x4x4x64xbf16, #tpu.memory_space<vmem>>, vector<1x1x4x4x64xbf16>
    %31 = vector.shape_cast %30 : vector<1x1x4x4x64xbf16> to vector<4x4x64xbf16>
    %32 = vector.shape_cast %31 : vector<4x4x64xbf16> to vector<16x64xbf16>
    %c0_35 = arith.constant 0 : index
    %c0_36 = arith.constant 0 : index
    %33 = vector.load %arg2[%c0_35, %c0_36] : memref<64x32xbf16, #tpu.memory_space<vmem>>, vector<64x32xbf16>
    %cst_37 = arith.constant dense<0.000000e+00> : vector<16x32xf32>
    %34 = tpu.matmul %32, %33, %cst_37 {dimension_numbers = #tpu.dot_dimension_numbers<[1], [0], [0], [1], [0, 0, 1, 1], [], []>} : vector<16x64xbf16>, vector<64x32xbf16>, vector<16x32xf32> -> vector<16x32xf32>
    %c0_38 = arith.constant 0 : index
    %c0_39 = arith.constant 0 : index
    %35 = vector.load %arg3[%c0_38, %c0_39] : memref<1x32xf32, #tpu.memory_space<vmem>>, vector<1x32xf32>
    %36 = vector.broadcast %35 : vector<1x32xf32> to vector<16x32xf32>
    %37 = arith.addf %34, %36 : vector<16x32xf32>
    %cst_40 = arith.constant 0.000000e+00 : f32
    %38 = vector.broadcast %cst_40 : f32 to vector<16x32xf32>
    %39 = arith.maximumf %37, %38 : vector<16x32xf32>
    %40 = vector.shape_cast %39 : vector<16x32xf32> to vector<4x4x32xf32>
    %c1_41 = arith.constant 1 : index
    %c1_42 = arith.constant 1 : index
    %c0_43 = arith.constant 0 : index
    %c0_44 = arith.constant 0 : index
    %41 = vector.load %arg11[%c1_41, %c1_42, %c0_43, %c0_44] : memref<4x5x5x32xf32, #tpu.memory_space<vmem>>, vector<1x4x4x32xf32>
    %42 = vector.shape_cast %41 : vector<1x4x4x32xf32> to vector<4x4x32xf32>
    %43 = vector.shape_cast %40 : vector<4x4x32xf32> to vector<1x4x4x32xf32>
    tpu.vector_store %arg11[%c1_41, %c1_42, %c0_43, %c0_44], %43 {strides = array<i32>} : memref<4x5x5x32xf32, #tpu.memory_space<vmem>>, vector<1x4x4x32xf32>,
    %c0_45 = arith.constant 0 : index
    %c3_46 = arith.constant 3 : index
    %c0_47 = arith.constant 0 : index
    %c0_48 = arith.constant 0 : index
    %c0_49 = arith.constant 0 : index
    %44 = vector.load %arg1[%c0_45, %c3_46, %c0_47, %c0_48, %c0_49] : memref<1x4x4x4x64xbf16, #tpu.memory_space<vmem>>, vector<1x1x4x4x64xbf16>
    %45 = vector.shape_cast %44 : vector<1x1x4x4x64xbf16> to vector<4x4x64xbf16>
    %46 = vector.shape_cast %45 : vector<4x4x64xbf16> to vector<16x64xbf16>
    %c0_50 = arith.constant 0 : index
    %c0_51 = arith.constant 0 : index
    %47 = vector.load %arg2[%c0_50, %c0_51] : memref<64x32xbf16, #tpu.memory_space<vmem>>, vector<64x32xbf16>
    %cst_52 = arith.constant dense<0.000000e+00> : vector<16x32xf32>
    %48 = tpu.matmul %46, %47, %cst_52 {dimension_numbers = #tpu.dot_dimension_numbers<[1], [0], [0], [1], [0, 0, 1, 1], [], []>} : vector<16x64xbf16>, vector<64x32xbf16>, vector<16x32xf32> -> vector<16x32xf32>
    %c0_53 = arith.constant 0 : index
    %c0_54 = arith.constant 0 : index
    %49 = vector.load %arg3[%c0_53, %c0_54] : memref<1x32xf32, #tpu.memory_space<vmem>>, vector<1x32xf32>
    %50 = vector.broadcast %49 : vector<1x32xf32> to vector<16x32xf32>
    %51 = arith.addf %48, %50 : vector<16x32xf32>
    %cst_55 = arith.constant 0.000000e+00 : f32
    %52 = vector.broadcast %cst_55 : f32 to vector<16x32xf32>
    %53 = arith.maximumf %51, %52 : vector<16x32xf32>
    %54 = vector.shape_cast %53 : vector<16x32xf32> to vector<4x4x32xf32>
    %c0_56 = arith.constant 0 : index
    %c1_57 = arith.constant 1 : index
    %c1_58 = arith.constant 1 : index
    %c0_59 = arith.constant 0 : index
    %55 = vector.load %arg11[%c0_56, %c1_57, %c1_58, %c0_59] : memref<4x5x5x32xf32, #tpu.memory_space<vmem>>, vector<1x4x4x32xf32>
    %56 = vector.shape_cast %55 : vector<1x4x4x32xf32> to vector<4x4x32xf32>
    %57 = vector.shape_cast %54 : vector<4x4x32xf32> to vector<1x4x4x32xf32>
    tpu.vector_store %arg11[%c0_56, %c1_57, %c1_58, %c0_59], %57 {strides = array<i32>} : memref<4x5x5x32xf32, #tpu.memory_space<vmem>>, vector<1x4x4x32xf32>,
    %c0_60 = arith.constant 0 : index
    %c0_61 = arith.constant 0 : index
    %c0_62 = arith.constant 0 : index
    %c0_63 = arith.constant 0 : index
    %58 = vector.load %arg11[%c0_60, %c0_61, %c0_62, %c0_63] : memref<4x5x5x32xf32, #tpu.memory_space<vmem>>, vector<1x4x4x32xf32>
    %59 = vector.shape_cast %58 : vector<1x4x4x32xf32> to vector<4x4x32xf32>
    %60 = vector.shape_cast %59 : vector<4x4x32xf32> to vector<16x32xf32>
    %61 = arith.truncf %60 : vector<16x32xf32> to vector<16x32xbf16>
    %c0_64 = arith.constant 0 : index
    %c0_65 = arith.constant 0 : index
    %c0_66 = arith.constant 0 : index
    %62 = vector.load %arg4[%c0_64, %c0_65, %c0_66] : memref<9x32x32xbf16, #tpu.memory_space<vmem>>, vector<1x32x32xbf16>
    %63 = vector.shape_cast %62 : vector<1x32x32xbf16> to vector<32x32xbf16>
    %cst_67 = arith.constant dense<0.000000e+00> : vector<16x32xf32>
    %64 = tpu.matmul %61, %63, %cst_67 {dimension_numbers = #tpu.dot_dimension_numbers<[1], [0], [0], [1], [0, 0, 1, 1], [], []>} : vector<16x32xbf16>, vector<32x32xbf16>, vector<16x32xf32> -> vector<16x32xf32>
    %c1_68 = arith.constant 1 : index
    %c0_69 = arith.constant 0 : index
    %c0_70 = arith.constant 0 : index
    %c0_71 = arith.constant 0 : index
    %65 = vector.load %arg11[%c1_68, %c0_69, %c0_70, %c0_71] : memref<4x5x5x32xf32, #tpu.memory_space<vmem>>, vector<1x4x4x32xf32>
    %66 = vector.shape_cast %65 : vector<1x4x4x32xf32> to vector<4x4x32xf32>
    %67 = vector.shape_cast %66 : vector<4x4x32xf32> to vector<16x32xf32>
    %68 = arith.truncf %67 : vector<16x32xf32> to vector<16x32xbf16>
    %c1_72 = arith.constant 1 : index
    %c0_73 = arith.constant 0 : index
    %c0_74 = arith.constant 0 : index
    %69 = vector.load %arg4[%c1_72, %c0_73, %c0_74] : memref<9x32x32xbf16, #tpu.memory_space<vmem>>, vector<1x32x32xbf16>
    %70 = vector.shape_cast %69 : vector<1x32x32xbf16> to vector<32x32xbf16>
    %cst_75 = arith.constant dense<0.000000e+00> : vector<16x32xf32>
    %71 = tpu.matmul %68, %70, %cst_75 {dimension_numbers = #tpu.dot_dimension_numbers<[1], [0], [0], [1], [0, 0, 1, 1], [], []>} : vector<16x32xbf16>, vector<32x32xbf16>, vector<16x32xf32> -> vector<16x32xf32>
    %72 = arith.addf %64, %71 : vector<16x32xf32>
    %c0_76 = arith.constant 0 : index
    %c0_77 = arith.constant 0 : index
    %c1_78 = arith.constant 1 : index
    %c0_79 = arith.constant 0 : index
    %73 = vector.load %arg11[%c0_76, %c0_77, %c1_78, %c0_79] : memref<4x5x5x32xf32, #tpu.memory_space<vmem>>, vector<1x4x4x32xf32>
    %74 = vector.shape_cast %73 : vector<1x4x4x32xf32> to vector<4x4x32xf32>
    %75 = vector.shape_cast %74 : vector<4x4x32xf32> to vector<16x32xf32>
    %76 = arith.truncf %75 : vector<16x32xf32> to vector<16x32xbf16>
    %c2_80 = arith.constant 2 : index
    %c0_81 = arith.constant 0 : index
    %c0_82 = arith.constant 0 : index
    %77 = vector.load %arg4[%c2_80, %c0_81, %c0_82] : memref<9x32x32xbf16, #tpu.memory_space<vmem>>, vector<1x32x32xbf16>
    %78 = vector.shape_cast %77 : vector<1x32x32xbf16> to vector<32x32xbf16>
    %cst_83 = arith.constant dense<0.000000e+00> : vector<16x32xf32>
    %79 = tpu.matmul %76, %78, %cst_83 {dimension_numbers = #tpu.dot_dimension_numbers<[1], [0], [0], [1], [0, 0, 1, 1], [], []>} : vector<16x32xbf16>, vector<32x32xbf16>, vector<16x32xf32> -> vector<16x32xf32>
    %80 = arith.addf %72, %79 : vector<16x32xf32>
    %c2_84 = arith.constant 2 : index
    %c0_85 = arith.constant 0 : index
    %c0_86 = arith.constant 0 : index
    %c0_87 = arith.constant 0 : index
    %81 = vector.load %arg11[%c2_84, %c0_85, %c0_86, %c0_87] : memref<4x5x5x32xf32, #tpu.memory_space<vmem>>, vector<1x4x4x32xf32>
    %82 = vector.shape_cast %81 : vector<1x4x4x32xf32> to vector<4x4x32xf32>
    %83 = vector.shape_cast %82 : vector<4x4x32xf32> to vector<16x32xf32>
    %84 = arith.truncf %83 : vector<16x32xf32> to vector<16x32xbf16>
    %c3_88 = arith.constant 3 : index
    %c0_89 = arith.constant 0 : index
    %c0_90 = arith.constant 0 : index
    %85 = vector.load %arg4[%c3_88, %c0_89, %c0_90] : memref<9x32x32xbf16, #tpu.memory_space<vmem>>, vector<1x32x32xbf16>
    %86 = vector.shape_cast %85 : vector<1x32x32xbf16> to vector<32x32xbf16>
    %cst_91 = arith.constant dense<0.000000e+00> : vector<16x32xf32>
    %87 = tpu.matmul %84, %86, %cst_91 {dimension_numbers = #tpu.dot_dimension_numbers<[1], [0], [0], [1], [0, 0, 1, 1], [], []>} : vector<16x32xbf16>, vector<32x32xbf16>, vector<16x32xf32> -> vector<16x32xf32>
    %88 = arith.addf %80, %87 : vector<16x32xf32>
    %c3_92 = arith.constant 3 : index
    %c0_93 = arith.constant 0 : index
    %c0_94 = arith.constant 0 : index
    %c0_95 = arith.constant 0 : index
    %89 = vector.load %arg11[%c3_92, %c0_93, %c0_94, %c0_95] : memref<4x5x5x32xf32, #tpu.memory_space<vmem>>, vector<1x4x4x32xf32>
    %90 = vector.shape_cast %89 : vector<1x4x4x32xf32> to vector<4x4x32xf32>
    %91 = vector.shape_cast %90 : vector<4x4x32xf32> to vector<16x32xf32>
    %92 = arith.truncf %91 : vector<16x32xf32> to vector<16x32xbf16>
    %c4 = arith.constant 4 : index
    %c0_96 = arith.constant 0 : index
    %c0_97 = arith.constant 0 : index
    %93 = vector.load %arg4[%c4, %c0_96, %c0_97] : memref<9x32x32xbf16, #tpu.memory_space<vmem>>, vector<1x32x32xbf16>
    %94 = vector.shape_cast %93 : vector<1x32x32xbf16> to vector<32x32xbf16>
    %cst_98 = arith.constant dense<0.000000e+00> : vector<16x32xf32>
    %95 = tpu.matmul %92, %94, %cst_98 {dimension_numbers = #tpu.dot_dimension_numbers<[1], [0], [0], [1], [0, 0, 1, 1], [], []>} : vector<16x32xbf16>, vector<32x32xbf16>, vector<16x32xf32> -> vector<16x32xf32>
    %96 = arith.addf %88, %95 : vector<16x32xf32>
    %c2_99 = arith.constant 2 : index
    %c0_100 = arith.constant 0 : index
    %c1_101 = arith.constant 1 : index
    %c0_102 = arith.constant 0 : index
    %97 = vector.load %arg11[%c2_99, %c0_100, %c1_101, %c0_102] : memref<4x5x5x32xf32, #tpu.memory_space<vmem>>, vector<1x4x4x32xf32>
    %98 = vector.shape_cast %97 : vector<1x4x4x32xf32> to vector<4x4x32xf32>
    %99 = vector.shape_cast %98 : vector<4x4x32xf32> to vector<16x32xf32>
    %100 = arith.truncf %99 : vector<16x32xf32> to vector<16x32xbf16>
    %c5 = arith.constant 5 : index
    %c0_103 = arith.constant 0 : index
    %c0_104 = arith.constant 0 : index
    %101 = vector.load %arg4[%c5, %c0_103, %c0_104] : memref<9x32x32xbf16, #tpu.memory_space<vmem>>, vector<1x32x32xbf16>
    %102 = vector.shape_cast %101 : vector<1x32x32xbf16> to vector<32x32xbf16>
    %cst_105 = arith.constant dense<0.000000e+00> : vector<16x32xf32>
    %103 = tpu.matmul %100, %102, %cst_105 {dimension_numbers = #tpu.dot_dimension_numbers<[1], [0], [0], [1], [0, 0, 1, 1], [], []>} : vector<16x32xbf16>, vector<32x32xbf16>, vector<16x32xf32> -> vector<16x32xf32>
    %104 = arith.addf %96, %103 : vector<16x32xf32>
    %c0_106 = arith.constant 0 : index
    %c1_107 = arith.constant 1 : index
    %c0_108 = arith.constant 0 : index
    %c0_109 = arith.constant 0 : index
    %105 = vector.load %arg11[%c0_106, %c1_107, %c0_108, %c0_109] : memref<4x5x5x32xf32, #tpu.memory_space<vmem>>, vector<1x4x4x32xf32>
    %106 = vector.shape_cast %105 : vector<1x4x4x32xf32> to vector<4x4x32xf32>
    %107 = vector.shape_cast %106 : vector<4x4x32xf32> to vector<16x32xf32>
    %108 = arith.truncf %107 : vector<16x32xf32> to vector<16x32xbf16>
    %c6 = arith.constant 6 : index
    %c0_110 = arith.constant 0 : index
    %c0_111 = arith.constant 0 : index
    %109 = vector.load %arg4[%c6, %c0_110, %c0_111] : memref<9x32x32xbf16, #tpu.memory_space<vmem>>, vector<1x32x32xbf16>
    %110 = vector.shape_cast %109 : vector<1x32x32xbf16> to vector<32x32xbf16>
    %cst_112 = arith.constant dense<0.000000e+00> : vector<16x32xf32>
    %111 = tpu.matmul %108, %110, %cst_112 {dimension_numbers = #tpu.dot_dimension_numbers<[1], [0], [0], [1], [0, 0, 1, 1], [], []>} : vector<16x32xbf16>, vector<32x32xbf16>, vector<16x32xf32> -> vector<16x32xf32>
    %112 = arith.addf %104, %111 : vector<16x32xf32>
    %c1_113 = arith.constant 1 : index
    %c1_114 = arith.constant 1 : index
    %c0_115 = arith.constant 0 : index
    %c0_116 = arith.constant 0 : index
    %113 = vector.load %arg11[%c1_113, %c1_114, %c0_115, %c0_116] : memref<4x5x5x32xf32, #tpu.memory_space<vmem>>, vector<1x4x4x32xf32>
    %114 = vector.shape_cast %113 : vector<1x4x4x32xf32> to vector<4x4x32xf32>
    %115 = vector.shape_cast %114 : vector<4x4x32xf32> to vector<16x32xf32>
    %116 = arith.truncf %115 : vector<16x32xf32> to vector<16x32xbf16>
    %c7 = arith.constant 7 : index
    %c0_117 = arith.constant 0 : index
    %c0_118 = arith.constant 0 : index
    %117 = vector.load %arg4[%c7, %c0_117, %c0_118] : memref<9x32x32xbf16, #tpu.memory_space<vmem>>, vector<1x32x32xbf16>
    %118 = vector.shape_cast %117 : vector<1x32x32xbf16> to vector<32x32xbf16>
    %cst_119 = arith.constant dense<0.000000e+00> : vector<16x32xf32>
    %119 = tpu.matmul %116, %118, %cst_119 {dimension_numbers = #tpu.dot_dimension_numbers<[1], [0], [0], [1], [0, 0, 1, 1], [], []>} : vector<16x32xbf16>, vector<32x32xbf16>, vector<16x32xf32> -> vector<16x32xf32>
    %120 = arith.addf %112, %119 : vector<16x32xf32>
    %c0_120 = arith.constant 0 : index
    %c1_121 = arith.constant 1 : index
    %c1_122 = arith.constant 1 : index
    %c0_123 = arith.constant 0 : index
    %121 = vector.load %arg11[%c0_120, %c1_121, %c1_122, %c0_123] : memref<4x5x5x32xf32, #tpu.memory_space<vmem>>, vector<1x4x4x32xf32>
    %122 = vector.shape_cast %121 : vector<1x4x4x32xf32> to vector<4x4x32xf32>
    %123 = vector.shape_cast %122 : vector<4x4x32xf32> to vector<16x32xf32>
    %124 = arith.truncf %123 : vector<16x32xf32> to vector<16x32xbf16>
    %c8 = arith.constant 8 : index
    %c0_124 = arith.constant 0 : index
    %c0_125 = arith.constant 0 : index
    %125 = vector.load %arg4[%c8, %c0_124, %c0_125] : memref<9x32x32xbf16, #tpu.memory_space<vmem>>, vector<1x32x32xbf16>
    %126 = vector.shape_cast %125 : vector<1x32x32xbf16> to vector<32x32xbf16>
    %cst_126 = arith.constant dense<0.000000e+00> : vector<16x32xf32>
    %127 = tpu.matmul %124, %126, %cst_126 {dimension_numbers = #tpu.dot_dimension_numbers<[1], [0], [0], [1], [0, 0, 1, 1], [], []>} : vector<16x32xbf16>, vector<32x32xbf16>, vector<16x32xf32> -> vector<16x32xf32>
    %128 = arith.addf %120, %127 : vector<16x32xf32>
    %c0_127 = arith.constant 0 : index
    %c0_128 = arith.constant 0 : index
    %129 = vector.load %arg5[%c0_127, %c0_128] : memref<1x32xf32, #tpu.memory_space<vmem>>, vector<1x32xf32>
    %130 = vector.broadcast %129 : vector<1x32xf32> to vector<16x32xf32>
    %131 = arith.addf %128, %130 : vector<16x32xf32>
    %cst_129 = arith.constant 0.000000e+00 : f32
    %132 = vector.broadcast %cst_129 : f32 to vector<16x32xf32>
    %133 = arith.maximumf %131, %132 : vector<16x32xf32>
    %134 = arith.truncf %133 : vector<16x32xf32> to vector<16x32xbf16>
    %c0_130 = arith.constant 0 : index
    %c0_131 = arith.constant 0 : index
    %135 = vector.load %arg6[%c0_130, %c0_131] : memref<32x128xbf16, #tpu.memory_space<vmem>>, vector<32x128xbf16>
    %cst_132 = arith.constant dense<0.000000e+00> : vector<16x128xf32>
    %136 = tpu.matmul %134, %135, %cst_132 {dimension_numbers = #tpu.dot_dimension_numbers<[1], [0], [0], [1], [0, 0, 1, 1], [], []>} : vector<16x32xbf16>, vector<32x128xbf16>, vector<16x128xf32> -> vector<16x128xf32>
    %c0_133 = arith.constant 0 : index
    %c0_134 = arith.constant 0 : index
    %137 = vector.load %arg7[%c0_133, %c0_134] : memref<1x128xf32, #tpu.memory_space<vmem>>, vector<1x128xf32>
    %138 = vector.broadcast %137 : vector<1x128xf32> to vector<16x128xf32>
    %139 = arith.addf %136, %138 : vector<16x128xf32>
    %c0_135 = arith.constant 0 : index
    %c0_136 = arith.constant 0 : index
    %c0_137 = arith.constant 0 : index
    %c0_138 = arith.constant 0 : index
    %c0_139 = arith.constant 0 : index
    %140 = vector.load %arg1[%c0_135, %c0_136, %c0_137, %c0_138, %c0_139] : memref<1x4x4x4x64xbf16, #tpu.memory_space<vmem>>, vector<1x1x4x4x64xbf16>
    %141 = vector.shape_cast %140 : vector<1x1x4x4x64xbf16> to vector<4x4x64xbf16>
    %142 = vector.shape_cast %141 : vector<4x4x64xbf16> to vector<16x64xbf16>
    %c0_140 = arith.constant 0 : index
    %c0_141 = arith.constant 0 : index
    %143 = vector.load %arg8[%c0_140, %c0_141] : memref<64x128xbf16, #tpu.memory_space<vmem>>, vector<64x128xbf16>
    %cst_142 = arith.constant dense<0.000000e+00> : vector<16x128xf32>
    %144 = tpu.matmul %142, %143, %cst_142 {dimension_numbers = #tpu.dot_dimension_numbers<[1], [0], [0], [1], [0, 0, 1, 1], [], []>} : vector<16x64xbf16>, vector<64x128xbf16>, vector<16x128xf32> -> vector<16x128xf32>
    %145 = arith.addf %139, %144 : vector<16x128xf32>
    %c0_143 = arith.constant 0 : index
    %c0_144 = arith.constant 0 : index
    %146 = vector.load %arg9[%c0_143, %c0_144] : memref<1x128xf32, #tpu.memory_space<vmem>>, vector<1x128xf32>
    %147 = vector.broadcast %146 : vector<1x128xf32> to vector<16x128xf32>
    %148 = arith.addf %145, %147 : vector<16x128xf32>
    %cst_145 = arith.constant 0.000000e+00 : f32
    %149 = vector.broadcast %cst_145 : f32 to vector<16x128xf32>
    %150 = arith.maximumf %148, %149 : vector<16x128xf32>
    %151 = arith.truncf %150 : vector<16x128xf32> to vector<16x128xbf16>
    %c0_146 = arith.constant 0 : index
    %c0_147 = arith.constant 0 : index
    %c0_148 = arith.constant 0 : index
    %152 = vector.load %arg10[%c0_146, %c0_147, %c0_148] : memref<1x16x128xbf16, #tpu.memory_space<vmem>>, vector<1x16x128xbf16>
    %153 = vector.shape_cast %152 : vector<1x16x128xbf16> to vector<16x128xbf16>
    %154 = vector.shape_cast %151 : vector<16x128xbf16> to vector<1x16x128xbf16>
    tpu.vector_store %arg10[%c0_146, %c0_147, %c0_148], %154 {strides = array<i32>} : memref<1x16x128xbf16, #tpu.memory_space<vmem>>, vector<1x16x128xbf16>,
    return
  }
  func.func @transform_0(%arg0: i32) -> (i32, i32, i32, i32, i32) {
    %c0_i32 = arith.constant 0 : i32
    %c0_i32_0 = arith.constant 0 : i32
    %c0_i32_1 = arith.constant 0 : i32
    %c0_i32_2 = arith.constant 0 : i32
    %c0_i32_3 = arith.constant 0 : i32
    return %arg0, %c0_i32, %c0_i32_0, %c0_i32_1, %c0_i32_2 : i32, i32, i32, i32, i32
  }
  func.func @transform_1(%arg0: i32) -> (i32, i32) {
    %c0_i32 = arith.constant 0 : i32
    %c0_i32_0 = arith.constant 0 : i32
    %c0_i32_1 = arith.constant 0 : i32
    return %c0_i32, %c0_i32_0 : i32, i32
  }
  func.func @transform_2(%arg0: i32) -> (i32, i32) {
    %c0_i32 = arith.constant 0 : i32
    %c0_i32_0 = arith.constant 0 : i32
    %c0_i32_1 = arith.constant 0 : i32
    return %c0_i32, %c0_i32_0 : i32, i32
  }
  func.func @transform_3(%arg0: i32) -> (i32, i32, i32) {
    %c0_i32 = arith.constant 0 : i32
    %c0_i32_0 = arith.constant 0 : i32
    %c0_i32_1 = arith.constant 0 : i32
    %c0_i32_2 = arith.constant 0 : i32
    return %c0_i32, %c0_i32_0, %c0_i32_1 : i32, i32, i32
  }
  func.func @transform_4(%arg0: i32) -> (i32, i32) {
    %c0_i32 = arith.constant 0 : i32
    %c0_i32_0 = arith.constant 0 : i32
    %c0_i32_1 = arith.constant 0 : i32
    return %c0_i32, %c0_i32_0 : i32, i32
  }
  func.func @transform_5(%arg0: i32) -> (i32, i32) {
    %c0_i32 = arith.constant 0 : i32
    %c0_i32_0 = arith.constant 0 : i32
    %c0_i32_1 = arith.constant 0 : i32
    return %c0_i32, %c0_i32_0 : i32, i32
  }
  func.func @transform_6(%arg0: i32) -> (i32, i32) {
    %c0_i32 = arith.constant 0 : i32
    %c0_i32_0 = arith.constant 0 : i32
    %c0_i32_1 = arith.constant 0 : i32
    return %c0_i32, %c0_i32_0 : i32, i32
  }
  func.func @transform_7(%arg0: i32) -> (i32, i32) {
    %c0_i32 = arith.constant 0 : i32
    %c0_i32_0 = arith.constant 0 : i32
    %c0_i32_1 = arith.constant 0 : i32
    return %c0_i32, %c0_i32_0 : i32, i32
  }
  func.func @transform_8(%arg0: i32) -> (i32, i32) {
    %c0_i32 = arith.constant 0 : i32
    %c0_i32_0 = arith.constant 0 : i32
    %c0_i32_1 = arith.constant 0 : i32
    return %c0_i32, %c0_i32_0 : i32, i32
  }
  func.func @transform_9(%arg0: i32) -> (i32, i32, i32) {
    %c0_i32 = arith.constant 0 : i32
    %c0_i32_0 = arith.constant 0 : i32
    %c0_i32_1 = arith.constant 0 : i32
    return %arg0, %c0_i32, %c0_i32_0 : i32, i32, i32
  }
}

module attributes {stable_mosaic.version = 11 : i64} {
  func.func @_bottleneck_kernel(%arg0: i32, %arg1: memref<1x4x8x8x32xbf16, #tpu.memory_space<vmem>>, %arg2: memref<32x16xbf16, #tpu.memory_space<vmem>>, %arg3: memref<1x16xf32, #tpu.memory_space<vmem>>, %arg4: memref<9x16x16xbf16, #tpu.memory_space<vmem>>, %arg5: memref<1x16xf32, #tpu.memory_space<vmem>>, %arg6: memref<16x64xbf16, #tpu.memory_space<vmem>>, %arg7: memref<1x64xf32, #tpu.memory_space<vmem>>, %arg8: memref<32x64xbf16, #tpu.memory_space<vmem>>, %arg9: memref<1x64xf32, #tpu.memory_space<vmem>>, %arg10: memref<1x64x64xbf16, #tpu.memory_space<vmem>>, %arg11: memref<4x9x9x16xf32, #tpu.memory_space<vmem>>) attributes {dimension_semantics = [#tpu.dimension_semantics<parallel>], iteration_bounds = array<i64: 2>, scalar_prefetch = 0 : i64, scratch_operands = 1 : i64, tpu.core_type = #tpu.core_type<tc>, window_params = [{transform_indices = @transform_0, window_bounds = array<i64: 1, 4, 8, 8, 32>}, {pipeline_mode = #tpu.pipeline_mode<synchronous>, transform_indices = @transform_1, window_bounds = array<i64: 32, 16>}, {pipeline_mode = #tpu.pipeline_mode<synchronous>, transform_indices = @transform_2, window_bounds = array<i64: 1, 16>}, {pipeline_mode = #tpu.pipeline_mode<synchronous>, transform_indices = @transform_3, window_bounds = array<i64: 9, 16, 16>}, {pipeline_mode = #tpu.pipeline_mode<synchronous>, transform_indices = @transform_4, window_bounds = array<i64: 1, 16>}, {pipeline_mode = #tpu.pipeline_mode<synchronous>, transform_indices = @transform_5, window_bounds = array<i64: 16, 64>}, {pipeline_mode = #tpu.pipeline_mode<synchronous>, transform_indices = @transform_6, window_bounds = array<i64: 1, 64>}, {pipeline_mode = #tpu.pipeline_mode<synchronous>, transform_indices = @transform_7, window_bounds = array<i64: 32, 64>}, {pipeline_mode = #tpu.pipeline_mode<synchronous>, transform_indices = @transform_8, window_bounds = array<i64: 1, 64>}, {transform_indices = @transform_9, window_bounds = array<i64: 1, 64, 64>}]} {
    %cst = arith.constant 0.000000e+00 : f32
    %0 = vector.broadcast %cst : f32 to vector<4x9x9x16xf32>
    %c0 = arith.constant 0 : index
    %c0_0 = arith.constant 0 : index
    %c0_1 = arith.constant 0 : index
    %c0_2 = arith.constant 0 : index
    %1 = vector.load %arg11[%c0, %c0_0, %c0_1, %c0_2] : memref<4x9x9x16xf32, #tpu.memory_space<vmem>>, vector<4x9x9x16xf32>
    tpu.vector_store %arg11[%c0, %c0_0, %c0_1, %c0_2], %0 {strides = array<i32>} : memref<4x9x9x16xf32, #tpu.memory_space<vmem>>, vector<4x9x9x16xf32>,
    %c0_3 = arith.constant 0 : index
    %c0_4 = arith.constant 0 : index
    %c0_5 = arith.constant 0 : index
    %c0_6 = arith.constant 0 : index
    %c0_7 = arith.constant 0 : index
    %2 = vector.load %arg1[%c0_3, %c0_4, %c0_5, %c0_6, %c0_7] : memref<1x4x8x8x32xbf16, #tpu.memory_space<vmem>>, vector<1x1x8x8x32xbf16>
    %3 = vector.shape_cast %2 : vector<1x1x8x8x32xbf16> to vector<8x8x32xbf16>
    %4 = vector.shape_cast %3 : vector<8x8x32xbf16> to vector<64x32xbf16>
    %c0_8 = arith.constant 0 : index
    %c0_9 = arith.constant 0 : index
    %5 = vector.load %arg2[%c0_8, %c0_9] : memref<32x16xbf16, #tpu.memory_space<vmem>>, vector<32x16xbf16>
    %cst_10 = arith.constant dense<0.000000e+00> : vector<64x16xf32>
    %6 = tpu.matmul %4, %5, %cst_10 {dimension_numbers = #tpu.dot_dimension_numbers<[1], [0], [0], [1], [0, 0, 1, 1], [], []>} : vector<64x32xbf16>, vector<32x16xbf16>, vector<64x16xf32> -> vector<64x16xf32>
    %c0_11 = arith.constant 0 : index
    %c0_12 = arith.constant 0 : index
    %7 = vector.load %arg3[%c0_11, %c0_12] : memref<1x16xf32, #tpu.memory_space<vmem>>, vector<1x16xf32>
    %8 = vector.broadcast %7 : vector<1x16xf32> to vector<64x16xf32>
    %9 = arith.addf %6, %8 : vector<64x16xf32>
    %cst_13 = arith.constant 0.000000e+00 : f32
    %10 = vector.broadcast %cst_13 : f32 to vector<64x16xf32>
    %11 = arith.maximumf %9, %10 : vector<64x16xf32>
    %12 = vector.shape_cast %11 : vector<64x16xf32> to vector<8x8x16xf32>
    %c3 = arith.constant 3 : index
    %c0_14 = arith.constant 0 : index
    %c0_15 = arith.constant 0 : index
    %c0_16 = arith.constant 0 : index
    %13 = vector.load %arg11[%c3, %c0_14, %c0_15, %c0_16] : memref<4x9x9x16xf32, #tpu.memory_space<vmem>>, vector<1x8x8x16xf32>
    %14 = vector.shape_cast %13 : vector<1x8x8x16xf32> to vector<8x8x16xf32>
    %15 = vector.shape_cast %12 : vector<8x8x16xf32> to vector<1x8x8x16xf32>
    tpu.vector_store %arg11[%c3, %c0_14, %c0_15, %c0_16], %15 {strides = array<i32>} : memref<4x9x9x16xf32, #tpu.memory_space<vmem>>, vector<1x8x8x16xf32>,
    %c0_17 = arith.constant 0 : index
    %c1 = arith.constant 1 : index
    %c0_18 = arith.constant 0 : index
    %c0_19 = arith.constant 0 : index
    %c0_20 = arith.constant 0 : index
    %16 = vector.load %arg1[%c0_17, %c1, %c0_18, %c0_19, %c0_20] : memref<1x4x8x8x32xbf16, #tpu.memory_space<vmem>>, vector<1x1x8x8x32xbf16>
    %17 = vector.shape_cast %16 : vector<1x1x8x8x32xbf16> to vector<8x8x32xbf16>
    %18 = vector.shape_cast %17 : vector<8x8x32xbf16> to vector<64x32xbf16>
    %c0_21 = arith.constant 0 : index
    %c0_22 = arith.constant 0 : index
    %19 = vector.load %arg2[%c0_21, %c0_22] : memref<32x16xbf16, #tpu.memory_space<vmem>>, vector<32x16xbf16>
    %cst_23 = arith.constant dense<0.000000e+00> : vector<64x16xf32>
    %20 = tpu.matmul %18, %19, %cst_23 {dimension_numbers = #tpu.dot_dimension_numbers<[1], [0], [0], [1], [0, 0, 1, 1], [], []>} : vector<64x32xbf16>, vector<32x16xbf16>, vector<64x16xf32> -> vector<64x16xf32>
    %c0_24 = arith.constant 0 : index
    %c0_25 = arith.constant 0 : index
    %21 = vector.load %arg3[%c0_24, %c0_25] : memref<1x16xf32, #tpu.memory_space<vmem>>, vector<1x16xf32>
    %22 = vector.broadcast %21 : vector<1x16xf32> to vector<64x16xf32>
    %23 = arith.addf %20, %22 : vector<64x16xf32>
    %cst_26 = arith.constant 0.000000e+00 : f32
    %24 = vector.broadcast %cst_26 : f32 to vector<64x16xf32>
    %25 = arith.maximumf %23, %24 : vector<64x16xf32>
    %26 = vector.shape_cast %25 : vector<64x16xf32> to vector<8x8x16xf32>
    %c2 = arith.constant 2 : index
    %c0_27 = arith.constant 0 : index
    %c1_28 = arith.constant 1 : index
    %c0_29 = arith.constant 0 : index
    %27 = vector.load %arg11[%c2, %c0_27, %c1_28, %c0_29] : memref<4x9x9x16xf32, #tpu.memory_space<vmem>>, vector<1x8x8x16xf32>
    %28 = vector.shape_cast %27 : vector<1x8x8x16xf32> to vector<8x8x16xf32>
    %29 = vector.shape_cast %26 : vector<8x8x16xf32> to vector<1x8x8x16xf32>
    tpu.vector_store %arg11[%c2, %c0_27, %c1_28, %c0_29], %29 {strides = array<i32>} : memref<4x9x9x16xf32, #tpu.memory_space<vmem>>, vector<1x8x8x16xf32>,
    %c0_30 = arith.constant 0 : index
    %c2_31 = arith.constant 2 : index
    %c0_32 = arith.constant 0 : index
    %c0_33 = arith.constant 0 : index
    %c0_34 = arith.constant 0 : index
    %30 = vector.load %arg1[%c0_30, %c2_31, %c0_32, %c0_33, %c0_34] : memref<1x4x8x8x32xbf16, #tpu.memory_space<vmem>>, vector<1x1x8x8x32xbf16>
    %31 = vector.shape_cast %30 : vector<1x1x8x8x32xbf16> to vector<8x8x32xbf16>
    %32 = vector.shape_cast %31 : vector<8x8x32xbf16> to vector<64x32xbf16>
    %c0_35 = arith.constant 0 : index
    %c0_36 = arith.constant 0 : index
    %33 = vector.load %arg2[%c0_35, %c0_36] : memref<32x16xbf16, #tpu.memory_space<vmem>>, vector<32x16xbf16>
    %cst_37 = arith.constant dense<0.000000e+00> : vector<64x16xf32>
    %34 = tpu.matmul %32, %33, %cst_37 {dimension_numbers = #tpu.dot_dimension_numbers<[1], [0], [0], [1], [0, 0, 1, 1], [], []>} : vector<64x32xbf16>, vector<32x16xbf16>, vector<64x16xf32> -> vector<64x16xf32>
    %c0_38 = arith.constant 0 : index
    %c0_39 = arith.constant 0 : index
    %35 = vector.load %arg3[%c0_38, %c0_39] : memref<1x16xf32, #tpu.memory_space<vmem>>, vector<1x16xf32>
    %36 = vector.broadcast %35 : vector<1x16xf32> to vector<64x16xf32>
    %37 = arith.addf %34, %36 : vector<64x16xf32>
    %cst_40 = arith.constant 0.000000e+00 : f32
    %38 = vector.broadcast %cst_40 : f32 to vector<64x16xf32>
    %39 = arith.maximumf %37, %38 : vector<64x16xf32>
    %40 = vector.shape_cast %39 : vector<64x16xf32> to vector<8x8x16xf32>
    %c1_41 = arith.constant 1 : index
    %c1_42 = arith.constant 1 : index
    %c0_43 = arith.constant 0 : index
    %c0_44 = arith.constant 0 : index
    %41 = vector.load %arg11[%c1_41, %c1_42, %c0_43, %c0_44] : memref<4x9x9x16xf32, #tpu.memory_space<vmem>>, vector<1x8x8x16xf32>
    %42 = vector.shape_cast %41 : vector<1x8x8x16xf32> to vector<8x8x16xf32>
    %43 = vector.shape_cast %40 : vector<8x8x16xf32> to vector<1x8x8x16xf32>
    tpu.vector_store %arg11[%c1_41, %c1_42, %c0_43, %c0_44], %43 {strides = array<i32>} : memref<4x9x9x16xf32, #tpu.memory_space<vmem>>, vector<1x8x8x16xf32>,
    %c0_45 = arith.constant 0 : index
    %c3_46 = arith.constant 3 : index
    %c0_47 = arith.constant 0 : index
    %c0_48 = arith.constant 0 : index
    %c0_49 = arith.constant 0 : index
    %44 = vector.load %arg1[%c0_45, %c3_46, %c0_47, %c0_48, %c0_49] : memref<1x4x8x8x32xbf16, #tpu.memory_space<vmem>>, vector<1x1x8x8x32xbf16>
    %45 = vector.shape_cast %44 : vector<1x1x8x8x32xbf16> to vector<8x8x32xbf16>
    %46 = vector.shape_cast %45 : vector<8x8x32xbf16> to vector<64x32xbf16>
    %c0_50 = arith.constant 0 : index
    %c0_51 = arith.constant 0 : index
    %47 = vector.load %arg2[%c0_50, %c0_51] : memref<32x16xbf16, #tpu.memory_space<vmem>>, vector<32x16xbf16>
    %cst_52 = arith.constant dense<0.000000e+00> : vector<64x16xf32>
    %48 = tpu.matmul %46, %47, %cst_52 {dimension_numbers = #tpu.dot_dimension_numbers<[1], [0], [0], [1], [0, 0, 1, 1], [], []>} : vector<64x32xbf16>, vector<32x16xbf16>, vector<64x16xf32> -> vector<64x16xf32>
    %c0_53 = arith.constant 0 : index
    %c0_54 = arith.constant 0 : index
    %49 = vector.load %arg3[%c0_53, %c0_54] : memref<1x16xf32, #tpu.memory_space<vmem>>, vector<1x16xf32>
    %50 = vector.broadcast %49 : vector<1x16xf32> to vector<64x16xf32>
    %51 = arith.addf %48, %50 : vector<64x16xf32>
    %cst_55 = arith.constant 0.000000e+00 : f32
    %52 = vector.broadcast %cst_55 : f32 to vector<64x16xf32>
    %53 = arith.maximumf %51, %52 : vector<64x16xf32>
    %54 = vector.shape_cast %53 : vector<64x16xf32> to vector<8x8x16xf32>
    %c0_56 = arith.constant 0 : index
    %c1_57 = arith.constant 1 : index
    %c1_58 = arith.constant 1 : index
    %c0_59 = arith.constant 0 : index
    %55 = vector.load %arg11[%c0_56, %c1_57, %c1_58, %c0_59] : memref<4x9x9x16xf32, #tpu.memory_space<vmem>>, vector<1x8x8x16xf32>
    %56 = vector.shape_cast %55 : vector<1x8x8x16xf32> to vector<8x8x16xf32>
    %57 = vector.shape_cast %54 : vector<8x8x16xf32> to vector<1x8x8x16xf32>
    tpu.vector_store %arg11[%c0_56, %c1_57, %c1_58, %c0_59], %57 {strides = array<i32>} : memref<4x9x9x16xf32, #tpu.memory_space<vmem>>, vector<1x8x8x16xf32>,
    %c0_60 = arith.constant 0 : index
    %c0_61 = arith.constant 0 : index
    %c0_62 = arith.constant 0 : index
    %c0_63 = arith.constant 0 : index
    %58 = vector.load %arg11[%c0_60, %c0_61, %c0_62, %c0_63] : memref<4x9x9x16xf32, #tpu.memory_space<vmem>>, vector<1x8x8x16xf32>
    %59 = vector.shape_cast %58 : vector<1x8x8x16xf32> to vector<8x8x16xf32>
    %60 = vector.shape_cast %59 : vector<8x8x16xf32> to vector<64x16xf32>
    %61 = arith.truncf %60 : vector<64x16xf32> to vector<64x16xbf16>
    %c0_64 = arith.constant 0 : index
    %c0_65 = arith.constant 0 : index
    %c0_66 = arith.constant 0 : index
    %62 = vector.load %arg4[%c0_64, %c0_65, %c0_66] : memref<9x16x16xbf16, #tpu.memory_space<vmem>>, vector<1x16x16xbf16>
    %63 = vector.shape_cast %62 : vector<1x16x16xbf16> to vector<16x16xbf16>
    %cst_67 = arith.constant dense<0.000000e+00> : vector<64x16xf32>
    %64 = tpu.matmul %61, %63, %cst_67 {dimension_numbers = #tpu.dot_dimension_numbers<[1], [0], [0], [1], [0, 0, 1, 1], [], []>} : vector<64x16xbf16>, vector<16x16xbf16>, vector<64x16xf32> -> vector<64x16xf32>
    %c1_68 = arith.constant 1 : index
    %c0_69 = arith.constant 0 : index
    %c0_70 = arith.constant 0 : index
    %c0_71 = arith.constant 0 : index
    %65 = vector.load %arg11[%c1_68, %c0_69, %c0_70, %c0_71] : memref<4x9x9x16xf32, #tpu.memory_space<vmem>>, vector<1x8x8x16xf32>
    %66 = vector.shape_cast %65 : vector<1x8x8x16xf32> to vector<8x8x16xf32>
    %67 = vector.shape_cast %66 : vector<8x8x16xf32> to vector<64x16xf32>
    %68 = arith.truncf %67 : vector<64x16xf32> to vector<64x16xbf16>
    %c1_72 = arith.constant 1 : index
    %c0_73 = arith.constant 0 : index
    %c0_74 = arith.constant 0 : index
    %69 = vector.load %arg4[%c1_72, %c0_73, %c0_74] : memref<9x16x16xbf16, #tpu.memory_space<vmem>>, vector<1x16x16xbf16>
    %70 = vector.shape_cast %69 : vector<1x16x16xbf16> to vector<16x16xbf16>
    %cst_75 = arith.constant dense<0.000000e+00> : vector<64x16xf32>
    %71 = tpu.matmul %68, %70, %cst_75 {dimension_numbers = #tpu.dot_dimension_numbers<[1], [0], [0], [1], [0, 0, 1, 1], [], []>} : vector<64x16xbf16>, vector<16x16xbf16>, vector<64x16xf32> -> vector<64x16xf32>
    %72 = arith.addf %64, %71 : vector<64x16xf32>
    %c0_76 = arith.constant 0 : index
    %c0_77 = arith.constant 0 : index
    %c1_78 = arith.constant 1 : index
    %c0_79 = arith.constant 0 : index
    %73 = vector.load %arg11[%c0_76, %c0_77, %c1_78, %c0_79] : memref<4x9x9x16xf32, #tpu.memory_space<vmem>>, vector<1x8x8x16xf32>
    %74 = vector.shape_cast %73 : vector<1x8x8x16xf32> to vector<8x8x16xf32>
    %75 = vector.shape_cast %74 : vector<8x8x16xf32> to vector<64x16xf32>
    %76 = arith.truncf %75 : vector<64x16xf32> to vector<64x16xbf16>
    %c2_80 = arith.constant 2 : index
    %c0_81 = arith.constant 0 : index
    %c0_82 = arith.constant 0 : index
    %77 = vector.load %arg4[%c2_80, %c0_81, %c0_82] : memref<9x16x16xbf16, #tpu.memory_space<vmem>>, vector<1x16x16xbf16>
    %78 = vector.shape_cast %77 : vector<1x16x16xbf16> to vector<16x16xbf16>
    %cst_83 = arith.constant dense<0.000000e+00> : vector<64x16xf32>
    %79 = tpu.matmul %76, %78, %cst_83 {dimension_numbers = #tpu.dot_dimension_numbers<[1], [0], [0], [1], [0, 0, 1, 1], [], []>} : vector<64x16xbf16>, vector<16x16xbf16>, vector<64x16xf32> -> vector<64x16xf32>
    %80 = arith.addf %72, %79 : vector<64x16xf32>
    %c2_84 = arith.constant 2 : index
    %c0_85 = arith.constant 0 : index
    %c0_86 = arith.constant 0 : index
    %c0_87 = arith.constant 0 : index
    %81 = vector.load %arg11[%c2_84, %c0_85, %c0_86, %c0_87] : memref<4x9x9x16xf32, #tpu.memory_space<vmem>>, vector<1x8x8x16xf32>
    %82 = vector.shape_cast %81 : vector<1x8x8x16xf32> to vector<8x8x16xf32>
    %83 = vector.shape_cast %82 : vector<8x8x16xf32> to vector<64x16xf32>
    %84 = arith.truncf %83 : vector<64x16xf32> to vector<64x16xbf16>
    %c3_88 = arith.constant 3 : index
    %c0_89 = arith.constant 0 : index
    %c0_90 = arith.constant 0 : index
    %85 = vector.load %arg4[%c3_88, %c0_89, %c0_90] : memref<9x16x16xbf16, #tpu.memory_space<vmem>>, vector<1x16x16xbf16>
    %86 = vector.shape_cast %85 : vector<1x16x16xbf16> to vector<16x16xbf16>
    %cst_91 = arith.constant dense<0.000000e+00> : vector<64x16xf32>
    %87 = tpu.matmul %84, %86, %cst_91 {dimension_numbers = #tpu.dot_dimension_numbers<[1], [0], [0], [1], [0, 0, 1, 1], [], []>} : vector<64x16xbf16>, vector<16x16xbf16>, vector<64x16xf32> -> vector<64x16xf32>
    %88 = arith.addf %80, %87 : vector<64x16xf32>
    %c3_92 = arith.constant 3 : index
    %c0_93 = arith.constant 0 : index
    %c0_94 = arith.constant 0 : index
    %c0_95 = arith.constant 0 : index
    %89 = vector.load %arg11[%c3_92, %c0_93, %c0_94, %c0_95] : memref<4x9x9x16xf32, #tpu.memory_space<vmem>>, vector<1x8x8x16xf32>
    %90 = vector.shape_cast %89 : vector<1x8x8x16xf32> to vector<8x8x16xf32>
    %91 = vector.shape_cast %90 : vector<8x8x16xf32> to vector<64x16xf32>
    %92 = arith.truncf %91 : vector<64x16xf32> to vector<64x16xbf16>
    %c4 = arith.constant 4 : index
    %c0_96 = arith.constant 0 : index
    %c0_97 = arith.constant 0 : index
    %93 = vector.load %arg4[%c4, %c0_96, %c0_97] : memref<9x16x16xbf16, #tpu.memory_space<vmem>>, vector<1x16x16xbf16>
    %94 = vector.shape_cast %93 : vector<1x16x16xbf16> to vector<16x16xbf16>
    %cst_98 = arith.constant dense<0.000000e+00> : vector<64x16xf32>
    %95 = tpu.matmul %92, %94, %cst_98 {dimension_numbers = #tpu.dot_dimension_numbers<[1], [0], [0], [1], [0, 0, 1, 1], [], []>} : vector<64x16xbf16>, vector<16x16xbf16>, vector<64x16xf32> -> vector<64x16xf32>
    %96 = arith.addf %88, %95 : vector<64x16xf32>
    %c2_99 = arith.constant 2 : index
    %c0_100 = arith.constant 0 : index
    %c1_101 = arith.constant 1 : index
    %c0_102 = arith.constant 0 : index
    %97 = vector.load %arg11[%c2_99, %c0_100, %c1_101, %c0_102] : memref<4x9x9x16xf32, #tpu.memory_space<vmem>>, vector<1x8x8x16xf32>
    %98 = vector.shape_cast %97 : vector<1x8x8x16xf32> to vector<8x8x16xf32>
    %99 = vector.shape_cast %98 : vector<8x8x16xf32> to vector<64x16xf32>
    %100 = arith.truncf %99 : vector<64x16xf32> to vector<64x16xbf16>
    %c5 = arith.constant 5 : index
    %c0_103 = arith.constant 0 : index
    %c0_104 = arith.constant 0 : index
    %101 = vector.load %arg4[%c5, %c0_103, %c0_104] : memref<9x16x16xbf16, #tpu.memory_space<vmem>>, vector<1x16x16xbf16>
    %102 = vector.shape_cast %101 : vector<1x16x16xbf16> to vector<16x16xbf16>
    %cst_105 = arith.constant dense<0.000000e+00> : vector<64x16xf32>
    %103 = tpu.matmul %100, %102, %cst_105 {dimension_numbers = #tpu.dot_dimension_numbers<[1], [0], [0], [1], [0, 0, 1, 1], [], []>} : vector<64x16xbf16>, vector<16x16xbf16>, vector<64x16xf32> -> vector<64x16xf32>
    %104 = arith.addf %96, %103 : vector<64x16xf32>
    %c0_106 = arith.constant 0 : index
    %c1_107 = arith.constant 1 : index
    %c0_108 = arith.constant 0 : index
    %c0_109 = arith.constant 0 : index
    %105 = vector.load %arg11[%c0_106, %c1_107, %c0_108, %c0_109] : memref<4x9x9x16xf32, #tpu.memory_space<vmem>>, vector<1x8x8x16xf32>
    %106 = vector.shape_cast %105 : vector<1x8x8x16xf32> to vector<8x8x16xf32>
    %107 = vector.shape_cast %106 : vector<8x8x16xf32> to vector<64x16xf32>
    %108 = arith.truncf %107 : vector<64x16xf32> to vector<64x16xbf16>
    %c6 = arith.constant 6 : index
    %c0_110 = arith.constant 0 : index
    %c0_111 = arith.constant 0 : index
    %109 = vector.load %arg4[%c6, %c0_110, %c0_111] : memref<9x16x16xbf16, #tpu.memory_space<vmem>>, vector<1x16x16xbf16>
    %110 = vector.shape_cast %109 : vector<1x16x16xbf16> to vector<16x16xbf16>
    %cst_112 = arith.constant dense<0.000000e+00> : vector<64x16xf32>
    %111 = tpu.matmul %108, %110, %cst_112 {dimension_numbers = #tpu.dot_dimension_numbers<[1], [0], [0], [1], [0, 0, 1, 1], [], []>} : vector<64x16xbf16>, vector<16x16xbf16>, vector<64x16xf32> -> vector<64x16xf32>
    %112 = arith.addf %104, %111 : vector<64x16xf32>
    %c1_113 = arith.constant 1 : index
    %c1_114 = arith.constant 1 : index
    %c0_115 = arith.constant 0 : index
    %c0_116 = arith.constant 0 : index
    %113 = vector.load %arg11[%c1_113, %c1_114, %c0_115, %c0_116] : memref<4x9x9x16xf32, #tpu.memory_space<vmem>>, vector<1x8x8x16xf32>
    %114 = vector.shape_cast %113 : vector<1x8x8x16xf32> to vector<8x8x16xf32>
    %115 = vector.shape_cast %114 : vector<8x8x16xf32> to vector<64x16xf32>
    %116 = arith.truncf %115 : vector<64x16xf32> to vector<64x16xbf16>
    %c7 = arith.constant 7 : index
    %c0_117 = arith.constant 0 : index
    %c0_118 = arith.constant 0 : index
    %117 = vector.load %arg4[%c7, %c0_117, %c0_118] : memref<9x16x16xbf16, #tpu.memory_space<vmem>>, vector<1x16x16xbf16>
    %118 = vector.shape_cast %117 : vector<1x16x16xbf16> to vector<16x16xbf16>
    %cst_119 = arith.constant dense<0.000000e+00> : vector<64x16xf32>
    %119 = tpu.matmul %116, %118, %cst_119 {dimension_numbers = #tpu.dot_dimension_numbers<[1], [0], [0], [1], [0, 0, 1, 1], [], []>} : vector<64x16xbf16>, vector<16x16xbf16>, vector<64x16xf32> -> vector<64x16xf32>
    %120 = arith.addf %112, %119 : vector<64x16xf32>
    %c0_120 = arith.constant 0 : index
    %c1_121 = arith.constant 1 : index
    %c1_122 = arith.constant 1 : index
    %c0_123 = arith.constant 0 : index
    %121 = vector.load %arg11[%c0_120, %c1_121, %c1_122, %c0_123] : memref<4x9x9x16xf32, #tpu.memory_space<vmem>>, vector<1x8x8x16xf32>
    %122 = vector.shape_cast %121 : vector<1x8x8x16xf32> to vector<8x8x16xf32>
    %123 = vector.shape_cast %122 : vector<8x8x16xf32> to vector<64x16xf32>
    %124 = arith.truncf %123 : vector<64x16xf32> to vector<64x16xbf16>
    %c8 = arith.constant 8 : index
    %c0_124 = arith.constant 0 : index
    %c0_125 = arith.constant 0 : index
    %125 = vector.load %arg4[%c8, %c0_124, %c0_125] : memref<9x16x16xbf16, #tpu.memory_space<vmem>>, vector<1x16x16xbf16>
    %126 = vector.shape_cast %125 : vector<1x16x16xbf16> to vector<16x16xbf16>
    %cst_126 = arith.constant dense<0.000000e+00> : vector<64x16xf32>
    %127 = tpu.matmul %124, %126, %cst_126 {dimension_numbers = #tpu.dot_dimension_numbers<[1], [0], [0], [1], [0, 0, 1, 1], [], []>} : vector<64x16xbf16>, vector<16x16xbf16>, vector<64x16xf32> -> vector<64x16xf32>
    %128 = arith.addf %120, %127 : vector<64x16xf32>
    %c0_127 = arith.constant 0 : index
    %c0_128 = arith.constant 0 : index
    %129 = vector.load %arg5[%c0_127, %c0_128] : memref<1x16xf32, #tpu.memory_space<vmem>>, vector<1x16xf32>
    %130 = vector.broadcast %129 : vector<1x16xf32> to vector<64x16xf32>
    %131 = arith.addf %128, %130 : vector<64x16xf32>
    %cst_129 = arith.constant 0.000000e+00 : f32
    %132 = vector.broadcast %cst_129 : f32 to vector<64x16xf32>
    %133 = arith.maximumf %131, %132 : vector<64x16xf32>
    %134 = arith.truncf %133 : vector<64x16xf32> to vector<64x16xbf16>
    %c0_130 = arith.constant 0 : index
    %c0_131 = arith.constant 0 : index
    %135 = vector.load %arg6[%c0_130, %c0_131] : memref<16x64xbf16, #tpu.memory_space<vmem>>, vector<16x64xbf16>
    %cst_132 = arith.constant dense<0.000000e+00> : vector<64x64xf32>
    %136 = tpu.matmul %134, %135, %cst_132 {dimension_numbers = #tpu.dot_dimension_numbers<[1], [0], [0], [1], [0, 0, 1, 1], [], []>} : vector<64x16xbf16>, vector<16x64xbf16>, vector<64x64xf32> -> vector<64x64xf32>
    %c0_133 = arith.constant 0 : index
    %c0_134 = arith.constant 0 : index
    %137 = vector.load %arg7[%c0_133, %c0_134] : memref<1x64xf32, #tpu.memory_space<vmem>>, vector<1x64xf32>
    %138 = vector.broadcast %137 : vector<1x64xf32> to vector<64x64xf32>
    %139 = arith.addf %136, %138 : vector<64x64xf32>
    %c0_135 = arith.constant 0 : index
    %c0_136 = arith.constant 0 : index
    %c0_137 = arith.constant 0 : index
    %c0_138 = arith.constant 0 : index
    %c0_139 = arith.constant 0 : index
    %140 = vector.load %arg1[%c0_135, %c0_136, %c0_137, %c0_138, %c0_139] : memref<1x4x8x8x32xbf16, #tpu.memory_space<vmem>>, vector<1x1x8x8x32xbf16>
    %141 = vector.shape_cast %140 : vector<1x1x8x8x32xbf16> to vector<8x8x32xbf16>
    %142 = vector.shape_cast %141 : vector<8x8x32xbf16> to vector<64x32xbf16>
    %c0_140 = arith.constant 0 : index
    %c0_141 = arith.constant 0 : index
    %143 = vector.load %arg8[%c0_140, %c0_141] : memref<32x64xbf16, #tpu.memory_space<vmem>>, vector<32x64xbf16>
    %cst_142 = arith.constant dense<0.000000e+00> : vector<64x64xf32>
    %144 = tpu.matmul %142, %143, %cst_142 {dimension_numbers = #tpu.dot_dimension_numbers<[1], [0], [0], [1], [0, 0, 1, 1], [], []>} : vector<64x32xbf16>, vector<32x64xbf16>, vector<64x64xf32> -> vector<64x64xf32>
    %145 = arith.addf %139, %144 : vector<64x64xf32>
    %c0_143 = arith.constant 0 : index
    %c0_144 = arith.constant 0 : index
    %146 = vector.load %arg9[%c0_143, %c0_144] : memref<1x64xf32, #tpu.memory_space<vmem>>, vector<1x64xf32>
    %147 = vector.broadcast %146 : vector<1x64xf32> to vector<64x64xf32>
    %148 = arith.addf %145, %147 : vector<64x64xf32>
    %cst_145 = arith.constant 0.000000e+00 : f32
    %149 = vector.broadcast %cst_145 : f32 to vector<64x64xf32>
    %150 = arith.maximumf %148, %149 : vector<64x64xf32>
    %151 = arith.truncf %150 : vector<64x64xf32> to vector<64x64xbf16>
    %c0_146 = arith.constant 0 : index
    %c0_147 = arith.constant 0 : index
    %c0_148 = arith.constant 0 : index
    %152 = vector.load %arg10[%c0_146, %c0_147, %c0_148] : memref<1x64x64xbf16, #tpu.memory_space<vmem>>, vector<1x64x64xbf16>
    %153 = vector.shape_cast %152 : vector<1x64x64xbf16> to vector<64x64xbf16>
    %154 = vector.shape_cast %151 : vector<64x64xbf16> to vector<1x64x64xbf16>
    tpu.vector_store %arg10[%c0_146, %c0_147, %c0_148], %154 {strides = array<i32>} : memref<1x64x64xbf16, #tpu.memory_space<vmem>>, vector<1x64x64xbf16>,
    return
  }
  func.func @transform_0(%arg0: i32) -> (i32, i32, i32, i32, i32) {
    %c0_i32 = arith.constant 0 : i32
    %c0_i32_0 = arith.constant 0 : i32
    %c0_i32_1 = arith.constant 0 : i32
    %c0_i32_2 = arith.constant 0 : i32
    %c0_i32_3 = arith.constant 0 : i32
    return %arg0, %c0_i32, %c0_i32_0, %c0_i32_1, %c0_i32_2 : i32, i32, i32, i32, i32
  }
  func.func @transform_1(%arg0: i32) -> (i32, i32) {
    %c0_i32 = arith.constant 0 : i32
    %c0_i32_0 = arith.constant 0 : i32
    %c0_i32_1 = arith.constant 0 : i32
    return %c0_i32, %c0_i32_0 : i32, i32
  }
  func.func @transform_2(%arg0: i32) -> (i32, i32) {
    %c0_i32 = arith.constant 0 : i32
    %c0_i32_0 = arith.constant 0 : i32
    %c0_i32_1 = arith.constant 0 : i32
    return %c0_i32, %c0_i32_0 : i32, i32
  }
  func.func @transform_3(%arg0: i32) -> (i32, i32, i32) {
    %c0_i32 = arith.constant 0 : i32
    %c0_i32_0 = arith.constant 0 : i32
    %c0_i32_1 = arith.constant 0 : i32
    %c0_i32_2 = arith.constant 0 : i32
    return %c0_i32, %c0_i32_0, %c0_i32_1 : i32, i32, i32
  }
  func.func @transform_4(%arg0: i32) -> (i32, i32) {
    %c0_i32 = arith.constant 0 : i32
    %c0_i32_0 = arith.constant 0 : i32
    %c0_i32_1 = arith.constant 0 : i32
    return %c0_i32, %c0_i32_0 : i32, i32
  }
  func.func @transform_5(%arg0: i32) -> (i32, i32) {
    %c0_i32 = arith.constant 0 : i32
    %c0_i32_0 = arith.constant 0 : i32
    %c0_i32_1 = arith.constant 0 : i32
    return %c0_i32, %c0_i32_0 : i32, i32
  }
  func.func @transform_6(%arg0: i32) -> (i32, i32) {
    %c0_i32 = arith.constant 0 : i32
    %c0_i32_0 = arith.constant 0 : i32
    %c0_i32_1 = arith.constant 0 : i32
    return %c0_i32, %c0_i32_0 : i32, i32
  }
  func.func @transform_7(%arg0: i32) -> (i32, i32) {
    %c0_i32 = arith.constant 0 : i32
    %c0_i32_0 = arith.constant 0 : i32
    %c0_i32_1 = arith.constant 0 : i32
    return %c0_i32, %c0_i32_0 : i32, i32
  }
  func.func @transform_8(%arg0: i32) -> (i32, i32) {
    %c0_i32 = arith.constant 0 : i32
    %c0_i32_0 = arith.constant 0 : i32
    %c0_i32_1 = arith.constant 0 : i32
    return %c0_i32, %c0_i32_0 : i32, i32
  }
  func.func @transform_9(%arg0: i32) -> (i32, i32, i32) {
    %c0_i32 = arith.constant 0 : i32
    %c0_i32_0 = arith.constant 0 : i32
    %c0_i32_1 = arith.constant 0 : i32
    return %arg0, %c0_i32, %c0_i32_0 : i32, i32, i32
  }
}

module attributes {stable_mosaic.version = 11 : i64} {
  func.func @_bottleneck_kernel(%arg0: i32, %arg1: memref<1x4x2x2x128xbf16, #tpu.memory_space<vmem>>, %arg2: memref<128x64xbf16, #tpu.memory_space<vmem>>, %arg3: memref<1x64xf32, #tpu.memory_space<vmem>>, %arg4: memref<9x64x64xbf16, #tpu.memory_space<vmem>>, %arg5: memref<1x64xf32, #tpu.memory_space<vmem>>, %arg6: memref<64x256xbf16, #tpu.memory_space<vmem>>, %arg7: memref<1x256xf32, #tpu.memory_space<vmem>>, %arg8: memref<128x256xbf16, #tpu.memory_space<vmem>>, %arg9: memref<1x256xf32, #tpu.memory_space<vmem>>, %arg10: memref<1x4x256xbf16, #tpu.memory_space<vmem>>, %arg11: memref<4x3x3x64xf32, #tpu.memory_space<vmem>>) attributes {dimension_semantics = [#tpu.dimension_semantics<parallel>], iteration_bounds = array<i64: 2>, scalar_prefetch = 0 : i64, scratch_operands = 1 : i64, tpu.core_type = #tpu.core_type<tc>, window_params = [{transform_indices = @transform_0, window_bounds = array<i64: 1, 4, 2, 2, 128>}, {pipeline_mode = #tpu.pipeline_mode<synchronous>, transform_indices = @transform_1, window_bounds = array<i64: 128, 64>}, {pipeline_mode = #tpu.pipeline_mode<synchronous>, transform_indices = @transform_2, window_bounds = array<i64: 1, 64>}, {pipeline_mode = #tpu.pipeline_mode<synchronous>, transform_indices = @transform_3, window_bounds = array<i64: 9, 64, 64>}, {pipeline_mode = #tpu.pipeline_mode<synchronous>, transform_indices = @transform_4, window_bounds = array<i64: 1, 64>}, {pipeline_mode = #tpu.pipeline_mode<synchronous>, transform_indices = @transform_5, window_bounds = array<i64: 64, 256>}, {pipeline_mode = #tpu.pipeline_mode<synchronous>, transform_indices = @transform_6, window_bounds = array<i64: 1, 256>}, {pipeline_mode = #tpu.pipeline_mode<synchronous>, transform_indices = @transform_7, window_bounds = array<i64: 128, 256>}, {pipeline_mode = #tpu.pipeline_mode<synchronous>, transform_indices = @transform_8, window_bounds = array<i64: 1, 256>}, {transform_indices = @transform_9, window_bounds = array<i64: 1, 4, 256>}]} {
    %cst = arith.constant 0.000000e+00 : f32
    %0 = vector.broadcast %cst : f32 to vector<4x3x3x64xf32>
    %c0 = arith.constant 0 : index
    %c0_0 = arith.constant 0 : index
    %c0_1 = arith.constant 0 : index
    %c0_2 = arith.constant 0 : index
    %1 = vector.load %arg11[%c0, %c0_0, %c0_1, %c0_2] : memref<4x3x3x64xf32, #tpu.memory_space<vmem>>, vector<4x3x3x64xf32>
    tpu.vector_store %arg11[%c0, %c0_0, %c0_1, %c0_2], %0 {strides = array<i32>} : memref<4x3x3x64xf32, #tpu.memory_space<vmem>>, vector<4x3x3x64xf32>,
    %c0_3 = arith.constant 0 : index
    %c0_4 = arith.constant 0 : index
    %c0_5 = arith.constant 0 : index
    %c0_6 = arith.constant 0 : index
    %c0_7 = arith.constant 0 : index
    %2 = vector.load %arg1[%c0_3, %c0_4, %c0_5, %c0_6, %c0_7] : memref<1x4x2x2x128xbf16, #tpu.memory_space<vmem>>, vector<1x1x2x2x128xbf16>
    %3 = vector.shape_cast %2 : vector<1x1x2x2x128xbf16> to vector<2x2x128xbf16>
    %4 = vector.shape_cast %3 : vector<2x2x128xbf16> to vector<4x128xbf16>
    %c0_8 = arith.constant 0 : index
    %c0_9 = arith.constant 0 : index
    %5 = vector.load %arg2[%c0_8, %c0_9] : memref<128x64xbf16, #tpu.memory_space<vmem>>, vector<128x64xbf16>
    %cst_10 = arith.constant dense<0.000000e+00> : vector<4x64xf32>
    %6 = tpu.matmul %4, %5, %cst_10 {dimension_numbers = #tpu.dot_dimension_numbers<[1], [0], [0], [1], [0, 0, 1, 1], [], []>} : vector<4x128xbf16>, vector<128x64xbf16>, vector<4x64xf32> -> vector<4x64xf32>
    %c0_11 = arith.constant 0 : index
    %c0_12 = arith.constant 0 : index
    %7 = vector.load %arg3[%c0_11, %c0_12] : memref<1x64xf32, #tpu.memory_space<vmem>>, vector<1x64xf32>
    %8 = vector.broadcast %7 : vector<1x64xf32> to vector<4x64xf32>
    %9 = arith.addf %6, %8 : vector<4x64xf32>
    %cst_13 = arith.constant 0.000000e+00 : f32
    %10 = vector.broadcast %cst_13 : f32 to vector<4x64xf32>
    %11 = arith.maximumf %9, %10 : vector<4x64xf32>
    %12 = vector.shape_cast %11 : vector<4x64xf32> to vector<2x2x64xf32>
    %c3 = arith.constant 3 : index
    %c0_14 = arith.constant 0 : index
    %c0_15 = arith.constant 0 : index
    %c0_16 = arith.constant 0 : index
    %13 = vector.load %arg11[%c3, %c0_14, %c0_15, %c0_16] : memref<4x3x3x64xf32, #tpu.memory_space<vmem>>, vector<1x2x2x64xf32>
    %14 = vector.shape_cast %13 : vector<1x2x2x64xf32> to vector<2x2x64xf32>
    %15 = vector.shape_cast %12 : vector<2x2x64xf32> to vector<1x2x2x64xf32>
    tpu.vector_store %arg11[%c3, %c0_14, %c0_15, %c0_16], %15 {strides = array<i32>} : memref<4x3x3x64xf32, #tpu.memory_space<vmem>>, vector<1x2x2x64xf32>,
    %c0_17 = arith.constant 0 : index
    %c1 = arith.constant 1 : index
    %c0_18 = arith.constant 0 : index
    %c0_19 = arith.constant 0 : index
    %c0_20 = arith.constant 0 : index
    %16 = vector.load %arg1[%c0_17, %c1, %c0_18, %c0_19, %c0_20] : memref<1x4x2x2x128xbf16, #tpu.memory_space<vmem>>, vector<1x1x2x2x128xbf16>
    %17 = vector.shape_cast %16 : vector<1x1x2x2x128xbf16> to vector<2x2x128xbf16>
    %18 = vector.shape_cast %17 : vector<2x2x128xbf16> to vector<4x128xbf16>
    %c0_21 = arith.constant 0 : index
    %c0_22 = arith.constant 0 : index
    %19 = vector.load %arg2[%c0_21, %c0_22] : memref<128x64xbf16, #tpu.memory_space<vmem>>, vector<128x64xbf16>
    %cst_23 = arith.constant dense<0.000000e+00> : vector<4x64xf32>
    %20 = tpu.matmul %18, %19, %cst_23 {dimension_numbers = #tpu.dot_dimension_numbers<[1], [0], [0], [1], [0, 0, 1, 1], [], []>} : vector<4x128xbf16>, vector<128x64xbf16>, vector<4x64xf32> -> vector<4x64xf32>
    %c0_24 = arith.constant 0 : index
    %c0_25 = arith.constant 0 : index
    %21 = vector.load %arg3[%c0_24, %c0_25] : memref<1x64xf32, #tpu.memory_space<vmem>>, vector<1x64xf32>
    %22 = vector.broadcast %21 : vector<1x64xf32> to vector<4x64xf32>
    %23 = arith.addf %20, %22 : vector<4x64xf32>
    %cst_26 = arith.constant 0.000000e+00 : f32
    %24 = vector.broadcast %cst_26 : f32 to vector<4x64xf32>
    %25 = arith.maximumf %23, %24 : vector<4x64xf32>
    %26 = vector.shape_cast %25 : vector<4x64xf32> to vector<2x2x64xf32>
    %c2 = arith.constant 2 : index
    %c0_27 = arith.constant 0 : index
    %c1_28 = arith.constant 1 : index
    %c0_29 = arith.constant 0 : index
    %27 = vector.load %arg11[%c2, %c0_27, %c1_28, %c0_29] : memref<4x3x3x64xf32, #tpu.memory_space<vmem>>, vector<1x2x2x64xf32>
    %28 = vector.shape_cast %27 : vector<1x2x2x64xf32> to vector<2x2x64xf32>
    %29 = vector.shape_cast %26 : vector<2x2x64xf32> to vector<1x2x2x64xf32>
    tpu.vector_store %arg11[%c2, %c0_27, %c1_28, %c0_29], %29 {strides = array<i32>} : memref<4x3x3x64xf32, #tpu.memory_space<vmem>>, vector<1x2x2x64xf32>,
    %c0_30 = arith.constant 0 : index
    %c2_31 = arith.constant 2 : index
    %c0_32 = arith.constant 0 : index
    %c0_33 = arith.constant 0 : index
    %c0_34 = arith.constant 0 : index
    %30 = vector.load %arg1[%c0_30, %c2_31, %c0_32, %c0_33, %c0_34] : memref<1x4x2x2x128xbf16, #tpu.memory_space<vmem>>, vector<1x1x2x2x128xbf16>
    %31 = vector.shape_cast %30 : vector<1x1x2x2x128xbf16> to vector<2x2x128xbf16>
    %32 = vector.shape_cast %31 : vector<2x2x128xbf16> to vector<4x128xbf16>
    %c0_35 = arith.constant 0 : index
    %c0_36 = arith.constant 0 : index
    %33 = vector.load %arg2[%c0_35, %c0_36] : memref<128x64xbf16, #tpu.memory_space<vmem>>, vector<128x64xbf16>
    %cst_37 = arith.constant dense<0.000000e+00> : vector<4x64xf32>
    %34 = tpu.matmul %32, %33, %cst_37 {dimension_numbers = #tpu.dot_dimension_numbers<[1], [0], [0], [1], [0, 0, 1, 1], [], []>} : vector<4x128xbf16>, vector<128x64xbf16>, vector<4x64xf32> -> vector<4x64xf32>
    %c0_38 = arith.constant 0 : index
    %c0_39 = arith.constant 0 : index
    %35 = vector.load %arg3[%c0_38, %c0_39] : memref<1x64xf32, #tpu.memory_space<vmem>>, vector<1x64xf32>
    %36 = vector.broadcast %35 : vector<1x64xf32> to vector<4x64xf32>
    %37 = arith.addf %34, %36 : vector<4x64xf32>
    %cst_40 = arith.constant 0.000000e+00 : f32
    %38 = vector.broadcast %cst_40 : f32 to vector<4x64xf32>
    %39 = arith.maximumf %37, %38 : vector<4x64xf32>
    %40 = vector.shape_cast %39 : vector<4x64xf32> to vector<2x2x64xf32>
    %c1_41 = arith.constant 1 : index
    %c1_42 = arith.constant 1 : index
    %c0_43 = arith.constant 0 : index
    %c0_44 = arith.constant 0 : index
    %41 = vector.load %arg11[%c1_41, %c1_42, %c0_43, %c0_44] : memref<4x3x3x64xf32, #tpu.memory_space<vmem>>, vector<1x2x2x64xf32>
    %42 = vector.shape_cast %41 : vector<1x2x2x64xf32> to vector<2x2x64xf32>
    %43 = vector.shape_cast %40 : vector<2x2x64xf32> to vector<1x2x2x64xf32>
    tpu.vector_store %arg11[%c1_41, %c1_42, %c0_43, %c0_44], %43 {strides = array<i32>} : memref<4x3x3x64xf32, #tpu.memory_space<vmem>>, vector<1x2x2x64xf32>,
    %c0_45 = arith.constant 0 : index
    %c3_46 = arith.constant 3 : index
    %c0_47 = arith.constant 0 : index
    %c0_48 = arith.constant 0 : index
    %c0_49 = arith.constant 0 : index
    %44 = vector.load %arg1[%c0_45, %c3_46, %c0_47, %c0_48, %c0_49] : memref<1x4x2x2x128xbf16, #tpu.memory_space<vmem>>, vector<1x1x2x2x128xbf16>
    %45 = vector.shape_cast %44 : vector<1x1x2x2x128xbf16> to vector<2x2x128xbf16>
    %46 = vector.shape_cast %45 : vector<2x2x128xbf16> to vector<4x128xbf16>
    %c0_50 = arith.constant 0 : index
    %c0_51 = arith.constant 0 : index
    %47 = vector.load %arg2[%c0_50, %c0_51] : memref<128x64xbf16, #tpu.memory_space<vmem>>, vector<128x64xbf16>
    %cst_52 = arith.constant dense<0.000000e+00> : vector<4x64xf32>
    %48 = tpu.matmul %46, %47, %cst_52 {dimension_numbers = #tpu.dot_dimension_numbers<[1], [0], [0], [1], [0, 0, 1, 1], [], []>} : vector<4x128xbf16>, vector<128x64xbf16>, vector<4x64xf32> -> vector<4x64xf32>
    %c0_53 = arith.constant 0 : index
    %c0_54 = arith.constant 0 : index
    %49 = vector.load %arg3[%c0_53, %c0_54] : memref<1x64xf32, #tpu.memory_space<vmem>>, vector<1x64xf32>
    %50 = vector.broadcast %49 : vector<1x64xf32> to vector<4x64xf32>
    %51 = arith.addf %48, %50 : vector<4x64xf32>
    %cst_55 = arith.constant 0.000000e+00 : f32
    %52 = vector.broadcast %cst_55 : f32 to vector<4x64xf32>
    %53 = arith.maximumf %51, %52 : vector<4x64xf32>
    %54 = vector.shape_cast %53 : vector<4x64xf32> to vector<2x2x64xf32>
    %c0_56 = arith.constant 0 : index
    %c1_57 = arith.constant 1 : index
    %c1_58 = arith.constant 1 : index
    %c0_59 = arith.constant 0 : index
    %55 = vector.load %arg11[%c0_56, %c1_57, %c1_58, %c0_59] : memref<4x3x3x64xf32, #tpu.memory_space<vmem>>, vector<1x2x2x64xf32>
    %56 = vector.shape_cast %55 : vector<1x2x2x64xf32> to vector<2x2x64xf32>
    %57 = vector.shape_cast %54 : vector<2x2x64xf32> to vector<1x2x2x64xf32>
    tpu.vector_store %arg11[%c0_56, %c1_57, %c1_58, %c0_59], %57 {strides = array<i32>} : memref<4x3x3x64xf32, #tpu.memory_space<vmem>>, vector<1x2x2x64xf32>,
    %c0_60 = arith.constant 0 : index
    %c0_61 = arith.constant 0 : index
    %c0_62 = arith.constant 0 : index
    %c0_63 = arith.constant 0 : index
    %58 = vector.load %arg11[%c0_60, %c0_61, %c0_62, %c0_63] : memref<4x3x3x64xf32, #tpu.memory_space<vmem>>, vector<1x2x2x64xf32>
    %59 = vector.shape_cast %58 : vector<1x2x2x64xf32> to vector<2x2x64xf32>
    %60 = vector.shape_cast %59 : vector<2x2x64xf32> to vector<4x64xf32>
    %61 = arith.truncf %60 : vector<4x64xf32> to vector<4x64xbf16>
    %c0_64 = arith.constant 0 : index
    %c0_65 = arith.constant 0 : index
    %c0_66 = arith.constant 0 : index
    %62 = vector.load %arg4[%c0_64, %c0_65, %c0_66] : memref<9x64x64xbf16, #tpu.memory_space<vmem>>, vector<1x64x64xbf16>
    %63 = vector.shape_cast %62 : vector<1x64x64xbf16> to vector<64x64xbf16>
    %cst_67 = arith.constant dense<0.000000e+00> : vector<4x64xf32>
    %64 = tpu.matmul %61, %63, %cst_67 {dimension_numbers = #tpu.dot_dimension_numbers<[1], [0], [0], [1], [0, 0, 1, 1], [], []>} : vector<4x64xbf16>, vector<64x64xbf16>, vector<4x64xf32> -> vector<4x64xf32>
    %c1_68 = arith.constant 1 : index
    %c0_69 = arith.constant 0 : index
    %c0_70 = arith.constant 0 : index
    %c0_71 = arith.constant 0 : index
    %65 = vector.load %arg11[%c1_68, %c0_69, %c0_70, %c0_71] : memref<4x3x3x64xf32, #tpu.memory_space<vmem>>, vector<1x2x2x64xf32>
    %66 = vector.shape_cast %65 : vector<1x2x2x64xf32> to vector<2x2x64xf32>
    %67 = vector.shape_cast %66 : vector<2x2x64xf32> to vector<4x64xf32>
    %68 = arith.truncf %67 : vector<4x64xf32> to vector<4x64xbf16>
    %c1_72 = arith.constant 1 : index
    %c0_73 = arith.constant 0 : index
    %c0_74 = arith.constant 0 : index
    %69 = vector.load %arg4[%c1_72, %c0_73, %c0_74] : memref<9x64x64xbf16, #tpu.memory_space<vmem>>, vector<1x64x64xbf16>
    %70 = vector.shape_cast %69 : vector<1x64x64xbf16> to vector<64x64xbf16>
    %cst_75 = arith.constant dense<0.000000e+00> : vector<4x64xf32>
    %71 = tpu.matmul %68, %70, %cst_75 {dimension_numbers = #tpu.dot_dimension_numbers<[1], [0], [0], [1], [0, 0, 1, 1], [], []>} : vector<4x64xbf16>, vector<64x64xbf16>, vector<4x64xf32> -> vector<4x64xf32>
    %72 = arith.addf %64, %71 : vector<4x64xf32>
    %c0_76 = arith.constant 0 : index
    %c0_77 = arith.constant 0 : index
    %c1_78 = arith.constant 1 : index
    %c0_79 = arith.constant 0 : index
    %73 = vector.load %arg11[%c0_76, %c0_77, %c1_78, %c0_79] : memref<4x3x3x64xf32, #tpu.memory_space<vmem>>, vector<1x2x2x64xf32>
    %74 = vector.shape_cast %73 : vector<1x2x2x64xf32> to vector<2x2x64xf32>
    %75 = vector.shape_cast %74 : vector<2x2x64xf32> to vector<4x64xf32>
    %76 = arith.truncf %75 : vector<4x64xf32> to vector<4x64xbf16>
    %c2_80 = arith.constant 2 : index
    %c0_81 = arith.constant 0 : index
    %c0_82 = arith.constant 0 : index
    %77 = vector.load %arg4[%c2_80, %c0_81, %c0_82] : memref<9x64x64xbf16, #tpu.memory_space<vmem>>, vector<1x64x64xbf16>
    %78 = vector.shape_cast %77 : vector<1x64x64xbf16> to vector<64x64xbf16>
    %cst_83 = arith.constant dense<0.000000e+00> : vector<4x64xf32>
    %79 = tpu.matmul %76, %78, %cst_83 {dimension_numbers = #tpu.dot_dimension_numbers<[1], [0], [0], [1], [0, 0, 1, 1], [], []>} : vector<4x64xbf16>, vector<64x64xbf16>, vector<4x64xf32> -> vector<4x64xf32>
    %80 = arith.addf %72, %79 : vector<4x64xf32>
    %c2_84 = arith.constant 2 : index
    %c0_85 = arith.constant 0 : index
    %c0_86 = arith.constant 0 : index
    %c0_87 = arith.constant 0 : index
    %81 = vector.load %arg11[%c2_84, %c0_85, %c0_86, %c0_87] : memref<4x3x3x64xf32, #tpu.memory_space<vmem>>, vector<1x2x2x64xf32>
    %82 = vector.shape_cast %81 : vector<1x2x2x64xf32> to vector<2x2x64xf32>
    %83 = vector.shape_cast %82 : vector<2x2x64xf32> to vector<4x64xf32>
    %84 = arith.truncf %83 : vector<4x64xf32> to vector<4x64xbf16>
    %c3_88 = arith.constant 3 : index
    %c0_89 = arith.constant 0 : index
    %c0_90 = arith.constant 0 : index
    %85 = vector.load %arg4[%c3_88, %c0_89, %c0_90] : memref<9x64x64xbf16, #tpu.memory_space<vmem>>, vector<1x64x64xbf16>
    %86 = vector.shape_cast %85 : vector<1x64x64xbf16> to vector<64x64xbf16>
    %cst_91 = arith.constant dense<0.000000e+00> : vector<4x64xf32>
    %87 = tpu.matmul %84, %86, %cst_91 {dimension_numbers = #tpu.dot_dimension_numbers<[1], [0], [0], [1], [0, 0, 1, 1], [], []>} : vector<4x64xbf16>, vector<64x64xbf16>, vector<4x64xf32> -> vector<4x64xf32>
    %88 = arith.addf %80, %87 : vector<4x64xf32>
    %c3_92 = arith.constant 3 : index
    %c0_93 = arith.constant 0 : index
    %c0_94 = arith.constant 0 : index
    %c0_95 = arith.constant 0 : index
    %89 = vector.load %arg11[%c3_92, %c0_93, %c0_94, %c0_95] : memref<4x3x3x64xf32, #tpu.memory_space<vmem>>, vector<1x2x2x64xf32>
    %90 = vector.shape_cast %89 : vector<1x2x2x64xf32> to vector<2x2x64xf32>
    %91 = vector.shape_cast %90 : vector<2x2x64xf32> to vector<4x64xf32>
    %92 = arith.truncf %91 : vector<4x64xf32> to vector<4x64xbf16>
    %c4 = arith.constant 4 : index
    %c0_96 = arith.constant 0 : index
    %c0_97 = arith.constant 0 : index
    %93 = vector.load %arg4[%c4, %c0_96, %c0_97] : memref<9x64x64xbf16, #tpu.memory_space<vmem>>, vector<1x64x64xbf16>
    %94 = vector.shape_cast %93 : vector<1x64x64xbf16> to vector<64x64xbf16>
    %cst_98 = arith.constant dense<0.000000e+00> : vector<4x64xf32>
    %95 = tpu.matmul %92, %94, %cst_98 {dimension_numbers = #tpu.dot_dimension_numbers<[1], [0], [0], [1], [0, 0, 1, 1], [], []>} : vector<4x64xbf16>, vector<64x64xbf16>, vector<4x64xf32> -> vector<4x64xf32>
    %96 = arith.addf %88, %95 : vector<4x64xf32>
    %c2_99 = arith.constant 2 : index
    %c0_100 = arith.constant 0 : index
    %c1_101 = arith.constant 1 : index
    %c0_102 = arith.constant 0 : index
    %97 = vector.load %arg11[%c2_99, %c0_100, %c1_101, %c0_102] : memref<4x3x3x64xf32, #tpu.memory_space<vmem>>, vector<1x2x2x64xf32>
    %98 = vector.shape_cast %97 : vector<1x2x2x64xf32> to vector<2x2x64xf32>
    %99 = vector.shape_cast %98 : vector<2x2x64xf32> to vector<4x64xf32>
    %100 = arith.truncf %99 : vector<4x64xf32> to vector<4x64xbf16>
    %c5 = arith.constant 5 : index
    %c0_103 = arith.constant 0 : index
    %c0_104 = arith.constant 0 : index
    %101 = vector.load %arg4[%c5, %c0_103, %c0_104] : memref<9x64x64xbf16, #tpu.memory_space<vmem>>, vector<1x64x64xbf16>
    %102 = vector.shape_cast %101 : vector<1x64x64xbf16> to vector<64x64xbf16>
    %cst_105 = arith.constant dense<0.000000e+00> : vector<4x64xf32>
    %103 = tpu.matmul %100, %102, %cst_105 {dimension_numbers = #tpu.dot_dimension_numbers<[1], [0], [0], [1], [0, 0, 1, 1], [], []>} : vector<4x64xbf16>, vector<64x64xbf16>, vector<4x64xf32> -> vector<4x64xf32>
    %104 = arith.addf %96, %103 : vector<4x64xf32>
    %c0_106 = arith.constant 0 : index
    %c1_107 = arith.constant 1 : index
    %c0_108 = arith.constant 0 : index
    %c0_109 = arith.constant 0 : index
    %105 = vector.load %arg11[%c0_106, %c1_107, %c0_108, %c0_109] : memref<4x3x3x64xf32, #tpu.memory_space<vmem>>, vector<1x2x2x64xf32>
    %106 = vector.shape_cast %105 : vector<1x2x2x64xf32> to vector<2x2x64xf32>
    %107 = vector.shape_cast %106 : vector<2x2x64xf32> to vector<4x64xf32>
    %108 = arith.truncf %107 : vector<4x64xf32> to vector<4x64xbf16>
    %c6 = arith.constant 6 : index
    %c0_110 = arith.constant 0 : index
    %c0_111 = arith.constant 0 : index
    %109 = vector.load %arg4[%c6, %c0_110, %c0_111] : memref<9x64x64xbf16, #tpu.memory_space<vmem>>, vector<1x64x64xbf16>
    %110 = vector.shape_cast %109 : vector<1x64x64xbf16> to vector<64x64xbf16>
    %cst_112 = arith.constant dense<0.000000e+00> : vector<4x64xf32>
    %111 = tpu.matmul %108, %110, %cst_112 {dimension_numbers = #tpu.dot_dimension_numbers<[1], [0], [0], [1], [0, 0, 1, 1], [], []>} : vector<4x64xbf16>, vector<64x64xbf16>, vector<4x64xf32> -> vector<4x64xf32>
    %112 = arith.addf %104, %111 : vector<4x64xf32>
    %c1_113 = arith.constant 1 : index
    %c1_114 = arith.constant 1 : index
    %c0_115 = arith.constant 0 : index
    %c0_116 = arith.constant 0 : index
    %113 = vector.load %arg11[%c1_113, %c1_114, %c0_115, %c0_116] : memref<4x3x3x64xf32, #tpu.memory_space<vmem>>, vector<1x2x2x64xf32>
    %114 = vector.shape_cast %113 : vector<1x2x2x64xf32> to vector<2x2x64xf32>
    %115 = vector.shape_cast %114 : vector<2x2x64xf32> to vector<4x64xf32>
    %116 = arith.truncf %115 : vector<4x64xf32> to vector<4x64xbf16>
    %c7 = arith.constant 7 : index
    %c0_117 = arith.constant 0 : index
    %c0_118 = arith.constant 0 : index
    %117 = vector.load %arg4[%c7, %c0_117, %c0_118] : memref<9x64x64xbf16, #tpu.memory_space<vmem>>, vector<1x64x64xbf16>
    %118 = vector.shape_cast %117 : vector<1x64x64xbf16> to vector<64x64xbf16>
    %cst_119 = arith.constant dense<0.000000e+00> : vector<4x64xf32>
    %119 = tpu.matmul %116, %118, %cst_119 {dimension_numbers = #tpu.dot_dimension_numbers<[1], [0], [0], [1], [0, 0, 1, 1], [], []>} : vector<4x64xbf16>, vector<64x64xbf16>, vector<4x64xf32> -> vector<4x64xf32>
    %120 = arith.addf %112, %119 : vector<4x64xf32>
    %c0_120 = arith.constant 0 : index
    %c1_121 = arith.constant 1 : index
    %c1_122 = arith.constant 1 : index
    %c0_123 = arith.constant 0 : index
    %121 = vector.load %arg11[%c0_120, %c1_121, %c1_122, %c0_123] : memref<4x3x3x64xf32, #tpu.memory_space<vmem>>, vector<1x2x2x64xf32>
    %122 = vector.shape_cast %121 : vector<1x2x2x64xf32> to vector<2x2x64xf32>
    %123 = vector.shape_cast %122 : vector<2x2x64xf32> to vector<4x64xf32>
    %124 = arith.truncf %123 : vector<4x64xf32> to vector<4x64xbf16>
    %c8 = arith.constant 8 : index
    %c0_124 = arith.constant 0 : index
    %c0_125 = arith.constant 0 : index
    %125 = vector.load %arg4[%c8, %c0_124, %c0_125] : memref<9x64x64xbf16, #tpu.memory_space<vmem>>, vector<1x64x64xbf16>
    %126 = vector.shape_cast %125 : vector<1x64x64xbf16> to vector<64x64xbf16>
    %cst_126 = arith.constant dense<0.000000e+00> : vector<4x64xf32>
    %127 = tpu.matmul %124, %126, %cst_126 {dimension_numbers = #tpu.dot_dimension_numbers<[1], [0], [0], [1], [0, 0, 1, 1], [], []>} : vector<4x64xbf16>, vector<64x64xbf16>, vector<4x64xf32> -> vector<4x64xf32>
    %128 = arith.addf %120, %127 : vector<4x64xf32>
    %c0_127 = arith.constant 0 : index
    %c0_128 = arith.constant 0 : index
    %129 = vector.load %arg5[%c0_127, %c0_128] : memref<1x64xf32, #tpu.memory_space<vmem>>, vector<1x64xf32>
    %130 = vector.broadcast %129 : vector<1x64xf32> to vector<4x64xf32>
    %131 = arith.addf %128, %130 : vector<4x64xf32>
    %cst_129 = arith.constant 0.000000e+00 : f32
    %132 = vector.broadcast %cst_129 : f32 to vector<4x64xf32>
    %133 = arith.maximumf %131, %132 : vector<4x64xf32>
    %134 = arith.truncf %133 : vector<4x64xf32> to vector<4x64xbf16>
    %c0_130 = arith.constant 0 : index
    %c0_131 = arith.constant 0 : index
    %135 = vector.load %arg6[%c0_130, %c0_131] : memref<64x256xbf16, #tpu.memory_space<vmem>>, vector<64x256xbf16>
    %cst_132 = arith.constant dense<0.000000e+00> : vector<4x256xf32>
    %136 = tpu.matmul %134, %135, %cst_132 {dimension_numbers = #tpu.dot_dimension_numbers<[1], [0], [0], [1], [0, 0, 1, 1], [], []>} : vector<4x64xbf16>, vector<64x256xbf16>, vector<4x256xf32> -> vector<4x256xf32>
    %c0_133 = arith.constant 0 : index
    %c0_134 = arith.constant 0 : index
    %137 = vector.load %arg7[%c0_133, %c0_134] : memref<1x256xf32, #tpu.memory_space<vmem>>, vector<1x256xf32>
    %138 = vector.broadcast %137 : vector<1x256xf32> to vector<4x256xf32>
    %139 = arith.addf %136, %138 : vector<4x256xf32>
    %c0_135 = arith.constant 0 : index
    %c0_136 = arith.constant 0 : index
    %c0_137 = arith.constant 0 : index
    %c0_138 = arith.constant 0 : index
    %c0_139 = arith.constant 0 : index
    %140 = vector.load %arg1[%c0_135, %c0_136, %c0_137, %c0_138, %c0_139] : memref<1x4x2x2x128xbf16, #tpu.memory_space<vmem>>, vector<1x1x2x2x128xbf16>
    %141 = vector.shape_cast %140 : vector<1x1x2x2x128xbf16> to vector<2x2x128xbf16>
    %142 = vector.shape_cast %141 : vector<2x2x128xbf16> to vector<4x128xbf16>
    %c0_140 = arith.constant 0 : index
    %c0_141 = arith.constant 0 : index
    %143 = vector.load %arg8[%c0_140, %c0_141] : memref<128x256xbf16, #tpu.memory_space<vmem>>, vector<128x256xbf16>
    %cst_142 = arith.constant dense<0.000000e+00> : vector<4x256xf32>
    %144 = tpu.matmul %142, %143, %cst_142 {dimension_numbers = #tpu.dot_dimension_numbers<[1], [0], [0], [1], [0, 0, 1, 1], [], []>} : vector<4x128xbf16>, vector<128x256xbf16>, vector<4x256xf32> -> vector<4x256xf32>
    %145 = arith.addf %139, %144 : vector<4x256xf32>
    %c0_143 = arith.constant 0 : index
    %c0_144 = arith.constant 0 : index
    %146 = vector.load %arg9[%c0_143, %c0_144] : memref<1x256xf32, #tpu.memory_space<vmem>>, vector<1x256xf32>
    %147 = vector.broadcast %146 : vector<1x256xf32> to vector<4x256xf32>
    %148 = arith.addf %145, %147 : vector<4x256xf32>
    %cst_145 = arith.constant 0.000000e+00 : f32
    %149 = vector.broadcast %cst_145 : f32 to vector<4x256xf32>
    %150 = arith.maximumf %148, %149 : vector<4x256xf32>
    %151 = arith.truncf %150 : vector<4x256xf32> to vector<4x256xbf16>
    %c0_146 = arith.constant 0 : index
    %c0_147 = arith.constant 0 : index
    %c0_148 = arith.constant 0 : index
    %152 = vector.load %arg10[%c0_146, %c0_147, %c0_148] : memref<1x4x256xbf16, #tpu.memory_space<vmem>>, vector<1x4x256xbf16>
    %153 = vector.shape_cast %152 : vector<1x4x256xbf16> to vector<4x256xbf16>
    %154 = vector.shape_cast %151 : vector<4x256xbf16> to vector<1x4x256xbf16>
    tpu.vector_store %arg10[%c0_146, %c0_147, %c0_148], %154 {strides = array<i32>} : memref<1x4x256xbf16, #tpu.memory_space<vmem>>, vector<1x4x256xbf16>,
    return
  }
  func.func @transform_0(%arg0: i32) -> (i32, i32, i32, i32, i32) {
    %c0_i32 = arith.constant 0 : i32
    %c0_i32_0 = arith.constant 0 : i32
    %c0_i32_1 = arith.constant 0 : i32
    %c0_i32_2 = arith.constant 0 : i32
    %c0_i32_3 = arith.constant 0 : i32
    return %arg0, %c0_i32, %c0_i32_0, %c0_i32_1, %c0_i32_2 : i32, i32, i32, i32, i32
  }
  func.func @transform_1(%arg0: i32) -> (i32, i32) {
    %c0_i32 = arith.constant 0 : i32
    %c0_i32_0 = arith.constant 0 : i32
    %c0_i32_1 = arith.constant 0 : i32
    return %c0_i32, %c0_i32_0 : i32, i32
  }
  func.func @transform_2(%arg0: i32) -> (i32, i32) {
    %c0_i32 = arith.constant 0 : i32
    %c0_i32_0 = arith.constant 0 : i32
    %c0_i32_1 = arith.constant 0 : i32
    return %c0_i32, %c0_i32_0 : i32, i32
  }
  func.func @transform_3(%arg0: i32) -> (i32, i32, i32) {
    %c0_i32 = arith.constant 0 : i32
    %c0_i32_0 = arith.constant 0 : i32
    %c0_i32_1 = arith.constant 0 : i32
    %c0_i32_2 = arith.constant 0 : i32
    return %c0_i32, %c0_i32_0, %c0_i32_1 : i32, i32, i32
  }
  func.func @transform_4(%arg0: i32) -> (i32, i32) {
    %c0_i32 = arith.constant 0 : i32
    %c0_i32_0 = arith.constant 0 : i32
    %c0_i32_1 = arith.constant 0 : i32
    return %c0_i32, %c0_i32_0 : i32, i32
  }
  func.func @transform_5(%arg0: i32) -> (i32, i32) {
    %c0_i32 = arith.constant 0 : i32
    %c0_i32_0 = arith.constant 0 : i32
    %c0_i32_1 = arith.constant 0 : i32
    return %c0_i32, %c0_i32_0 : i32, i32
  }
  func.func @transform_6(%arg0: i32) -> (i32, i32) {
    %c0_i32 = arith.constant 0 : i32
    %c0_i32_0 = arith.constant 0 : i32
    %c0_i32_1 = arith.constant 0 : i32
    return %c0_i32, %c0_i32_0 : i32, i32
  }
  func.func @transform_7(%arg0: i32) -> (i32, i32) {
    %c0_i32 = arith.constant 0 : i32
    %c0_i32_0 = arith.constant 0 : i32
    %c0_i32_1 = arith.constant 0 : i32
    return %c0_i32, %c0_i32_0 : i32, i32
  }
  func.func @transform_8(%arg0: i32) -> (i32, i32) {
    %c0_i32 = arith.constant 0 : i32
    %c0_i32_0 = arith.constant 0 : i32
    %c0_i32_1 = arith.constant 0 : i32
    return %c0_i32, %c0_i32_0 : i32, i32
  }
  func.func @transform_9(%arg0: i32) -> (i32, i32, i32) {
    %c0_i32 = arith.constant 0 : i32
    %c0_i32_0 = arith.constant 0 : i32
    %c0_i32_1 = arith.constant 0 : i32
    return %arg0, %c0_i32, %c0_i32_0 : i32, i32, i32
  }
}

</mosaic_0001>

<bundles_post_ra>
// kernel: _lambda_.6
= control target key start
LH: loop header
LB: loop body
LE: loop exit
PB: predicated region body
PF: predicated region fallthrough
CT: control target
= control target key end

     0   :  { %s3263_s12 = smov 0   ;;  %s3904_s0 = inlined_call_operand.vmem [shape: bf16[2,1024,147], index: 0, kind: input, shape index: {}]   ;;  %s3905_s1 = inlined_call_operand.vmem [shape: bf16[147,8], index: 1, kind: input, shape index: {}]   ;;  %s3906_s2 = inlined_call_operand.vmem [shape: f32[1,8], index: 2, kind: input, shape index: {}]   ;;  %s3907_s3 = inlined_call_operand.vmem [shape: bf16[2,1024,8], index: 3, kind: output, shape index: {}]  }
   0x1 LB: > { %s2528_s13 = sadd.s32 4294967295, %s3239_s12   ;;  %p2532_p0 = scmp.ge.s32.totalorder %s3239_s12, 1  ;;  %s3239_s12 = sphi %s3263_s12, %s13_s12  }
   0x2   : > { %p137_p1 = scmp.lt.s32.totalorder %s3239_s12, 3 }
   0x4   : > { %p138_p2 = pnand %p2532_p0, %p137_p1 }
   0x5   : > { %v3030_v0 = vld [vmem:[%s3905_s1] sm:$0xff] (!%p138_p2)   ;;  %v3241_v1 = vmov (!%p138_p2), 0   ;;  %v3031_v2 = vld [vmem:[%s3905_s1 + $0x8] sm:$0xff] (!%p138_p2)   ;;  %v3032_v3 = vld [vmem:[%s3905_s1 + $0x10] sm:$0xff] (!%p138_p2)   ;;  %p161_p3 = scmp.lt.s32.totalorder (!%p138_p2), %s2528_s13, 1  ;;  %vm959_vm0 = vcmask (!%p138_p2), 154624  }
   0x6   : > { %141 = sbr.rel (%p138_p2) target bundleno = 515 (0x203), region = 32  ;;  %1159 = vmatprep.subr.bf16.mxu0 (!%p138_p2), %v3241_v1  ;;  %3000 = vmatprep.subr.bf16.mxu1 (!%p138_p2), %v3241_v1  ;;  %v3033_v4 = vld [vmem:[%s3905_s1 + $0x18] sm:$0xff] (!%p138_p2)   ;;  %v3034_v6 = vld [vmem:[%s3905_s1 + $0x20] sm:$0xff] (!%p138_p2)   ;;  %v3035_v8 = vld [vmem:[%s3905_s1 + $0x28] sm:$0xff] (!%p138_p2)   ;;  %vm1152_vm1 = vcmask (!%p138_p2), 1040384   ;;  %vm1153_vm2 = vcmask (!%p138_p2), 1041408  }
   0x7   : > { %1160 = vmatpush1.bf16.msra.mxu0 (!%p138_p2), %v3030_v0  ;;  %3010 = vmatpush1.bf16.msra.mxu1 (!%p138_p2), %v3030_v0  ;;  %v3036_v9 = vld [vmem:[%s3905_s1 + $0x30] sm:$0xff] (!%p138_p2)   ;;  %v3037_v10 = vld [vmem:[%s3905_s1 + $0x38] sm:$0xff] (!%p138_p2)   ;;  %v3242_v11 = vmov (!%p138_p2), 65535   ;;  %v3038_v13 = vld [vmem:[%s3905_s1 + $0x40] sm:$0xff] (!%p138_p2)   ;;  %vm2344_vm3 = vcmask (!%p138_p2), 60416  }
   0x8   : > { %1161 = vmatprep.subr.bf16.mxu0 (!%p138_p2), %v3241_v1  ;;  %3001 = vmatprep.subr.bf16.mxu1 (!%p138_p2), %v3241_v1  ;;  %v1154_v12 = vsel (!%p138_p2), %vm1152_vm1, 4294967295, %v3242_v11  ;;  %v3039_v14 = vld [vmem:[%s3905_s1 + $0x48] ss:$0 sps:$4 sm:$0x33] (!%p138_p2)  }
   0x9   : > { %v1155_v15 = vsel (!%p138_p2), %vm1153_vm2, %v1154_v12, 0 }
   0xa   : > { %v1157_v16 = vand.u32 (!%p138_p2), %v3039_v14, %v1155_v15 }
   0xb   : > { %1162 = vmatpush1.bf16.msra.mxu0 (!%p138_p2), %v3031_v2  ;;  %3011 = vmatpush1.bf16.msra.mxu1 (!%p138_p2), %v3031_v2 }
   0xc   : > { %1163 = vmatprep.subr.bf16.mxu0 (!%p138_p2), %v3241_v1  ;;  %3002 = vmatprep.subr.bf16.mxu1 (!%p138_p2), %v3241_v1 }
   0xd   : > { %s3909_s13 = smov (!%p161_p3, %s2528_s13), 1 }
   0xe   : > { %s2870_s22 = sshll.u32 %s3909_s13, 10  ;;  %s2871_s15 = sshll.u32 %s3909_s13, 9 }
   0xf   : > { %1164 = vmatpush1.bf16.msra.mxu0 %v3032_v3  ;;  %3012 = vmatpush1.bf16.msra.mxu1 %v3032_v3  ;;  %s3289_s25 = scalar_lea.vmem %s3904_s0, %s2870_s22  ;;  %s3492_s17 = scalar_lea.vmem %s3907_s3, %s2871_s15 }
  0x10   : > { %1165 = vmatprep.subr.bf16.mxu0 %v3241_v1  ;;  %3003 = vmatprep.subr.bf16.mxu1 %v3241_v1  ;;  %v3042_v5 = vld [vmem:[%s3289_s25 + $0x4] ss:$8 sps:$4 sm:$0xff]   ;;  %v3040_v17 = vld [vmem:[%s3289_s25] ss:$8 sps:$4 sm:$0xff]   ;;  %v3046_v19 = vld [vmem:[%s3289_s25 + $0x14] ss:$8 sps:$4 sm:$0xff]  }
  0x11   : > { %v3045_v7 = vld [vmem:[%s3289_s25 + $0x204] ss:$8 sps:$4 sm:$0xff]   ;;  %2676 = vmatprep.mubr.msk.bf16.mxu0 %vm959_vm0, %v3042_v5  ;;  %v3043_v18 = vld [vmem:[%s3289_s25 + $0x200] ss:$8 sps:$4 sm:$0xff]   ;;  %v3048_v20 = vld [vmem:[%s3289_s25 + $0x214] ss:$8 sps:$4 sm:$0xff]  }
  0x12   : > { %2708 = vmatprep.mubr.msk.bf16.mxu1 %vm959_vm0, %v3045_v7  ;;  %v3050_v21 = vld [vmem:[%s3289_s25 + $0x10] ss:$8 sps:$4 sm:$0xff]   ;;  %v3052_v23 = vld [vmem:[%s3289_s25 + $0x24] ss:$8 sps:$4 sm:$0xff]   ;;  %v3056_v25 = vld [vmem:[%s3289_s25 + $0x20] ss:$8 sps:$4 sm:$0xff]  }
  0x13   : > { %1166 = vmatpush1.bf16.msra.mxu0 %v3033_v4  ;;  %3013 = vmatpush1.bf16.msra.mxu1 %v3033_v4  ;;  %v3051_v22 = vld [vmem:[%s3289_s25 + $0x210] ss:$8 sps:$4 sm:$0xff]   ;;  %v3054_v24 = vld [vmem:[%s3289_s25 + $0x224] ss:$8 sps:$4 sm:$0xff]   ;;  %v3057_v26 = vld [vmem:[%s3289_s25 + $0x220] ss:$8 sps:$4 sm:$0xff]  }
  0x14   : > { %1167 = vmatprep.subr.bf16.mxu0 %v3241_v1  ;;  %3004 = vmatprep.subr.bf16.mxu1 %v3241_v1  ;;  %v3058_v27 = vld [vmem:[%s3289_s25 + $0x34] ss:$8 sps:$4 sm:$0xff]   ;;  %v3062_v29 = vld [vmem:[%s3289_s25 + $0x30] ss:$8 sps:$4 sm:$0xff]   ;;  %v3064_v31 = vld [vmem:[%s3289_s25 + $0x44] ss:$8 sps:$4 sm:$0xff]  }
  0x15   : > { %v3060_v28 = vld [vmem:[%s3289_s25 + $0x234] ss:$8 sps:$4 sm:$0xff]   ;;  %v3063_v30 = vld [vmem:[%s3289_s25 + $0x230] ss:$8 sps:$4 sm:$0xff]   ;;  %v3066_v32 = vld [vmem:[%s3289_s25 + $0x244] ss:$8 sps:$4 sm:$0xff]  }
  0x16   : > { %v3068_v33 = vld [vmem:[%s3289_s25 + $0x40] ss:$8 sps:$4 sm:$0xff]   ;;  %v3070_v35 = vld [vmem:[%s3289_s25 + $0x54] ss:$8 sps:$4 sm:$0xff]   ;;  %v3074_v37 = vld [vmem:[%s3289_s25 + $0x50] ss:$8 sps:$4 sm:$0xff]  }
  0x17   : > { %1168 = vmatpush1.bf16.msra.mxu0 %v3034_v6  ;;  %3014 = vmatpush1.bf16.msra.mxu1 %v3034_v6  ;;  %v3069_v34 = vld [vmem:[%s3289_s25 + $0x240] ss:$8 sps:$4 sm:$0xff]   ;;  %v3072_v36 = vld [vmem:[%s3289_s25 + $0x254] ss:$8 sps:$4 sm:$0xff]   ;;  %v3075_v38 = vld [vmem:[%s3289_s25 + $0x250] ss:$8 sps:$4 sm:$0xff]  }
  0x18   : > { %1169 = vmatprep.subr.bf16.mxu0 %v3241_v1  ;;  %3005 = vmatprep.subr.bf16.mxu1 %v3241_v1  ;;  %v3076_v39 = vld [vmem:[%s3289_s25 + $0x64] ss:$8 sps:$4 sm:$0xff]   ;;  %v3080_v41 = vld [vmem:[%s3289_s25 + $0x60] ss:$8 sps:$4 sm:$0xff]   ;;  %v3082_v43 = vld [vmem:[%s3289_s25 + $0x74] ss:$8 sps:$4 sm:$0xff]  }
  0x19   : > { %v3078_v40 = vld [vmem:[%s3289_s25 + $0x264] ss:$8 sps:$4 sm:$0xff]   ;;  %v3081_v42 = vld [vmem:[%s3289_s25 + $0x260] ss:$8 sps:$4 sm:$0xff]   ;;  %v3084_v44 = vld [vmem:[%s3289_s25 + $0x274] ss:$8 sps:$4 sm:$0xff]  }
  0x1a   : > { %v3086_v45 = vld [vmem:[%s3289_s25 + $0x70] ss:$8 sps:$4 sm:$0xff]   ;;  %v3088_v47 = vld [vmem:[%s3289_s25 + $0x84] ss:$8 sps:$4 sm:$0xff]   ;;  %v3092_v49 = vld [vmem:[%s3289_s25 + $0x80] ss:$8 sps:$4 sm:$0xff]  }
  0x1b   : > { %1170 = vmatpush1.bf16.msra.mxu0 %v3035_v8  ;;  %3015 = vmatpush1.bf16.msra.mxu1 %v3035_v8  ;;  %v3087_v46 = vld [vmem:[%s3289_s25 + $0x270] ss:$8 sps:$4 sm:$0xff]   ;;  %v3090_v48 = vld [vmem:[%s3289_s25 + $0x284] ss:$8 sps:$4 sm:$0xff]   ;;  %v3093_v50 = vld [vmem:[%s3289_s25 + $0x280] ss:$8 sps:$4 sm:$0xff]  }
  0x1c   : > { %1171 = vmatprep.subr.bf16.mxu0 %v3241_v1  ;;  %3006 = vmatprep.subr.bf16.mxu1 %v3241_v1  ;;  %v3094_v51 = vld [vmem:[%s3289_s25 + $0x94] ss:$8 sps:$4 sm:$0xff]   ;;  %v3098_v53 = vld [vmem:[%s3289_s25 + $0x90] ss:$8 sps:$4 sm:$0xff]   ;;  %v3100_v55 = vld [vmem:[%s3289_s25 + $0xa4] ss:$8 sps:$4 sm:$0xff]  }
  0x1d   : > { %v3096_v52 = vld [vmem:[%s3289_s25 + $0x294] ss:$8 sps:$4 sm:$0xff]   ;;  %v3099_v54 = vld [vmem:[%s3289_s25 + $0x290] ss:$8 sps:$4 sm:$0xff]   ;;  %v3102_v56 = vld [vmem:[%s3289_s25 + $0x2a4] ss:$8 sps:$4 sm:$0xff]  }
  0x1e   : > { %v3104_v57 = vld [vmem:[%s3289_s25 + $0xa0] ss:$8 sps:$4 sm:$0xff]   ;;  %v3106_v59 = vld [vmem:[%s3289_s25 + $0xb4] ss:$8 sps:$4 sm:$0xff]   ;;  %v3110_v61 = vld [vmem:[%s3289_s25 + $0xb0] ss:$8 sps:$4 sm:$0xff]  }
  0x1f   : > { %1172 = vmatpush1.bf16.msra.mxu0 %v3036_v9  ;;  %3016 = vmatpush1.bf16.msra.mxu1 %v3036_v9  ;;  %v3105_v58 = vld [vmem:[%s3289_s25 + $0x2a0] ss:$8 sps:$4 sm:$0xff]   ;;  %v3108_v60 = vld [vmem:[%s3289_s25 + $0x2b4] ss:$8 sps:$4 sm:$0xff]   ;;  %v3111_v62 = vld [vmem:[%s3289_s25 + $0x2b0] ss:$8 sps:$4 sm:$0xff]  }
  0x20   : > { %1173 = vmatprep.subr.bf16.mxu0 %v3241_v1  ;;  %3007 = vmatprep.subr.bf16.mxu1 %v3241_v1  ;;  %v3112_v63 = vld [vmem:[%s3289_s25 + $0xc4] ss:$8 sps:$4 sm:$0xff]   ;;  %v3117_v2 = vld [vmem:[%s3289_s25 + $0x2c0] ss:$8 sps:$4 sm:$0xff]   ;;  %v3118_v3 = vld [vmem:[%s3289_s25 + $0xd4] ss:$8 sps:$4 sm:$0xff]  }
  0x21   : > { %v3114_v0 = vld [vmem:[%s3289_s25 + $0x2c4] ss:$8 sps:$4 sm:$0xff]   ;;  %v3120_v4 = vld [vmem:[%s3289_s25 + $0x2d4] ss:$8 sps:$4 sm:$0xff]   ;;  %v3122_v5 = vld [vmem:[%s3289_s25 + $0xd0] ss:$8 sps:$4 sm:$0xff]  }
  0x22   : > { %v3123_v6 = vld [vmem:[%s3289_s25 + $0x2d0] ss:$8 sps:$4 sm:$0xff]   ;;  %v3124_v7 = vld [vmem:[%s3289_s25 + $0xe4] ss:$8 sps:$4 sm:$0xff]   ;;  %v3128_v9 = vld [vmem:[%s3289_s25 + $0xe0] ss:$8 sps:$4 sm:$0xff]  }
  0x23   : > { %1174 = vmatpush1.bf16.msra.mxu0 %v3037_v10  ;;  %3017 = vmatpush1.bf16.msra.mxu1 %v3037_v10  ;;  %v3126_v8 = vld [vmem:[%s3289_s25 + $0x2e4] ss:$8 sps:$4 sm:$0xff]   ;;  %v3129_v10 = vld [vmem:[%s3289_s25 + $0x2e0] ss:$8 sps:$4 sm:$0xff]   ;;  %v3130_v11 = vld [vmem:[%s3289_s25 + $0xf4] ss:$8 sps:$4 sm:$0xff]  }
  0x24   : > { %1175 = vmatprep.subr.bf16.mxu0 %v3241_v1  ;;  %3008 = vmatprep.subr.bf16.mxu1 %v3241_v1  ;;  %v3132_v12 = vld [vmem:[%s3289_s25 + $0x2f4] ss:$8 sps:$4 sm:$0xff]   ;;  %v3135_v14 = vld [vmem:[%s3289_s25 + $0x2f0] ss:$8 sps:$4 sm:$0xff]   ;;  %v3136_v15 = vld [vmem:[%s3289_s25 + $0x104] ss:$8 sps:$4 sm:$0xff]  }
  0x27   : > { %1176 = vmatpush1.bf16.msra.mxu0 %v3038_v13  ;;  %3018 = vmatpush1.bf16.msra.mxu1 %v3038_v13  ;;  %v3134_v13 = vld [vmem:[%s3289_s25 + $0xf0] ss:$8 sps:$4 sm:$0xff]  }
  0x28   : > { %1177 = vmatprep.subr.bf16.mxu0 %v3241_v1  ;;  %3009 = vmatprep.subr.bf16.mxu1 %v3241_v1  ;;  %v3116_v1 = vld [vmem:[%s3289_s25 + $0xc0] ss:$8 sps:$4 sm:$0xff]  }
  0x2b   : > { %1178 = vmatpush1.bf16.msra.mxu0 %v1157_v16  ;;  %3019 = vmatpush1.bf16.msra.mxu1 %v1157_v16  ;;  %v3138_v16 = vld [vmem:[%s3289_s25 + $0x304] ss:$8 sps:$4 sm:$0xff]  }
  0x2e   : > { %1192 = vmatmul.mubr.bf16.vlgmr.msra.gmra.mrb[0].mxu0 %v3040_v17  ;;  %1448 = vmatmul.mubr.bf16.vlgmr.msra.gmra.mrb[0].mxu1 %v3043_v18  ;;  %v3140_v17 = vld [vmem:[%s3289_s25 + $0x100] ss:$8 sps:$4 sm:$0xff]  }
  0x2f   : > { %2677 = vmatprep.mubr.msk.bf16.mxu0 %vm959_vm0, %v3046_v19  ;;  %2709 = vmatprep.mubr.msk.bf16.mxu1 %vm959_vm0, %v3048_v20  ;;  %v3141_v18 = vld [vmem:[%s3289_s25 + $0x300] ss:$8 sps:$4 sm:$0xff]   ;;  %v3142_v19 = vld [vmem:[%s3289_s25 + $0x114] ss:$8 sps:$4 sm:$0xff]  }
  0x30   : > { %v3144_v20 = vld [vmem:[%s3289_s25 + $0x314] ss:$8 sps:$4 sm:$0xff]  }
  0x36   : > { %1200 = vmatmul.mubr.bf16.gmra.mrb[4].mxu0 %v3050_v21  ;;  %1456 = vmatmul.mubr.bf16.gmra.mrb[4].mxu1 %v3051_v22  ;;  %v3146_v21 = vld [vmem:[%s3289_s25 + $0x110] ss:$8 sps:$4 sm:$0xff]  }
  0x37   : > { %2678 = vmatprep.mubr.msk.bf16.mxu0 %vm959_vm0, %v3052_v23  ;;  %2710 = vmatprep.mubr.msk.bf16.mxu1 %vm959_vm0, %v3054_v24  ;;  %v3147_v22 = vld [vmem:[%s3289_s25 + $0x310] ss:$8 sps:$4 sm:$0xff]   ;;  %v3148_v23 = vld [vmem:[%s3289_s25 + $0x124] ss:$8 sps:$4 sm:$0xff]  }
  0x38   : > { %v3150_v24 = vld [vmem:[%s3289_s25 + $0x324] ss:$8 sps:$4 sm:$0xff]  }
  0x3e   : > { %1208 = vmatmul.mubr.bf16.gmra.mrb[8].mxu0 %v3056_v25  ;;  %1464 = vmatmul.mubr.bf16.gmra.mrb[8].mxu1 %v3057_v26  ;;  %v3152_v25 = vld [vmem:[%s3289_s25 + $0x120] ss:$8 sps:$4 sm:$0xff]  }
  0x3f   : > { %2679 = vmatprep.mubr.msk.bf16.mxu0 %vm959_vm0, %v3058_v27  ;;  %2711 = vmatprep.mubr.msk.bf16.mxu1 %vm959_vm0, %v3060_v28  ;;  %v3153_v26 = vld [vmem:[%s3289_s25 + $0x320] ss:$8 sps:$4 sm:$0xff]   ;;  %v3154_v27 = vld [vmem:[%s3289_s25 + $0x134] ss:$8 sps:$4 sm:$0xff]  }
  0x40   : > { %v3156_v28 = vld [vmem:[%s3289_s25 + $0x334] ss:$8 sps:$4 sm:$0xff]  }
  0x46   : > { %1216 = vmatmul.mubr.bf16.gmra.mrb[12].mxu0 %v3062_v29  ;;  %1472 = vmatmul.mubr.bf16.gmra.mrb[12].mxu1 %v3063_v30  ;;  %v3158_v29 = vld [vmem:[%s3289_s25 + $0x130] ss:$8 sps:$4 sm:$0xff]  }
  0x47   : > { %2680 = vmatprep.mubr.msk.bf16.mxu0 %vm959_vm0, %v3064_v31  ;;  %2712 = vmatprep.mubr.msk.bf16.mxu1 %vm959_vm0, %v3066_v32  ;;  %v3159_v30 = vld [vmem:[%s3289_s25 + $0x330] ss:$8 sps:$4 sm:$0xff]   ;;  %v3160_v31 = vld [vmem:[%s3289_s25 + $0x144] ss:$8 sps:$4 sm:$0xff]  }
  0x48   : > { %v3162_v32 = vld [vmem:[%s3289_s25 + $0x344] ss:$8 sps:$4 sm:$0xff]  }
  0x4e   : > { %1224 = vmatmul.mubr.bf16.gmra.mrb[16].mxu0 %v3068_v33  ;;  %1480 = vmatmul.mubr.bf16.gmra.mrb[16].mxu1 %v3069_v34  ;;  %v3164_v33 = vld [vmem:[%s3289_s25 + $0x140] ss:$8 sps:$4 sm:$0xff]  }
  0x4f   : > { %2681 = vmatprep.mubr.msk.bf16.mxu0 %vm959_vm0, %v3070_v35  ;;  %2713 = vmatprep.mubr.msk.bf16.mxu1 %vm959_vm0, %v3072_v36  ;;  %v3165_v34 = vld [vmem:[%s3289_s25 + $0x340] ss:$8 sps:$4 sm:$0xff]   ;;  %v3166_v35 = vld [vmem:[%s3289_s25 + $0x154] ss:$8 sps:$4 sm:$0xff]  }
  0x50   : > { %v3168_v36 = vld [vmem:[%s3289_s25 + $0x354] ss:$8 sps:$4 sm:$0xff]  }
  0x56   : > { %1232 = vmatmul.mubr.bf16.gmra.mrb[20].mxu0 %v3074_v37  ;;  %1488 = vmatmul.mubr.bf16.gmra.mrb[20].mxu1 %v3075_v38  ;;  %v3170_v37 = vld [vmem:[%s3289_s25 + $0x150] ss:$8 sps:$4 sm:$0xff]  }
  0x57   : > { %2682 = vmatprep.mubr.msk.bf16.mxu0 %vm959_vm0, %v3076_v39  ;;  %2714 = vmatprep.mubr.msk.bf16.mxu1 %vm959_vm0, %v3078_v40  ;;  %v3171_v38 = vld [vmem:[%s3289_s25 + $0x350] ss:$8 sps:$4 sm:$0xff]   ;;  %v3172_v39 = vld [vmem:[%s3289_s25 + $0x164] ss:$8 sps:$4 sm:$0xff]  }
  0x58   : > { %v3174_v40 = vld [vmem:[%s3289_s25 + $0x364] ss:$8 sps:$4 sm:$0xff]  }
  0x5e   : > { %1240 = vmatmul.mubr.bf16.gmra.mrb[24].mxu0 %v3080_v41  ;;  %1496 = vmatmul.mubr.bf16.gmra.mrb[24].mxu1 %v3081_v42  ;;  %v3176_v41 = vld [vmem:[%s3289_s25 + $0x160] ss:$8 sps:$4 sm:$0xff]  }
  0x5f   : > { %2683 = vmatprep.mubr.msk.bf16.mxu0 %vm959_vm0, %v3082_v43  ;;  %2715 = vmatprep.mubr.msk.bf16.mxu1 %vm959_vm0, %v3084_v44  ;;  %v3177_v42 = vld [vmem:[%s3289_s25 + $0x360] ss:$8 sps:$4 sm:$0xff]   ;;  %v3178_v43 = vld [vmem:[%s3289_s25 + $0x174] ss:$8 sps:$4 sm:$0xff]  }
  0x60   : > { %v3180_v44 = vld [vmem:[%s3289_s25 + $0x374] ss:$8 sps:$4 sm:$0xff]  }
  0x66   : > { %1248 = vmatmul.mubr.bf16.gmra.mrb[28].mxu0 %v3086_v45  ;;  %1504 = vmatmul.mubr.bf16.gmra.mrb[28].mxu1 %v3087_v46  ;;  %v3182_v45 = vld [vmem:[%s3289_s25 + $0x170] ss:$8 sps:$4 sm:$0xff]  }
  0x67   : > { %2684 = vmatprep.mubr.msk.bf16.mxu0 %vm959_vm0, %v3088_v47  ;;  %2716 = vmatprep.mubr.msk.bf16.mxu1 %vm959_vm0, %v3090_v48  ;;  %v3183_v46 = vld [vmem:[%s3289_s25 + $0x370] ss:$8 sps:$4 sm:$0xff]   ;;  %v3184_v47 = vld [vmem:[%s3289_s25 + $0x184] ss:$8 sps:$4 sm:$0xff]  }
  0x68   : > { %v3186_v48 = vld [vmem:[%s3289_s25 + $0x384] ss:$8 sps:$4 sm:$0xff]  }
  0x6e   : > { %1256 = vmatmul.mubr.bf16.gmra.mrb[32].mxu0 %v3092_v49  ;;  %1512 = vmatmul.mubr.bf16.gmra.mrb[32].mxu1 %v3093_v50  ;;  %v3188_v49 = vld [vmem:[%s3289_s25 + $0x180] ss:$8 sps:$4 sm:$0xff]  }
  0x6f   : > { %2685 = vmatprep.mubr.msk.bf16.mxu0 %vm959_vm0, %v3094_v51  ;;  %2717 = vmatprep.mubr.msk.bf16.mxu1 %vm959_vm0, %v3096_v52  ;;  %v3189_v50 = vld [vmem:[%s3289_s25 + $0x380] ss:$8 sps:$4 sm:$0xff]   ;;  %v3190_v51 = vld [vmem:[%s3289_s25 + $0x194] ss:$8 sps:$4 sm:$0xff]  }
  0x70   : > { %v3192_v52 = vld [vmem:[%s3289_s25 + $0x394] ss:$8 sps:$4 sm:$0xff]  }
  0x76   : > { %1264 = vmatmul.mubr.bf16.gmra.mrb[36].mxu0 %v3098_v53  ;;  %1520 = vmatmul.mubr.bf16.gmra.mrb[36].mxu1 %v3099_v54  ;;  %v3194_v53 = vld [vmem:[%s3289_s25 + $0x190] ss:$8 sps:$4 sm:$0xff]  }
  0x77   : > { %2686 = vmatprep.mubr.msk.bf16.mxu0 %vm959_vm0, %v3100_v55  ;;  %2718 = vmatprep.mubr.msk.bf16.mxu1 %vm959_vm0, %v3102_v56  ;;  %v3195_v54 = vld [vmem:[%s3289_s25 + $0x390] ss:$8 sps:$4 sm:$0xff]   ;;  %v3196_v55 = vld [vmem:[%s3289_s25 + $0x1a4] ss:$8 sps:$4 sm:$0xff]  }
  0x78   : > { %v3198_v56 = vld [vmem:[%s3289_s25 + $0x3a4] ss:$8 sps:$4 sm:$0xff]  }
  0x7e   : > { %1272 = vmatmul.mubr.bf16.gmra.mrb[40].mxu0 %v3104_v57  ;;  %1528 = vmatmul.mubr.bf16.gmra.mrb[40].mxu1 %v3105_v58  ;;  %v3200_v57 = vld [vmem:[%s3289_s25 + $0x1a0] ss:$8 sps:$4 sm:$0xff]  }
  0x7f   : > { %2687 = vmatprep.mubr.msk.bf16.mxu0 %vm959_vm0, %v3106_v59  ;;  %2719 = vmatprep.mubr.msk.bf16.mxu1 %vm959_vm0, %v3108_v60  ;;  %v3201_v58 = vld [vmem:[%s3289_s25 + $0x3a0] ss:$8 sps:$4 sm:$0xff]   ;;  %v3202_v59 = vld [vmem:[%s3289_s25 + $0x1b4] ss:$8 sps:$4 sm:$0xff]  }
  0x80   : > { %v3204_v60 = vld [vmem:[%s3289_s25 + $0x3b4] ss:$8 sps:$4 sm:$0xff]  }
  0x86   : > { %1280 = vmatmul.mubr.bf16.gmra.mrb[44].mxu0 %v3110_v61  ;;  %1536 = vmatmul.mubr.bf16.gmra.mrb[44].mxu1 %v3111_v62  ;;  %v3476_v61 = vld [vmem:[%s3906_s2] ss:$0 sm:$0xff] }
  0x87   : > { %2688 = vmatprep.mubr.msk.bf16.mxu0 %vm959_vm0, %v3112_v63  ;;  %2720 = vmatprep.mubr.msk.bf16.mxu1 %vm959_vm0, %v3114_v0 }
  0x8e   : > { %1288 = vmatmul.mubr.bf16.gmra.mrb[48].mxu0 %v3116_v1  ;;  %1544 = vmatmul.mubr.bf16.gmra.mrb[48].mxu1 %v3117_v2 }
  0x8f   : > { %2689 = vmatprep.mubr.msk.bf16.mxu0 %vm959_vm0, %v3118_v3  ;;  %2721 = vmatprep.mubr.msk.bf16.mxu1 %vm959_vm0, %v3120_v4  ;;  %v3206_v4 = vld [vmem:[%s3289_s25 + $0x1b0] ss:$8 sps:$4 sm:$0xff]  }
  0x96   : > { %1296 = vmatmul.mubr.bf16.gmra.mrb[52].mxu0 %v3122_v5  ;;  %1552 = vmatmul.mubr.bf16.gmra.mrb[52].mxu1 %v3123_v6  ;;  %v3207_v5 = vld [vmem:[%s3289_s25 + $0x3b0] ss:$8 sps:$4 sm:$0xff]  }
  0x97   : > { %2690 = vmatprep.mubr.msk.bf16.mxu0 %vm959_vm0, %v3124_v7  ;;  %2722 = vmatprep.mubr.msk.bf16.mxu1 %vm959_vm0, %v3126_v8  ;;  %v3208_v8 = vld [vmem:[%s3289_s25 + $0x1c4] ss:$8 sps:$4 sm:$0xff]  }
  0x9e   : > { %1304 = vmatmul.mubr.bf16.gmra.mrb[56].mxu0 %v3128_v9  ;;  %1560 = vmatmul.mubr.bf16.gmra.mrb[56].mxu1 %v3129_v10  ;;  %v3210_v9 = vld [vmem:[%s3289_s25 + $0x3c4] ss:$8 sps:$4 sm:$0xff]  }
  0x9f   : > { %2691 = vmatprep.mubr.msk.bf16.mxu0 %vm959_vm0, %v3130_v11  ;;  %2723 = vmatprep.mubr.msk.bf16.mxu1 %vm959_vm0, %v3132_v12 }
  0xa6   : > { %1312 = vmatmul.mubr.bf16.gmra.mrb[60].mxu0 %v3134_v13  ;;  %1568 = vmatmul.mubr.bf16.gmra.mrb[60].mxu1 %v3135_v14 }
  0xa7   : > { %2692 = vmatprep.mubr.msk.bf16.mxu0 %vm959_vm0, %v3136_v15  ;;  %2724 = vmatprep.mubr.msk.bf16.mxu1 %vm959_vm0, %v3138_v16 }
  0xae   : > { %1320 = vmatmul.mubr.bf16.gmra.mrb[64].mxu0 %v3140_v17  ;;  %1576 = vmatmul.mubr.bf16.gmra.mrb[64].mxu1 %v3141_v18 }
  0xaf   : > { %2693 = vmatprep.mubr.msk.bf16.mxu0 %vm959_vm0, %v3142_v19  ;;  %2725 = vmatprep.mubr.msk.bf16.mxu1 %vm959_vm0, %v3144_v20 }
  0xb6   : > { %1328 = vmatmul.mubr.bf16.gmra.mrb[68].mxu0 %v3146_v21  ;;  %1584 = vmatmul.mubr.bf16.gmra.mrb[68].mxu1 %v3147_v22 }
  0xb7   : > { %2694 = vmatprep.mubr.msk.bf16.mxu0 %vm959_vm0, %v3148_v23  ;;  %2726 = vmatprep.mubr.msk.bf16.mxu1 %vm959_vm0, %v3150_v24 }
  0xbe   : > { %1336 = vmatmul.mubr.bf16.gmra.mrb[72].mxu0 %v3152_v25  ;;  %1592 = vmatmul.mubr.bf16.gmra.mrb[72].mxu1 %v3153_v26 }
  0xbf   : > { %2695 = vmatprep.mubr.msk.bf16.mxu0 %vm959_vm0, %v3154_v27  ;;  %2727 = vmatprep.mubr.msk.bf16.mxu1 %vm959_vm0, %v3156_v28  ;;  %v3212_v28 = vld [vmem:[%s3289_s25 + $0x1c0] ss:$8 sps:$4 sm:$0xff]  }
  0xc6   : > { %1344 = vmatmul.mubr.bf16.gmra.mrb[76].mxu0 %v3158_v29  ;;  %1600 = vmatmul.mubr.bf16.gmra.mrb[76].mxu1 %v3159_v30  ;;  %v3213_v29 = vld [vmem:[%s3289_s25 + $0x3c0] ss:$8 sps:$4 sm:$0xff]  }
  0xc7   : > { %2696 = vmatprep.mubr.msk.bf16.mxu0 %vm959_vm0, %v3160_v31  ;;  %2728 = vmatprep.mubr.msk.bf16.mxu1 %vm959_vm0, %v3162_v32  ;;  %v3214_v32 = vld [vmem:[%s3289_s25 + $0x1d4] ss:$8 sps:$4 sm:$0xff]  }
  0xce   : > { %1352 = vmatmul.mubr.bf16.gmra.mrb[80].mxu0 %v3164_v33  ;;  %1608 = vmatmul.mubr.bf16.gmra.mrb[80].mxu1 %v3165_v34  ;;  %v3216_v33 = vld [vmem:[%s3289_s25 + $0x3d4] ss:$8 sps:$4 sm:$0xff]  }
  0xcf   : > { %2697 = vmatprep.mubr.msk.bf16.mxu0 %vm959_vm0, %v3166_v35  ;;  %2729 = vmatprep.mubr.msk.bf16.mxu1 %vm959_vm0, %v3168_v36 }
  0xd6   : > { %1360 = vmatmul.mubr.bf16.gmra.mrb[84].mxu0 %v3170_v37  ;;  %1616 = vmatmul.mubr.bf16.gmra.mrb[84].mxu1 %v3171_v38 }
  0xd7   : > { %2698 = vmatprep.mubr.msk.bf16.mxu0 %vm959_vm0, %v3172_v39  ;;  %2730 = vmatprep.mubr.msk.bf16.mxu1 %vm959_vm0, %v3174_v40 }
  0xde   : > { %1368 = vmatmul.mubr.bf16.gmra.mrb[88].mxu0 %v3176_v41  ;;  %1624 = vmatmul.mubr.bf16.gmra.mrb[88].mxu1 %v3177_v42 }
  0xdf   : > { %2699 = vmatprep.mubr.msk.bf16.mxu0 %vm959_vm0, %v3178_v43  ;;  %2731 = vmatprep.mubr.msk.bf16.mxu1 %vm959_vm0, %v3180_v44 }
  0xe6   : > { %1376 = vmatmul.mubr.bf16.gmra.mrb[92].mxu0 %v3182_v45  ;;  %1632 = vmatmul.mubr.bf16.gmra.mrb[92].mxu1 %v3183_v46 }
  0xe7   : > { %2700 = vmatprep.mubr.msk.bf16.mxu0 %vm959_vm0, %v3184_v47  ;;  %2732 = vmatprep.mubr.msk.bf16.mxu1 %vm959_vm0, %v3186_v48 }
  0xee   : > { %1384 = vmatmul.mubr.bf16.gmra.mrb[96].mxu0 %v3188_v49  ;;  %1640 = vmatmul.mubr.bf16.gmra.mrb[96].mxu1 %v3189_v50 }
  0xef   : > { %2701 = vmatprep.mubr.msk.bf16.mxu0 %vm959_vm0, %v3190_v51  ;;  %2733 = vmatprep.mubr.msk.bf16.mxu1 %vm959_vm0, %v3192_v52  ;;  %v3218_v52 = vld [vmem:[%s3289_s25 + $0x1d0] ss:$8 sps:$4 sm:$0xff]  }
  0xf6   : > { %1392 = vmatmul.mubr.bf16.gmra.mrb[100].mxu0 %v3194_v53  ;;  %1648 = vmatmul.mubr.bf16.gmra.mrb[100].mxu1 %v3195_v54  ;;  %v3219_v53 = vld [vmem:[%s3289_s25 + $0x3d0] ss:$8 sps:$4 sm:$0xff]  }
  0xf7   : > { %2702 = vmatprep.mubr.msk.bf16.mxu0 %vm959_vm0, %v3196_v55  ;;  %2734 = vmatprep.mubr.msk.bf16.mxu1 %vm959_vm0, %v3198_v56  ;;  %v3220_v56 = vld [vmem:[%s3289_s25 + $0x1e4] ss:$8 sps:$4 sm:$0xff]  }
  0xfe   : > { %1400 = vmatmul.mubr.bf16.gmra.mrb[104].mxu0 %v3200_v57  ;;  %1656 = vmatmul.mubr.bf16.gmra.mrb[104].mxu1 %v3201_v58  ;;  %v3222_v57 = vld [vmem:[%s3289_s25 + $0x3e4] ss:$8 sps:$4 sm:$0xff]  }
  0xff   : > { %2703 = vmatprep.mubr.msk.bf16.mxu0 %vm959_vm0, %v3202_v59  ;;  %2735 = vmatprep.mubr.msk.bf16.mxu1 %vm959_vm0, %v3204_v60 }
 0x101   : > { %v1193_v62 = vpop.f32.mrb[0].mxu0  ;;  %v1449_v63 = vpop.f32.mrb[0].mxu1 }
 0x102   : > { %v1194_v0 = vadd.f32 %v3476_v61, %v1193_v62  ;;  %v1450_v1 = vadd.f32 %v3476_v61, %v1449_v63  ;;  %v1195_v2 = vpop.f32.mrb[1].mxu0  ;;  %v1451_v3 = vpop.f32.mrb[1].mxu1 }
 0x103   : > { %v1196_v6 = vpop.f32.mrb[2].mxu0  ;;  %v1452_v7 = vpop.f32.mrb[2].mxu1 }
 0x104   : > { %v1704_v10 = vmax.f32 %v1194_v0, 0.0  ;;  %v1768_v11 = vmax.f32 %v1450_v1, 0.0  ;;  %v1197_v12 = vadd.f32 %v3476_v61, %v1196_v6  ;;  %v1453_v13 = vadd.f32 %v3476_v61, %v1452_v7  ;;  %v1198_v14 = vpop.f32.mrb[3].mxu0  ;;  %v1454_v15 = vpop.f32.mrb[3].mxu1 }
 0x105   : > { %v3225_v14 = vld [vmem:[%s3289_s25 + $0x3e0] ss:$8 sps:$4 sm:$0xff]  }
 0x106   : > { %v2872_v16 = vpack.c.bf16 %v1704_v10, %v1704_v10  ;;  %v2936_v17 = vpack.c.bf16 %v1768_v11, %v1768_v11  ;;  %v1705_v18 = vmax.f32 %v1197_v12, 0.0  ;;  %v1769_v19 = vmax.f32 %v1453_v13, 0.0  ;;  %1408 = vmatmul.mubr.bf16.gmra.mrb[108].mxu0 %v3206_v4  ;;  %1664 = vmatmul.mubr.bf16.gmra.mrb[108].mxu1 %v3207_v5  ;;  %v3224_v13 = vld [vmem:[%s3289_s25 + $0x1e0] ss:$8 sps:$4 sm:$0xff]  }
 0x107   : > { %2704 = vmatprep.mubr.msk.bf16.mxu0 %vm959_vm0, %v3208_v8  ;;  %2736 = vmatprep.mubr.msk.bf16.mxu1 %vm959_vm0, %v3210_v9 }
 0x108   : > { %2345 = vst.msk [vmem:[%s3492_s17] sm:$0xf] %vm2344_vm3, %v2872_v16  ;;  %2409 = vst.msk [vmem:[%s3492_s17 + $0x100] sm:$0xf] %vm2344_vm3, %v2936_v17  ;;  %v2873_v20 = vpack.c.bf16 %v1705_v18, %v1705_v18  ;;  %v2937_v21 = vpack.c.bf16 %v1769_v19, %v1769_v19  ;;  %v3226_v17 = vld [vmem:[%s3289_s25 + $0x1f4] ss:$8 sps:$4 sm:$0xff]  }
 0x109   : > { %v1201_v22 = vpop.f32.mrb[4].mxu0  ;;  %v1457_v23 = vpop.f32.mrb[4].mxu1  ;;  %v3228_v18 = vld [vmem:[%s3289_s25 + $0x3f4] ss:$8 sps:$4 sm:$0xff]  }
 0x10a   : > { %2346 = vst.msk [vmem:[%s3492_s17 + $0x4] sm:$0xf] %vm2344_vm3, %v2873_v20  ;;  %2410 = vst.msk [vmem:[%s3492_s17 + $0x104] sm:$0xf] %vm2344_vm3, %v2937_v21  ;;  %v1202_v24 = vadd.f32 %v3476_v61, %v1201_v22  ;;  %v1458_v25 = vadd.f32 %v3476_v61, %v1457_v23  ;;  %v1203_v26 = vpop.f32.mrb[5].mxu0  ;;  %v1459_v27 = vpop.f32.mrb[5].mxu1 }
 0x10b   : > { %v1204_v30 = vpop.f32.mrb[6].mxu0  ;;  %v1460_v31 = vpop.f32.mrb[6].mxu1 }
 0x10c   : > { %v1706_v34 = vmax.f32 %v1202_v24, 0.0  ;;  %v1770_v35 = vmax.f32 %v1458_v25, 0.0  ;;  %v1205_v36 = vadd.f32 %v3476_v61, %v1204_v30  ;;  %v1461_v37 = vadd.f32 %v3476_v61, %v1460_v31  ;;  %v1206_v38 = vpop.f32.mrb[7].mxu0  ;;  %v1462_v39 = vpop.f32.mrb[7].mxu1 }
 0x10d   : > { %v3231_v38 = vld [vmem:[%s3289_s25 + $0x3f0] ss:$8 sps:$4 sm:$0xff]  }
 0x10e   : > { %v2874_v40 = vpack.c.bf16 %v1706_v34, %v1706_v34  ;;  %v2938_v41 = vpack.c.bf16 %v1770_v35, %v1770_v35  ;;  %v1707_v42 = vmax.f32 %v1205_v36, 0.0  ;;  %v1771_v43 = vmax.f32 %v1461_v37, 0.0  ;;  %1416 = vmatmul.mubr.bf16.gmra.mrb[112].mxu0 %v3212_v28  ;;  %1672 = vmatmul.mubr.bf16.gmra.mrb[112].mxu1 %v3213_v29  ;;  %v3230_v37 = vld [vmem:[%s3289_s25 + $0x1f0] ss:$8 sps:$4 sm:$0xff]  }
 0x10f   : > { %2705 = vmatprep.mubr.msk.bf16.mxu0 %vm959_vm0, %v3214_v32  ;;  %2737 = vmatprep.mubr.msk.bf16.mxu1 %vm959_vm0, %v3216_v33 }
 0x110   : > { %2347 = vst.msk [vmem:[%s3492_s17 + $0x8] sm:$0xf] %vm2344_vm3, %v2874_v40  ;;  %2411 = vst.msk [vmem:[%s3492_s17 + $0x108] sm:$0xf] %vm2344_vm3, %v2938_v41  ;;  %v2875_v44 = vpack.c.bf16 %v1707_v42, %v1707_v42  ;;  %v2939_v45 = vpack.c.bf16 %v1771_v43, %v1771_v43 }
 0x111   : > { %v1209_v46 = vpop.f32.mrb[8].mxu0  ;;  %v1465_v47 = vpop.f32.mrb[8].mxu1 }
 0x112   : > { %2348 = vst.msk [vmem:[%s3492_s17 + $0xc] sm:$0xf] %vm2344_vm3, %v2875_v44  ;;  %2412 = vst.msk [vmem:[%s3492_s17 + $0x10c] sm:$0xf] %vm2344_vm3, %v2939_v45  ;;  %v1210_v48 = vadd.f32 %v3476_v61, %v1209_v46  ;;  %v1466_v49 = vadd.f32 %v3476_v61, %v1465_v47  ;;  %v1211_v50 = vpop.f32.mrb[9].mxu0  ;;  %v1467_v51 = vpop.f32.mrb[9].mxu1 }
 0x113   : > { %v1212_v54 = vpop.f32.mrb[10].mxu0  ;;  %v1468_v55 = vpop.f32.mrb[10].mxu1 }
 0x114   : > { %v1708_v58 = vmax.f32 %v1210_v48, 0.0  ;;  %v1772_v59 = vmax.f32 %v1466_v49, 0.0  ;;  %v1213_v60 = vadd.f32 %v3476_v61, %v1212_v54  ;;  %v1469_v62 = vadd.f32 %v3476_v61, %v1468_v55  ;;  %v1214_v63 = vpop.f32.mrb[11].mxu0  ;;  %v1470_v0 = vpop.f32.mrb[11].mxu1 }
 0x116   : > { %v2876_v1 = vpack.c.bf16 %v1708_v58, %v1708_v58  ;;  %v2940_v2 = vpack.c.bf16 %v1772_v59, %v1772_v59  ;;  %v1709_v3 = vmax.f32 %v1213_v60, 0.0  ;;  %v1773_v4 = vmax.f32 %v1469_v62, 0.0  ;;  %1424 = vmatmul.mubr.bf16.gmra.mrb[116].mxu0 %v3218_v52  ;;  %1680 = vmatmul.mubr.bf16.gmra.mrb[116].mxu1 %v3219_v53 }
 0x117   : > { %2706 = vmatprep.mubr.msk.bf16.mxu0 %vm959_vm0, %v3220_v56  ;;  %2738 = vmatprep.mubr.msk.bf16.mxu1 %vm959_vm0, %v3222_v57 }
 0x118   : > { %2349 = vst.msk [vmem:[%s3492_s17 + $0x10] sm:$0xf] %vm2344_vm3, %v2876_v1  ;;  %2413 = vst.msk [vmem:[%s3492_s17 + $0x110] sm:$0xf] %vm2344_vm3, %v2940_v2  ;;  %v2877_v5 = vpack.c.bf16 %v1709_v3, %v1709_v3  ;;  %v2941_v6 = vpack.c.bf16 %v1773_v4, %v1773_v4 }
 0x119   : > { %v1217_v7 = vpop.f32.mrb[12].mxu0  ;;  %v1473_v8 = vpop.f32.mrb[12].mxu1 }
 0x11a   : > { %2350 = vst.msk [vmem:[%s3492_s17 + $0x14] sm:$0xf] %vm2344_vm3, %v2877_v5  ;;  %2414 = vst.msk [vmem:[%s3492_s17 + $0x114] sm:$0xf] %vm2344_vm3, %v2941_v6  ;;  %v1218_v9 = vadd.f32 %v3476_v61, %v1217_v7  ;;  %v1474_v10 = vadd.f32 %v3476_v61, %v1473_v8  ;;  %v1219_v11 = vpop.f32.mrb[13].mxu0  ;;  %v1475_v12 = vpop.f32.mrb[13].mxu1 }
 0x11b   : > { %v1220_v15 = vpop.f32.mrb[14].mxu0  ;;  %v1476_v16 = vpop.f32.mrb[14].mxu1 }
 0x11c   : > { %v1710_v19 = vmax.f32 %v1218_v9, 0.0  ;;  %v1774_v20 = vmax.f32 %v1474_v10, 0.0  ;;  %v1221_v21 = vadd.f32 %v3476_v61, %v1220_v15  ;;  %v1477_v22 = vadd.f32 %v3476_v61, %v1476_v16  ;;  %v1222_v23 = vpop.f32.mrb[15].mxu0  ;;  %v1478_v24 = vpop.f32.mrb[15].mxu1 }
 0x11e   : > { %v2878_v25 = vpack.c.bf16 %v1710_v19, %v1710_v19  ;;  %v2942_v26 = vpack.c.bf16 %v1774_v20, %v1774_v20  ;;  %v1711_v27 = vmax.f32 %v1221_v21, 0.0  ;;  %v1775_v28 = vmax.f32 %v1477_v22, 0.0  ;;  %1432 = vmatmul.mubr.bf16.gmra.mrb[120].mxu0 %v3224_v13  ;;  %1688 = vmatmul.mubr.bf16.gmra.mrb[120].mxu1 %v3225_v14 }
 0x11f   : > { %2707 = vmatprep.mubr.msk.bf16.mxu0 %vm959_vm0, %v3226_v17  ;;  %2739 = vmatprep.mubr.msk.bf16.mxu1 %vm959_vm0, %v3228_v18 }
 0x120   : > { %2351 = vst.msk [vmem:[%s3492_s17 + $0x18] sm:$0xf] %vm2344_vm3, %v2878_v25  ;;  %2415 = vst.msk [vmem:[%s3492_s17 + $0x118] sm:$0xf] %vm2344_vm3, %v2942_v26  ;;  %v2879_v29 = vpack.c.bf16 %v1711_v27, %v1711_v27  ;;  %v2943_v30 = vpack.c.bf16 %v1775_v28, %v1775_v28 }
 0x121   : > { %v1225_v31 = vpop.f32.mrb[16].mxu0  ;;  %v1481_v32 = vpop.f32.mrb[16].mxu1 }
 0x122   : > { %2352 = vst.msk [vmem:[%s3492_s17 + $0x1c] sm:$0xf] %vm2344_vm3, %v2879_v29  ;;  %2416 = vst.msk [vmem:[%s3492_s17 + $0x11c] sm:$0xf] %vm2344_vm3, %v2943_v30  ;;  %v1226_v33 = vadd.f32 %v3476_v61, %v1225_v31  ;;  %v1482_v34 = vadd.f32 %v3476_v61, %v1481_v32  ;;  %v1227_v35 = vpop.f32.mrb[17].mxu0  ;;  %v1483_v36 = vpop.f32.mrb[17].mxu1 }
 0x123   : > { %v1228_v39 = vpop.f32.mrb[18].mxu0  ;;  %v1484_v40 = vpop.f32.mrb[18].mxu1 }
 0x124   : > { %v1712_v41 = vmax.f32 %v1226_v33, 0.0  ;;  %v1776_v42 = vmax.f32 %v1482_v34, 0.0  ;;  %v1229_v43 = vadd.f32 %v3476_v61, %v1228_v39  ;;  %v1485_v44 = vadd.f32 %v3476_v61, %v1484_v40  ;;  %v1230_v45 = vpop.f32.mrb[19].mxu0  ;;  %v1486_v46 = vpop.f32.mrb[19].mxu1 }
 0x126   : > { %v2880_v47 = vpack.c.bf16 %v1712_v41, %v1712_v41  ;;  %v2944_v48 = vpack.c.bf16 %v1776_v42, %v1776_v42  ;;  %v1713_v49 = vmax.f32 %v1229_v43, 0.0  ;;  %v1777_v50 = vmax.f32 %v1485_v44, 0.0  ;;  %1440 = vmatmul.mubr.bf16.gmra.mrb[124].mxu0 %v3230_v37  ;;  %1696 = vmatmul.mubr.bf16.gmra.mrb[124].mxu1 %v3231_v38 }
 0x128   : > { %2353 = vst.msk [vmem:[%s3492_s17 + $0x20] sm:$0xf] %vm2344_vm3, %v2880_v47  ;;  %2417 = vst.msk [vmem:[%s3492_s17 + $0x120] sm:$0xf] %vm2344_vm3, %v2944_v48  ;;  %v2881_v51 = vpack.c.bf16 %v1713_v49, %v1713_v49  ;;  %v2945_v52 = vpack.c.bf16 %v1777_v50, %v1777_v50 }
 0x129   : > { %v1233_v53 = vpop.f32.mrb[20].mxu0  ;;  %v1489_v54 = vpop.f32.mrb[20].mxu1 }
 0x12a   : > { %2354 = vst.msk [vmem:[%s3492_s17 + $0x24] sm:$0xf] %vm2344_vm3, %v2881_v51  ;;  %2418 = vst.msk [vmem:[%s3492_s17 + $0x124] sm:$0xf] %vm2344_vm3, %v2945_v52  ;;  %v1234_v55 = vadd.f32 %v3476_v61, %v1233_v53  ;;  %v1490_v56 = vadd.f32 %v3476_v61, %v1489_v54  ;;  %v1235_v57 = vpop.f32.mrb[21].mxu0  ;;  %v1491_v58 = vpop.f32.mrb[21].mxu1 }
 0x12b   : > { %v1236_v59 = vpop.f32.mrb[22].mxu0  ;;  %v1492_v60 = vpop.f32.mrb[22].mxu1 }
 0x12c   : > { %v1714_v62 = vmax.f32 %v1234_v55, 0.0  ;;  %v1778_v63 = vmax.f32 %v1490_v56, 0.0  ;;  %v1237_v0 = vadd.f32 %v3476_v61, %v1236_v59  ;;  %v1493_v1 = vadd.f32 %v3476_v61, %v1492_v60  ;;  %v1238_v2 = vpop.f32.mrb[23].mxu0  ;;  %v1494_v3 = vpop.f32.mrb[23].mxu1 }
 0x12e   : > { %v2882_v4 = vpack.c.bf16 %v1714_v62, %v1714_v62  ;;  %v2946_v5 = vpack.c.bf16 %v1778_v63, %v1778_v63  ;;  %v1715_v6 = vmax.f32 %v1237_v0, 0.0  ;;  %v1779_v7 = vmax.f32 %v1493_v1, 0.0 }
 0x130   : > { %2355 = vst.msk [vmem:[%s3492_s17 + $0x28] sm:$0xf] %vm2344_vm3, %v2882_v4  ;;  %2419 = vst.msk [vmem:[%s3492_s17 + $0x128] sm:$0xf] %vm2344_vm3, %v2946_v5  ;;  %v2883_v8 = vpack.c.bf16 %v1715_v6, %v1715_v6  ;;  %v2947_v9 = vpack.c.bf16 %v1779_v7, %v1779_v7 }
 0x131   : > { %v1241_v10 = vpop.f32.mrb[24].mxu0  ;;  %v1497_v11 = vpop.f32.mrb[24].mxu1 }
 0x132   : > { %2356 = vst.msk [vmem:[%s3492_s17 + $0x2c] sm:$0xf] %vm2344_vm3, %v2883_v8  ;;  %2420 = vst.msk [vmem:[%s3492_s17 + $0x12c] sm:$0xf] %vm2344_vm3, %v2947_v9  ;;  %v1242_v12 = vadd.f32 %v3476_v61, %v1241_v10  ;;  %v1498_v13 = vadd.f32 %v3476_v61, %v1497_v11  ;;  %v1243_v14 = vpop.f32.mrb[25].mxu0  ;;  %v1499_v15 = vpop.f32.mrb[25].mxu1 }
 0x133   : > { %v1244_v16 = vpop.f32.mrb[26].mxu0  ;;  %v1500_v17 = vpop.f32.mrb[26].mxu1 }
 0x134   : > { %v1716_v18 = vmax.f32 %v1242_v12, 0.0  ;;  %v1780_v19 = vmax.f32 %v1498_v13, 0.0  ;;  %v1245_v20 = vadd.f32 %v3476_v61, %v1244_v16  ;;  %v1501_v21 = vadd.f32 %v3476_v61, %v1500_v17  ;;  %v1246_v22 = vpop.f32.mrb[27].mxu0  ;;  %v1502_v23 = vpop.f32.mrb[27].mxu1 }
 0x136   : > { %v2884_v24 = vpack.c.bf16 %v1716_v18, %v1716_v18  ;;  %v2948_v25 = vpack.c.bf16 %v1780_v19, %v1780_v19  ;;  %v1717_v26 = vmax.f32 %v1245_v20, 0.0  ;;  %v1781_v27 = vmax.f32 %v1501_v21, 0.0 }
 0x138   : > { %2357 = vst.msk [vmem:[%s3492_s17 + $0x30] sm:$0xf] %vm2344_vm3, %v2884_v24  ;;  %2421 = vst.msk [vmem:[%s3492_s17 + $0x130] sm:$0xf] %vm2344_vm3, %v2948_v25  ;;  %v2885_v28 = vpack.c.bf16 %v1717_v26, %v1717_v26  ;;  %v2949_v29 = vpack.c.bf16 %v1781_v27, %v1781_v27 }
 0x139   : > { %v1249_v30 = vpop.f32.mrb[28].mxu0  ;;  %v1505_v31 = vpop.f32.mrb[28].mxu1 }
 0x13a   : > { %2358 = vst.msk [vmem:[%s3492_s17 + $0x34] sm:$0xf] %vm2344_vm3, %v2885_v28  ;;  %2422 = vst.msk [vmem:[%s3492_s17 + $0x134] sm:$0xf] %vm2344_vm3, %v2949_v29  ;;  %v1250_v32 = vadd.f32 %v3476_v61, %v1249_v30  ;;  %v1506_v33 = vadd.f32 %v3476_v61, %v1505_v31  ;;  %v1251_v34 = vpop.f32.mrb[29].mxu0  ;;  %v1507_v35 = vpop.f32.mrb[29].mxu1 }
 0x13b   : > { %v1252_v36 = vpop.f32.mrb[30].mxu0  ;;  %v1508_v37 = vpop.f32.mrb[30].mxu1 }
 0x13c   : > { %v1718_v38 = vmax.f32 %v1250_v32, 0.0  ;;  %v1782_v39 = vmax.f32 %v1506_v33, 0.0  ;;  %v1253_v40 = vadd.f32 %v3476_v61, %v1252_v36  ;;  %v1509_v41 = vadd.f32 %v3476_v61, %v1508_v37  ;;  %v1254_v42 = vpop.f32.mrb[31].mxu0  ;;  %v1510_v43 = vpop.f32.mrb[31].mxu1 }
 0x13e   : > { %v2886_v44 = vpack.c.bf16 %v1718_v38, %v1718_v38  ;;  %v2950_v45 = vpack.c.bf16 %v1782_v39, %v1782_v39  ;;  %v1719_v46 = vmax.f32 %v1253_v40, 0.0  ;;  %v1783_v47 = vmax.f32 %v1509_v41, 0.0 }
 0x140   : > { %2359 = vst.msk [vmem:[%s3492_s17 + $0x38] sm:$0xf] %vm2344_vm3, %v2886_v44  ;;  %2423 = vst.msk [vmem:[%s3492_s17 + $0x138] sm:$0xf] %vm2344_vm3, %v2950_v45  ;;  %v2887_v48 = vpack.c.bf16 %v1719_v46, %v1719_v46  ;;  %v2951_v49 = vpack.c.bf16 %v1783_v47, %v1783_v47 }
 0x141   : > { %v1257_v50 = vpop.f32.mrb[32].mxu0  ;;  %v1513_v51 = vpop.f32.mrb[32].mxu1 }
 0x142   : > { %2360 = vst.msk [vmem:[%s3492_s17 + $0x3c] sm:$0xf] %vm2344_vm3, %v2887_v48  ;;  %2424 = vst.msk [vmem:[%s3492_s17 + $0x13c] sm:$0xf] %vm2344_vm3, %v2951_v49  ;;  %v1258_v52 = vadd.f32 %v3476_v61, %v1257_v50  ;;  %v1514_v53 = vadd.f32 %v3476_v61, %v1513_v51  ;;  %v1259_v54 = vpop.f32.mrb[33].mxu0  ;;  %v1515_v55 = vpop.f32.mrb[33].mxu1 }
 0x143   : > { %v1260_v56 = vpop.f32.mrb[34].mxu0  ;;  %v1516_v57 = vpop.f32.mrb[34].mxu1 }
 0x144   : > { %v1720_v58 = vmax.f32 %v1258_v52, 0.0  ;;  %v1784_v59 = vmax.f32 %v1514_v53, 0.0  ;;  %v1261_v60 = vadd.f32 %v3476_v61, %v1260_v56  ;;  %v1517_v62 = vadd.f32 %v3476_v61, %v1516_v57  ;;  %v1262_v63 = vpop.f32.mrb[35].mxu0  ;;  %v1518_v0 = vpop.f32.mrb[35].mxu1 }
 0x146   : > { %v2888_v1 = vpack.c.bf16 %v1720_v58, %v1720_v58  ;;  %v2952_v2 = vpack.c.bf16 %v1784_v59, %v1784_v59  ;;  %v1721_v3 = vmax.f32 %v1261_v60, 0.0  ;;  %v1785_v4 = vmax.f32 %v1517_v62, 0.0 }
 0x148   : > { %2361 = vst.msk [vmem:[%s3492_s17 + $0x40] sm:$0xf] %vm2344_vm3, %v2888_v1  ;;  %2425 = vst.msk [vmem:[%s3492_s17 + $0x140] sm:$0xf] %vm2344_vm3, %v2952_v2  ;;  %v2889_v5 = vpack.c.bf16 %v1721_v3, %v1721_v3  ;;  %v2953_v6 = vpack.c.bf16 %v1785_v4, %v1785_v4 }
 0x149   : > { %v1265_v7 = vpop.f32.mrb[36].mxu0  ;;  %v1521_v8 = vpop.f32.mrb[36].mxu1 }
 0x14a   : > { %2362 = vst.msk [vmem:[%s3492_s17 + $0x44] sm:$0xf] %vm2344_vm3, %v2889_v5  ;;  %2426 = vst.msk [vmem:[%s3492_s17 + $0x144] sm:$0xf] %vm2344_vm3, %v2953_v6  ;;  %v1266_v9 = vadd.f32 %v3476_v61, %v1265_v7  ;;  %v1522_v10 = vadd.f32 %v3476_v61, %v1521_v8  ;;  %v1267_v11 = vpop.f32.mrb[37].mxu0  ;;  %v1523_v12 = vpop.f32.mrb[37].mxu1 }
 0x14b   : > { %v1268_v13 = vpop.f32.mrb[38].mxu0  ;;  %v1524_v14 = vpop.f32.mrb[38].mxu1 }
 0x14c   : > { %v1722_v15 = vmax.f32 %v1266_v9, 0.0  ;;  %v1786_v16 = vmax.f32 %v1522_v10, 0.0  ;;  %v1269_v17 = vadd.f32 %v3476_v61, %v1268_v13  ;;  %v1525_v18 = vadd.f32 %v3476_v61, %v1524_v14  ;;  %v1270_v19 = vpop.f32.mrb[39].mxu0  ;;  %v1526_v20 = vpop.f32.mrb[39].mxu1 }
 0x14e   : > { %v2890_v21 = vpack.c.bf16 %v1722_v15, %v1722_v15  ;;  %v2954_v22 = vpack.c.bf16 %v1786_v16, %v1786_v16  ;;  %v1723_v23 = vmax.f32 %v1269_v17, 0.0  ;;  %v1787_v24 = vmax.f32 %v1525_v18, 0.0 }
 0x150   : > { %2363 = vst.msk [vmem:[%s3492_s17 + $0x48] sm:$0xf] %vm2344_vm3, %v2890_v21  ;;  %2427 = vst.msk [vmem:[%s3492_s17 + $0x148] sm:$0xf] %vm2344_vm3, %v2954_v22  ;;  %v2891_v25 = vpack.c.bf16 %v1723_v23, %v1723_v23  ;;  %v2955_v26 = vpack.c.bf16 %v1787_v24, %v1787_v24 }
 0x151   : > { %v1273_v27 = vpop.f32.mrb[40].mxu0  ;;  %v1529_v28 = vpop.f32.mrb[40].mxu1 }
 0x152   : > { %2364 = vst.msk [vmem:[%s3492_s17 + $0x4c] sm:$0xf] %vm2344_vm3, %v2891_v25  ;;  %2428 = vst.msk [vmem:[%s3492_s17 + $0x14c] sm:$0xf] %vm2344_vm3, %v2955_v26  ;;  %v1274_v29 = vadd.f32 %v3476_v61, %v1273_v27  ;;  %v1530_v30 = vadd.f32 %v3476_v61, %v1529_v28  ;;  %v1275_v31 = vpop.f32.mrb[41].mxu0  ;;  %v1531_v32 = vpop.f32.mrb[41].mxu1 }
 0x153   : > { %v1276_v33 = vpop.f32.mrb[42].mxu0  ;;  %v1532_v34 = vpop.f32.mrb[42].mxu1 }
 0x154   : > { %v1724_v35 = vmax.f32 %v1274_v29, 0.0  ;;  %v1788_v36 = vmax.f32 %v1530_v30, 0.0  ;;  %v1277_v37 = vadd.f32 %v3476_v61, %v1276_v33  ;;  %v1533_v38 = vadd.f32 %v3476_v61, %v1532_v34  ;;  %v1278_v39 = vpop.f32.mrb[43].mxu0  ;;  %v1534_v40 = vpop.f32.mrb[43].mxu1 }
 0x156   : > { %v2892_v41 = vpack.c.bf16 %v1724_v35, %v1724_v35  ;;  %v2956_v42 = vpack.c.bf16 %v1788_v36, %v1788_v36  ;;  %v1725_v43 = vmax.f32 %v1277_v37, 0.0  ;;  %v1789_v44 = vmax.f32 %v1533_v38, 0.0 }
 0x158   : > { %2365 = vst.msk [vmem:[%s3492_s17 + $0x50] sm:$0xf] %vm2344_vm3, %v2892_v41  ;;  %2429 = vst.msk [vmem:[%s3492_s17 + $0x150] sm:$0xf] %vm2344_vm3, %v2956_v42  ;;  %v2893_v45 = vpack.c.bf16 %v1725_v43, %v1725_v43  ;;  %v2957_v46 = vpack.c.bf16 %v1789_v44, %v1789_v44 }
 0x159   : > { %v1281_v47 = vpop.f32.mrb[44].mxu0  ;;  %v1537_v48 = vpop.f32.mrb[44].mxu1 }
 0x15a   : > { %2366 = vst.msk [vmem:[%s3492_s17 + $0x54] sm:$0xf] %vm2344_vm3, %v2893_v45  ;;  %2430 = vst.msk [vmem:[%s3492_s17 + $0x154] sm:$0xf] %vm2344_vm3, %v2957_v46  ;;  %v1282_v49 = vadd.f32 %v3476_v61, %v1281_v47  ;;  %v1538_v50 = vadd.f32 %v3476_v61, %v1537_v48  ;;  %v1283_v51 = vpop.f32.mrb[45].mxu0  ;;  %v1539_v52 = vpop.f32.mrb[45].mxu1 }
 0x15b   : > { %v1284_v53 = vpop.f32.mrb[46].mxu0  ;;  %v1540_v54 = vpop.f32.mrb[46].mxu1 }
 0x15c   : > { %v1726_v55 = vmax.f32 %v1282_v49, 0.0  ;;  %v1790_v56 = vmax.f32 %v1538_v50, 0.0  ;;  %v1285_v57 = vadd.f32 %v3476_v61, %v1284_v53  ;;  %v1541_v58 = vadd.f32 %v3476_v61, %v1540_v54  ;;  %v1286_v59 = vpop.f32.mrb[47].mxu0  ;;  %v1542_v60 = vpop.f32.mrb[47].mxu1 }
 0x15e   : > { %v2894_v62 = vpack.c.bf16 %v1726_v55, %v1726_v55  ;;  %v2958_v63 = vpack.c.bf16 %v1790_v56, %v1790_v56  ;;  %v1727_v0 = vmax.f32 %v1285_v57, 0.0  ;;  %v1791_v1 = vmax.f32 %v1541_v58, 0.0 }
 0x160   : > { %2367 = vst.msk [vmem:[%s3492_s17 + $0x58] sm:$0xf] %vm2344_vm3, %v2894_v62  ;;  %2431 = vst.msk [vmem:[%s3492_s17 + $0x158] sm:$0xf] %vm2344_vm3, %v2958_v63  ;;  %v2895_v2 = vpack.c.bf16 %v1727_v0, %v1727_v0  ;;  %v2959_v3 = vpack.c.bf16 %v1791_v1, %v1791_v1 }
 0x161   : > { %v1289_v4 = vpop.f32.mrb[48].mxu0  ;;  %v1545_v5 = vpop.f32.mrb[48].mxu1 }
 0x162   : > { %2368 = vst.msk [vmem:[%s3492_s17 + $0x5c] sm:$0xf] %vm2344_vm3, %v2895_v2  ;;  %2432 = vst.msk [vmem:[%s3492_s17 + $0x15c] sm:$0xf] %vm2344_vm3, %v2959_v3  ;;  %v1290_v6 = vadd.f32 %v3476_v61, %v1289_v4  ;;  %v1546_v7 = vadd.f32 %v3476_v61, %v1545_v5  ;;  %v1291_v8 = vpop.f32.mrb[49].mxu0  ;;  %v1547_v9 = vpop.f32.mrb[49].mxu1 }
 0x163   : > { %v1292_v10 = vpop.f32.mrb[50].mxu0  ;;  %v1548_v11 = vpop.f32.mrb[50].mxu1 }
 0x164   : > { %v1728_v12 = vmax.f32 %v1290_v6, 0.0  ;;  %v1792_v13 = vmax.f32 %v1546_v7, 0.0  ;;  %v1293_v14 = vadd.f32 %v3476_v61, %v1292_v10  ;;  %v1549_v15 = vadd.f32 %v3476_v61, %v1548_v11  ;;  %v1294_v16 = vpop.f32.mrb[51].mxu0  ;;  %v1550_v17 = vpop.f32.mrb[51].mxu1 }
 0x166   : > { %v2896_v18 = vpack.c.bf16 %v1728_v12, %v1728_v12  ;;  %v2960_v19 = vpack.c.bf16 %v1792_v13, %v1792_v13  ;;  %v1729_v20 = vmax.f32 %v1293_v14, 0.0  ;;  %v1793_v21 = vmax.f32 %v1549_v15, 0.0 }
 0x168   : > { %2369 = vst.msk [vmem:[%s3492_s17 + $0x60] sm:$0xf] %vm2344_vm3, %v2896_v18  ;;  %2433 = vst.msk [vmem:[%s3492_s17 + $0x160] sm:$0xf] %vm2344_vm3, %v2960_v19  ;;  %v2897_v22 = vpack.c.bf16 %v1729_v20, %v1729_v20  ;;  %v2961_v23 = vpack.c.bf16 %v1793_v21, %v1793_v21 }
 0x169   : > { %v1297_v24 = vpop.f32.mrb[52].mxu0  ;;  %v1553_v25 = vpop.f32.mrb[52].mxu1 }
 0x16a   : > { %2370 = vst.msk [vmem:[%s3492_s17 + $0x64] sm:$0xf] %vm2344_vm3, %v2897_v22  ;;  %2434 = vst.msk [vmem:[%s3492_s17 + $0x164] sm:$0xf] %vm2344_vm3, %v2961_v23  ;;  %v1298_v26 = vadd.f32 %v3476_v61, %v1297_v24  ;;  %v1554_v27 = vadd.f32 %v3476_v61, %v1553_v25  ;;  %v1299_v28 = vpop.f32.mrb[53].mxu0  ;;  %v1555_v29 = vpop.f32.mrb[53].mxu1 }
 0x16b   : > { %v1300_v30 = vpop.f32.mrb[54].mxu0  ;;  %v1556_v31 = vpop.f32.mrb[54].mxu1 }
 0x16c   : > { %v1730_v32 = vmax.f32 %v1298_v26, 0.0  ;;  %v1794_v33 = vmax.f32 %v1554_v27, 0.0  ;;  %v1301_v34 = vadd.f32 %v3476_v61, %v1300_v30  ;;  %v1557_v35 = vadd.f32 %v3476_v61, %v1556_v31  ;;  %v1302_v36 = vpop.f32.mrb[55].mxu0  ;;  %v1558_v37 = vpop.f32.mrb[55].mxu1 }
 0x16e   : > { %v2898_v38 = vpack.c.bf16 %v1730_v32, %v1730_v32  ;;  %v2962_v39 = vpack.c.bf16 %v1794_v33, %v1794_v33  ;;  %v1731_v40 = vmax.f32 %v1301_v34, 0.0  ;;  %v1795_v41 = vmax.f32 %v1557_v35, 0.0 }
 0x170   : > { %2371 = vst.msk [vmem:[%s3492_s17 + $0x68] sm:$0xf] %vm2344_vm3, %v2898_v38  ;;  %2435 = vst.msk [vmem:[%s3492_s17 + $0x168] sm:$0xf] %vm2344_vm3, %v2962_v39  ;;  %v2899_v42 = vpack.c.bf16 %v1731_v40, %v1731_v40  ;;  %v2963_v43 = vpack.c.bf16 %v1795_v41, %v1795_v41 }
 0x171   : > { %v1305_v44 = vpop.f32.mrb[56].mxu0  ;;  %v1561_v45 = vpop.f32.mrb[56].mxu1 }
 0x172   : > { %2372 = vst.msk [vmem:[%s3492_s17 + $0x6c] sm:$0xf] %vm2344_vm3, %v2899_v42  ;;  %2436 = vst.msk [vmem:[%s3492_s17 + $0x16c] sm:$0xf] %vm2344_vm3, %v2963_v43  ;;  %v1306_v46 = vadd.f32 %v3476_v61, %v1305_v44  ;;  %v1562_v47 = vadd.f32 %v3476_v61, %v1561_v45  ;;  %v1307_v48 = vpop.f32.mrb[57].mxu0  ;;  %v1563_v49 = vpop.f32.mrb[57].mxu1 }
 0x173   : > { %v1308_v50 = vpop.f32.mrb[58].mxu0  ;;  %v1564_v51 = vpop.f32.mrb[58].mxu1 }
 0x174   : > { %v1732_v52 = vmax.f32 %v1306_v46, 0.0  ;;  %v1796_v53 = vmax.f32 %v1562_v47, 0.0  ;;  %v1309_v54 = vadd.f32 %v3476_v61, %v1308_v50  ;;  %v1565_v55 = vadd.f32 %v3476_v61, %v1564_v51  ;;  %v1310_v56 = vpop.f32.mrb[59].mxu0  ;;  %v1566_v57 = vpop.f32.mrb[59].mxu1 }
 0x176   : > { %v2900_v58 = vpack.c.bf16 %v1732_v52, %v1732_v52  ;;  %v2964_v59 = vpack.c.bf16 %v1796_v53, %v1796_v53  ;;  %v1733_v60 = vmax.f32 %v1309_v54, 0.0  ;;  %v1797_v62 = vmax.f32 %v1565_v55, 0.0 }
 0x178   : > { %2373 = vst.msk [vmem:[%s3492_s17 + $0x70] sm:$0xf] %vm2344_vm3, %v2900_v58  ;;  %2437 = vst.msk [vmem:[%s3492_s17 + $0x170] sm:$0xf] %vm2344_vm3, %v2964_v59  ;;  %v2901_v63 = vpack.c.bf16 %v1733_v60, %v1733_v60  ;;  %v2965_v0 = vpack.c.bf16 %v1797_v62, %v1797_v62 }
 0x179   : > { %v1313_v1 = vpop.f32.mrb[60].mxu0  ;;  %v1569_v2 = vpop.f32.mrb[60].mxu1 }
 0x17a   : > { %2374 = vst.msk [vmem:[%s3492_s17 + $0x74] sm:$0xf] %vm2344_vm3, %v2901_v63  ;;  %2438 = vst.msk [vmem:[%s3492_s17 + $0x174] sm:$0xf] %vm2344_vm3, %v2965_v0  ;;  %v1314_v3 = vadd.f32 %v3476_v61, %v1313_v1  ;;  %v1570_v4 = vadd.f32 %v3476_v61, %v1569_v2  ;;  %v1315_v5 = vpop.f32.mrb[61].mxu0  ;;  %v1571_v6 = vpop.f32.mrb[61].mxu1 }
 0x17b   : > { %v1316_v7 = vpop.f32.mrb[62].mxu0  ;;  %v1572_v8 = vpop.f32.mrb[62].mxu1 }
 0x17c   : > { %v1734_v9 = vmax.f32 %v1314_v3, 0.0  ;;  %v1798_v10 = vmax.f32 %v1570_v4, 0.0  ;;  %v1317_v11 = vadd.f32 %v3476_v61, %v1316_v7  ;;  %v1573_v12 = vadd.f32 %v3476_v61, %v1572_v8  ;;  %v1318_v13 = vpop.f32.mrb[63].mxu0  ;;  %v1574_v14 = vpop.f32.mrb[63].mxu1 }
 0x17e   : > { %v2902_v15 = vpack.c.bf16 %v1734_v9, %v1734_v9  ;;  %v2966_v16 = vpack.c.bf16 %v1798_v10, %v1798_v10  ;;  %v1735_v17 = vmax.f32 %v1317_v11, 0.0  ;;  %v1799_v18 = vmax.f32 %v1573_v12, 0.0 }
 0x180   : > { %2375 = vst.msk [vmem:[%s3492_s17 + $0x78] sm:$0xf] %vm2344_vm3, %v2902_v15  ;;  %2439 = vst.msk [vmem:[%s3492_s17 + $0x178] sm:$0xf] %vm2344_vm3, %v2966_v16  ;;  %v2903_v19 = vpack.c.bf16 %v1735_v17, %v1735_v17  ;;  %v2967_v20 = vpack.c.bf16 %v1799_v18, %v1799_v18 }
 0x181   : > { %v1321_v21 = vpop.f32.mrb[64].mxu0  ;;  %v1577_v22 = vpop.f32.mrb[64].mxu1 }
 0x182   : > { %2376 = vst.msk [vmem:[%s3492_s17 + $0x7c] sm:$0xf] %vm2344_vm3, %v2903_v19  ;;  %2440 = vst.msk [vmem:[%s3492_s17 + $0x17c] sm:$0xf] %vm2344_vm3, %v2967_v20  ;;  %v1322_v23 = vadd.f32 %v3476_v61, %v1321_v21  ;;  %v1578_v24 = vadd.f32 %v3476_v61, %v1577_v22  ;;  %v1323_v25 = vpop.f32.mrb[65].mxu0  ;;  %v1579_v26 = vpop.f32.mrb[65].mxu1 }
 0x183   : > { %v1324_v27 = vpop.f32.mrb[66].mxu0  ;;  %v1580_v28 = vpop.f32.mrb[66].mxu1 }
 0x184   : > { %v1736_v29 = vmax.f32 %v1322_v23, 0.0  ;;  %v1800_v30 = vmax.f32 %v1578_v24, 0.0  ;;  %v1325_v31 = vadd.f32 %v3476_v61, %v1324_v27  ;;  %v1581_v32 = vadd.f32 %v3476_v61, %v1580_v28  ;;  %v1326_v33 = vpop.f32.mrb[67].mxu0  ;;  %v1582_v34 = vpop.f32.mrb[67].mxu1 }
 0x186   : > { %v2904_v35 = vpack.c.bf16 %v1736_v29, %v1736_v29  ;;  %v2968_v36 = vpack.c.bf16 %v1800_v30, %v1800_v30  ;;  %v1737_v37 = vmax.f32 %v1325_v31, 0.0  ;;  %v1801_v38 = vmax.f32 %v1581_v32, 0.0 }
 0x188   : > { %2377 = vst.msk [vmem:[%s3492_s17 + $0x80] sm:$0xf] %vm2344_vm3, %v2904_v35  ;;  %2441 = vst.msk [vmem:[%s3492_s17 + $0x180] sm:$0xf] %vm2344_vm3, %v2968_v36  ;;  %v2905_v39 = vpack.c.bf16 %v1737_v37, %v1737_v37  ;;  %v2969_v40 = vpack.c.bf16 %v1801_v38, %v1801_v38 }
 0x189   : > { %v1329_v41 = vpop.f32.mrb[68].mxu0  ;;  %v1585_v42 = vpop.f32.mrb[68].mxu1 }
 0x18a   : > { %2378 = vst.msk [vmem:[%s3492_s17 + $0x84] sm:$0xf] %vm2344_vm3, %v2905_v39  ;;  %2442 = vst.msk [vmem:[%s3492_s17 + $0x184] sm:$0xf] %vm2344_vm3, %v2969_v40  ;;  %v1330_v43 = vadd.f32 %v3476_v61, %v1329_v41  ;;  %v1586_v44 = vadd.f32 %v3476_v61, %v1585_v42  ;;  %v1331_v45 = vpop.f32.mrb[69].mxu0  ;;  %v1587_v46 = vpop.f32.mrb[69].mxu1 }
 0x18b   : > { %v1332_v47 = vpop.f32.mrb[70].mxu0  ;;  %v1588_v48 = vpop.f32.mrb[70].mxu1 }
 0x18c   : > { %v1738_v49 = vmax.f32 %v1330_v43, 0.0  ;;  %v1802_v50 = vmax.f32 %v1586_v44, 0.0  ;;  %v1333_v51 = vadd.f32 %v3476_v61, %v1332_v47  ;;  %v1589_v52 = vadd.f32 %v3476_v61, %v1588_v48  ;;  %v1334_v53 = vpop.f32.mrb[71].mxu0  ;;  %v1590_v54 = vpop.f32.mrb[71].mxu1 }
 0x18e   : > { %v2906_v55 = vpack.c.bf16 %v1738_v49, %v1738_v49  ;;  %v2970_v56 = vpack.c.bf16 %v1802_v50, %v1802_v50  ;;  %v1739_v57 = vmax.f32 %v1333_v51, 0.0  ;;  %v1803_v58 = vmax.f32 %v1589_v52, 0.0 }
 0x190   : > { %2379 = vst.msk [vmem:[%s3492_s17 + $0x88] sm:$0xf] %vm2344_vm3, %v2906_v55  ;;  %2443 = vst.msk [vmem:[%s3492_s17 + $0x188] sm:$0xf] %vm2344_vm3, %v2970_v56  ;;  %v2907_v59 = vpack.c.bf16 %v1739_v57, %v1739_v57  ;;  %v2971_v60 = vpack.c.bf16 %v1803_v58, %v1803_v58 }
 0x191   : > { %v1337_v62 = vpop.f32.mrb[72].mxu0  ;;  %v1593_v63 = vpop.f32.mrb[72].mxu1 }
 0x192   : > { %2380 = vst.msk [vmem:[%s3492_s17 + $0x8c] sm:$0xf] %vm2344_vm3, %v2907_v59  ;;  %2444 = vst.msk [vmem:[%s3492_s17 + $0x18c] sm:$0xf] %vm2344_vm3, %v2971_v60  ;;  %v1338_v0 = vadd.f32 %v3476_v61, %v1337_v62  ;;  %v1594_v1 = vadd.f32 %v3476_v61, %v1593_v63  ;;  %v1339_v2 = vpop.f32.mrb[73].mxu0  ;;  %v1595_v3 = vpop.f32.mrb[73].mxu1 }
 0x193   : > { %v1340_v4 = vpop.f32.mrb[74].mxu0  ;;  %v1596_v5 = vpop.f32.mrb[74].mxu1 }
 0x194   : > { %v1740_v6 = vmax.f32 %v1338_v0, 0.0  ;;  %v1804_v7 = vmax.f32 %v1594_v1, 0.0  ;;  %v1341_v8 = vadd.f32 %v3476_v61, %v1340_v4  ;;  %v1597_v9 = vadd.f32 %v3476_v61, %v1596_v5  ;;  %v1342_v10 = vpop.f32.mrb[75].mxu0  ;;  %v1598_v11 = vpop.f32.mrb[75].mxu1 }
 0x196   : > { %v2908_v12 = vpack.c.bf16 %v1740_v6, %v1740_v6  ;;  %v2972_v13 = vpack.c.bf16 %v1804_v7, %v1804_v7  ;;  %v1741_v14 = vmax.f32 %v1341_v8, 0.0  ;;  %v1805_v15 = vmax.f32 %v1597_v9, 0.0 }
 0x198   : > { %2381 = vst.msk [vmem:[%s3492_s17 + $0x90] sm:$0xf] %vm2344_vm3, %v2908_v12  ;;  %2445 = vst.msk [vmem:[%s3492_s17 + $0x190] sm:$0xf] %vm2344_vm3, %v2972_v13  ;;  %v2909_v16 = vpack.c.bf16 %v1741_v14, %v1741_v14  ;;  %v2973_v17 = vpack.c.bf16 %v1805_v15, %v1805_v15 }
 0x199   : > { %v1345_v18 = vpop.f32.mrb[76].mxu0  ;;  %v1601_v19 = vpop.f32.mrb[76].mxu1 }
 0x19a   : > { %2382 = vst.msk [vmem:[%s3492_s17 + $0x94] sm:$0xf] %vm2344_vm3, %v2909_v16  ;;  %2446 = vst.msk [vmem:[%s3492_s17 + $0x194] sm:$0xf] %vm2344_vm3, %v2973_v17  ;;  %v1346_v20 = vadd.f32 %v3476_v61, %v1345_v18  ;;  %v1602_v21 = vadd.f32 %v3476_v61, %v1601_v19  ;;  %v1347_v22 = vpop.f32.mrb[77].mxu0  ;;  %v1603_v23 = vpop.f32.mrb[77].mxu1 }
 0x19b   : > { %v1348_v24 = vpop.f32.mrb[78].mxu0  ;;  %v1604_v25 = vpop.f32.mrb[78].mxu1 }
 0x19c   : > { %v1742_v26 = vmax.f32 %v1346_v20, 0.0  ;;  %v1806_v27 = vmax.f32 %v1602_v21, 0.0  ;;  %v1349_v28 = vadd.f32 %v3476_v61, %v1348_v24  ;;  %v1605_v29 = vadd.f32 %v3476_v61, %v1604_v25  ;;  %v1350_v30 = vpop.f32.mrb[79].mxu0  ;;  %v1606_v31 = vpop.f32.mrb[79].mxu1  ;;  %v3755_v61 = vld [vmem:[%s3906_s2] ss:$0 sm:$0xff] }
 0x19e   : > { %v2910_v32 = vpack.c.bf16 %v1742_v26, %v1742_v26  ;;  %v2974_v33 = vpack.c.bf16 %v1806_v27, %v1806_v27  ;;  %v1743_v34 = vmax.f32 %v1349_v28, 0.0  ;;  %v1807_v35 = vmax.f32 %v1605_v29, 0.0 }
 0x1a0   : > { %2383 = vst.msk [vmem:[%s3492_s17 + $0x98] sm:$0xf] %vm2344_vm3, %v2910_v32  ;;  %2447 = vst.msk [vmem:[%s3492_s17 + $0x198] sm:$0xf] %vm2344_vm3, %v2974_v33  ;;  %v2911_v36 = vpack.c.bf16 %v1743_v34, %v1743_v34  ;;  %v2975_v37 = vpack.c.bf16 %v1807_v35, %v1807_v35 }
 0x1a1   : > { %v1353_v38 = vpop.f32.mrb[80].mxu0  ;;  %v1609_v39 = vpop.f32.mrb[80].mxu1 }
 0x1a2   : > { %2384 = vst.msk [vmem:[%s3492_s17 + $0x9c] sm:$0xf] %vm2344_vm3, %v2911_v36  ;;  %2448 = vst.msk [vmem:[%s3492_s17 + $0x19c] sm:$0xf] %vm2344_vm3, %v2975_v37  ;;  %v1354_v40 = vadd.f32 %v3755_v61, %v1353_v38  ;;  %v1610_v41 = vadd.f32 %v3755_v61, %v1609_v39  ;;  %v1355_v42 = vpop.f32.mrb[81].mxu0  ;;  %v1611_v43 = vpop.f32.mrb[81].mxu1 }
 0x1a3   : > { %v1356_v44 = vpop.f32.mrb[82].mxu0  ;;  %v1612_v45 = vpop.f32.mrb[82].mxu1 }
 0x1a4   : > { %v1744_v46 = vmax.f32 %v1354_v40, 0.0  ;;  %v1808_v47 = vmax.f32 %v1610_v41, 0.0  ;;  %v1357_v48 = vadd.f32 %v3755_v61, %v1356_v44  ;;  %v1613_v49 = vadd.f32 %v3755_v61, %v1612_v45  ;;  %v1358_v50 = vpop.f32.mrb[83].mxu0  ;;  %v1614_v51 = vpop.f32.mrb[83].mxu1 }
 0x1a6   : > { %v2912_v52 = vpack.c.bf16 %v1744_v46, %v1744_v46  ;;  %v2976_v53 = vpack.c.bf16 %v1808_v47, %v1808_v47  ;;  %v1745_v54 = vmax.f32 %v1357_v48, 0.0  ;;  %v1809_v55 = vmax.f32 %v1613_v49, 0.0 }
 0x1a8   : > { %2385 = vst.msk [vmem:[%s3492_s17 + $0xa0] sm:$0xf] %vm2344_vm3, %v2912_v52  ;;  %2449 = vst.msk [vmem:[%s3492_s17 + $0x1a0] sm:$0xf] %vm2344_vm3, %v2976_v53  ;;  %v2913_v56 = vpack.c.bf16 %v1745_v54, %v1745_v54  ;;  %v2977_v57 = vpack.c.bf16 %v1809_v55, %v1809_v55 }
 0x1a9   : > { %v1361_v58 = vpop.f32.mrb[84].mxu0  ;;  %v1617_v59 = vpop.f32.mrb[84].mxu1 }
 0x1aa   : > { %2386 = vst.msk [vmem:[%s3492_s17 + $0xa4] sm:$0xf] %vm2344_vm3, %v2913_v56  ;;  %2450 = vst.msk [vmem:[%s3492_s17 + $0x1a4] sm:$0xf] %vm2344_vm3, %v2977_v57  ;;  %v1362_v60 = vadd.f32 %v3755_v61, %v1361_v58  ;;  %v1618_v62 = vadd.f32 %v3755_v61, %v1617_v59  ;;  %v1363_v63 = vpop.f32.mrb[85].mxu0  ;;  %v1619_v0 = vpop.f32.mrb[85].mxu1 }
 0x1ab   : > { %v1364_v1 = vpop.f32.mrb[86].mxu0  ;;  %v1620_v2 = vpop.f32.mrb[86].mxu1 }
 0x1ac   : > { %v1746_v3 = vmax.f32 %v1362_v60, 0.0  ;;  %v1810_v4 = vmax.f32 %v1618_v62, 0.0  ;;  %v1365_v5 = vadd.f32 %v3755_v61, %v1364_v1  ;;  %v1621_v6 = vadd.f32 %v3755_v61, %v1620_v2  ;;  %v1366_v7 = vpop.f32.mrb[87].mxu0  ;;  %v1622_v8 = vpop.f32.mrb[87].mxu1 }
 0x1ae   : > { %v2914_v9 = vpack.c.bf16 %v1746_v3, %v1746_v3  ;;  %v2978_v10 = vpack.c.bf16 %v1810_v4, %v1810_v4  ;;  %v1747_v11 = vmax.f32 %v1365_v5, 0.0  ;;  %v1811_v12 = vmax.f32 %v1621_v6, 0.0 }
 0x1b0   : > { %2387 = vst.msk [vmem:[%s3492_s17 + $0xa8] sm:$0xf] %vm2344_vm3, %v2914_v9  ;;  %2451 = vst.msk [vmem:[%s3492_s17 + $0x1a8] sm:$0xf] %vm2344_vm3, %v2978_v10  ;;  %v2915_v13 = vpack.c.bf16 %v1747_v11, %v1747_v11  ;;  %v2979_v14 = vpack.c.bf16 %v1811_v12, %v1811_v12 }
 0x1b1   : > { %v1369_v15 = vpop.f32.mrb[88].mxu0  ;;  %v1625_v16 = vpop.f32.mrb[88].mxu1 }
 0x1b2   : > { %2388 = vst.msk [vmem:[%s3492_s17 + $0xac] sm:$0xf] %vm2344_vm3, %v2915_v13  ;;  %2452 = vst.msk [vmem:[%s3492_s17 + $0x1ac] sm:$0xf] %vm2344_vm3, %v2979_v14  ;;  %v1370_v17 = vadd.f32 %v3755_v61, %v1369_v15  ;;  %v1626_v18 = vadd.f32 %v3755_v61, %v1625_v16  ;;  %v1371_v19 = vpop.f32.mrb[89].mxu0  ;;  %v1627_v20 = vpop.f32.mrb[89].mxu1 }
 0x1b3   : > { %v1372_v21 = vpop.f32.mrb[90].mxu0  ;;  %v1628_v22 = vpop.f32.mrb[90].mxu1 }
 0x1b4   : > { %v1748_v23 = vmax.f32 %v1370_v17, 0.0  ;;  %v1812_v24 = vmax.f32 %v1626_v18, 0.0  ;;  %v1373_v25 = vadd.f32 %v3755_v61, %v1372_v21  ;;  %v1629_v26 = vadd.f32 %v3755_v61, %v1628_v22  ;;  %v1374_v27 = vpop.f32.mrb[91].mxu0  ;;  %v1630_v28 = vpop.f32.mrb[91].mxu1 }
 0x1b6   : > { %v2916_v29 = vpack.c.bf16 %v1748_v23, %v1748_v23  ;;  %v2980_v30 = vpack.c.bf16 %v1812_v24, %v1812_v24  ;;  %v1749_v31 = vmax.f32 %v1373_v25, 0.0  ;;  %v1813_v32 = vmax.f32 %v1629_v26, 0.0 }
 0x1b8   : > { %2389 = vst.msk [vmem:[%s3492_s17 + $0xb0] sm:$0xf] %vm2344_vm3, %v2916_v29  ;;  %2453 = vst.msk [vmem:[%s3492_s17 + $0x1b0] sm:$0xf] %vm2344_vm3, %v2980_v30  ;;  %v2917_v33 = vpack.c.bf16 %v1749_v31, %v1749_v31  ;;  %v2981_v34 = vpack.c.bf16 %v1813_v32, %v1813_v32 }
 0x1b9   : > { %v1377_v35 = vpop.f32.mrb[92].mxu0  ;;  %v1633_v36 = vpop.f32.mrb[92].mxu1 }
 0x1ba   : > { %2390 = vst.msk [vmem:[%s3492_s17 + $0xb4] sm:$0xf] %vm2344_vm3, %v2917_v33  ;;  %2454 = vst.msk [vmem:[%s3492_s17 + $0x1b4] sm:$0xf] %vm2344_vm3, %v2981_v34  ;;  %v1378_v37 = vadd.f32 %v3755_v61, %v1377_v35  ;;  %v1634_v38 = vadd.f32 %v3755_v61, %v1633_v36  ;;  %v1379_v39 = vpop.f32.mrb[93].mxu0  ;;  %v1635_v40 = vpop.f32.mrb[93].mxu1 }
 0x1bb   : > { %v1380_v41 = vpop.f32.mrb[94].mxu0  ;;  %v1636_v42 = vpop.f32.mrb[94].mxu1 }
 0x1bc   : > { %v1750_v43 = vmax.f32 %v1378_v37, 0.0  ;;  %v1814_v44 = vmax.f32 %v1634_v38, 0.0  ;;  %v1381_v45 = vadd.f32 %v3755_v61, %v1380_v41  ;;  %v1637_v46 = vadd.f32 %v3755_v61, %v1636_v42  ;;  %v1382_v47 = vpop.f32.mrb[95].mxu0  ;;  %v1638_v48 = vpop.f32.mrb[95].mxu1 }
 0x1be   : > { %v2918_v49 = vpack.c.bf16 %v1750_v43, %v1750_v43  ;;  %v2982_v50 = vpack.c.bf16 %v1814_v44, %v1814_v44  ;;  %v1751_v51 = vmax.f32 %v1381_v45, 0.0  ;;  %v1815_v52 = vmax.f32 %v1637_v46, 0.0 }
 0x1c0   : > { %2391 = vst.msk [vmem:[%s3492_s17 + $0xb8] sm:$0xf] %vm2344_vm3, %v2918_v49  ;;  %2455 = vst.msk [vmem:[%s3492_s17 + $0x1b8] sm:$0xf] %vm2344_vm3, %v2982_v50  ;;  %v2919_v53 = vpack.c.bf16 %v1751_v51, %v1751_v51  ;;  %v2983_v54 = vpack.c.bf16 %v1815_v52, %v1815_v52 }
 0x1c1   : > { %v1385_v55 = vpop.f32.mrb[96].mxu0  ;;  %v1641_v56 = vpop.f32.mrb[96].mxu1 }
 0x1c2   : > { %2392 = vst.msk [vmem:[%s3492_s17 + $0xbc] sm:$0xf] %vm2344_vm3, %v2919_v53  ;;  %2456 = vst.msk [vmem:[%s3492_s17 + $0x1bc] sm:$0xf] %vm2344_vm3, %v2983_v54  ;;  %v1386_v57 = vadd.f32 %v3755_v61, %v1385_v55  ;;  %v1642_v58 = vadd.f32 %v3755_v61, %v1641_v56  ;;  %v1387_v59 = vpop.f32.mrb[97].mxu0  ;;  %v1643_v60 = vpop.f32.mrb[97].mxu1 }
 0x1c3   : > { %v1388_v62 = vpop.f32.mrb[98].mxu0  ;;  %v1644_v63 = vpop.f32.mrb[98].mxu1 }
 0x1c4   : > { %v1752_v0 = vmax.f32 %v1386_v57, 0.0  ;;  %v1816_v1 = vmax.f32 %v1642_v58, 0.0  ;;  %v1389_v2 = vadd.f32 %v3755_v61, %v1388_v62  ;;  %v1645_v3 = vadd.f32 %v3755_v61, %v1644_v63  ;;  %v1390_v4 = vpop.f32.mrb[99].mxu0  ;;  %v1646_v5 = vpop.f32.mrb[99].mxu1 }
 0x1c6   : > { %v2920_v6 = vpack.c.bf16 %v1752_v0, %v1752_v0  ;;  %v2984_v7 = vpack.c.bf16 %v1816_v1, %v1816_v1  ;;  %v1753_v8 = vmax.f32 %v1389_v2, 0.0  ;;  %v1817_v9 = vmax.f32 %v1645_v3, 0.0 }
 0x1c8   : > { %2393 = vst.msk [vmem:[%s3492_s17 + $0xc0] sm:$0xf] %vm2344_vm3, %v2920_v6  ;;  %2457 = vst.msk [vmem:[%s3492_s17 + $0x1c0] sm:$0xf] %vm2344_vm3, %v2984_v7  ;;  %v2921_v10 = vpack.c.bf16 %v1753_v8, %v1753_v8  ;;  %v2985_v11 = vpack.c.bf16 %v1817_v9, %v1817_v9 }
 0x1c9   : > { %v1393_v12 = vpop.f32.mrb[100].mxu0  ;;  %v1649_v13 = vpop.f32.mrb[100].mxu1 }
 0x1ca   : > { %2394 = vst.msk [vmem:[%s3492_s17 + $0xc4] sm:$0xf] %vm2344_vm3, %v2921_v10  ;;  %2458 = vst.msk [vmem:[%s3492_s17 + $0x1c4] sm:$0xf] %vm2344_vm3, %v2985_v11  ;;  %v1394_v14 = vadd.f32 %v3755_v61, %v1393_v12  ;;  %v1650_v15 = vadd.f32 %v3755_v61, %v1649_v13  ;;  %v1395_v16 = vpop.f32.mrb[101].mxu0  ;;  %v1651_v17 = vpop.f32.mrb[101].mxu1 }
 0x1cb   : > { %v1396_v18 = vpop.f32.mrb[102].mxu0  ;;  %v1652_v19 = vpop.f32.mrb[102].mxu1 }
 0x1cc   : > { %v1754_v20 = vmax.f32 %v1394_v14, 0.0  ;;  %v1818_v21 = vmax.f32 %v1650_v15, 0.0  ;;  %v1397_v22 = vadd.f32 %v3755_v61, %v1396_v18  ;;  %v1653_v23 = vadd.f32 %v3755_v61, %v1652_v19  ;;  %v1398_v24 = vpop.f32.mrb[103].mxu0  ;;  %v1654_v25 = vpop.f32.mrb[103].mxu1 }
 0x1ce   : > { %v2922_v26 = vpack.c.bf16 %v1754_v20, %v1754_v20  ;;  %v2986_v27 = vpack.c.bf16 %v1818_v21, %v1818_v21  ;;  %v1755_v28 = vmax.f32 %v1397_v22, 0.0  ;;  %v1819_v29 = vmax.f32 %v1653_v23, 0.0 }
 0x1d0   : > { %2395 = vst.msk [vmem:[%s3492_s17 + $0xc8] sm:$0xf] %vm2344_vm3, %v2922_v26  ;;  %2459 = vst.msk [vmem:[%s3492_s17 + $0x1c8] sm:$0xf] %vm2344_vm3, %v2986_v27  ;;  %v2923_v30 = vpack.c.bf16 %v1755_v28, %v1755_v28  ;;  %v2987_v31 = vpack.c.bf16 %v1819_v29, %v1819_v29 }
 0x1d1   : > { %v1401_v32 = vpop.f32.mrb[104].mxu0  ;;  %v1657_v33 = vpop.f32.mrb[104].mxu1 }
 0x1d2   : > { %2396 = vst.msk [vmem:[%s3492_s17 + $0xcc] sm:$0xf] %vm2344_vm3, %v2923_v30  ;;  %2460 = vst.msk [vmem:[%s3492_s17 + $0x1cc] sm:$0xf] %vm2344_vm3, %v2987_v31  ;;  %v1402_v34 = vadd.f32 %v3755_v61, %v1401_v32  ;;  %v1658_v35 = vadd.f32 %v3755_v61, %v1657_v33  ;;  %v1403_v36 = vpop.f32.mrb[105].mxu0  ;;  %v1659_v37 = vpop.f32.mrb[105].mxu1 }
 0x1d3   : > { %v1404_v38 = vpop.f32.mrb[106].mxu0  ;;  %v1660_v39 = vpop.f32.mrb[106].mxu1 }
 0x1d4   : > { %v1756_v40 = vmax.f32 %v1402_v34, 0.0  ;;  %v1820_v41 = vmax.f32 %v1658_v35, 0.0  ;;  %v1405_v42 = vadd.f32 %v3755_v61, %v1404_v38  ;;  %v1661_v43 = vadd.f32 %v3755_v61, %v1660_v39  ;;  %v1406_v44 = vpop.f32.mrb[107].mxu0  ;;  %v1662_v45 = vpop.f32.mrb[107].mxu1 }
 0x1d6   : > { %v2924_v46 = vpack.c.bf16 %v1756_v40, %v1756_v40  ;;  %v2988_v47 = vpack.c.bf16 %v1820_v41, %v1820_v41  ;;  %v1757_v48 = vmax.f32 %v1405_v42, 0.0  ;;  %v1821_v49 = vmax.f32 %v1661_v43, 0.0 }
 0x1d8   : > { %2397 = vst.msk [vmem:[%s3492_s17 + $0xd0] sm:$0xf] %vm2344_vm3, %v2924_v46  ;;  %2461 = vst.msk [vmem:[%s3492_s17 + $0x1d0] sm:$0xf] %vm2344_vm3, %v2988_v47  ;;  %v2925_v50 = vpack.c.bf16 %v1757_v48, %v1757_v48  ;;  %v2989_v51 = vpack.c.bf16 %v1821_v49, %v1821_v49 }
 0x1d9   : > { %v1409_v52 = vpop.f32.mrb[108].mxu0  ;;  %v1665_v53 = vpop.f32.mrb[108].mxu1 }
 0x1da   : > { %2398 = vst.msk [vmem:[%s3492_s17 + $0xd4] sm:$0xf] %vm2344_vm3, %v2925_v50  ;;  %2462 = vst.msk [vmem:[%s3492_s17 + $0x1d4] sm:$0xf] %vm2344_vm3, %v2989_v51  ;;  %v1410_v54 = vadd.f32 %v3755_v61, %v1409_v52  ;;  %v1666_v55 = vadd.f32 %v3755_v61, %v1665_v53  ;;  %v1411_v56 = vpop.f32.mrb[109].mxu0  ;;  %v1667_v57 = vpop.f32.mrb[109].mxu1 }
 0x1db   : > { %v1412_v58 = vpop.f32.mrb[110].mxu0  ;;  %v1668_v59 = vpop.f32.mrb[110].mxu1 }
 0x1dc   : > { %v1758_v60 = vmax.f32 %v1410_v54, 0.0  ;;  %v1822_v62 = vmax.f32 %v1666_v55, 0.0  ;;  %v1413_v63 = vadd.f32 %v3755_v61, %v1412_v58  ;;  %v1669_v0 = vadd.f32 %v3755_v61, %v1668_v59  ;;  %v1414_v1 = vpop.f32.mrb[111].mxu0  ;;  %v1670_v2 = vpop.f32.mrb[111].mxu1 }
 0x1de   : > { %v2926_v3 = vpack.c.bf16 %v1758_v60, %v1758_v60  ;;  %v2990_v4 = vpack.c.bf16 %v1822_v62, %v1822_v62  ;;  %v1759_v5 = vmax.f32 %v1413_v63, 0.0  ;;  %v1823_v6 = vmax.f32 %v1669_v0, 0.0 }
 0x1e0   : > { %2399 = vst.msk [vmem:[%s3492_s17 + $0xd8] sm:$0xf] %vm2344_vm3, %v2926_v3  ;;  %2463 = vst.msk [vmem:[%s3492_s17 + $0x1d8] sm:$0xf] %vm2344_vm3, %v2990_v4  ;;  %v2927_v7 = vpack.c.bf16 %v1759_v5, %v1759_v5  ;;  %v2991_v8 = vpack.c.bf16 %v1823_v6, %v1823_v6 }
 0x1e1   : > { %v1417_v9 = vpop.f32.mrb[112].mxu0  ;;  %v1673_v10 = vpop.f32.mrb[112].mxu1 }
 0x1e2   : > { %2400 = vst.msk [vmem:[%s3492_s17 + $0xdc] sm:$0xf] %vm2344_vm3, %v2927_v7  ;;  %2464 = vst.msk [vmem:[%s3492_s17 + $0x1dc] sm:$0xf] %vm2344_vm3, %v2991_v8  ;;  %v1418_v11 = vadd.f32 %v3755_v61, %v1417_v9  ;;  %v1674_v12 = vadd.f32 %v3755_v61, %v1673_v10  ;;  %v1419_v13 = vpop.f32.mrb[113].mxu0  ;;  %v1675_v14 = vpop.f32.mrb[113].mxu1 }
 0x1e3   : > { %v1420_v15 = vpop.f32.mrb[114].mxu0  ;;  %v1676_v16 = vpop.f32.mrb[114].mxu1 }
 0x1e4   : > { %v1760_v17 = vmax.f32 %v1418_v11, 0.0  ;;  %v1824_v18 = vmax.f32 %v1674_v12, 0.0  ;;  %v1421_v19 = vadd.f32 %v3755_v61, %v1420_v15  ;;  %v1677_v20 = vadd.f32 %v3755_v61, %v1676_v16  ;;  %v1422_v21 = vpop.f32.mrb[115].mxu0  ;;  %v1678_v22 = vpop.f32.mrb[115].mxu1 }
 0x1e6   : > { %v2928_v23 = vpack.c.bf16 %v1760_v17, %v1760_v17  ;;  %v2992_v24 = vpack.c.bf16 %v1824_v18, %v1824_v18  ;;  %v1761_v25 = vmax.f32 %v1421_v19, 0.0  ;;  %v1825_v26 = vmax.f32 %v1677_v20, 0.0 }
 0x1e8   : > { %2401 = vst.msk [vmem:[%s3492_s17 + $0xe0] sm:$0xf] %vm2344_vm3, %v2928_v23  ;;  %2465 = vst.msk [vmem:[%s3492_s17 + $0x1e0] sm:$0xf] %vm2344_vm3, %v2992_v24  ;;  %v2929_v27 = vpack.c.bf16 %v1761_v25, %v1761_v25  ;;  %v2993_v28 = vpack.c.bf16 %v1825_v26, %v1825_v26 }
 0x1e9   : > { %v1425_v29 = vpop.f32.mrb[116].mxu0  ;;  %v1681_v30 = vpop.f32.mrb[116].mxu1 }
 0x1ea   : > { %2402 = vst.msk [vmem:[%s3492_s17 + $0xe4] sm:$0xf] %vm2344_vm3, %v2929_v27  ;;  %2466 = vst.msk [vmem:[%s3492_s17 + $0x1e4] sm:$0xf] %vm2344_vm3, %v2993_v28  ;;  %v1426_v31 = vadd.f32 %v3755_v61, %v1425_v29  ;;  %v1682_v32 = vadd.f32 %v3755_v61, %v1681_v30  ;;  %v1427_v33 = vpop.f32.mrb[117].mxu0  ;;  %v1683_v34 = vpop.f32.mrb[117].mxu1 }
 0x1eb   : > { %v1428_v35 = vpop.f32.mrb[118].mxu0  ;;  %v1684_v36 = vpop.f32.mrb[118].mxu1 }
 0x1ec   : > { %v1762_v37 = vmax.f32 %v1426_v31, 0.0  ;;  %v1826_v38 = vmax.f32 %v1682_v32, 0.0  ;;  %v1429_v39 = vadd.f32 %v3755_v61, %v1428_v35  ;;  %v1685_v40 = vadd.f32 %v3755_v61, %v1684_v36  ;;  %v1430_v41 = vpop.f32.mrb[119].mxu0  ;;  %v1686_v42 = vpop.f32.mrb[119].mxu1 }
 0x1ee   : > { %v2930_v43 = vpack.c.bf16 %v1762_v37, %v1762_v37  ;;  %v2994_v44 = vpack.c.bf16 %v1826_v38, %v1826_v38  ;;  %v1763_v45 = vmax.f32 %v1429_v39, 0.0  ;;  %v1827_v46 = vmax.f32 %v1685_v40, 0.0 }
 0x1f0   : > { %2403 = vst.msk [vmem:[%s3492_s17 + $0xe8] sm:$0xf] %vm2344_vm3, %v2930_v43  ;;  %2467 = vst.msk [vmem:[%s3492_s17 + $0x1e8] sm:$0xf] %vm2344_vm3, %v2994_v44  ;;  %v2931_v47 = vpack.c.bf16 %v1763_v45, %v1763_v45  ;;  %v2995_v48 = vpack.c.bf16 %v1827_v46, %v1827_v46 }
 0x1f1   : > { %v1433_v49 = vpop.f32.mrb[120].mxu0  ;;  %v1689_v50 = vpop.f32.mrb[120].mxu1 }
 0x1f2   : > { %2404 = vst.msk [vmem:[%s3492_s17 + $0xec] sm:$0xf] %vm2344_vm3, %v2931_v47  ;;  %2468 = vst.msk [vmem:[%s3492_s17 + $0x1ec] sm:$0xf] %vm2344_vm3, %v2995_v48  ;;  %v1434_v51 = vadd.f32 %v3755_v61, %v1433_v49  ;;  %v1690_v52 = vadd.f32 %v3755_v61, %v1689_v50  ;;  %v1435_v53 = vpop.f32.mrb[121].mxu0  ;;  %v1691_v54 = vpop.f32.mrb[121].mxu1 }
 0x1f3   : > { %v1436_v55 = vpop.f32.mrb[122].mxu0  ;;  %v1692_v56 = vpop.f32.mrb[122].mxu1 }
 0x1f4   : > { %v1764_v57 = vmax.f32 %v1434_v51, 0.0  ;;  %v1828_v58 = vmax.f32 %v1690_v52, 0.0  ;;  %v1437_v59 = vadd.f32 %v3755_v61, %v1436_v55  ;;  %v1693_v60 = vadd.f32 %v3755_v61, %v1692_v56  ;;  %v1438_v62 = vpop.f32.mrb[123].mxu0  ;;  %v1694_v63 = vpop.f32.mrb[123].mxu1 }
 0x1f6   : > { %v2932_v0 = vpack.c.bf16 %v1764_v57, %v1764_v57  ;;  %v2996_v1 = vpack.c.bf16 %v1828_v58, %v1828_v58  ;;  %v1765_v2 = vmax.f32 %v1437_v59, 0.0  ;;  %v1829_v3 = vmax.f32 %v1693_v60, 0.0 }
 0x1f8   : > { %2405 = vst.msk [vmem:[%s3492_s17 + $0xf0] sm:$0xf] %vm2344_vm3, %v2932_v0  ;;  %2469 = vst.msk [vmem:[%s3492_s17 + $0x1f0] sm:$0xf] %vm2344_vm3, %v2996_v1  ;;  %v2933_v4 = vpack.c.bf16 %v1765_v2, %v1765_v2  ;;  %v2997_v5 = vpack.c.bf16 %v1829_v3, %v1829_v3 }
 0x1f9   : > { %v1441_v6 = vpop.f32.mrb[124].mxu0  ;;  %v1697_v7 = vpop.f32.mrb[124].mxu1 }
 0x1fa   : > { %2406 = vst.msk [vmem:[%s3492_s17 + $0xf4] sm:$0xf] %vm2344_vm3, %v2933_v4  ;;  %2470 = vst.msk [vmem:[%s3492_s17 + $0x1f4] sm:$0xf] %vm2344_vm3, %v2997_v5  ;;  %v1442_v8 = vadd.f32 %v3755_v61, %v1441_v6  ;;  %v1698_v9 = vadd.f32 %v3755_v61, %v1697_v7  ;;  %v1443_v10 = vpop.f32.mrb[125].mxu0  ;;  %v1699_v11 = vpop.f32.mrb[125].mxu1 }
 0x1fb   : > { %v1444_v12 = vpop.f32.mrb[126].mxu0  ;;  %v1700_v13 = vpop.f32.mrb[126].mxu1 }
 0x1fc   : > { %v1766_v14 = vmax.f32 %v1442_v8, 0.0  ;;  %v1830_v15 = vmax.f32 %v1698_v9, 0.0  ;;  %v1445_v16 = vadd.f32 %v3755_v61, %v1444_v12  ;;  %v1701_v17 = vadd.f32 %v3755_v61, %v1700_v13  ;;  %v1446_v18 = vpop.f32.mrb[127].mxu0  ;;  %v1702_v19 = vpop.f32.mrb[127].mxu1 }
 0x1fe   : > { %v2934_v20 = vpack.c.bf16 %v1766_v14, %v1766_v14  ;;  %v2998_v21 = vpack.c.bf16 %v1830_v15, %v1830_v15  ;;  %v1767_v22 = vmax.f32 %v1445_v16, 0.0  ;;  %v1831_v23 = vmax.f32 %v1701_v17, 0.0 }
 0x200   : > { %2407 = vst.msk [vmem:[%s3492_s17 + $0xf8] sm:$0xf] %vm2344_vm3, %v2934_v20  ;;  %2471 = vst.msk [vmem:[%s3492_s17 + $0x1f8] sm:$0xf] %vm2344_vm3, %v2998_v21  ;;  %v2935_v24 = vpack.c.bf16 %v1767_v22, %v1767_v22  ;;  %v2999_v25 = vpack.c.bf16 %v1831_v23, %v1831_v23 }
 0x202   : > { %2408 = vst.msk [vmem:[%s3492_s17 + $0xfc] sm:$0xf] %vm2344_vm3, %v2935_v24  ;;  %2472 = vst.msk [vmem:[%s3492_s17 + $0x1fc] sm:$0xf] %vm2344_vm3, %v2999_v25 }
 0x203 PF: > { %s13_s12 = sadd.s32 1, %s3239_s12  }
 0x204   : > { %p10_p4 = scmp.ge.s32.totalorder %s13_s12, 4  }
 0x206   :  { %12 = sbr.rel (!%p10_p4) target bundleno = 1 (0x1), region = 62 }

// kernel: _lambda_.7
= control target key start
LH: loop header
LB: loop body
LE: loop exit
PB: predicated region body
PF: predicated region fallthrough
CT: control target
= control target key end

     0   :  { %s2187_s6 = smov 0   ;;  %s3220_s0 = inlined_call_operand.vmem [shape: bf16[2,4,17,17,8], index: 0, kind: input, shape index: {}]   ;;  %s3221_s1 = inlined_call_operand.vmem [shape: bf16[2,16,16,8], index: 1, kind: output, shape index: {}]  }
   0x1 LB: > { %s1957_s7 = sadd.s32 4294967295, %s2175_s6   ;;  %p1961_p0 = scmp.ge.s32.totalorder %s2175_s6, 1  ;;  %s2175_s6 = sphi %s2187_s6, %s11_s6  }
   0x2   : > { %p87_p1 = scmp.lt.s32.totalorder %s2175_s6, 3 }
   0x4   : > { %p88_p2 = pnand %p1961_p0, %p87_p1 }
   0x5   : > { %p107_p3 = scmp.lt.s32.totalorder (!%p88_p2), %s1957_s7, 1  ;;  %vm230_vm0 = vsmask.f32 (!%p88_p2), 3328  ;;  %vm231_vm1 = vsmask.f32 (!%p88_p2), 7440  ;;  %vm1869_vm3 = vcmask (!%p88_p2), 60416  }
   0x6   : > { %91 = sbr.rel (%p88_p2) target bundleno = 286 (0x11e), region = 24  ;;  %vm2225_vm2 = vmor (!%p88_p2), %vm230_vm0, %vm231_vm1 }
   0xd   : > { %s3225_s7 = smov (!%p107_p3, %s1957_s7), 1 }
   0xe   : > { %s2160_s8 = smul.u32 816, %s3225_s7  ;;  %s2159_s12 = sshll.u32 %s3225_s7, 7 }
   0xf   : > { %s2296_s15 = scalar_lea.vmem %s3221_s1, %s2159_s12 }
  0x10   : > { %s2201_s11 = scalar_lea.vmem %s3220_s0, %s2160_s8 }
  0x11   : > { %v117_v0 = vld [vmem:[%s2201_s11] sm:$0xf]  ;;  %v2205_v1 = vld [vmem:[%s2201_s11 + $0x4] sm:$0xf]  ;;  %v1965_v2 = vld [vmem:[%s2201_s11 + $0xcc] sm:$0xf] }
  0x12   : > { %v234_v3 = vshrl.u32 %v117_v0, 16  ;;  %v237_v4 = vshll.u32 %v117_v0, 16  ;;  %v243_v5 = vshll.u32 %v2205_v1, 16  ;;  %v1997_v6 = vld [vmem:[%s2201_s11 + $0x198] sm:$0xf]  ;;  %v182_v14 = vmax.bf16 %v1965_v2, %v117_v0 }
  0x13   : > { %v2211_v7 = vld [vmem:[%s2201_s11 + $0x19c] sm:$0xf]  ;;  %v828_v8 = vshrl.u32 %v1997_v6, 16  ;;  %v831_v9 = vshll.u32 %v1997_v6, 16  ;;  %v2215_v13 = vld [vmem:[%s2201_s11 + $0xc] sm:$0xf] }
  0x14   : > { %v236_v10 = vrot.slane %v234_v3, 4  ;;  %v239_v11 = vrot.slane %v237_v4, 5  ;;  %v837_v12 = vshll.u32 %v2211_v7, 16  ;;  %v2218_v17 = vld [vmem:[%s2201_s11 + $0x10] sm:$0xf]  ;;  %v245_v19 = vrot.slane %v243_v5, 5 }
  0x15   : > { %v830_v15 = vrot.slane %v828_v8, 4  ;;  %v833_v16 = vrot.slane %v831_v9, 5  ;;  %v1422_v20 = vshrl.u32 %v2215_v13, 16  ;;  %v1425_v21 = vshll.u32 %v2215_v13, 16  ;;  %v1966_v22 = vld [vmem:[%s2201_s11 + $0xd0] sm:$0xf] }
  0x16   : > { %v240_v18 = vor.u32 %v239_v11, %v236_v10  ;;  %v839_v25 = vrot.slane %v837_v12, 5  ;;  %v1431_v26 = vshll.u32 %v2218_v17, 16  ;;  %v214_v27 = vld [vmem:[%s2201_s11 + $0x8] sm:$0x1]  ;;  %v247_v28 = vshrl.u32 %v2205_v1, 16 }
  0x17   : > { %v834_v24 = vor.u32 %v833_v16, %v830_v15  ;;  %v1424_v30 = vrot.slane %v1422_v20, 4  ;;  %v1427_v31 = vrot.slane %v1425_v21, 5  ;;  %v253_v32 = vshll.u32 %v214_v27, 16  ;;  %v2061_v33 = vld [vmem:[%s2201_s11 + $0x1a0] sm:$0x1] }
  0x18   : > { %v241_v29 = vrot.slane %v240_v18, 4  ;;  %v183_v35 = vmax.bf16 %v1966_v22, %v2205_v1  ;;  %v249_v36 = vrot.slane %v247_v28, 4  ;;  %v841_v37 = vshrl.u32 %v2211_v7, 16  ;;  %v2141_v42 = vld [vmem:[%s2201_s11 + $0x14] sm:$0x1] }
  0x19   : > { %v835_v34 = vrot.slane %v834_v24, 4  ;;  %v1428_v39 = vor.u32 %v1427_v31, %v1424_v30  ;;  %v2237_v40 = vrot.slane %v1431_v26, 5  ;;  %v847_v41 = vshll.u32 %v2061_v33, 16  ;;  %v2241_v47 = vld [vmem:[%s2201_s11 + $0xc] sm:$0xf] }
  0x1a   : > { %v246_v38 = vsel %vm2225_vm2, %v241_v29, %v245_v19  ;;  %v250_v44 = vor.u32 %v249_v36, %v245_v19  ;;  %v255_v45 = vrot.slane %v253_v32, 5  ;;  %v843_v46 = vrot.slane %v841_v37, 4  ;;  %v2244_v48 = vld [vmem:[%s2201_s11 + $0xd8] sm:$0xf]  ;;  %v2029_v49 = vld [vmem:[%s2201_s11 + $0x264] sm:$0xf] }
  0x1b   : > { %v649_v43 = vmax.bf16 %v246_v38, %v182_v14  ;;  %v840_v50 = vsel %vm2225_vm2, %v835_v34, %v839_v25  ;;  %v1429_v51 = vrot.slane %v1428_v39, 4  ;;  %v849_v52 = vrot.slane %v847_v41, 5  ;;  %v2251_v58 = vld [vmem:[%s2201_s11 + $0x10] sm:$0xf]  ;;  %v2260_v63 = vld [vmem:[%s2201_s11 + $0x1a4] sm:$0xf] }
  0x1c   : > { %v1435_v53 = vshrl.u32 %v2218_v17, 16  ;;  %v251_v55 = vrot.slane %v250_v44, 4  ;;  %v844_v56 = vor.u32 %v843_v46, %v839_v25  ;;  %v1441_v57 = vshll.u32 %v2141_v42, 16  ;;  %v2030_v5 = vld [vmem:[%s2201_s11 + $0x268] sm:$0xf] }
  0x1d   : > { %v714_v54 = vmax.bf16 %v1997_v6, %v649_v43  ;;  %v1434_v59 = vsel %vm2225_vm2, %v1429_v51, %v2237_v40  ;;  %v184_v61 = vmax.bf16 %v2244_v48, %v2241_v47  ;;  %v258_v62 = vshrl.u32 %v2241_v47, 16  ;;  %v2269_v10 = vld [vmem:[%s2201_s11 + $0x1a8] sm:$0xf]  ;;  %v2273_v16 = vld [vmem:[%s2201_s11 + $0x18] sm:$0xf] }
  0x1e   : > { %v1437_v60 = vrot.slane %v1435_v53, 4  ;;  %v256_v1 = vsel %vm2225_vm2, %v251_v55, %v255_v45  ;;  %v845_v2 = vrot.slane %v844_v56, 4  ;;  %v261_v3 = vshll.u32 %v2241_v47, 16  ;;  %v2109_v18 = vld [vmem:[%s2201_s11 + $0xd8] sm:$0xf] }
  0x1f   : > { %v779_v0 = vmax.bf16 %v2029_v49, %v714_v54  ;;  %v650_v4 = vmax.bf16 %v256_v1, %v183_v35  ;;  %v260_v8 = vrot.slane %v258_v62, 4  ;;  %v267_v9 = vshll.u32 %v2251_v58, 16  ;;  %v2284_v28 = vld [vmem:[%s2201_s11 + $0x1c] sm:$0xf]  ;;  %v2062_v46 = vld [vmem:[%s2201_s11 + $0x1ac] sm:$0x1] }
  0x20   : > { %v1438_v6 = vor.u32 %v1437_v60, %v2237_v40  ;;  %v1443_v12 = vrot.slane %v1441_v57, 5  ;;  %v263_v14 = vrot.slane %v261_v3, 5  ;;  %v852_v15 = vshrl.u32 %v2260_v63, 16  ;;  %v2291_v35 = vld [vmem:[%s2201_s11 + $0xdc] sm:$0xf] }
  0x21   : > { %v1243_v11 = vmax.bf16 %v840_v50, %v779_v0  ;;  %v715_v19 = vmax.bf16 %v2211_v7, %v650_v4  ;;  %v850_v20 = vsel %vm2225_vm2, %v845_v2, %v849_v52  ;;  %v855_v22 = vshll.u32 %v2260_v63, 16  ;;  %v215_v40 = vld [vmem:[%s2201_s11 + $0x14] sm:$0x1]  ;;  %v2110_v42 = vld [vmem:[%s2201_s11 + $0xdc] sm:$0xf] }
  0x22   : > { %v1439_v21 = vrot.slane %v1438_v6, 4  ;;  %v264_v25 = vor.u32 %v263_v14, %v260_v8  ;;  %v854_v26 = vrot.slane %v852_v15, 4  ;;  %v861_v27 = vshll.u32 %v2269_v10, 16  ;;  %v2031_v51 = vld [vmem:[%s2201_s11 + $0x270] sm:$0xf] }
  0x23   : > { %v1308_v24 = vmax.bf16 %v2215_v13, %v1243_v11  ;;  %v780_v29 = vmax.bf16 %v2030_v5, %v715_v19  ;;  %v269_v7 = vrot.slane %v267_v9, 5  ;;  %v857_v30 = vrot.slane %v855_v22, 5  ;;  %v2142_v60 = vld [vmem:[%s2201_s11 + $0x20] sm:$0x1]  ;;  %v2317_v2 = vld [vmem:[%s2201_s11 + $0x18] sm:$0xf] }
  0x24   : > { %v1446_v31 = vshrl.u32 %v2273_v16, 16  ;;  %v1444_v33 = vsel %vm2225_vm2, %v1439_v21, %v1443_v12  ;;  %v265_v34 = vrot.slane %v264_v25, 4  ;;  %v1449_v13 = vshll.u32 %v2273_v16, 16  ;;  %v1969_v5 = vld [vmem:[%s2201_s11 + $0xe4] sm:$0xf] }
  0x25   : > { %v1373_v32 = vmax.bf16 %v2109_v18, %v1308_v24  ;;  %v1244_v36 = vmax.bf16 %v850_v20, %v780_v29  ;;  %v858_v37 = vor.u32 %v857_v30, %v854_v26  ;;  %v1455_v39 = vshll.u32 %v2284_v28, 16  ;;  %v2322_v12 = vld [vmem:[%s2201_s11 + $0x1c] sm:$0xf]  ;;  %v2330_v20 = vld [vmem:[%s2201_s11 + $0x1b0] sm:$0xf] }
  0x26   : > { %v1448_v38 = vrot.slane %v1446_v31, 4  ;;  %v270_v43 = vsel %vm2225_vm2, %v265_v34, %v269_v7  ;;  %v863_v44 = vrot.slane %v861_v27, 5  ;;  %v1451_v45 = vrot.slane %v1449_v13, 5  ;;  %v2111_v21 = vld [vmem:[%s2201_s11 + $0xe4] sm:$0xf] }
  0x27   : > { %v1837_v41 = vmax.bf16 %v1434_v59, %v1373_v32  ;;  %v1309_v47 = vmax.bf16 %v2218_v17, %v1244_v36  ;;  %v651_v48 = vmax.bf16 %v270_v43, %v184_v61  ;;  %v859_v49 = vrot.slane %v858_v37, 4  ;;  %v2338_v31 = vld [vmem:[%s2201_s11 + $0x1b4] sm:$0xf] }
  0x28   : > { %v185_v50 = vmax.bf16 %v2291_v35, %v2251_v58  ;;  %v1452_v52 = vor.u32 %v1451_v45, %v1448_v38  ;;  %v271_v53 = vshrl.u32 %v2251_v58, 16  ;;  %v277_v54 = vshll.u32 %v215_v40, 16  ;;  %v2346_v35 = vld [vmem:[%s2201_s11 + $0x24] sm:$0xf]  ;;  %v2032_v37 = vld [vmem:[%s2201_s11 + $0x274] sm:$0xf] }
  0x29   : > { %1870 = vst.msk [vmem:[%s2296_s15] sm:$0xf] %vm1869_vm3, %v1837_v41  ;;  %v865_v55 = vshrl.u32 %v2269_v10, 16  ;;  %v1374_v56 = vmax.bf16 %v2110_v42, %v1309_v47  ;;  %v716_v57 = vmax.bf16 %v2260_v63, %v651_v48  ;;  %v1457_v17 = vrot.slane %v1455_v39, 5 }
  0x2a   : > { %v871_v59 = vshll.u32 %v2062_v46, 16  ;;  %v864_v61 = vsel %vm2225_vm2, %v859_v49, %v863_v44  ;;  %v1453_v62 = vrot.slane %v1452_v52, 4  ;;  %v273_v0 = vrot.slane %v271_v53, 4  ;;  %v1970_v49 = vld [vmem:[%s2201_s11 + $0xe8] sm:$0xf] }
  0x2b   : > { %v867_v1 = vrot.slane %v865_v55, 4  ;;  %v1838_v58 = vmax.bf16 %v1444_v33, %v1374_v56  ;;  %v781_v3 = vmax.bf16 %v2031_v51, %v716_v57  ;;  %v279_v4 = vrot.slane %v277_v54, 5  ;;  %v216_v54 = vld [vmem:[%s2201_s11 + $0x20] sm:$0x1] }
  0x2c   : > { %v1459_v63 = vshrl.u32 %v2284_v28, 16  ;;  %v274_v6 = vor.u32 %v273_v0, %v269_v7  ;;  %v873_v9 = vrot.slane %v871_v59, 5  ;;  %v1465_v11 = vshll.u32 %v2142_v60, 16 }
  0x2d   : > { %v868_v8 = vor.u32 %v867_v1, %v863_v44  ;;  %1871 = vst.msk [vmem:[%s2296_s15 + $0x4] sm:$0xf] %vm1869_vm3, %v1838_v58  ;;  %v1245_v14 = vmax.bf16 %v864_v61, %v781_v3  ;;  %v1458_v15 = vsel %vm2225_vm2, %v1453_v62, %v1457_v17  ;;  %v282_v19 = vshrl.u32 %v2317_v2, 16  ;;  %v2354_v44 = vld [vmem:[%s2201_s11 + $0x28] sm:$0xf] }
  0x2e   : > { %v1461_v18 = vrot.slane %v1459_v63, 4  ;;  %v275_v22 = vrot.slane %v274_v6, 4  ;;  %v186_v25 = vmax.bf16 %v1969_v5, %v2317_v2  ;;  %v285_v26 = vshll.u32 %v2317_v2, 16  ;;  %v2063_v62 = vld [vmem:[%s2201_s11 + $0x1b8] sm:$0x1] }
  0x2f   : > { %v869_v24 = vrot.slane %v868_v8, 4  ;;  %v1310_v27 = vmax.bf16 %v2273_v16, %v1245_v14  ;;  %v284_v7 = vrot.slane %v282_v19, 4  ;;  %v291_v30 = vshll.u32 %v2322_v12, 16  ;;  %v2112_v1 = vld [vmem:[%s2201_s11 + $0xe8] sm:$0xf] }
  0x30   : > { %v1462_v29 = vor.u32 %v1461_v18, %v1457_v17  ;;  %v280_v32 = vsel %vm2225_vm2, %v275_v22, %v279_v4  ;;  %v2342_v33 = vrot.slane %v1465_v11, 5  ;;  %v287_v34 = vrot.slane %v285_v26, 5  ;;  %v2033_v4 = vld [vmem:[%s2201_s11 + $0x27c] sm:$0xf]  ;;  %v2143_v18 = vld [vmem:[%s2201_s11 + $0x2c] sm:$0x1] }
  0x31   : > { %v876_v13 = vshrl.u32 %v2330_v20, 16  ;;  %v1375_v36 = vmax.bf16 %v2111_v21, %v1310_v27  ;;  %v652_v16 = vmax.bf16 %v280_v32, %v185_v50  ;;  %v874_v38 = vsel %vm2225_vm2, %v869_v24, %v873_v9 }
  0x32   : > { %v1463_v39 = vrot.slane %v1462_v29, 4  ;;  %v288_v40 = vor.u32 %v287_v34, %v284_v7  ;;  %v879_v42 = vshll.u32 %v2330_v20, 16  ;;  %v885_v43 = vshll.u32 %v2338_v31, 16 }
  0x33   : > { %v878_v41 = vrot.slane %v876_v13, 4  ;;  %v1839_v45 = vmax.bf16 %v1458_v15, %v1375_v36  ;;  %v717_v46 = vmax.bf16 %v2269_v10, %v652_v16  ;;  %v293_v47 = vrot.slane %v291_v30, 5  ;;  %v2390_v16 = vld [vmem:[%s2201_s11 + $0x28] sm:$0xf] }
  0x34   : > { %v1470_v48 = vshrl.u32 %v2346_v35, 16  ;;  %v1468_v50 = vsel %vm2225_vm2, %v1463_v39, %v2342_v33  ;;  %v289_v51 = vrot.slane %v288_v40, 4  ;;  %v881_v52 = vrot.slane %v879_v42, 5 }
  0x35   : > { %v1473_v53 = vshll.u32 %v2346_v35, 16  ;;  %1872 = vst.msk [vmem:[%s2296_s15 + $0x8] sm:$0xf] %vm1869_vm3, %v1839_v45  ;;  %v782_v55 = vmax.bf16 %v2032_v37, %v717_v46  ;;  %v887_v10 = vrot.slane %v885_v43, 5  ;;  %v1479_v57 = vshll.u32 %v2354_v44, 16 }
  0x36   : > { %v1472_v56 = vrot.slane %v1470_v48, 4  ;;  %v294_v17 = vsel %vm2225_vm2, %v289_v51, %v293_v47  ;;  %v882_v59 = vor.u32 %v881_v52, %v878_v41  ;;  %v295_v61 = vshrl.u32 %v2322_v12, 16  ;;  %v2393_v37 = vld [vmem:[%s2201_s11 + $0x1bc] sm:$0xf]  ;;  %v2406_v48 = vld [vmem:[%s2201_s11 + $0x1c0] sm:$0xf] }
  0x37   : > { %v1475_v60 = vrot.slane %v1473_v53, 5  ;;  %v1246_v0 = vmax.bf16 %v874_v38, %v782_v55  ;;  %v653_v2 = vmax.bf16 %v294_v17, %v186_v25  ;;  %v187_v58 = vmax.bf16 %v1970_v49, %v2322_v12  ;;  %v2113_v38 = vld [vmem:[%s2201_s11 + $0xf0] sm:$0xf]  ;;  %v2034_v49 = vld [vmem:[%s2201_s11 + $0x280] sm:$0xf] }
  0x38   : > { %v301_v3 = vshll.u32 %v216_v54, 16  ;;  %v883_v63 = vrot.slane %v882_v59, 4  ;;  %v297_v6 = vrot.slane %v295_v61, 4  ;;  %v889_v8 = vshrl.u32 %v2338_v31, 16  ;;  %v2420_v61 = vld [vmem:[%s2201_s11 + $0x34] sm:$0xf] }
  0x39   : > { %v1476_v5 = vor.u32 %v1475_v60, %v1472_v56  ;;  %v1311_v9 = vmax.bf16 %v2284_v28, %v1246_v0  ;;  %v718_v11 = vmax.bf16 %v2330_v20, %v653_v2  ;;  %v895_v15 = vshll.u32 %v2063_v62, 16  ;;  %v2382_v28 = vld [vmem:[%s2201_s11 + $0x24] sm:$0xf]  ;;  %v2385_v20 = vld [vmem:[%s2201_s11 + $0xf0] sm:$0xf] }
  0x3a   : > { %v303_v14 = vrot.slane %v301_v3, 5  ;;  %v888_v19 = vsel %vm2225_vm2, %v883_v63, %v887_v10  ;;  %v298_v21 = vor.u32 %v297_v6, %v293_v47  ;;  %v891_v22 = vrot.slane %v889_v8, 4  ;;  %v2413_v56 = vld [vmem:[%s2201_s11 + $0x30] sm:$0xf]  ;;  %v1972_v2 = vld [vmem:[%s2201_s11 + $0xf4] sm:$0xf] }
  0x3b   : > { %v1477_v12 = vrot.slane %v1476_v5, 4  ;;  %v1376_v24 = vmax.bf16 %v2112_v1, %v1311_v9  ;;  %v783_v25 = vmax.bf16 %v2033_v4, %v718_v11  ;;  %v1481_v26 = vrot.slane %v1479_v57, 5  ;;  %v217_v5 = vld [vmem:[%s2201_s11 + $0x2c] sm:$0x1]  ;;  %v2114_v8 = vld [vmem:[%s2201_s11 + $0xf4] sm:$0xf] }
  0x3c   : > { %v1483_v27 = vshrl.u32 %v2354_v44, 16  ;;  %v299_v29 = vrot.slane %v298_v21, 4  ;;  %v892_v7 = vor.u32 %v891_v22, %v887_v10  ;;  %v897_v30 = vrot.slane %v895_v15, 5  ;;  %v2064_v21 = vld [vmem:[%s2201_s11 + $0x1c4] sm:$0x1] }
  0x3d   : > { %v1489_v32 = vshll.u32 %v2143_v18, 16  ;;  %v1840_v33 = vmax.bf16 %v1468_v50, %v1376_v24  ;;  %v1247_v34 = vmax.bf16 %v888_v19, %v783_v25  ;;  %v1482_v13 = vsel %vm2225_vm2, %v1477_v12, %v1481_v26 }
  0x3e   : > { %v1485_v36 = vrot.slane %v1483_v27, 4  ;;  %v304_v39 = vsel %vm2225_vm2, %v299_v29, %v303_v14  ;;  %v893_v40 = vrot.slane %v892_v7, 4  ;;  %v188_v41 = vmax.bf16 %v2385_v20, %v2382_v28 }
  0x3f   : > { %v306_v42 = vshrl.u32 %v2382_v28, 16  ;;  %1873 = vst.msk [vmem:[%s2296_s15 + $0xc] sm:$0xf] %vm1869_vm3, %v1840_v33  ;;  %v1312_v43 = vmax.bf16 %v2346_v35, %v1247_v34  ;;  %v654_v45 = vmax.bf16 %v304_v39, %v187_v58  ;;  %v309_v47 = vshll.u32 %v2382_v28, 16  ;;  %v2443_v39 = vld [vmem:[%s2201_s11 + $0x30] sm:$0xf] }
  0x40   : > { %v1486_v46 = vor.u32 %v1485_v36, %v1481_v26  ;;  %v1491_v50 = vrot.slane %v1489_v32, 5  ;;  %v315_v52 = vshll.u32 %v2390_v16, 16  ;;  %v900_v53 = vshrl.u32 %v2393_v37, 16 }
  0x41   : > { %v308_v51 = vrot.slane %v306_v42, 4  ;;  %v1377_v54 = vmax.bf16 %v2113_v38, %v1312_v43  ;;  %v719_v55 = vmax.bf16 %v2338_v31, %v654_v45  ;;  %v311_v35 = vrot.slane %v309_v47, 5  ;;  %v2144_v38 = vld [vmem:[%s2201_s11 + $0x38] sm:$0x1]  ;;  %v1973_v45 = vld [vmem:[%s2201_s11 + $0xfc] sm:$0xf] }
  0x42   : > { %v1487_v10 = vrot.slane %v1486_v46, 4  ;;  %v898_v57 = vsel %vm2225_vm2, %v893_v40, %v897_v30  ;;  %v902_v17 = vrot.slane %v900_v53, 4  ;;  %v903_v59 = vshll.u32 %v2393_v37, 16  ;;  %v2035_v30 = vld [vmem:[%s2201_s11 + $0x288] sm:$0xf] }
  0x43   : > { %v909_v60 = vshll.u32 %v2406_v48, 16  ;;  %v1841_v62 = vmax.bf16 %v1482_v13, %v1377_v54  ;;  %v784_v0 = vmax.bf16 %v2034_v49, %v719_v55  ;;  %v312_v31 = vor.u32 %v311_v35, %v308_v51  ;;  %v2458_v55 = vld [vmem:[%s2201_s11 + $0x1c8] sm:$0xf] }
  0x44   : > { %v317_v1 = vrot.slane %v315_v52, 5  ;;  %v1492_v58 = vsel %vm2225_vm2, %v1487_v10, %v1491_v50  ;;  %v905_v3 = vrot.slane %v903_v59, 5  ;;  %v1494_v4 = vshrl.u32 %v2413_v56, 16  ;;  %v2452_v50 = vld [vmem:[%s2201_s11 + $0x34] sm:$0xf] }
  0x45   : > { %v1497_v63 = vshll.u32 %v2413_v56, 16  ;;  %1874 = vst.msk [vmem:[%s2296_s15 + $0x10] sm:$0xf] %vm1869_vm3, %v1841_v62  ;;  %v1248_v6 = vmax.bf16 %v898_v57, %v784_v0  ;;  %v313_v9 = vrot.slane %v312_v31, 4  ;;  %v911_v11 = vrot.slane %v909_v60, 5 }
  0x46   : > { %v1503_v14 = vshll.u32 %v2420_v61, 16  ;;  %v906_v15 = vor.u32 %v905_v3, %v902_v17  ;;  %v1496_v18 = vrot.slane %v1494_v4, 4  ;;  %v319_v12 = vshrl.u32 %v2390_v16, 16  ;;  %v2115_v59 = vld [vmem:[%s2201_s11 + $0xfc] sm:$0xf] }
  0x47   : > { %v1499_v19 = vrot.slane %v1497_v63, 5  ;;  %v1313_v22 = vmax.bf16 %v2354_v44, %v1248_v6  ;;  %v318_v24 = vsel %vm2225_vm2, %v313_v9, %v317_v1  ;;  %v189_v25 = vmax.bf16 %v1972_v2, %v2390_v16  ;;  %v2036_v62 = vld [vmem:[%s2201_s11 + $0x28c] sm:$0xf] }
  0x48   : > { %v325_v26 = vshll.u32 %v217_v5, 16  ;;  %v655_v27 = vmax.bf16 %v318_v24, %v188_v41  ;;  %v907_v28 = vrot.slane %v906_v15, 4  ;;  %v321_v29 = vrot.slane %v319_v12, 4  ;;  %v2469_v4 = vld [vmem:[%s2201_s11 + $0x1cc] sm:$0xf] }
  0x49   : > { %v1500_v20 = vor.u32 %v1499_v19, %v1496_v18  ;;  %v1378_v7 = vmax.bf16 %v2114_v8, %v1313_v22  ;;  %v1505_v32 = vrot.slane %v1503_v14, 5  ;;  %v913_v33 = vshrl.u32 %v2406_v48, 16  ;;  %v2480_v19 = vld [vmem:[%s2201_s11 + $0x40] sm:$0xf] }
  0x4a   : > { %v919_v34 = vshll.u32 %v2064_v21, 16  ;;  %v720_v44 = vmax.bf16 %v2393_v37, %v655_v27  ;;  %v322_v36 = vor.u32 %v321_v29, %v317_v1  ;;  %v327_v16 = vrot.slane %v325_v26, 5  ;;  %v2116_v29 = vld [vmem:[%s2201_s11 + $0x100] sm:$0xf] }
  0x4b   : > { %v1501_v13 = vrot.slane %v1500_v20, 4  ;;  %v1842_v40 = vmax.bf16 %v1492_v58, %v1378_v7  ;;  %v912_v41 = vsel %vm2225_vm2, %v907_v28, %v911_v11  ;;  %v915_v42 = vrot.slane %v913_v33, 4  ;;  %v2486_v28 = vld [vmem:[%s2201_s11 + $0x100] sm:$0xf]  ;;  %v218_v33 = vld [vmem:[%s2201_s11 + $0x38] sm:$0x1] }
  0x4c   : > { %v1507_v43 = vshrl.u32 %v2420_v61, 16  ;;  %v785_v46 = vmax.bf16 %v2035_v30, %v720_v44  ;;  %v323_v47 = vrot.slane %v322_v36, 4  ;;  %v921_v49 = vrot.slane %v919_v34, 5 }
  0x4d   : > { %v1506_v37 = vsel %vm2225_vm2, %v1501_v13, %v1505_v32  ;;  %1875 = vst.msk [vmem:[%s2296_s15 + $0x14] sm:$0xf] %vm1869_vm3, %v1842_v40  ;;  %v916_v51 = vor.u32 %v915_v42, %v911_v11  ;;  %v1513_v53 = vshll.u32 %v2144_v38, 16  ;;  %v330_v54 = vshrl.u32 %v2443_v39, 16  ;;  %v2475_v11 = vld [vmem:[%s2201_s11 + $0x3c] sm:$0xf] }
  0x4e   : > { %v1509_v52 = vrot.slane %v1507_v43, 4  ;;  %v1249_v10 = vmax.bf16 %v912_v41, %v785_v46  ;;  %v328_v35 = vsel %vm2225_vm2, %v323_v47, %v327_v16  ;;  %v190_v57 = vmax.bf16 %v1973_v45, %v2443_v39  ;;  %v2065_v16 = vld [vmem:[%s2201_s11 + $0x1d0] sm:$0x1]  ;;  %v2037_v42 = vld [vmem:[%s2201_s11 + $0x294] sm:$0xf] }
  0x4f   : > { %v333_v17 = vshll.u32 %v2443_v39, 16  ;;  %v656_v60 = vmax.bf16 %v328_v35, %v189_v25  ;;  %v917_v0 = vrot.slane %v916_v51, 4  ;;  %v332_v1 = vrot.slane %v330_v54, 4 }
  0x50   : > { %v1510_v31 = vor.u32 %v1509_v52, %v1505_v32  ;;  %v1314_v2 = vmax.bf16 %v2413_v56, %v1249_v10  ;;  %v339_v3 = vshll.u32 %v2452_v50, 16  ;;  %v924_v63 = vshrl.u32 %v2458_v55, 16 }
  0x51   : > { %v335_v58 = vrot.slane %v333_v17, 5  ;;  %v721_v5 = vmax.bf16 %v2406_v48, %v656_v60  ;;  %v1515_v8 = vrot.slane %v1513_v53, 5  ;;  %v927_v9 = vshll.u32 %v2458_v55, 16  ;;  %v1975_v60 = vld [vmem:[%s2201_s11 + $0x108] sm:$0xf] }
  0x52   : > { %v1511_v6 = vrot.slane %v1510_v31, 4  ;;  %v1379_v14 = vmax.bf16 %v2115_v59, %v1314_v2  ;;  %v922_v56 = vsel %vm2225_vm2, %v917_v0, %v921_v49  ;;  %v926_v18 = vrot.slane %v924_v63, 4  ;;  %v2514_v2 = vld [vmem:[%s2201_s11 + $0x40] sm:$0xf] }
  0x53   : > { %v336_v15 = vor.u32 %v335_v58, %v332_v1  ;;  %v786_v12 = vmax.bf16 %v2036_v62, %v721_v5  ;;  %v341_v48 = vrot.slane %v339_v3, 5  ;;  %v929_v21 = vrot.slane %v927_v9, 5 }
  0x54   : > { %v933_v22 = vshll.u32 %v2469_v4, 16  ;;  %v1843_v24 = vmax.bf16 %v1506_v37, %v1379_v14  ;;  %v1518_v26 = vshrl.u32 %v2475_v11, 16  ;;  %v1521_v27 = vshll.u32 %v2475_v11, 16 }
  0x55   : > { %v337_v25 = vrot.slane %v336_v15, 4  ;;  %v1250_v20 = vmax.bf16 %v922_v56, %v786_v12  ;;  %v1516_v7 = vsel %vm2225_vm2, %v1511_v6, %v1515_v8  ;;  %v930_v30 = vor.u32 %v929_v21, %v926_v18  ;;  %v2522_v6 = vld [vmem:[%s2201_s11 + $0x1d4] sm:$0xf]  ;;  %v2117_v8 = vld [vmem:[%s2201_s11 + $0x108] sm:$0xf] }
  0x56   : > { %v1527_v32 = vshll.u32 %v2480_v19, 16  ;;  %1876 = vst.msk [vmem:[%s2296_s15 + $0x18] sm:$0xf] %vm1869_vm3, %v1843_v24  ;;  %v935_v44 = vrot.slane %v933_v22, 5  ;;  %v1520_v13 = vrot.slane %v1518_v26, 4  ;;  %v1523_v36 = vrot.slane %v1521_v27, 5 }
  0x57   : > { %v342_v34 = vsel %vm2225_vm2, %v337_v25, %v341_v48  ;;  %v1315_v38 = vmax.bf16 %v2420_v61, %v1250_v20  ;;  %v931_v40 = vrot.slane %v930_v30, 4  ;;  %v191_v41 = vmax.bf16 %v2486_v28, %v2452_v50  ;;  %v2145_v61 = vld [vmem:[%s2201_s11 + $0x44] sm:$0x1]  ;;  %v2530_v22 = vld [vmem:[%s2201_s11 + $0x1d8] sm:$0xf] }
  0x58   : > { %v657_v39 = vmax.bf16 %v342_v34, %v190_v57  ;;  %v1524_v43 = vor.u32 %v1523_v36, %v1520_v13  ;;  %v343_v45 = vshrl.u32 %v2452_v50, 16  ;;  %v349_v46 = vshll.u32 %v218_v33, 16  ;;  %v2509_v57 = vld [vmem:[%s2201_s11 + $0x3c] sm:$0xf]  ;;  %v2538_v28 = vld [vmem:[%s2201_s11 + $0x48] sm:$0xf] }
  0x59   : > { %v937_v37 = vshrl.u32 %v2469_v4, 16  ;;  %v1380_v47 = vmax.bf16 %v2116_v29, %v1315_v38  ;;  %v1529_v51 = vrot.slane %v1527_v32, 5  ;;  %v943_v52 = vshll.u32 %v2065_v16, 16  ;;  %v2038_v29 = vld [vmem:[%s2201_s11 + $0x298] sm:$0xf] }
  0x5a   : > { %v722_v49 = vmax.bf16 %v2458_v55, %v657_v39  ;;  %v936_v53 = vsel %vm2225_vm2, %v931_v40, %v935_v44  ;;  %v1525_v54 = vrot.slane %v1524_v43, 4  ;;  %v345_v10 = vrot.slane %v343_v45, 4  ;;  %v2546_v13 = vld [vmem:[%s2201_s11 + $0x4c] sm:$0xf] }
  0x5b   : > { %v939_v35 = vrot.slane %v937_v37, 4  ;;  %v1844_v50 = vmax.bf16 %v1516_v7, %v1380_v47  ;;  %v351_v59 = vrot.slane %v349_v46, 5  ;;  %v1531_v55 = vshrl.u32 %v2480_v19, 16  ;;  %v1976_v40 = vld [vmem:[%s2201_s11 + $0x10c] sm:$0xf] }
  0x5c   : > { %v787_v17 = vmax.bf16 %v2037_v42, %v722_v49  ;;  %v346_v62 = vor.u32 %v345_v10, %v341_v48  ;;  %v945_v31 = vrot.slane %v943_v52, 5  ;;  %v1537_v1 = vshll.u32 %v2145_v61, 16  ;;  %v219_v46 = vld [vmem:[%s2201_s11 + $0x44] sm:$0x1] }
  0x5d   : > { %v940_v0 = vor.u32 %v939_v35, %v935_v44  ;;  %1877 = vst.msk [vmem:[%s2296_s15 + $0x1c] sm:$0xf] %vm1869_vm3, %v1844_v50  ;;  %v1530_v3 = vsel %vm2225_vm2, %v1525_v54, %v1529_v51  ;;  %v1533_v63 = vrot.slane %v1531_v55, 4  ;;  %v354_v5 = vshrl.u32 %v2509_v57, 16  ;;  %v2066_v54 = vld [vmem:[%s2201_s11 + $0x1dc] sm:$0x1] }
  0x5e   : > { %v1251_v58 = vmax.bf16 %v936_v53, %v787_v17  ;;  %v347_v9 = vrot.slane %v346_v62, 4  ;;  %v192_v56 = vmax.bf16 %v1975_v60, %v2509_v57  ;;  %v357_v15 = vshll.u32 %v2509_v57, 16  ;;  %v2118_v35 = vld [vmem:[%s2201_s11 + $0x10c] sm:$0xf] }
  0x5f   : > { %v941_v14 = vrot.slane %v940_v0, 4  ;;  %v1534_v12 = vor.u32 %v1533_v63, %v1529_v51  ;;  %v356_v48 = vrot.slane %v354_v5, 4  ;;  %v363_v21 = vshll.u32 %v2514_v2, 16  ;;  %v2146_v63 = vld [vmem:[%s2201_s11 + $0x50] sm:$0x1] }
  0x60   : > { %v1316_v18 = vmax.bf16 %v2475_v11, %v1251_v58  ;;  %v352_v24 = vsel %vm2225_vm2, %v347_v9, %v351_v59  ;;  %v2534_v25 = vrot.slane %v1537_v1, 5  ;;  %v359_v26 = vrot.slane %v357_v15, 5  ;;  %v2039_v59 = vld [vmem:[%s2201_s11 + $0x2a0] sm:$0xf] }
  0x61   : > { %v948_v27 = vshrl.u32 %v2522_v6, 16  ;;  %v658_v11 = vmax.bf16 %v352_v24, %v191_v41  ;;  %v946_v7 = vsel %vm2225_vm2, %v941_v14, %v945_v31  ;;  %v1535_v30 = vrot.slane %v1534_v12, 4 }
  0x62   : > { %v1381_v20 = vmax.bf16 %v2117_v8, %v1316_v18  ;;  %v360_v32 = vor.u32 %v359_v26, %v356_v48  ;;  %v951_v34 = vshll.u32 %v2522_v6, 16  ;;  %v957_v44 = vshll.u32 %v2530_v22, 16 }
  0x63   : > { %v950_v33 = vrot.slane %v948_v27, 4  ;;  %v723_v16 = vmax.bf16 %v2469_v4, %v658_v11  ;;  %v365_v38 = vrot.slane %v363_v21, 5  ;;  %v1542_v39 = vshrl.u32 %v2538_v28, 16  ;;  %v2582_v11 = vld [vmem:[%s2201_s11 + $0x4c] sm:$0xf] }
  0x64   : > { %v1845_v36 = vmax.bf16 %v1530_v3, %v1381_v20  ;;  %v1540_v41 = vsel %vm2225_vm2, %v1535_v30, %v2534_v25  ;;  %v361_v42 = vrot.slane %v360_v32, 4  ;;  %v953_v43 = vrot.slane %v951_v34, 5 }
  0x65   : > { %v1545_v45 = vshll.u32 %v2538_v28, 16  ;;  %v788_v37 = vmax.bf16 %v2038_v29, %v723_v16  ;;  %v959_v4 = vrot.slane %v957_v44, 5  ;;  %v1544_v47 = vrot.slane %v1542_v39, 4  ;;  %v2585_v29 = vld [vmem:[%s2201_s11 + $0x1e0] sm:$0xf] }
  0x66   : > { %1878 = vst.msk [vmem:[%s2296_s15 + $0x20] sm:$0xf] %vm1869_vm3, %v1845_v36  ;;  %v1551_v49 = vshll.u32 %v2546_v13, 16  ;;  %v366_v51 = vsel %vm2225_vm2, %v361_v42, %v365_v38  ;;  %v954_v52 = vor.u32 %v953_v43, %v950_v33  ;;  %v367_v53 = vshrl.u32 %v2514_v2, 16  ;;  %v2598_v39 = vld [vmem:[%s2201_s11 + $0x1e4] sm:$0xf] }
  0x67   : > { %v1547_v61 = vrot.slane %v1545_v45, 5  ;;  %v1252_v10 = vmax.bf16 %v946_v7, %v788_v37  ;;  %v659_v57 = vmax.bf16 %v366_v51, %v192_v56  ;;  %v193_v50 = vmax.bf16 %v1976_v40, %v2514_v2  ;;  %v2119_v7 = vld [vmem:[%s2201_s11 + $0x114] sm:$0xf]  ;;  %v2040_v40 = vld [vmem:[%s2201_s11 + $0x2a4] sm:$0xf] }
  0x68   : > { %v373_v17 = vshll.u32 %v219_v46, 16  ;;  %v955_v55 = vrot.slane %v954_v52, 4  ;;  %v369_v62 = vrot.slane %v367_v53, 4  ;;  %v961_v0 = vshrl.u32 %v2530_v22, 16  ;;  %v2612_v53 = vld [vmem:[%s2201_s11 + $0x58] sm:$0xf] }
  0x69   : > { %v1548_v60 = vor.u32 %v1547_v61, %v1544_v47  ;;  %v1317_v31 = vmax.bf16 %v2480_v19, %v1252_v10  ;;  %v724_v1 = vmax.bf16 %v2522_v6, %v659_v57  ;;  %v967_v3 = vshll.u32 %v2066_v54, 16  ;;  %v2574_v19 = vld [vmem:[%s2201_s11 + $0x48] sm:$0xf]  ;;  %v2577_v6 = vld [vmem:[%s2201_s11 + $0x114] sm:$0xf] }
  0x6a   : > { %v375_v58 = vrot.slane %v373_v17, 5  ;;  %v960_v5 = vsel %vm2225_vm2, %v955_v55, %v959_v4  ;;  %v370_v8 = vor.u32 %v369_v62, %v365_v38  ;;  %v963_v9 = vrot.slane %v961_v0, 4  ;;  %v2605_v47 = vld [vmem:[%s2201_s11 + $0x54] sm:$0xf]  ;;  %v1978_v57 = vld [vmem:[%s2201_s11 + $0x118] sm:$0xf] }
  0x6b   : > { %v1549_v2 = vrot.slane %v1548_v60, 4  ;;  %v1382_v14 = vmax.bf16 %v2118_v35, %v1317_v31  ;;  %v789_v56 = vmax.bf16 %v2039_v59, %v724_v1  ;;  %v1553_v15 = vrot.slane %v1551_v49, 5  ;;  %v220_v60 = vld [vmem:[%s2201_s11 + $0x50] sm:$0x1]  ;;  %v2120_v0 = vld [vmem:[%s2201_s11 + $0x118] sm:$0xf] }
  0x6c   : > { %v1555_v18 = vshrl.u32 %v2546_v13, 16  ;;  %v371_v12 = vrot.slane %v370_v8, 4  ;;  %v964_v48 = vor.u32 %v963_v9, %v959_v4  ;;  %v969_v21 = vrot.slane %v967_v3, 5  ;;  %v2067_v8 = vld [vmem:[%s2201_s11 + $0x1e8] sm:$0x1] }
  0x6d   : > { %v1561_v24 = vshll.u32 %v2146_v63, 16  ;;  %v1846_v25 = vmax.bf16 %v1540_v41, %v1382_v14  ;;  %v1253_v26 = vmax.bf16 %v960_v5, %v789_v56  ;;  %v1554_v27 = vsel %vm2225_vm2, %v1549_v2, %v1553_v15 }
  0x6e   : > { %v1557_v20 = vrot.slane %v1555_v18, 4  ;;  %v376_v30 = vsel %vm2225_vm2, %v371_v12, %v375_v58  ;;  %v965_v32 = vrot.slane %v964_v48, 4  ;;  %v194_v33 = vmax.bf16 %v2577_v6, %v2574_v19 }
  0x6f   : > { %v378_v34 = vshrl.u32 %v2574_v19, 16  ;;  %1879 = vst.msk [vmem:[%s2296_s15 + $0x24] sm:$0xf] %vm1869_vm3, %v1846_v25  ;;  %v1318_v44 = vmax.bf16 %v2538_v28, %v1253_v26  ;;  %v660_v36 = vmax.bf16 %v376_v30, %v193_v50  ;;  %v381_v38 = vshll.u32 %v2574_v19, 16  ;;  %v2635_v30 = vld [vmem:[%s2201_s11 + $0x54] sm:$0xf] }
  0x70   : > { %v1558_v16 = vor.u32 %v1557_v20, %v1553_v15  ;;  %v1563_v41 = vrot.slane %v1561_v24, 5  ;;  %v387_v43 = vshll.u32 %v2582_v11, 16  ;;  %v972_v45 = vshrl.u32 %v2585_v29, 16 }
  0x71   : > { %v380_v42 = vrot.slane %v378_v34, 4  ;;  %v1383_v46 = vmax.bf16 %v2119_v7, %v1318_v44  ;;  %v725_v37 = vmax.bf16 %v2530_v22, %v660_v36  ;;  %v383_v28 = vrot.slane %v381_v38, 5  ;;  %v2147_v7 = vld [vmem:[%s2201_s11 + $0x5c] sm:$0x1]  ;;  %v1979_v36 = vld [vmem:[%s2201_s11 + $0x120] sm:$0xf] }
  0x72   : > { %v1559_v4 = vrot.slane %v1558_v16, 4  ;;  %v970_v49 = vsel %vm2225_vm2, %v965_v32, %v969_v21  ;;  %v974_v51 = vrot.slane %v972_v45, 4  ;;  %v975_v52 = vshll.u32 %v2585_v29, 16  ;;  %v2041_v21 = vld [vmem:[%s2201_s11 + $0x2ac] sm:$0xf] }
  0x73   : > { %v981_v61 = vshll.u32 %v2598_v39, 16  ;;  %v1847_v54 = vmax.bf16 %v1554_v27, %v1383_v46  ;;  %v790_v10 = vmax.bf16 %v2040_v40, %v725_v37  ;;  %v384_v22 = vor.u32 %v383_v28, %v380_v42  ;;  %v2650_v37 = vld [vmem:[%s2201_s11 + $0x1ec] sm:$0xf] }
  0x74   : > { %v389_v35 = vrot.slane %v387_v43, 5  ;;  %v1564_v50 = vsel %vm2225_vm2, %v1559_v4, %v1563_v41  ;;  %v977_v17 = vrot.slane %v975_v52, 5  ;;  %v1566_v59 = vshrl.u32 %v2605_v47, 16  ;;  %v2644_v41 = vld [vmem:[%s2201_s11 + $0x58] sm:$0xf] }
  0x75   : > { %v1569_v55 = vshll.u32 %v2605_v47, 16  ;;  %1880 = vst.msk [vmem:[%s2296_s15 + $0x28] sm:$0xf] %vm1869_vm3, %v1847_v54  ;;  %v1254_v62 = vmax.bf16 %v970_v49, %v790_v10  ;;  %v385_v31 = vrot.slane %v384_v22, 4  ;;  %v983_v1 = vrot.slane %v981_v61, 5 }
  0x76   : > { %v1575_v58 = vshll.u32 %v2612_v53, 16  ;;  %v978_v3 = vor.u32 %v977_v17, %v974_v51  ;;  %v1568_v63 = vrot.slane %v1566_v59, 4  ;;  %v391_v2 = vshrl.u32 %v2582_v11, 16  ;;  %v2121_v52 = vld [vmem:[%s2201_s11 + $0x120] sm:$0xf] }
  0x77   : > { %v1571_v5 = vrot.slane %v1569_v55, 5  ;;  %v1319_v9 = vmax.bf16 %v2546_v13, %v1254_v62  ;;  %v390_v14 = vsel %vm2225_vm2, %v385_v31, %v389_v35  ;;  %v195_v56 = vmax.bf16 %v1978_v57, %v2582_v11  ;;  %v2042_v54 = vld [vmem:[%s2201_s11 + $0x2b0] sm:$0xf] }
  0x78   : > { %v397_v15 = vshll.u32 %v220_v60, 16  ;;  %v661_v18 = vmax.bf16 %v390_v14, %v194_v33  ;;  %v979_v19 = vrot.slane %v978_v3, 4  ;;  %v393_v12 = vrot.slane %v391_v2, 4  ;;  %v2661_v59 = vld [vmem:[%s2201_s11 + $0x1f0] sm:$0xf] }
  0x79   : > { %v1572_v6 = vor.u32 %v1571_v5, %v1568_v63  ;;  %v1384_v48 = vmax.bf16 %v2120_v0, %v1319_v9  ;;  %v1577_v24 = vrot.slane %v1575_v58, 5  ;;  %v985_v25 = vshrl.u32 %v2598_v39, 16  ;;  %v2672_v5 = vld [vmem:[%s2201_s11 + $0x64] sm:$0xf] }
  0x7a   : > { %v991_v26 = vshll.u32 %v2067_v8, 16  ;;  %v726_v13 = vmax.bf16 %v2585_v29, %v661_v18  ;;  %v394_v20 = vor.u32 %v393_v12, %v389_v35  ;;  %v399_v11 = vrot.slane %v397_v15, 5  ;;  %v2122_v12 = vld [vmem:[%s2201_s11 + $0x124] sm:$0xf] }
  0x7b   : > { %v1573_v27 = vrot.slane %v1572_v6, 4  ;;  %v1848_v32 = vmax.bf16 %v1564_v50, %v1384_v48  ;;  %v984_v33 = vsel %vm2225_vm2, %v979_v19, %v983_v1  ;;  %v987_v34 = vrot.slane %v985_v25, 4  ;;  %v2678_v19 = vld [vmem:[%s2201_s11 + $0x124] sm:$0xf]  ;;  %v221_v25 = vld [vmem:[%s2201_s11 + $0x5c] sm:$0x1] }
  0x7c   : > { %v1579_v44 = vshrl.u32 %v2612_v53, 16  ;;  %v791_v16 = vmax.bf16 %v2041_v21, %v726_v13  ;;  %v395_v38 = vrot.slane %v394_v20, 4  ;;  %v993_v40 = vrot.slane %v991_v26, 5 }
  0x7d   : > { %v1578_v29 = vsel %vm2225_vm2, %v1573_v27, %v1577_v24  ;;  %1881 = vst.msk [vmem:[%s2296_s15 + $0x2c] sm:$0xf] %vm1869_vm3, %v1848_v32  ;;  %v988_v42 = vor.u32 %v987_v34, %v983_v1  ;;  %v1585_v45 = vshll.u32 %v2147_v7, 16  ;;  %v402_v46 = vshrl.u32 %v2635_v30, 16  ;;  %v2667_v1 = vld [vmem:[%s2201_s11 + $0x60] sm:$0xf] }
  0x7e   : > { %v1581_v43 = vrot.slane %v1579_v44, 4  ;;  %v1255_v4 = vmax.bf16 %v984_v33, %v791_v16  ;;  %v400_v28 = vsel %vm2225_vm2, %v395_v38, %v399_v11  ;;  %v196_v49 = vmax.bf16 %v1979_v36, %v2635_v30  ;;  %v2068_v11 = vld [vmem:[%s2201_s11 + $0x1f4] sm:$0x1]  ;;  %v2043_v34 = vld [vmem:[%s2201_s11 + $0x2b8] sm:$0xf] }
  0x7f   : > { %v405_v51 = vshll.u32 %v2635_v30, 16  ;;  %v662_v61 = vmax.bf16 %v400_v28, %v195_v56  ;;  %v989_v10 = vrot.slane %v988_v42, 4  ;;  %v404_v35 = vrot.slane %v402_v46, 4 }
  0x80   : > { %v1582_v22 = vor.u32 %v1581_v43, %v1577_v24  ;;  %v1320_v57 = vmax.bf16 %v2605_v47, %v1255_v4  ;;  %v411_v17 = vshll.u32 %v2644_v41, 16  ;;  %v996_v55 = vshrl.u32 %v2650_v37, 16 }
  0x81   : > { %v407_v50 = vrot.slane %v405_v51, 5  ;;  %v727_v60 = vmax.bf16 %v2598_v39, %v662_v61  ;;  %v1587_v0 = vrot.slane %v1585_v45, 5  ;;  %v999_v31 = vshll.u32 %v2650_v37, 16  ;;  %v1981_v61 = vld [vmem:[%s2201_s11 + $0x12c] sm:$0xf] }
  0x82   : > { %v1583_v62 = vrot.slane %v1582_v22, 4  ;;  %v1385_v58 = vmax.bf16 %v2121_v52, %v1320_v57  ;;  %v994_v47 = vsel %vm2225_vm2, %v989_v10, %v993_v40  ;;  %v998_v63 = vrot.slane %v996_v55, 4  ;;  %v2706_v57 = vld [vmem:[%s2201_s11 + $0x64] sm:$0xf] }
  0x83   : > { %v408_v3 = vor.u32 %v407_v50, %v404_v35  ;;  %v792_v2 = vmax.bf16 %v2042_v54, %v727_v60  ;;  %v413_v39 = vrot.slane %v411_v17, 5  ;;  %v1001_v8 = vrot.slane %v999_v31, 5 }
  0x84   : > { %v1005_v9 = vshll.u32 %v2661_v59, 16  ;;  %v1849_v14 = vmax.bf16 %v1578_v29, %v1385_v58  ;;  %v1590_v15 = vshrl.u32 %v2667_v1, 16  ;;  %v1593_v18 = vshll.u32 %v2667_v1, 16 }
  0x85   : > { %v409_v56 = vrot.slane %v408_v3, 4  ;;  %v1256_v6 = vmax.bf16 %v994_v47, %v792_v2  ;;  %v1588_v48 = vsel %vm2225_vm2, %v1583_v62, %v1587_v0  ;;  %v1002_v21 = vor.u32 %v1001_v8, %v998_v63  ;;  %v2714_v62 = vld [vmem:[%s2201_s11 + $0x1f8] sm:$0xf]  ;;  %v2123_v0 = vld [vmem:[%s2201_s11 + $0x12c] sm:$0xf] }
  0x86   : > { %v1599_v24 = vshll.u32 %v2672_v5, 16  ;;  %1882 = vst.msk [vmem:[%s2296_s15 + $0x30] sm:$0xf] %vm1869_vm3, %v1849_v14  ;;  %v1007_v13 = vrot.slane %v1005_v9, 5  ;;  %v1592_v27 = vrot.slane %v1590_v15, 4  ;;  %v1595_v20 = vrot.slane %v1593_v18, 5 }
  0x87   : > { %v414_v26 = vsel %vm2225_vm2, %v409_v56, %v413_v39  ;;  %v1321_v7 = vmax.bf16 %v2612_v53, %v1256_v6  ;;  %v1003_v32 = vrot.slane %v1002_v21, 4  ;;  %v197_v33 = vmax.bf16 %v2678_v19, %v2644_v41  ;;  %v2148_v53 = vld [vmem:[%s2201_s11 + $0x68] sm:$0x1]  ;;  %v2722_v9 = vld [vmem:[%s2201_s11 + $0x1fc] sm:$0xf] }
  0x88   : > { %v663_v30 = vmax.bf16 %v414_v26, %v196_v49  ;;  %v1596_v44 = vor.u32 %v1595_v20, %v1592_v27  ;;  %v415_v36 = vshrl.u32 %v2644_v41, 16  ;;  %v421_v16 = vshll.u32 %v221_v25, 16  ;;  %v2701_v49 = vld [vmem:[%s2201_s11 + $0x60] sm:$0xf]  ;;  %v2730_v19 = vld [vmem:[%s2201_s11 + $0x6c] sm:$0xf] }
  0x89   : > { %v1009_v29 = vshrl.u32 %v2661_v59, 16  ;;  %v1386_v38 = vmax.bf16 %v2122_v12, %v1321_v7  ;;  %v1601_v42 = vrot.slane %v1599_v24, 5  ;;  %v1015_v43 = vshll.u32 %v2068_v11, 16  ;;  %v2044_v12 = vld [vmem:[%s2201_s11 + $0x2bc] sm:$0xf] }
  0x8a   : > { %v728_v40 = vmax.bf16 %v2650_v37, %v663_v30  ;;  %v1008_v45 = vsel %vm2225_vm2, %v1003_v32, %v1007_v13  ;;  %v1597_v46 = vrot.slane %v1596_v44, 4  ;;  %v417_v4 = vrot.slane %v415_v36, 4  ;;  %v2738_v27 = vld [vmem:[%s2201_s11 + $0x70] sm:$0xf] }
  0x8b   : > { %v1011_v28 = vrot.slane %v1009_v29, 4  ;;  %v1850_v41 = vmax.bf16 %v1588_v48, %v1386_v38  ;;  %v423_v52 = vrot.slane %v421_v16, 5  ;;  %v1603_v37 = vshrl.u32 %v2672_v5, 16  ;;  %v1982_v32 = vld [vmem:[%s2201_s11 + $0x130] sm:$0xf] }
  0x8c   : > { %v793_v51 = vmax.bf16 %v2043_v34, %v728_v40  ;;  %v418_v54 = vor.u32 %v417_v4, %v413_v39  ;;  %v1017_v22 = vrot.slane %v1015_v43, 5  ;;  %v1609_v35 = vshll.u32 %v2148_v53, 16  ;;  %v222_v16 = vld [vmem:[%s2201_s11 + $0x68] sm:$0x1] }
  0x8d   : > { %v1012_v10 = vor.u32 %v1011_v28, %v1007_v13  ;;  %1883 = vst.msk [vmem:[%s2296_s15 + $0x34] sm:$0xf] %vm1869_vm3, %v1850_v41  ;;  %v1602_v17 = vsel %vm2225_vm2, %v1597_v46, %v1601_v42  ;;  %v1605_v55 = vrot.slane %v1603_v37, 4  ;;  %v426_v60 = vshrl.u32 %v2701_v49, 16  ;;  %v2069_v46 = vld [vmem:[%s2201_s11 + $0x200] sm:$0x1] }
  0x8e   : > { %v1257_v50 = vmax.bf16 %v1008_v45, %v793_v51  ;;  %v419_v31 = vrot.slane %v418_v54, 4  ;;  %v198_v47 = vmax.bf16 %v1981_v61, %v2701_v49  ;;  %v429_v3 = vshll.u32 %v2701_v49, 16  ;;  %v2124_v28 = vld [vmem:[%s2201_s11 + $0x130] sm:$0xf] }
  0x8f   : > { %v1013_v58 = vrot.slane %v1012_v10, 4  ;;  %v1606_v2 = vor.u32 %v1605_v55, %v1601_v42  ;;  %v428_v39 = vrot.slane %v426_v60, 4  ;;  %v435_v8 = vshll.u32 %v2706_v57, 16  ;;  %v2149_v55 = vld [vmem:[%s2201_s11 + $0x74] sm:$0x1] }
  0x90   : > { %v1322_v63 = vmax.bf16 %v2667_v1, %v1257_v50  ;;  %v424_v14 = vsel %vm2225_vm2, %v419_v31, %v423_v52  ;;  %v2726_v56 = vrot.slane %v1609_v35, 5  ;;  %v431_v15 = vrot.slane %v429_v3, 5  ;;  %v2045_v52 = vld [vmem:[%s2201_s11 + $0x2c4] sm:$0xf] }
  0x91   : > { %v1020_v18 = vshrl.u32 %v2714_v62, 16  ;;  %v664_v1 = vmax.bf16 %v424_v14, %v197_v33  ;;  %v1018_v48 = vsel %vm2225_vm2, %v1013_v58, %v1017_v22  ;;  %v1607_v21 = vrot.slane %v1606_v2, 4 }
  0x92   : > { %v1387_v6 = vmax.bf16 %v2123_v0, %v1322_v63  ;;  %v432_v24 = vor.u32 %v431_v15, %v428_v39  ;;  %v1023_v26 = vshll.u32 %v2714_v62, 16  ;;  %v1029_v13 = vshll.u32 %v2722_v9, 16 }
  0x93   : > { %v1022_v25 = vrot.slane %v1020_v18, 4  ;;  %v729_v11 = vmax.bf16 %v2661_v59, %v664_v1  ;;  %v437_v7 = vrot.slane %v435_v8, 5  ;;  %v1614_v30 = vshrl.u32 %v2730_v19, 16  ;;  %v2774_v1 = vld [vmem:[%s2201_s11 + $0x70] sm:$0xf] }
  0x94   : > { %v1851_v20 = vmax.bf16 %v1602_v17, %v1387_v6  ;;  %v1612_v33 = vsel %vm2225_vm2, %v1607_v21, %v2726_v56  ;;  %v433_v34 = vrot.slane %v432_v24, 4  ;;  %v1025_v44 = vrot.slane %v1023_v26, 5 }
  0x95   : > { %v1617_v36 = vshll.u32 %v2730_v19, 16  ;;  %v794_v29 = vmax.bf16 %v2044_v12, %v729_v11  ;;  %v1031_v59 = vrot.slane %v1029_v13, 5  ;;  %v1616_v38 = vrot.slane %v1614_v30, 4  ;;  %v2777_v12 = vld [vmem:[%s2201_s11 + $0x204] sm:$0xf] }
  0x96   : > { %1884 = vst.msk [vmem:[%s2296_s15 + $0x38] sm:$0xf] %vm1869_vm3, %v1851_v20  ;;  %v1623_v40 = vshll.u32 %v2738_v27, 16  ;;  %v438_v42 = vsel %vm2225_vm2, %v433_v34, %v437_v7  ;;  %v1026_v43 = vor.u32 %v1025_v44, %v1022_v25  ;;  %v439_v45 = vshrl.u32 %v2706_v57, 16  ;;  %v2790_v30 = vld [vmem:[%s2201_s11 + $0x208] sm:$0xf] }
  0x97   : > { %v1619_v53 = vrot.slane %v1617_v36, 5  ;;  %v1258_v4 = vmax.bf16 %v1018_v48, %v794_v29  ;;  %v665_v49 = vmax.bf16 %v438_v42, %v198_v47  ;;  %v199_v41 = vmax.bf16 %v1982_v32, %v2706_v57  ;;  %v2125_v48 = vld [vmem:[%s2201_s11 + $0x138] sm:$0xf]  ;;  %v2046_v32 = vld [vmem:[%s2201_s11 + $0x2c8] sm:$0xf] }
  0x98   : > { %v445_v51 = vshll.u32 %v222_v16, 16  ;;  %v1027_v37 = vrot.slane %v1026_v43, 4  ;;  %v441_v54 = vrot.slane %v439_v45, 4  ;;  %v1033_v10 = vshrl.u32 %v2722_v9, 16  ;;  %v2804_v45 = vld [vmem:[%s2201_s11 + $0x7c] sm:$0xf] }
  0x99   : > { %v1620_v61 = vor.u32 %v1619_v53, %v1616_v38  ;;  %v1323_v22 = vmax.bf16 %v2672_v5, %v1258_v4  ;;  %v730_v35 = vmax.bf16 %v2714_v62, %v665_v49  ;;  %v1039_v17 = vshll.u32 %v2069_v46, 16  ;;  %v2766_v5 = vld [vmem:[%s2201_s11 + $0x6c] sm:$0xf]  ;;  %v2769_v62 = vld [vmem:[%s2201_s11 + $0x138] sm:$0xf] }
  0x9a   : > { %v447_v50 = vrot.slane %v445_v51, 5  ;;  %v1032_v60 = vsel %vm2225_vm2, %v1027_v37, %v1031_v59  ;;  %v442_v0 = vor.u32 %v441_v54, %v437_v7  ;;  %v1035_v31 = vrot.slane %v1033_v10, 4  ;;  %v2797_v38 = vld [vmem:[%s2201_s11 + $0x78] sm:$0xf]  ;;  %v1984_v49 = vld [vmem:[%s2201_s11 + $0x13c] sm:$0xf] }
  0x9b   : > { %v1621_v57 = vrot.slane %v1620_v61, 4  ;;  %v1388_v58 = vmax.bf16 %v2124_v28, %v1323_v22  ;;  %v795_v47 = vmax.bf16 %v2045_v52, %v730_v35  ;;  %v1625_v3 = vrot.slane %v1623_v40, 5  ;;  %v223_v61 = vld [vmem:[%s2201_s11 + $0x74] sm:$0x1]  ;;  %v2126_v10 = vld [vmem:[%s2201_s11 + $0x13c] sm:$0xf] }
  0x9c   : > { %v1627_v63 = vshrl.u32 %v2738_v27, 16  ;;  %v443_v2 = vrot.slane %v442_v0, 4  ;;  %v1036_v39 = vor.u32 %v1035_v31, %v1031_v59  ;;  %v1041_v8 = vrot.slane %v1039_v17, 5  ;;  %v2070_v0 = vld [vmem:[%s2201_s11 + $0x20c] sm:$0x1] }
  0x9d   : > { %v1633_v14 = vshll.u32 %v2149_v55, 16  ;;  %v1852_v56 = vmax.bf16 %v1612_v33, %v1388_v58  ;;  %v1259_v15 = vmax.bf16 %v1032_v60, %v795_v47  ;;  %v1626_v18 = vsel %vm2225_vm2, %v1621_v57, %v1625_v3 }
  0x9e   : > { %v1629_v6 = vrot.slane %v1627_v63, 4  ;;  %v448_v21 = vsel %vm2225_vm2, %v443_v2, %v447_v50  ;;  %v1037_v24 = vrot.slane %v1036_v39, 4  ;;  %v200_v25 = vmax.bf16 %v2769_v62, %v2766_v5 }
  0x9f   : > { %v450_v26 = vshrl.u32 %v2766_v5, 16  ;;  %1885 = vst.msk [vmem:[%s2296_s15 + $0x3c] sm:$0xf] %vm1869_vm3, %v1852_v56  ;;  %v1324_v13 = vmax.bf16 %v2730_v19, %v1259_v15  ;;  %v666_v20 = vmax.bf16 %v448_v21, %v199_v41  ;;  %v453_v7 = vshll.u32 %v2766_v5, 16  ;;  %v2827_v21 = vld [vmem:[%s2201_s11 + $0x78] sm:$0xf] }
  0xa0   : > { %v1630_v11 = vor.u32 %v1629_v6, %v1625_v3  ;;  %v1635_v33 = vrot.slane %v1633_v14, 5  ;;  %v459_v44 = vshll.u32 %v2774_v1, 16  ;;  %v1044_v36 = vshrl.u32 %v2777_v12, 16 }
  0xa1   : > { %v452_v34 = vrot.slane %v450_v26, 4  ;;  %v1389_v16 = vmax.bf16 %v2125_v48, %v1324_v13  ;;  %v731_v29 = vmax.bf16 %v2722_v9, %v666_v20  ;;  %v455_v19 = vrot.slane %v453_v7, 5  ;;  %v2150_v48 = vld [vmem:[%s2201_s11 + $0x80] sm:$0x1]  ;;  %v1985_v20 = vld [vmem:[%s2201_s11 + $0x144] sm:$0xf] }
  0xa2   : > { %v1631_v59 = vrot.slane %v1630_v11, 4  ;;  %v1042_v40 = vsel %vm2225_vm2, %v1037_v24, %v1041_v8  ;;  %v1046_v42 = vrot.slane %v1044_v36, 4  ;;  %v1047_v43 = vshll.u32 %v2777_v12, 16  ;;  %v2047_v8 = vld [vmem:[%s2201_s11 + $0x2d0] sm:$0xf] }
  0xa3   : > { %v1053_v53 = vshll.u32 %v2790_v30, 16  ;;  %v1853_v46 = vmax.bf16 %v1626_v18, %v1389_v16  ;;  %v796_v4 = vmax.bf16 %v2046_v32, %v731_v29  ;;  %v456_v9 = vor.u32 %v455_v19, %v452_v34  ;;  %v2842_v29 = vld [vmem:[%s2201_s11 + $0x210] sm:$0xf] }
  0xa4   : > { %v461_v28 = vrot.slane %v459_v44, 5  ;;  %v1636_v41 = vsel %vm2225_vm2, %v1631_v59, %v1635_v33  ;;  %v1049_v51 = vrot.slane %v1047_v43, 5  ;;  %v1638_v52 = vshrl.u32 %v2797_v38, 16  ;;  %v2836_v33 = vld [vmem:[%s2201_s11 + $0x7c] sm:$0xf] }
  0xa5   : > { %v1641_v37 = vshll.u32 %v2797_v38, 16  ;;  %1886 = vst.msk [vmem:[%s2296_s15 + $0x40] sm:$0xf] %vm1869_vm3, %v1853_v46  ;;  %v1260_v54 = vmax.bf16 %v1042_v40, %v796_v4  ;;  %v457_v22 = vrot.slane %v456_v9, 4  ;;  %v1055_v35 = vrot.slane %v1053_v53, 5 }
  0xa6   : > { %v1647_v50 = vshll.u32 %v2804_v45, 16  ;;  %v1050_v17 = vor.u32 %v1049_v51, %v1046_v42  ;;  %v1640_v55 = vrot.slane %v1638_v52, 4  ;;  %v463_v57 = vshrl.u32 %v2774_v1, 16  ;;  %v2127_v43 = vld [vmem:[%s2201_s11 + $0x144] sm:$0xf] }
  0xa7   : > { %v1643_v60 = vrot.slane %v1641_v37, 5  ;;  %v1325_v31 = vmax.bf16 %v2738_v27, %v1260_v54  ;;  %v462_v58 = vsel %vm2225_vm2, %v457_v22, %v461_v28  ;;  %v201_v47 = vmax.bf16 %v1984_v49, %v2774_v1  ;;  %v2048_v46 = vld [vmem:[%s2201_s11 + $0x2d4] sm:$0xf] }
  0xa8   : > { %v469_v3 = vshll.u32 %v223_v61, 16  ;;  %v667_v63 = vmax.bf16 %v462_v58, %v200_v25  ;;  %v1051_v5 = vrot.slane %v1050_v17, 4  ;;  %v465_v2 = vrot.slane %v463_v57, 4  ;;  %v2853_v52 = vld [vmem:[%s2201_s11 + $0x214] sm:$0xf] }
  0xa9   : > { %v1644_v62 = vor.u32 %v1643_v60, %v1640_v55  ;;  %v1390_v39 = vmax.bf16 %v2126_v10, %v1325_v31  ;;  %v1649_v14 = vrot.slane %v1647_v50, 5  ;;  %v1057_v56 = vshrl.u32 %v2790_v30, 16  ;;  %v2864_v60 = vld [vmem:[%s2201_s11 + $0x88] sm:$0xf] }
  0xaa   : > { %v1063_v15 = vshll.u32 %v2070_v0, 16  ;;  %v732_v27 = vmax.bf16 %v2777_v12, %v667_v63  ;;  %v466_v6 = vor.u32 %v465_v2, %v461_v28  ;;  %v471_v1 = vrot.slane %v469_v3, 5  ;;  %v2128_v2 = vld [vmem:[%s2201_s11 + $0x148] sm:$0xf] }
  0xab   : > { %v1645_v18 = vrot.slane %v1644_v62, 4  ;;  %v1854_v24 = vmax.bf16 %v1636_v41, %v1390_v39  ;;  %v1056_v25 = vsel %vm2225_vm2, %v1051_v5, %v1055_v35  ;;  %v1059_v26 = vrot.slane %v1057_v56, 4  ;;  %v2870_v5 = vld [vmem:[%s2201_s11 + $0x148] sm:$0xf]  ;;  %v224_v56 = vld [vmem:[%s2201_s11 + $0x80] sm:$0x1] }
  0xac   : > { %v1651_v13 = vshrl.u32 %v2804_v45, 16  ;;  %v797_v11 = vmax.bf16 %v2047_v8, %v732_v27  ;;  %v467_v7 = vrot.slane %v466_v6, 4  ;;  %v1065_v32 = vrot.slane %v1063_v15, 5 }
  0xad   : > { %v1650_v12 = vsel %vm2225_vm2, %v1645_v18, %v1649_v14  ;;  %1887 = vst.msk [vmem:[%s2296_s15 + $0x44] sm:$0xf] %vm1869_vm3, %v1854_v24  ;;  %v1060_v34 = vor.u32 %v1059_v26, %v1055_v35  ;;  %v1657_v36 = vshll.u32 %v2150_v48, 16  ;;  %v474_v16 = vshrl.u32 %v2827_v21, 16  ;;  %v2859_v35 = vld [vmem:[%s2201_s11 + $0x84] sm:$0xf] }
  0xae   : > { %v1653_v44 = vrot.slane %v1651_v13, 4  ;;  %v1261_v59 = vmax.bf16 %v1056_v25, %v797_v11  ;;  %v472_v19 = vsel %vm2225_vm2, %v467_v7, %v471_v1  ;;  %v202_v40 = vmax.bf16 %v1985_v20, %v2827_v21  ;;  %v2071_v1 = vld [vmem:[%s2201_s11 + $0x218] sm:$0x1]  ;;  %v2049_v26 = vld [vmem:[%s2201_s11 + $0x2dc] sm:$0xf] }
  0xaf   : > { %v477_v42 = vshll.u32 %v2827_v21, 16  ;;  %v668_v53 = vmax.bf16 %v472_v19, %v201_v47  ;;  %v1061_v4 = vrot.slane %v1060_v34, 4  ;;  %v476_v28 = vrot.slane %v474_v16, 4 }
  0xb0   : > { %v1654_v9 = vor.u32 %v1653_v44, %v1649_v14  ;;  %v1326_v49 = vmax.bf16 %v2797_v38, %v1261_v59  ;;  %v483_v51 = vshll.u32 %v2836_v33, 16  ;;  %v1068_v37 = vshrl.u32 %v2842_v29, 16 }
  0xb1   : > { %v479_v41 = vrot.slane %v477_v42, 5  ;;  %v733_v61 = vmax.bf16 %v2790_v30, %v668_v53  ;;  %v1659_v10 = vrot.slane %v1657_v36, 5  ;;  %v1071_v22 = vshll.u32 %v2842_v29, 16  ;;  %v1987_v53 = vld [vmem:[%s2201_s11 + $0x150] sm:$0xf] }
  0xb2   : > { %v1655_v54 = vrot.slane %v1654_v9, 4  ;;  %v1391_v50 = vmax.bf16 %v2127_v43, %v1326_v49  ;;  %v1066_v38 = vsel %vm2225_vm2, %v1061_v4, %v1065_v32  ;;  %v1070_v55 = vrot.slane %v1068_v37, 4  ;;  %v2898_v49 = vld [vmem:[%s2201_s11 + $0x88] sm:$0xf] }
  0xb3   : > { %v480_v17 = vor.u32 %v479_v41, %v476_v28  ;;  %v798_v57 = vmax.bf16 %v2048_v46, %v733_v61  ;;  %v485_v30 = vrot.slane %v483_v51, 5  ;;  %v1073_v0 = vrot.slane %v1071_v22, 5 }
  0xb4   : > { %v1077_v31 = vshll.u32 %v2853_v52, 16  ;;  %v1855_v58 = vmax.bf16 %v1650_v12, %v1391_v50  ;;  %v1662_v3 = vshrl.u32 %v2859_v35, 16  ;;  %v1665_v63 = vshll.u32 %v2859_v35, 16 }
  0xb5   : > { %v481_v47 = vrot.slane %v480_v17, 4  ;;  %v1262_v62 = vmax.bf16 %v1066_v38, %v798_v57  ;;  %v1660_v39 = vsel %vm2225_vm2, %v1655_v54, %v1659_v10  ;;  %v1074_v8 = vor.u32 %v1073_v0, %v1070_v55  ;;  %v2906_v54 = vld [vmem:[%s2201_s11 + $0x21c] sm:$0xf]  ;;  %v2129_v10 = vld [vmem:[%s2201_s11 + $0x150] sm:$0xf] }
  0xb6   : > { %v1671_v14 = vshll.u32 %v2864_v60, 16  ;;  %1888 = vst.msk [vmem:[%s2296_s15 + $0x48] sm:$0xf] %vm1869_vm3, %v1855_v58  ;;  %v1079_v27 = vrot.slane %v1077_v31, 5  ;;  %v1664_v18 = vrot.slane %v1662_v3, 4  ;;  %v1667_v6 = vrot.slane %v1665_v63, 5 }
  0xb7   : > { %v486_v15 = vsel %vm2225_vm2, %v481_v47, %v485_v30  ;;  %v1327_v48 = vmax.bf16 %v2804_v45, %v1262_v62  ;;  %v1075_v24 = vrot.slane %v1074_v8, 4  ;;  %v203_v25 = vmax.bf16 %v2870_v5, %v2836_v33  ;;  %v2151_v45 = vld [vmem:[%s2201_s11 + $0x8c] sm:$0x1]  ;;  %v2914_v31 = vld [vmem:[%s2201_s11 + $0x220] sm:$0xf] }
  0xb8   : > { %v669_v21 = vmax.bf16 %v486_v15, %v202_v40  ;;  %v1668_v13 = vor.u32 %v1667_v6, %v1664_v18  ;;  %v487_v20 = vshrl.u32 %v2836_v33, 16  ;;  %v493_v11 = vshll.u32 %v224_v56, 16  ;;  %v2893_v40 = vld [vmem:[%s2201_s11 + $0x84] sm:$0xf]  ;;  %v2922_v5 = vld [vmem:[%s2201_s11 + $0x90] sm:$0xf] }
  0xb9   : > { %v1081_v12 = vshrl.u32 %v2853_v52, 16  ;;  %v1392_v7 = vmax.bf16 %v2128_v2, %v1327_v48  ;;  %v1673_v34 = vrot.slane %v1671_v14, 5  ;;  %v1087_v44 = vshll.u32 %v2071_v1, 16  ;;  %v2050_v2 = vld [vmem:[%s2201_s11 + $0x2e0] sm:$0xf] }
  0xba   : > { %v734_v32 = vmax.bf16 %v2842_v29, %v669_v21  ;;  %v1080_v36 = vsel %vm2225_vm2, %v1075_v24, %v1079_v27  ;;  %v1669_v16 = vrot.slane %v1668_v13, 4  ;;  %v489_v59 = vrot.slane %v487_v20, 4  ;;  %v2930_v18 = vld [vmem:[%s2201_s11 + $0x94] sm:$0xf] }
  0xbb   : > { %v1083_v19 = vrot.slane %v1081_v12, 4  ;;  %v1856_v33 = vmax.bf16 %v1660_v39, %v1392_v7  ;;  %v495_v43 = vrot.slane %v493_v11, 5  ;;  %v1675_v29 = vshrl.u32 %v2864_v60, 16  ;;  %v1988_v24 = vld [vmem:[%s2201_s11 + $0x154] sm:$0xf] }
  0xbc   : > { %v799_v42 = vmax.bf16 %v2049_v26, %v734_v32  ;;  %v490_v46 = vor.u32 %v489_v59, %v485_v30  ;;  %v1089_v9 = vrot.slane %v1087_v44, 5  ;;  %v1681_v28 = vshll.u32 %v2151_v45, 16  ;;  %v225_v11 = vld [vmem:[%s2201_s11 + $0x8c] sm:$0x1] }
  0xbd   : > { %v1084_v4 = vor.u32 %v1083_v19, %v1079_v27  ;;  %1889 = vst.msk [vmem:[%s2296_s15 + $0x4c] sm:$0xf] %vm1869_vm3, %v1856_v33  ;;  %v1674_v51 = vsel %vm2225_vm2, %v1669_v16, %v1673_v34  ;;  %v1677_v37 = vrot.slane %v1675_v29, 4  ;;  %v498_v61 = vshrl.u32 %v2893_v40, 16  ;;  %v2072_v16 = vld [vmem:[%s2201_s11 + $0x224] sm:$0x1] }
  0xbe   : > { %v1263_v41 = vmax.bf16 %v1080_v36, %v799_v42  ;;  %v491_v22 = vrot.slane %v490_v46, 4  ;;  %v204_v38 = vmax.bf16 %v1987_v53, %v2893_v40  ;;  %v501_v17 = vshll.u32 %v2893_v40, 16  ;;  %v2130_v19 = vld [vmem:[%s2201_s11 + $0x154] sm:$0xf] }
  0xbf   : > { %v1085_v50 = vrot.slane %v1084_v4, 4  ;;  %v1678_v57 = vor.u32 %v1677_v37, %v1673_v34  ;;  %v500_v30 = vrot.slane %v498_v61, 4  ;;  %v507_v0 = vshll.u32 %v2898_v49, 16  ;;  %v2152_v37 = vld [vmem:[%s2201_s11 + $0x98] sm:$0x1] }
  0xc0   : > { %v1328_v55 = vmax.bf16 %v2859_v35, %v1263_v41  ;;  %v496_v58 = vsel %vm2225_vm2, %v491_v22, %v495_v43  ;;  %v2918_v47 = vrot.slane %v1681_v28, 5  ;;  %v503_v3 = vrot.slane %v501_v17, 5  ;;  %v2051_v43 = vld [vmem:[%s2201_s11 + $0x2e8] sm:$0xf] }
  0xc1   : > { %v1092_v63 = vshrl.u32 %v2906_v54, 16  ;;  %v670_v35 = vmax.bf16 %v496_v58, %v203_v25  ;;  %v1090_v39 = vsel %vm2225_vm2, %v1085_v50, %v1089_v9  ;;  %v1679_v8 = vrot.slane %v1678_v57, 4 }
  0xc2   : > { %v1393_v62 = vmax.bf16 %v2129_v10, %v1328_v55  ;;  %v504_v14 = vor.u32 %v503_v3, %v500_v30  ;;  %v1095_v15 = vshll.u32 %v2906_v54, 16  ;;  %v1101_v27 = vshll.u32 %v2914_v31, 16 }
  0xc3   : > { %v1094_v56 = vrot.slane %v1092_v63, 4  ;;  %v735_v1 = vmax.bf16 %v2853_v52, %v670_v35  ;;  %v509_v48 = vrot.slane %v507_v0, 5  ;;  %v1686_v21 = vshrl.u32 %v2922_v5, 16  ;;  %v2966_v35 = vld [vmem:[%s2201_s11 + $0x94] sm:$0xf] }
  0xc4   : > { %v1857_v6 = vmax.bf16 %v1674_v51, %v1393_v62  ;;  %v1684_v25 = vsel %vm2225_vm2, %v1679_v8, %v2918_v47  ;;  %v505_v26 = vrot.slane %v504_v14, 4  ;;  %v1097_v13 = vrot.slane %v1095_v15, 5 }
  0xc5   : > { %v1689_v20 = vshll.u32 %v2922_v5, 16  ;;  %v800_v12 = vmax.bf16 %v2050_v2, %v735_v1  ;;  %v1103_v52 = vrot.slane %v1101_v27, 5  ;;  %v1688_v7 = vrot.slane %v1686_v21, 4  ;;  %v2969_v2 = vld [vmem:[%s2201_s11 + $0x228] sm:$0xf] }
  0xc6   : > { %1890 = vst.msk [vmem:[%s2296_s15 + $0x50] sm:$0xf] %vm1869_vm3, %v1857_v6  ;;  %v1695_v32 = vshll.u32 %v2930_v18, 16  ;;  %v510_v34 = vsel %vm2225_vm2, %v505_v26, %v509_v48  ;;  %v1098_v44 = vor.u32 %v1097_v13, %v1094_v56  ;;  %v511_v36 = vshrl.u32 %v2898_v49, 16  ;;  %v2982_v21 = vld [vmem:[%s2201_s11 + $0x22c] sm:$0xf] }
  0xc7   : > { %v1691_v45 = vrot.slane %v1689_v20, 5  ;;  %v1264_v59 = vmax.bf16 %v1090_v39, %v800_v12  ;;  %v671_v40 = vmax.bf16 %v510_v34, %v204_v38  ;;  %v205_v33 = vmax.bf16 %v1988_v24, %v2898_v49  ;;  %v2131_v39 = vld [vmem:[%s2201_s11 + $0x15c] sm:$0xf]  ;;  %v2052_v24 = vld [vmem:[%s2201_s11 + $0x2ec] sm:$0xf] }
  0xc8   : > { %v517_v42 = vshll.u32 %v225_v11, 16  ;;  %v1099_v29 = vrot.slane %v1098_v44, 4  ;;  %v513_v46 = vrot.slane %v511_v36, 4  ;;  %v1105_v4 = vshrl.u32 %v2914_v31, 16  ;;  %v2996_v36 = vld [vmem:[%s2201_s11 + $0xa0] sm:$0xf] }
  0xc9   : > { %v1692_v53 = vor.u32 %v1691_v45, %v1688_v7  ;;  %v1329_v9 = vmax.bf16 %v2864_v60, %v1264_v59  ;;  %v736_v28 = vmax.bf16 %v2906_v54, %v671_v40  ;;  %v1111_v51 = vshll.u32 %v2072_v16, 16  ;;  %v2958_v60 = vld [vmem:[%s2201_s11 + $0x90] sm:$0xf]  ;;  %v2961_v54 = vld [vmem:[%s2201_s11 + $0x15c] sm:$0xf] }
  0xca   : > { %v519_v41 = vrot.slane %v517_v42, 5  ;;  %v1104_v61 = vsel %vm2225_vm2, %v1099_v29, %v1103_v52  ;;  %v514_v10 = vor.u32 %v513_v46, %v509_v48  ;;  %v1107_v22 = vrot.slane %v1105_v4, 4  ;;  %v2989_v7 = vld [vmem:[%s2201_s11 + $0x9c] sm:$0xf]  ;;  %v1990_v40 = vld [vmem:[%s2201_s11 + $0x160] sm:$0xf] }
  0xcb   : > { %v1693_v49 = vrot.slane %v1692_v53, 4  ;;  %v1394_v50 = vmax.bf16 %v2130_v19, %v1329_v9  ;;  %v801_v38 = vmax.bf16 %v2051_v43, %v736_v28  ;;  %v1697_v17 = vrot.slane %v1695_v32, 5  ;;  %v226_v53 = vld [vmem:[%s2201_s11 + $0x98] sm:$0x1]  ;;  %v2132_v4 = vld [vmem:[%s2201_s11 + $0x160] sm:$0xf] }
  0xcc   : > { %v1699_v55 = vshrl.u32 %v2930_v18, 16  ;;  %v515_v57 = vrot.slane %v514_v10, 4  ;;  %v1108_v30 = vor.u32 %v1107_v22, %v1103_v52  ;;  %v1113_v0 = vrot.slane %v1111_v51, 5  ;;  %v2073_v10 = vld [vmem:[%s2201_s11 + $0x230] sm:$0x1] }
  0xcd   : > { %v1705_v58 = vshll.u32 %v2152_v37, 16  ;;  %v1858_v47 = vmax.bf16 %v1684_v25, %v1394_v50  ;;  %v1265_v3 = vmax.bf16 %v1104_v61, %v801_v38  ;;  %v1698_v63 = vsel %vm2225_vm2, %v1693_v49, %v1697_v17 }
  0xce   : > { %v1701_v62 = vrot.slane %v1699_v55, 4  ;;  %v520_v8 = vsel %vm2225_vm2, %v515_v57, %v519_v41  ;;  %v1109_v14 = vrot.slane %v1108_v30, 4  ;;  %v206_v56 = vmax.bf16 %v2961_v54, %v2958_v60 }
  0xcf   : > { %v522_v15 = vshrl.u32 %v2958_v60, 16  ;;  %1891 = vst.msk [vmem:[%s2296_s15 + $0x54] sm:$0xf] %vm1869_vm3, %v1858_v47  ;;  %v1330_v27 = vmax.bf16 %v2922_v5, %v1265_v3  ;;  %v672_v6 = vmax.bf16 %v520_v8, %v205_v33  ;;  %v525_v48 = vshll.u32 %v2958_v60, 16  ;;  %v3019_v8 = vld [vmem:[%s2201_s11 + $0x9c] sm:$0xf] }
  0xd0   : > { %v1702_v1 = vor.u32 %v1701_v62, %v1697_v17  ;;  %v1707_v25 = vrot.slane %v1705_v58, 5  ;;  %v531_v13 = vshll.u32 %v2966_v35, 16  ;;  %v1116_v20 = vshrl.u32 %v2969_v2, 16 }
  0xd1   : > { %v524_v26 = vrot.slane %v522_v15, 4  ;;  %v1395_v11 = vmax.bf16 %v2131_v39, %v1330_v27  ;;  %v737_v12 = vmax.bf16 %v2914_v31, %v672_v6  ;;  %v527_v5 = vrot.slane %v525_v48, 5  ;;  %v2153_v39 = vld [vmem:[%s2201_s11 + $0xa4] sm:$0x1]  ;;  %v1991_v6 = vld [vmem:[%s2201_s11 + $0x168] sm:$0xf] }
  0xd2   : > { %v1703_v52 = vrot.slane %v1702_v1, 4  ;;  %v1114_v32 = vsel %vm2225_vm2, %v1109_v14, %v1113_v0  ;;  %v1118_v34 = vrot.slane %v1116_v20, 4  ;;  %v1119_v44 = vshll.u32 %v2969_v2, 16  ;;  %v2053_v0 = vld [vmem:[%s2201_s11 + $0x2f4] sm:$0xf] }
  0xd3   : > { %v1125_v45 = vshll.u32 %v2982_v21, 16  ;;  %v1859_v16 = vmax.bf16 %v1698_v63, %v1395_v11  ;;  %v802_v59 = vmax.bf16 %v2052_v24, %v737_v12  ;;  %v528_v31 = vor.u32 %v527_v5, %v524_v26  ;;  %v3034_v12 = vld [vmem:[%s2201_s11 + $0x234] sm:$0xf] }
  0xd4   : > { %v533_v19 = vrot.slane %v531_v13, 5  ;;  %v1708_v33 = vsel %vm2225_vm2, %v1703_v52, %v1707_v25  ;;  %v1121_v42 = vrot.slane %v1119_v44, 5  ;;  %v1710_v43 = vshrl.u32 %v2989_v7, 16  ;;  %v3028_v25 = vld [vmem:[%s2201_s11 + $0xa0] sm:$0xf] }
  0xd5   : > { %v1713_v29 = vshll.u32 %v2989_v7, 16  ;;  %1892 = vst.msk [vmem:[%s2296_s15 + $0x58] sm:$0xf] %vm1869_vm3, %v1859_v16  ;;  %v1266_v46 = vmax.bf16 %v1114_v32, %v802_v59  ;;  %v529_v9 = vrot.slane %v528_v31, 4  ;;  %v1127_v28 = vrot.slane %v1125_v45, 5 }
  0xd6   : > { %v1719_v41 = vshll.u32 %v2996_v36, 16  ;;  %v1122_v51 = vor.u32 %v1121_v42, %v1118_v34  ;;  %v1712_v37 = vrot.slane %v1710_v43, 4  ;;  %v535_v49 = vshrl.u32 %v2966_v35, 16  ;;  %v2133_v44 = vld [vmem:[%s2201_s11 + $0x168] sm:$0xf] }
  0xd7   : > { %v1715_v61 = vrot.slane %v1713_v29, 5  ;;  %v1331_v22 = vmax.bf16 %v2930_v18, %v1266_v46  ;;  %v534_v50 = vsel %vm2225_vm2, %v529_v9, %v533_v19  ;;  %v207_v38 = vmax.bf16 %v1990_v40, %v2966_v35  ;;  %v2054_v16 = vld [vmem:[%s2201_s11 + $0x2f8] sm:$0xf] }
  0xd8   : > { %v541_v17 = vshll.u32 %v226_v53, 16  ;;  %v673_v55 = vmax.bf16 %v534_v50, %v206_v56  ;;  %v1123_v60 = vrot.slane %v1122_v51, 4  ;;  %v537_v57 = vrot.slane %v535_v49, 4  ;;  %v3045_v43 = vld [vmem:[%s2201_s11 + $0x238] sm:$0xf] }
  0xd9   : > { %v1716_v54 = vor.u32 %v1715_v61, %v1712_v37  ;;  %v1396_v30 = vmax.bf16 %v2132_v4, %v1331_v22  ;;  %v1721_v58 = vrot.slane %v1719_v41, 5  ;;  %v1129_v47 = vshrl.u32 %v2982_v21, 16  ;;  %v3056_v61 = vld [vmem:[%s2201_s11 + $0xac] sm:$0xf] }
  0xda   : > { %v1135_v3 = vshll.u32 %v2073_v10, 16  ;;  %v738_v18 = vmax.bf16 %v2969_v2, %v673_v55  ;;  %v538_v62 = vor.u32 %v537_v57, %v533_v19  ;;  %v543_v35 = vrot.slane %v541_v17, 5  ;;  %v2134_v57 = vld [vmem:[%s2201_s11 + $0x16c] sm:$0xf] }
  0xdb   : > { %v1717_v63 = vrot.slane %v1716_v54, 4  ;;  %v1860_v14 = vmax.bf16 %v1708_v33, %v1396_v30  ;;  %v1128_v56 = vsel %vm2225_vm2, %v1123_v60, %v1127_v28  ;;  %v1131_v15 = vrot.slane %v1129_v47, 4  ;;  %v3062_v60 = vld [vmem:[%s2201_s11 + $0x16c] sm:$0xf]  ;;  %v227_v47 = vld [vmem:[%s2201_s11 + $0xa4] sm:$0x1] }
  0xdc   : > { %v1723_v27 = vshrl.u32 %v2996_v36, 16  ;;  %v803_v1 = vmax.bf16 %v2053_v0, %v738_v18  ;;  %v539_v48 = vrot.slane %v538_v62, 4  ;;  %v1137_v24 = vrot.slane %v1135_v3, 5 }
  0xdd   : > { %v1722_v2 = vsel %vm2225_vm2, %v1717_v63, %v1721_v58  ;;  %1893 = vst.msk [vmem:[%s2296_s15 + $0x5c] sm:$0xf] %vm1869_vm3, %v1860_v14  ;;  %v1132_v26 = vor.u32 %v1131_v15, %v1127_v28  ;;  %v1729_v20 = vshll.u32 %v2153_v39, 16  ;;  %v546_v11 = vshrl.u32 %v3019_v8, 16  ;;  %v3051_v28 = vld [vmem:[%s2201_s11 + $0xa8] sm:$0xf] }
  0xde   : > { %v1725_v13 = vrot.slane %v1723_v27, 4  ;;  %v1267_v52 = vmax.bf16 %v1128_v56, %v803_v1  ;;  %v544_v5 = vsel %vm2225_vm2, %v539_v48, %v543_v35  ;;  %v208_v32 = vmax.bf16 %v1991_v6, %v3019_v8  ;;  %v2074_v35 = vld [vmem:[%s2201_s11 + $0x23c] sm:$0x1]  ;;  %v2055_v15 = vld [vmem:[%s2201_s11 + $0x300] sm:$0xf] }
  0xdf   : > { %v549_v34 = vshll.u32 %v3019_v8, 16  ;;  %v674_v45 = vmax.bf16 %v544_v5, %v207_v38  ;;  %v1133_v59 = vrot.slane %v1132_v26, 4  ;;  %v548_v19 = vrot.slane %v546_v11, 4 }
  0xe0   : > { %v1726_v31 = vor.u32 %v1725_v13, %v1721_v58  ;;  %v1332_v40 = vmax.bf16 %v2989_v7, %v1267_v52  ;;  %v555_v42 = vshll.u32 %v3028_v25, 16  ;;  %v1140_v29 = vshrl.u32 %v3034_v12, 16 }
  0xe1   : > { %v551_v33 = vrot.slane %v549_v34, 5  ;;  %v739_v53 = vmax.bf16 %v2982_v21, %v674_v45  ;;  %v1731_v4 = vrot.slane %v1729_v20, 5  ;;  %v1143_v9 = vshll.u32 %v3034_v12, 16  ;;  %v1993_v45 = vld [vmem:[%s2201_s11 + $0x174] sm:$0xf] }
  0xe2   : > { %v1727_v46 = vrot.slane %v1726_v31, 4  ;;  %v1397_v41 = vmax.bf16 %v2133_v44, %v1332_v40  ;;  %v1138_v7 = vsel %vm2225_vm2, %v1133_v59, %v1137_v24  ;;  %v1142_v37 = vrot.slane %v1140_v29, 4  ;;  %v3090_v40 = vld [vmem:[%s2201_s11 + $0xac] sm:$0xf] }
  0xe3   : > { %v552_v51 = vor.u32 %v551_v33, %v548_v19  ;;  %v804_v49 = vmax.bf16 %v2054_v16, %v739_v53  ;;  %v557_v21 = vrot.slane %v555_v42, 5  ;;  %v1145_v10 = vrot.slane %v1143_v9, 5 }
  0xe4   : > { %v1149_v22 = vshll.u32 %v3045_v43, 16  ;;  %v1861_v50 = vmax.bf16 %v1722_v2, %v1397_v41  ;;  %v1734_v17 = vshrl.u32 %v3051_v28, 16  ;;  %v1737_v55 = vshll.u32 %v3051_v28, 16 }
  0xe5   : > { %v553_v38 = vrot.slane %v552_v51, 4  ;;  %v1268_v54 = vmax.bf16 %v1138_v7, %v804_v49  ;;  %v1732_v30 = vsel %vm2225_vm2, %v1727_v46, %v1731_v4  ;;  %v1146_v0 = vor.u32 %v1145_v10, %v1142_v37  ;;  %v3098_v46 = vld [vmem:[%s2201_s11 + $0x240] sm:$0xf]  ;;  %v2135_v4 = vld [vmem:[%s2201_s11 + $0x174] sm:$0xf] }
  0xe6   : > { %v1743_v58 = vshll.u32 %v3056_v61, 16  ;;  %1894 = vst.msk [vmem:[%s2296_s15 + $0x60] sm:$0xf] %vm1869_vm3, %v1861_v50  ;;  %v1151_v18 = vrot.slane %v1149_v22, 5  ;;  %v1736_v63 = vrot.slane %v1734_v17, 4  ;;  %v1739_v62 = vrot.slane %v1737_v55, 5 }
  0xe7   : > { %v558_v3 = vsel %vm2225_vm2, %v553_v38, %v557_v21  ;;  %v1333_v39 = vmax.bf16 %v2996_v36, %v1268_v54  ;;  %v1147_v14 = vrot.slane %v1146_v0, 4  ;;  %v209_v56 = vmax.bf16 %v3062_v60, %v3028_v25  ;;  %v2154_v36 = vld [vmem:[%s2201_s11 + $0xb0] sm:$0x1]  ;;  %v3106_v22 = vld [vmem:[%s2201_s11 + $0x244] sm:$0xf] }
  0xe8   : > { %v675_v8 = vmax.bf16 %v558_v3, %v208_v32  ;;  %v1740_v27 = vor.u32 %v1739_v62, %v1736_v63  ;;  %v559_v6 = vshrl.u32 %v3028_v25, 16  ;;  %v565_v1 = vshll.u32 %v227_v47, 16  ;;  %v3085_v32 = vld [vmem:[%s2201_s11 + $0xa8] sm:$0xf]  ;;  %v3112_v60 = vld [vmem:[%s2201_s11 + $0xb4] sm:$0xf] }
  0xe9   : > { %v1153_v2 = vshrl.u32 %v3045_v43, 16  ;;  %v1398_v48 = vmax.bf16 %v2134_v57, %v1333_v39  ;;  %v1745_v26 = vrot.slane %v1743_v58, 5  ;;  %v1159_v13 = vshll.u32 %v2074_v35, 16  ;;  %v3120_v63 = vld [vmem:[%s2201_s11 + $0xb8] sm:$0xf] }
  0xea   : > { %v740_v24 = vmax.bf16 %v3034_v12, %v675_v8  ;;  %v1152_v20 = vsel %vm2225_vm2, %v1147_v14, %v1151_v18  ;;  %v1741_v11 = vrot.slane %v1740_v27, 4  ;;  %v561_v52 = vrot.slane %v559_v6, 4  ;;  %v1994_v14 = vld [vmem:[%s2201_s11 + $0x178] sm:$0xf] }
  0xeb   : > { %v1155_v5 = vrot.slane %v1153_v2, 4  ;;  %v1862_v25 = vmax.bf16 %v1732_v30, %v1398_v48  ;;  %v567_v44 = vrot.slane %v565_v1, 5  ;;  %v1747_v12 = vshrl.u32 %v3056_v61, 16  ;;  %v228_v1 = vld [vmem:[%s2201_s11 + $0xb0] sm:$0x1] }
  0xec   : > { %v805_v34 = vmax.bf16 %v2055_v15, %v740_v24  ;;  %v562_v16 = vor.u32 %v561_v52, %v557_v21  ;;  %v1161_v31 = vrot.slane %v1159_v13, 5  ;;  %v1753_v19 = vshll.u32 %v2154_v36, 16 }
  0xed   : > { %v1156_v59 = vor.u32 %v1155_v5, %v1151_v18  ;;  %1895 = vst.msk [vmem:[%s2296_s15 + $0x64] sm:$0xf] %vm1869_vm3, %v1862_v25  ;;  %v1746_v42 = vsel %vm2225_vm2, %v1741_v11, %v1745_v26  ;;  %v1749_v29 = vrot.slane %v1747_v12, 4  ;;  %v570_v53 = vshrl.u32 %v3085_v32, 16  ;;  %v2075_v11 = vld [vmem:[%s2201_s11 + $0x248] sm:$0x1] }
  0xee   : > { %v1269_v33 = vmax.bf16 %v1152_v20, %v805_v34  ;;  %v563_v9 = vrot.slane %v562_v16, 4  ;;  %v210_v7 = vmax.bf16 %v1993_v45, %v3085_v32  ;;  %v573_v51 = vshll.u32 %v3085_v32, 16  ;;  %v2136_v5 = vld [vmem:[%s2201_s11 + $0x178] sm:$0xf] }
  0xef   : > { %v1157_v41 = vrot.slane %v1156_v59, 4  ;;  %v1750_v49 = vor.u32 %v1749_v29, %v1745_v26  ;;  %v572_v21 = vrot.slane %v570_v53, 4  ;;  %v579_v10 = vshll.u32 %v3090_v40, 16  ;;  %v2155_v29 = vld [vmem:[%s2201_s11 + $0xbc] sm:$0x1] }
  0xf0   : > { %v1334_v37 = vmax.bf16 %v3051_v28, %v1269_v33  ;;  %v568_v50 = vsel %vm2225_vm2, %v563_v9, %v567_v44  ;;  %v1755_v38 = vrot.slane %v1753_v19, 5  ;;  %v575_v17 = vrot.slane %v573_v51, 5  ;;  %v2056_v28 = vld [vmem:[%s2201_s11 + $0x304] sm:$0xf]  ;;  %v2057_v44 = vld [vmem:[%s2201_s11 + $0x30c] sm:$0xf] }
  0xf1   : > { %v1164_v55 = vshrl.u32 %v3098_v46, 16  ;;  %v676_v57 = vmax.bf16 %v568_v50, %v209_v56  ;;  %v1162_v30 = vsel %vm2225_vm2, %v1157_v41, %v1161_v31  ;;  %v1751_v0 = vrot.slane %v1750_v49, 4 }
  0xf2   : > { %v1399_v54 = vmax.bf16 %v2135_v4, %v1334_v37  ;;  %v576_v58 = vor.u32 %v575_v17, %v572_v21  ;;  %v1167_v3 = vshll.u32 %v3098_v46, 16  ;;  %v1173_v18 = vshll.u32 %v3106_v22, 16 }
  0xf3   : > { %v1166_v47 = vrot.slane %v1164_v55, 4  ;;  %v741_v35 = vmax.bf16 %v3045_v43, %v676_v57  ;;  %v581_v39 = vrot.slane %v579_v10, 5  ;;  %v1758_v8 = vshrl.u32 %v3112_v60, 16  ;;  %v3148_v55 = vld [vmem:[%s2201_s11 + $0xb8] sm:$0xf] }
  0xf4   : > { %v1863_v62 = vmax.bf16 %v1746_v42, %v1399_v54  ;;  %v1756_v56 = vsel %vm2225_vm2, %v1751_v0, %v1755_v38  ;;  %v577_v15 = vrot.slane %v576_v58, 4  ;;  %v1169_v27 = vrot.slane %v1167_v3, 5  ;;  %v3151_v54 = vld [vmem:[%s2201_s11 + $0x24c] sm:$0xf]  ;;  %v2137_v57 = vld [vmem:[%s2201_s11 + $0x180] sm:$0xf] }
  0xf5   : > { %v1761_v6 = vshll.u32 %v3112_v60, 16  ;;  %v806_v2 = vmax.bf16 %v2056_v28, %v741_v35  ;;  %v1175_v48 = vrot.slane %v1173_v18, 5  ;;  %v1760_v43 = vrot.slane %v1758_v8, 4  ;;  %v2058_v18 = vld [vmem:[%s2201_s11 + $0x310] sm:$0xf] }
  0xf6   : > { %1896 = vst.msk [vmem:[%s2296_s15 + $0x68] sm:$0xf] %vm1869_vm3, %v1863_v62  ;;  %v1767_v24 = vshll.u32 %v3120_v63, 16  ;;  %v582_v26 = vsel %vm2225_vm2, %v577_v15, %v581_v39  ;;  %v1170_v13 = vor.u32 %v1169_v27, %v1166_v47  ;;  %v583_v20 = vshrl.u32 %v3090_v40, 16 }
  0xf7   : > { %v1763_v36 = vrot.slane %v1761_v6, 5  ;;  %v1270_v52 = vmax.bf16 %v1162_v30, %v806_v2  ;;  %v677_v32 = vmax.bf16 %v582_v26, %v210_v7  ;;  %v211_v25 = vmax.bf16 %v1994_v14, %v3090_v40  ;;  %v1995_v2 = vld [vmem:[%s2201_s11 + $0x180] sm:$0xf] }
  0xf8   : > { %v589_v34 = vshll.u32 %v228_v1, 16  ;;  %v1171_v12 = vrot.slane %v1170_v13, 4  ;;  %v585_v16 = vrot.slane %v583_v20, 4  ;;  %v1177_v59 = vshrl.u32 %v3106_v22, 16 }
  0xf9   : > { %v1764_v45 = vor.u32 %v1763_v36, %v1760_v43  ;;  %v1335_v31 = vmax.bf16 %v3056_v61, %v1270_v52  ;;  %v742_v19 = vmax.bf16 %v3098_v46, %v677_v32  ;;  %v1183_v42 = vshll.u32 %v2075_v11, 16  ;;  %v147_v61 = vld [vmem:[%s2201_s11 + $0xb4] sm:$0xf] }
  0xfa   : > { %v591_v33 = vrot.slane %v589_v34, 5  ;;  %v1176_v53 = vsel %vm2225_vm2, %v1171_v12, %v1175_v48  ;;  %v586_v4 = vor.u32 %v585_v16, %v581_v39  ;;  %v1179_v9 = vrot.slane %v1177_v59, 4  ;;  %v2108_v59 = vld [vmem:[%s2201_s11 + $0xc4] sm:$0xf] }
  0xfb   : > { %v1765_v40 = vrot.slane %v1764_v45, 4  ;;  %v1400_v41 = vmax.bf16 %v2136_v5, %v1335_v31  ;;  %v807_v7 = vmax.bf16 %v2057_v44, %v742_v19  ;;  %v1769_v51 = vrot.slane %v1767_v24, 5  ;;  %v2138_v44 = vld [vmem:[%s2201_s11 + $0x184] sm:$0xf] }
  0xfc   : > { %v1771_v37 = vshrl.u32 %v3120_v63, 16  ;;  %v587_v46 = vrot.slane %v586_v4, 4  ;;  %v1180_v49 = vor.u32 %v1179_v9, %v1175_v48  ;;  %v1777_v21 = vshll.u32 %v2155_v29, 16  ;;  %v3170_v48 = vld [vmem:[%s2201_s11 + $0xc0] sm:$0xf] }
  0xfd   : > { %v1864_v10 = vmax.bf16 %v1756_v56, %v1400_v41  ;;  %v1271_v50 = vmax.bf16 %v1176_v53, %v807_v7  ;;  %v1185_v38 = vrot.slane %v1183_v42, 5  ;;  %v1770_v28 = vsel %vm2225_vm2, %v1765_v40, %v1769_v51  ;;  %v3164_v56 = vld [vmem:[%s2201_s11 + $0x250] sm:$0xf]  ;;  %v1996_v42 = vld [vmem:[%s2201_s11 + $0x184] sm:$0xf] }
  0xfe   : > { %v1773_v17 = vrot.slane %v1771_v37, 4  ;;  %v592_v30 = vsel %vm2225_vm2, %v587_v46, %v591_v33  ;;  %v1181_v0 = vrot.slane %v1180_v49, 4  ;;  %v594_v58 = vshrl.u32 %v147_v61, 16  ;;  %v2076_v41 = vld [vmem:[%s2201_s11 + $0x254] sm:$0x1] }
  0xff   : > { %1897 = vst.msk [vmem:[%s2296_s15 + $0x6c] sm:$0xf] %vm1869_vm3, %v1864_v10  ;;  %v1336_v47 = vmax.bf16 %v3112_v60, %v1271_v50  ;;  %v678_v3 = vmax.bf16 %v592_v30, %v211_v25  ;;  %v597_v35 = vshll.u32 %v147_v61, 16  ;;  %v1779_v39 = vrot.slane %v1777_v21, 5  ;;  %v229_v25 = vld [vmem:[%s2201_s11 + $0xbc] sm:$0x1] }
 0x100   : > { %v1774_v62 = vor.u32 %v1773_v17, %v1769_v51  ;;  %v596_v8 = vrot.slane %v594_v58, 4  ;;  %v603_v14 = vshll.u32 %v3148_v55, 16  ;;  %v1188_v15 = vshrl.u32 %v3151_v54, 16  ;;  %v2059_v49 = vld [vmem:[%s2201_s11 + $0x318] sm:$0xf] }
 0x101   : > { %v1401_v27 = vmax.bf16 %v2137_v57, %v1336_v47  ;;  %v743_v6 = vmax.bf16 %v3106_v22, %v678_v3  ;;  %v599_v60 = vrot.slane %v597_v35, 5  ;;  %v1186_v43 = vsel %vm2225_vm2, %v1181_v0, %v1185_v38  ;;  %v2156_v35 = vld [vmem:[%s2201_s11 + $0xc8] sm:$0x1] }
 0x102   : > { %v1775_v1 = vrot.slane %v1774_v62, 4  ;;  %v1190_v24 = vrot.slane %v1188_v15, 4  ;;  %v1191_v26 = vshll.u32 %v3151_v54, 16  ;;  %v1197_v22 = vshll.u32 %v3164_v56, 16  ;;  %v2139_v15 = vld [vmem:[%s2201_s11 + $0x18c] sm:$0xf] }
 0x103   : > { %v1865_v13 = vmax.bf16 %v1770_v28, %v1401_v27  ;;  %v808_v36 = vmax.bf16 %v2058_v18, %v743_v6  ;;  %v600_v20 = vor.u32 %v599_v60, %v596_v8  ;;  %v212_v11 = vmax.bf16 %v1995_v2, %v147_v61  ;;  %v2060_v2 = vld [vmem:[%s2201_s11 + $0x31c] sm:$0xf] }
 0x104   : > { %v1193_v52 = vrot.slane %v1191_v26, 5  ;;  %v1782_v5 = vshrl.u32 %v3170_v48, 16  ;;  %v1785_v32 = vshll.u32 %v3170_v48, 16  ;;  %v1780_v12 = vsel %vm2225_vm2, %v1775_v1, %v1779_v39 }
 0x105   : > { %1898 = vst.msk [vmem:[%s2296_s15 + $0x70] sm:$0xf] %vm1869_vm3, %v1865_v13  ;;  %v1272_v34 = vmax.bf16 %v1186_v43, %v808_v36  ;;  %v601_v45 = vrot.slane %v600_v20, 4  ;;  %v605_v16 = vrot.slane %v603_v14, 5  ;;  %v607_v29 = vshrl.u32 %v3148_v55, 16 }
 0x106   : > { %v1194_v31 = vor.u32 %v1193_v52, %v1190_v24  ;;  %v1784_v19 = vrot.slane %v1782_v5, 4  ;;  %v1787_v33 = vrot.slane %v1785_v32, 5  ;;  %v1199_v4 = vrot.slane %v1197_v22, 5 }
 0x107   : > { %v1337_v53 = vmax.bf16 %v3120_v63, %v1272_v34  ;;  %v606_v40 = vsel %vm2225_vm2, %v601_v45, %v605_v16  ;;  %v613_v9 = vshll.u32 %v229_v25, 16  ;;  %v1791_v37 = vshll.u32 %v2108_v59, 16 }
 0x108   : > { %v679_v7 = vmax.bf16 %v606_v40, %v212_v11  ;;  %v1195_v51 = vrot.slane %v1194_v31, 4  ;;  %v609_v61 = vrot.slane %v607_v29, 4  ;;  %v1788_v21 = vor.u32 %v1787_v33, %v1784_v19 }
 0x109   : > { %v1402_v46 = vmax.bf16 %v2138_v44, %v1337_v53  ;;  %v213_v10 = vmax.bf16 %v1996_v42, %v3148_v55  ;;  %v1201_v50 = vshrl.u32 %v3164_v56, 16  ;;  %v615_v17 = vrot.slane %v613_v9, 5 }
 0x10a   : > { %v744_v63 = vmax.bf16 %v3151_v54, %v679_v7  ;;  %v610_v38 = vor.u32 %v609_v61, %v605_v16  ;;  %v1207_v57 = vshll.u32 %v2076_v41, 16  ;;  %v1200_v30 = vsel %vm2225_vm2, %v1195_v51, %v1199_v4 }
 0x10b   : > { %v1866_v28 = vmax.bf16 %v1780_v12, %v1402_v46  ;;  %v1203_v0 = vrot.slane %v1201_v50, 4  ;;  %v1795_v58 = vshrl.u32 %v2108_v59, 16  ;;  %v1793_v3 = vrot.slane %v1791_v37, 5 }
 0x10c   : > { %v809_v47 = vmax.bf16 %v2059_v49, %v744_v63  ;;  %v611_v18 = vrot.slane %v610_v38, 4  ;;  %v1789_v55 = vrot.slane %v1788_v21, 4  ;;  %v1209_v14 = vrot.slane %v1207_v57, 5 }
 0x10d   : > { %1899 = vst.msk [vmem:[%s2296_s15 + $0x74] sm:$0xf] %vm1869_vm3, %v1866_v28  ;;  %v1204_v62 = vor.u32 %v1203_v0, %v1199_v4  ;;  %v1797_v54 = vrot.slane %v1795_v58, 4  ;;  %v1801_v43 = vshll.u32 %v2156_v35, 16 }
 0x10e   : > { %v1273_v39 = vmax.bf16 %v1200_v30, %v809_v47  ;;  %v616_v8 = vsel %vm2225_vm2, %v611_v18, %v615_v17  ;;  %v1794_v24 = vsel %vm2225_vm2, %v1789_v55, %v1793_v3 }
 0x10f   : > { %v680_v27 = vmax.bf16 %v616_v8, %v213_v10  ;;  %v1205_v6 = vrot.slane %v1204_v62, 4  ;;  %v1798_v60 = vor.u32 %v1797_v54, %v1793_v3  ;;  %v1803_v52 = vrot.slane %v1801_v43, 5 }
 0x110   : > { %v1338_v1 = vmax.bf16 %v3170_v48, %v1273_v39  ;;  %v2140_v48 = vld [vmem:[%s2201_s11 + $0x190] sm:$0xf] }
 0x111   : > { %v745_v26 = vmax.bf16 %v3164_v56, %v680_v27  ;;  %v1210_v36 = vsel %vm2225_vm2, %v1205_v6, %v1209_v14  ;;  %v1799_v11 = vrot.slane %v1798_v60, 4 }
 0x112   : > { %v1403_v13 = vmax.bf16 %v2139_v15, %v1338_v1 }
 0x113   : > { %v810_v20 = vmax.bf16 %v2060_v2, %v745_v26  ;;  %v1804_v25 = vsel %vm2225_vm2, %v1799_v11, %v1803_v52 }
 0x114   : > { %v1867_v22 = vmax.bf16 %v1794_v24, %v1403_v13 }
 0x115   : > { %v1274_v5 = vmax.bf16 %v1210_v36, %v810_v20 }
 0x116   : > { %1900 = vst.msk [vmem:[%s2296_s15 + $0x78] sm:$0xf] %vm1869_vm3, %v1867_v22 }
 0x117   : > { %v1339_v32 = vmax.bf16 %v2108_v59, %v1274_v5 }
 0x119   : > { %v1404_v34 = vmax.bf16 %v2140_v48, %v1339_v32 }
 0x11b   : > { %v1868_v44 = vmax.bf16 %v1804_v25, %v1404_v34 }
 0x11d   : > { %1901 = vst.msk [vmem:[%s2296_s15 + $0x7c] sm:$0xf] %vm1869_vm3, %v1868_v44 }
 0x11e PF: > { %s11_s6 = sadd.s32 1, %s2175_s6  }
 0x11f   : > { %p8_p4 = scmp.ge.s32.totalorder %s11_s6, 4  }
 0x121   :  { %10 = sbr.rel (!%p8_p4) target bundleno = 1 (0x1), region = 59 }

// kernel: _lambda_.10
= control target key start
LH: loop header
LB: loop body
LE: loop exit
PB: predicated region body
PF: predicated region fallthrough
CT: control target
= control target key end

     0   :  { %s2236_s30 = smov 0   ;;  %s2560_s0 = inlined_call_operand.vmem [shape: bf16[2,4,4,4,64], index: 0, kind: input, shape index: {}]   ;;  %s2561_s1 = inlined_call_operand.vmem [shape: bf16[64,32], index: 1, kind: input, shape index: {}]   ;;  %s2562_s2 = inlined_call_operand.vmem [shape: f32[1,32], index: 2, kind: input, shape index: {}]   ;;  %s2563_s3 = inlined_call_operand.vmem [shape: bf16[9,32,32], index: 3, kind: input, shape index: {}]   ;;  %s2564_s4 = inlined_call_operand.vmem [shape: f32[1,32], index: 4, kind: input, shape index: {}]   ;;  %s2565_s5 = inlined_call_operand.vmem [shape: bf16[32,128], index: 5, kind: input, shape index: {}]   ;;  %s2566_s6 = inlined_call_operand.vmem [shape: f32[1,128], index: 6, kind: input, shape index: {}]   ;;  %s2567_s7 = inlined_call_operand.vmem [shape: bf16[64,128], index: 7, kind: input, shape index: {}]   ;;  %s2568_s8 = inlined_call_operand.vmem [shape: f32[1,128], index: 8, kind: input, shape index: {}]   ;;  %s2569_s9 = inlined_call_operand.vmem [shape: bf16[2,16,128], index: 9, kind: output, shape index: {}]  }
   0x1 LB: > { %s1783_s10 = sadd.s32 4294967295, %s2181_s30   ;;  %p1787_p0 = scmp.ge.s32.totalorder %s2181_s30, 1  ;;  %s2181_s30 = sphi %s2236_s30, %s19_s30  }
   0x2   : > { %p287_p1 = scmp.lt.s32.totalorder %s2181_s30, 3 }
   0x4   : > { %p288_p2 = pnand %p1787_p0, %p287_p1 }
   0x5   : > { %v2117_v0 = vld [vmem:[%s2561_s1] sm:$0xff] (!%p288_p2)   ;;  %v2183_v1 = vmov (!%p288_p2), 0.0   ;;  %v383_v3 = vlaneseq (!%p288_p2)  ;;  %v2119_v4 = vld [vmem:[%s2561_s1 + $0x8] sm:$0xff] (!%p288_p2)   ;;  %vm2184_vm0 = vmmov (!%p288_p2), 0   ;;  %p323_p3 = scmp.lt.s32.totalorder (!%p288_p2), %s1783_s10, 1  ;;  %v2121_v7 = vld [vmem:[%s2561_s1 + $0x10] sm:$0xff] (!%p288_p2)  }
   0x6   : > { %291 = sbr.rel (%p288_p2) target bundleno = 749 (0x2ed), region = 56  ;;  %1966 = vmatprep.subr.bf16.mxu0 (!%p288_p2), %v2183_v1  ;;  %1978 = vmatprep.subr.bf16.mxu1 (!%p288_p2), %v2183_v1  ;;  %v2118_v2 = vld [vmem:[%s2561_s1] sm:$0xff] (!%p288_p2)   ;;  %v2120_v5 = vld [vmem:[%s2561_s1 + $0x8] sm:$0xff] (!%p288_p2)   ;;  %v2122_v8 = vld [vmem:[%s2561_s1 + $0x10] sm:$0xff] (!%p288_p2)   ;;  %vm334_vm1 = vcmask (!%p288_p2), 258048   ;;  %vm419_vm2 = vcmask (!%p288_p2), 523264  }
   0x7   : > { %1967 = vmatpush3.bf16.msra.mxu0 (!%p288_p2), %v2117_v0  ;;  %1974 = vmatprep.mubr.msk.bf16.mxu0 (!%p288_p2), %vm2184_vm0, %v2183_v1  ;;  %v384_v6 = vshrl.u32 (!%p288_p2), %v383_v3, 7  ;;  %v2123_v9 = vld [vmem:[%s2561_s1 + $0x18] sm:$0xff] (!%p288_p2)   ;;  %350 = vst.msk [vmem:[#allocation2 + $0x78] sm:$0x1f] (!%p288_p2), %vm334_vm1, %v2183_v1  ;;  %351 = vst.msk [vmem:[#allocation2 + $0x80] sm:$0x1f] (!%p288_p2), %vm334_vm1, %v2183_v1 }
   0x8   : > { %1979 = vmatpush3.bf16.msra.mxu1 (!%p288_p2), %v2118_v2  ;;  %1968 = vmatprep.subr.bf16.mxu0 (!%p288_p2), %v2183_v1  ;;  %335 = vst.msk [vmem:[#allocation2] sm:$0x1f] (!%p288_p2), %vm334_vm1, %v2183_v1  ;;  %336 = vst.msk [vmem:[#allocation2 + $0x8] sm:$0x1f] (!%p288_p2), %vm334_vm1, %v2183_v1  ;;  %v2185_v15 = vmov (!%p288_p2), 1983009808  }
   0x9   : > { %1980 = vmatprep.subr.bf16.mxu1 (!%p288_p2), %v2183_v1  ;;  %1986 = vmatprep.mubr.msk.bf16.mxu1 (!%p288_p2), %vm2184_vm0, %v2183_v1  ;;  %337 = vst.msk [vmem:[#allocation2 + $0x10] sm:$0x1f] (!%p288_p2), %vm334_vm1, %v2183_v1  ;;  %338 = vst.msk [vmem:[#allocation2 + $0x18] sm:$0x1f] (!%p288_p2), %vm334_vm1, %v2183_v1  ;;  %v381_v16 = vunpack.c.l.s4 (!%p288_p2), %v2185_v15  ;;  %v2124_v20 = vld [vmem:[%s2561_s1 + $0x18] sm:$0xff] (!%p288_p2)   ;;  %v2125_v31 = vld [vmem:[%s2561_s1] sm:$0xff] (!%p288_p2)  }
   0xa   : > { %339 = vst.msk [vmem:[#allocation2 + $0x20] sm:$0x1f] (!%p288_p2), %vm334_vm1, %v2183_v1  ;;  %340 = vst.msk [vmem:[#allocation2 + $0x28] sm:$0x1f] (!%p288_p2), %vm334_vm1, %v2183_v1  ;;  %v2126_v32 = vld [vmem:[%s2561_s1] sm:$0xff] (!%p288_p2)   ;;  %v2127_v35 = vld [vmem:[%s2561_s1 + $0x8] sm:$0xff] (!%p288_p2)  }
   0xb   : > { %1969 = vmatpush3.bf16.msra.mxu0 (!%p288_p2), %v2119_v4  ;;  %341 = vst.msk [vmem:[#allocation2 + $0x30] sm:$0x1f] (!%p288_p2), %vm334_vm1, %v2183_v1  ;;  %342 = vst.msk [vmem:[#allocation2 + $0x38] sm:$0x1f] (!%p288_p2), %vm334_vm1, %v2183_v1  ;;  %v382_v23 = vunpack.c.0.s8 (!%p288_p2), %v381_v16  ;;  %v2128_v36 = vld [vmem:[%s2561_s1 + $0x8] sm:$0xff] (!%p288_p2)   ;;  %v2129_v45 = vld [vmem:[%s2561_s1 + $0x10] sm:$0xff] (!%p288_p2)  }
   0xc   : > { %1981 = vmatpush3.bf16.msra.mxu1 (!%p288_p2), %v2120_v5  ;;  %1970 = vmatprep.subr.bf16.mxu0 (!%p288_p2), %v2183_v1  ;;  %343 = vst.msk [vmem:[#allocation2 + $0x40] sm:$0x1f] (!%p288_p2), %vm334_vm1, %v2183_v1  ;;  %344 = vst.msk [vmem:[#allocation2 + $0x48] sm:$0x1f] (!%p288_p2), %vm334_vm1, %v2183_v1  ;;  %v2130_v46 = vld [vmem:[%s2561_s1 + $0x10] sm:$0xff] (!%p288_p2)   ;;  %v2131_v51 = vld [vmem:[%s2561_s1 + $0x18] sm:$0xff] (!%p288_p2)  }
   0xd   : > { %s2571_s10 = smov (!%p323_p3, %s1783_s10), 1  ;;  %1982 = vmatprep.subr.bf16.mxu1 %v2183_v1  ;;  %345 = vst.msk [vmem:[#allocation2 + $0x50] sm:$0x1f] %vm334_vm1, %v2183_v1  ;;  %346 = vst.msk [vmem:[#allocation2 + $0x58] sm:$0x1f] %vm334_vm1, %v2183_v1  ;;  %v2332_v26 = vsub.s32 %v382_v23, %v384_v6  ;;  %v2132_v52 = vld [vmem:[%s2561_s1 + $0x18] sm:$0xff]  }
   0xe   : > { %s1902_s21 = sshll.u32 %s2571_s10, 5  ;;  %347 = vst.msk [vmem:[#allocation2 + $0x60] sm:$0x1f] %vm334_vm1, %v2183_v1  ;;  %348 = vst.msk [vmem:[#allocation2 + $0x68] sm:$0x1f] %vm334_vm1, %v2183_v1  ;;  %v2133_v59 = vld [vmem:[%s2563_s3 + $0x10] sm:$0xff]  }
   0xf   : > { %s2277_s26 = scalar_lea.vmem %s2560_s0, %s1902_s21  ;;  %352 = vst.msk [vmem:[#allocation2 + $0x88] sm:$0x1f] %vm334_vm1, %v2183_v1  ;;  %353 = vst.msk [vmem:[#allocation2 + $0x90] sm:$0x1f] %vm334_vm1, %v2183_v1  ;;  %1971 = vmatpush3.bf16.msra.mxu0 %v2121_v7  ;;  %v2134_v60 = vld [vmem:[%s2563_s3 + $0x20] sm:$0xff]   ;;  %v2135_v61 = vld [vmem:[%s2563_s3 + $0x18] sm:$0xff]  }
  0x10   : > { %v355_v10 = vld [vmem:[%s2277_s26] sm:$0x3]  ;;  %v356_v11 = vld [vmem:[%s2277_s26 + $0x2] sm:$0x3]  ;;  %v357_v12 = vld [vmem:[%s2277_s26 + $0x4] sm:$0x3]  ;;  %1983 = vmatpush3.bf16.msra.mxu1 %v2122_v8  ;;  %1972 = vmatprep.subr.bf16.mxu0 %v2183_v1 }
  0x11   : > { %v358_v13 = vld [vmem:[%s2277_s26 + $0x6] sm:$0x3]  ;;  %v1798_v14 = vld [vmem:[%s2277_s26 + $0x8] sm:$0x3]  ;;  %v1799_v17 = vld [vmem:[%s2277_s26 + $0xa] sm:$0x3]  ;;  %v378_v21 = vcombine.low %v355_v10, %v356_v11  ;;  %1984 = vmatprep.subr.bf16.mxu1 %v2183_v1 }
  0x12   : > { %v1800_v18 = vld [vmem:[%s2277_s26 + $0xc] sm:$0x3]  ;;  %v1801_v19 = vld [vmem:[%s2277_s26 + $0xe] sm:$0x3]  ;;  %v379_v22 = vcombine.low %v357_v12, %v358_v13  ;;  %v502_v24 = vcombine.low %v1798_v14, %v1799_v17  ;;  %v1808_v37 = vld [vmem:[%s2277_s26 + $0x10] sm:$0x3] }
  0x13   : > { %v503_v25 = vcombine.low %v1800_v18, %v1801_v19  ;;  %1973 = vmatpush3.bf16.msra.mxu0 %v2123_v9  ;;  %v386_v27 = vrot.slane %v378_v21, %v2332_v26  ;;  %v1809_v38 = vld [vmem:[%s2277_s26 + $0x12] sm:$0x3]  ;;  %v1810_v39 = vld [vmem:[%s2277_s26 + $0x14] sm:$0x3]  ;;  %v1811_v40 = vld [vmem:[%s2277_s26 + $0x16] sm:$0x3] }
  0x14   : > { %1985 = vmatpush3.bf16.msra.mxu1 %v2124_v20  ;;  %1990 = vmatprep.subr.bf16.mxu0 %v2183_v1  ;;  %v393_v28 = vrot.slane %v379_v22, %v2332_v26  ;;  %v510_v29 = vrot.slane %v502_v24, %v2332_v26  ;;  %v1818_v41 = vld [vmem:[%s2277_s26 + $0x18] sm:$0x3]  ;;  %v1819_v42 = vld [vmem:[%s2277_s26 + $0x1a] sm:$0x3]  ;;  %v1820_v43 = vld [vmem:[%s2277_s26 + $0x1c] sm:$0x3]  ;;  %v624_v47 = vcombine.low %v1808_v37, %v1809_v38 }
  0x15   : > { %2002 = vmatprep.subr.bf16.mxu1 %v2183_v1  ;;  %v517_v30 = vrot.slane %v503_v25, %v2332_v26  ;;  %v1821_v44 = vld [vmem:[%s2277_s26 + $0x1e] sm:$0x3]  ;;  %v625_v48 = vcombine.low %v1810_v39, %v1811_v40  ;;  %v746_v49 = vcombine.low %v1818_v41, %v1819_v42  ;;  %v2136_v62 = vld [vmem:[%s2563_s3 + $0x28] sm:$0xff]   ;;  %v1792_v63 = vld [vmem:[%s2562_s2] ss:$0 sm:$0xff]  ;;  %vm473_vm3 = vcmask 257024  }
  0x16   : > { %v394_v33 = vcombine.low %v386_v27, %v393_v28  ;;  %v747_v50 = vcombine.low %v1820_v43, %v1821_v44  ;;  %v632_v53 = vrot.slane %v624_v47, %v2332_v26  ;;  %vm892_vm4 = vcmask 261120   ;;  %v2139_v43 = vld [vmem:[%s2563_s3] sm:$0xff]   ;;  %s1903_s11 = sshll.u32 %s2571_s10, 3 }
  0x17   : > { %v518_v34 = vcombine.low %v510_v29, %v517_v30  ;;  %v639_v54 = vrot.slane %v625_v48, %v2332_v26  ;;  %v754_v55 = vrot.slane %v746_v49, %v2332_v26  ;;  %v2142_v48 = vld [vmem:[%s2563_s3 + $0x40] sm:$0xff]   ;;  %s332_s14 = scalar_lea.vmem %s2569_s9, %s1903_s11 }
  0x18   : > { %1975 = vmatmul.mubr.msk.bf16.vlgmr.msra.gmra.mrb[0].mxu0 %vm419_vm2, %v394_v33  ;;  %v761_v56 = vrot.slane %v747_v50, %v2332_v26  ;;  %v2143_v50 = vld [vmem:[%s2563_s3 + $0x8] sm:$0xff]  }
  0x19   : > { %1987 = vmatmul.mubr.msk.bf16.vlgmr.msra.gmra.mrb[0].mxu1 %vm419_vm2, %v518_v34  ;;  %1991 = vmatpush3.bf16.msra.mxu0 %v2125_v31  ;;  %v640_v57 = vcombine.low %v632_v53, %v639_v54 }
  0x1a   : > { %2003 = vmatpush3.bf16.msra.mxu1 %v2126_v32  ;;  %1992 = vmatprep.subr.bf16.mxu0 %v2183_v1  ;;  %v762_v58 = vcombine.low %v754_v55, %v761_v56  ;;  %v2147_v55 = vld [vmem:[%s2563_s3 + $0x30] sm:$0xff]  }
  0x1b   : > { %2004 = vmatprep.subr.bf16.mxu1 %v2183_v1  ;;  %1998 = vmatprep.mubr.msk.bf16.mxu0 %vm2184_vm0, %v2183_v1 }
  0x1c   : > { %2010 = vmatprep.mubr.msk.bf16.mxu1 %vm2184_vm0, %v2183_v1 }
  0x1d   : > { %1993 = vmatpush3.bf16.msra.mxu0 %v2127_v35 }
  0x1e   : > { %2005 = vmatpush3.bf16.msra.mxu1 %v2128_v36  ;;  %1994 = vmatprep.subr.bf16.mxu0 %v2183_v1 }
  0x1f   : > { %2006 = vmatprep.subr.bf16.mxu1 %v2183_v1 }
  0x21   : > { %1995 = vmatpush3.bf16.msra.mxu0 %v2129_v45 }
  0x22   : > { %2007 = vmatpush3.bf16.msra.mxu1 %v2130_v46  ;;  %1996 = vmatprep.subr.bf16.mxu0 %v2183_v1 }
  0x23   : > { %2008 = vmatprep.subr.bf16.mxu1 %v2183_v1 }
  0x25   : > { %1997 = vmatpush3.bf16.msra.mxu0 %v2131_v51  ;;  %v2144_v51 = vld [vmem:[%s2563_s3 + $0x48] sm:$0xff]  }
  0x26   : > { %2009 = vmatpush3.bf16.msra.mxu1 %v2132_v52  ;;  %2030 = vmatprep.subr.bf16.mxu0 %v2183_v1 }
  0x27   : > { %2014 = vmatprep.subr.bf16.mxu1 %v2183_v1 }
  0x28   : > { %1999 = vmatmul.mubr.msk.bf16.vlgmr.msra.gmra.mrb[4].mxu0 %vm419_vm2, %v640_v57 }
  0x29   : > { %2011 = vmatmul.mubr.msk.bf16.vlgmr.msra.gmra.mrb[4].mxu1 %vm419_vm2, %v762_v58  ;;  %2034 = vmatprep.mubr.msk.bf16.mxu0 %vm2184_vm0, %v2183_v1  ;;  %v2150_v58 = vld [vmem:[%s2563_s3 + $0x60] sm:$0xff]  }
  0x2a   : > { %2018 = vmatprep.mubr.msk.bf16.mxu1 %vm2184_vm0, %v2183_v1  ;;  %2015 = vmatpush3.bf16.msra.mxu1 %v2133_v59 }
  0x2b   : > { %2031 = vmatpush3.bf16.msra.mxu0 %v2134_v60  ;;  %2016 = vmatprep.subr.bf16.mxu1 %v2183_v1  ;;  %v2151_v60 = vld [vmem:[%s2563_s3 + $0x38] sm:$0xff]  }
  0x2c   : > { %2032 = vmatprep.subr.bf16.mxu0 %v2183_v1 }
  0x2e   : > { %2017 = vmatpush3.bf16.msra.mxu1 %v2135_v61  ;;  %v2152_v61 = vld [vmem:[%s2563_s3 + $0x68] sm:$0xff]  }
  0x2f   : > { %2033 = vmatpush3.bf16.msra.mxu0 %v2136_v62  ;;  %2022 = vmatprep.subr.bf16.mxu1 %v2183_v1 }
  0x30   : > { %2046 = vmatprep.subr.bf16.mxu0 %v2183_v1 }
  0xeb   : > { %v457_v0 = vpop.f32.mrb[0].mxu0 }
  0xec   : > { %v580_v2 = vpop.f32.mrb[0].mxu1  ;;  %v458_v3 = vadd.f32 %v1792_v63, %v457_v0  ;;  %v1976_v4 = vpop.f32.mrb[1].mxu0 }
  0xed   : > { %v581_v5 = vadd.f32 %v1792_v63, %v580_v2  ;;  %v1988_v6 = vpop.f32.mrb[1].mxu1  ;;  %v460_v7 = vpop.f32.mrb[2].mxu0 }
  0xee   : > { %v583_v8 = vpop.f32.mrb[2].mxu1  ;;  %v464_v9 = vmax.f32 %v458_v3, 0.0  ;;  %v461_v10 = vadd.f32 %v1792_v63, %v460_v7  ;;  %v1977_v11 = vpop.f32.mrb[3].mxu0  ;;  %v2155_v3 = vld [vmem:[%s2563_s3 + $0x50] sm:$0xff]   ;;  %v2159_v7 = vld [vmem:[%s2563_s3 + $0x58] sm:$0xff]  }
  0xef   : > { %v587_v12 = vmax.f32 %v581_v5, 0.0  ;;  %v584_v13 = vadd.f32 %v1792_v63, %v583_v8  ;;  %v1989_v14 = vpop.f32.mrb[3].mxu1  ;;  %v2158_v5 = vld [vmem:[%s2563_s3 + $0x80] sm:$0xff]   ;;  %v2160_v8 = vld [vmem:[%s2563_s3 + $0x88] sm:$0xff]  }
  0xf0   : > { %v468_v15 = vcombine.high %v464_v9, %v464_v9  ;;  %474 = vst.msk [vmem:[#allocation2 + $0x78] sm:$0xf] %vm473_vm3, %v464_v9  ;;  %v465_v16 = vmax.f32 %v461_v10, 0.0 }
  0xf1   : > { %v591_v17 = vcombine.high %v587_v12, %v587_v12  ;;  %596 = vst.msk [vmem:[#allocation2 + $0x51] sm:$0xf] %vm473_vm3, %v587_v12  ;;  %v588_v18 = vmax.f32 %v584_v13, 0.0  ;;  %v2163_v13 = vld [vmem:[%s2563_s3 + $0x70] sm:$0xff]  }
  0xf2   : > { %475 = vst.msk [vmem:[#allocation2 + $0x80] sm:$0xf] %vm473_vm3, %v468_v15  ;;  %v469_v19 = vcombine.high %v465_v16, %v465_v16  ;;  %476 = vst.msk [vmem:[#allocation2 + $0x88] sm:$0xf] %vm473_vm3, %v465_v16  ;;  %v2166_v16 = vld [vmem:[%s2563_s3 + $0x78] sm:$0xff]  }
  0xf3   : > { %597 = vst.msk [vmem:[#allocation2 + $0x59] sm:$0xf] %vm473_vm3, %v591_v17  ;;  %v592_v20 = vcombine.high %v588_v18, %v588_v18  ;;  %598 = vst.msk [vmem:[#allocation2 + $0x61] sm:$0xf] %vm473_vm3, %v588_v18 }
  0xf4   : > { %477 = vst.msk [vmem:[#allocation2 + $0x90] sm:$0xf] %vm473_vm3, %v469_v19 }
  0xf5   : > { %599 = vst.msk [vmem:[#allocation2 + $0x69] sm:$0xf] %vm473_vm3, %v592_v20  ;;  %v2169_v20 = vld [vmem:[%s2567_s7] sm:$0xff]  }
  0xf9   : > { %v2148_v56 = vld [vmem:[#allocation2 + $0x78] ss:$8 sps:$4 sm:$0xff]  }
  0xfa   : > { %v2153_v62 = vld [vmem:[#allocation2 + $0x50] ss:$8 sps:$4 sm:$0xff]  }
  0xfb   : > { %v702_v21 = vpop.f32.mrb[4].mxu0  ;;  %v2149_v52 = vld [vmem:[#allocation2 + $0x88] ss:$8 sps:$4 sm:$0xff]  }
  0xfc   : > { %v824_v22 = vpop.f32.mrb[4].mxu1  ;;  %v703_v23 = vadd.f32 %v1792_v63, %v702_v21  ;;  %v2000_v25 = vpop.f32.mrb[5].mxu0  ;;  %v1157_v59 = vpack.c.bf16 %v2149_v52, %v2148_v56  ;;  %v2161_v9 = vld [vmem:[#allocation2 + $0x51] ss:$8 sps:$4 sm:$0xff]   ;;  %v2162_v10 = vld [vmem:[#allocation2 + $0x61] ss:$8 sps:$4 sm:$0xff]  }
  0xfd   : > { %v825_v24 = vadd.f32 %v1792_v63, %v824_v22  ;;  %v2012_v27 = vpop.f32.mrb[5].mxu1  ;;  %v705_v28 = vpop.f32.mrb[6].mxu0  ;;  %v1233_v14 = vpack.c.bf16 %v2162_v10, %v2161_v9  ;;  %v2170_v21 = vld [vmem:[%s2567_s7 + $0x8] sm:$0xff]   ;;  %v2171_v22 = vld [vmem:[%s2565_s5] sm:$0xff]  }
  0xfe   : > { %v827_v29 = vpop.f32.mrb[6].mxu1  ;;  %v709_v30 = vmax.f32 %v703_v23, 0.0  ;;  %v706_v32 = vadd.f32 %v1792_v63, %v705_v28  ;;  %v2001_v34 = vpop.f32.mrb[7].mxu0  ;;  %v2172_v23 = vld [vmem:[%s2567_s7 + $0x10] sm:$0xff]   ;;  %v1604_v25 = vld [vmem:[%s2277_s26] sm:$0x3] }
  0xff   : > { %v831_v31 = vmax.f32 %v825_v24, 0.0  ;;  %v828_v33 = vadd.f32 %v1792_v63, %v827_v29  ;;  %v2013_v35 = vpop.f32.mrb[7].mxu1  ;;  %v2154_v63 = vld [vmem:[#allocation2 + $0x60] ss:$8 sps:$4 sm:$0xff]   ;;  %v2174_v28 = vld [vmem:[%s2567_s7 + $0x18] sm:$0xff]  }
 0x100   : > { %v713_v36 = vcombine.high %v709_v30, %v709_v30  ;;  %718 = vst.msk [vmem:[#allocation2 + $0x30] sm:$0xf] %vm473_vm3, %v709_v30  ;;  %v710_v38 = vmax.f32 %v706_v32, 0.0  ;;  %v1081_v4 = vpack.c.bf16 %v2154_v63, %v2153_v62  ;;  %v2173_v24 = vld [vmem:[%s2565_s5 + $0x8] sm:$0xff]   ;;  %v1605_v27 = vld [vmem:[%s2277_s26 + $0x2] sm:$0x3] }
 0x101   : > { %v835_v37 = vcombine.high %v831_v31, %v831_v31  ;;  %840 = vst.msk [vmem:[#allocation2 + $0x9] sm:$0xf] %vm473_vm3, %v831_v31  ;;  %v832_v39 = vmax.f32 %v828_v33, 0.0  ;;  %v1606_v29 = vld [vmem:[%s2277_s26 + $0x4] sm:$0x3]  ;;  %v1620_v31 = vcombine.low %v1604_v25, %v1605_v27 }
 0x102   : > { %719 = vst.msk [vmem:[#allocation2 + $0x38] sm:$0xf] %vm473_vm3, %v713_v36  ;;  %v714_v40 = vcombine.high %v710_v38, %v710_v38  ;;  %720 = vst.msk [vmem:[#allocation2 + $0x40] sm:$0xf] %vm473_vm3, %v710_v38  ;;  %v1607_v30 = vld [vmem:[%s2277_s26 + $0x6] sm:$0x3] }
 0x103   : > { %841 = vst.msk [vmem:[#allocation2 + $0x11] sm:$0xf] %vm473_vm3, %v835_v37  ;;  %v836_v41 = vcombine.high %v832_v39, %v832_v39  ;;  %842 = vst.msk [vmem:[#allocation2 + $0x19] sm:$0xf] %vm473_vm3, %v832_v39  ;;  %v1621_v32 = vcombine.low %v1606_v29, %v1607_v30  ;;  %v1628_v33 = vrot.slane %v1620_v31, %v2332_v26 }
 0x104   : > { %721 = vst.msk [vmem:[#allocation2 + $0x48] sm:$0xf] %vm473_vm3, %v714_v40 }
 0x105   : > { %843 = vst.msk [vmem:[#allocation2 + $0x21] sm:$0xf] %vm473_vm3, %v836_v41  ;;  %v1635_v34 = vrot.slane %v1621_v32, %v2332_v26 }
 0x107   : > { %v2137_v42 = vld [vmem:[#allocation2 + $0x28] ss:$8 sps:$4 sm:$0xff]   ;;  %v1636_v35 = vcombine.low %v1628_v33, %v1635_v34  ;;  %v1888_v34 = vld [vmem:[%s2566_s6] ss:$0 sm:$0xff] }
 0x108   : > { %v2140_v44 = vld [vmem:[#allocation2 + $0x1] ss:$8 sps:$4 sm:$0xff]  }
 0x109   : > { %v2138_v45 = vld [vmem:[#allocation2 + $0x38] ss:$8 sps:$4 sm:$0xff]  }
 0x10a   : > { %v2141_v46 = vld [vmem:[#allocation2 + $0x11] ss:$8 sps:$4 sm:$0xff]   ;;  %v874_v47 = vpack.c.bf16 %v2138_v45, %v2137_v42  ;;  %v2145_v53 = vld [vmem:[#allocation2] ss:$8 sps:$4 sm:$0xff]  }
 0x10b   : > { %v1005_v49 = vpack.c.bf16 %v2141_v46, %v2140_v44  ;;  %v2146_v54 = vld [vmem:[#allocation2 + $0x10] ss:$8 sps:$4 sm:$0xff]   ;;  %v2168_v17 = vld [vmem:[#allocation2 + $0x40] ss:$8 sps:$4 sm:$0xff]  }
 0x10c   : > { %2019 = vmatmul.mubr.msk.bf16.vlgmr.msra.gmra.mrb[8].mxu1 %vm892_vm4, %v874_v47  ;;  %v856_v57 = vpack.c.bf16 %v2146_v54, %v2145_v53  ;;  %v2156_v0 = vld [vmem:[#allocation2 + $0x8] ss:$8 sps:$4 sm:$0xff]   ;;  %v2157_v2 = vld [vmem:[#allocation2 + $0x18] ss:$8 sps:$4 sm:$0xff]  }
 0x10d   : > { %2023 = vmatpush3.bf16.msra.mxu1 %v2139_v43  ;;  %2035 = vmatmul.mubr.msk.bf16.vlgmr.msra.gmra.mrb[8].mxu0 %vm892_vm4, %v1005_v49  ;;  %v1309_v6 = vpack.c.bf16 %v2157_v2, %v2156_v0  ;;  %v2164_v11 = vld [vmem:[#allocation2 + $0x9] ss:$8 sps:$4 sm:$0xff]   ;;  %v2165_v12 = vld [vmem:[#allocation2 + $0x19] ss:$8 sps:$4 sm:$0xff]  }
 0x10e   : > { %2047 = vmatpush3.bf16.msra.mxu0 %v2142_v48  ;;  %2024 = vmatprep.subr.bf16.mxu1 %v2183_v1  ;;  %v1461_v15 = vpack.c.bf16 %v2165_v12, %v2164_v11  ;;  %v2167_v18 = vld [vmem:[#allocation2 + $0x30] ss:$8 sps:$4 sm:$0xff]  }
 0x10f   : > { %2048 = vmatprep.subr.bf16.mxu0 %v2183_v1  ;;  %2026 = vmatprep.mubr.msk.bf16.mxu1 %vm2184_vm0, %v2183_v1  ;;  %v1385_v19 = vpack.c.bf16 %v2168_v17, %v2167_v18  ;;  %v1887_v18 = vld [vmem:[%s2564_s4] ss:$0 sm:$0xff] }
 0x110   : > { %2050 = vmatprep.mubr.msk.bf16.mxu0 %vm2184_vm0, %v2183_v1 }
 0x111   : > { %2025 = vmatpush3.bf16.msra.mxu1 %v2143_v50 }
 0x112   : > { %2049 = vmatpush3.bf16.msra.mxu0 %v2144_v51  ;;  %2038 = vmatprep.subr.bf16.mxu1 %v2183_v1 }
 0x113   : > { %2062 = vmatprep.subr.bf16.mxu0 %v2183_v1 }
 0x114   : > { %2027 = vmatmul.mubr.msk.bf16.vlgmr.msra.gmra.mrb[12].mxu1 %vm892_vm4, %v856_v57 }
 0x115   : > { %2039 = vmatpush3.bf16.msra.mxu1 %v2147_v55  ;;  %2051 = vmatmul.mubr.msk.bf16.vlgmr.msra.gmra.mrb[12].mxu0 %vm892_vm4, %v1157_v59 }
 0x116   : > { %2063 = vmatpush3.bf16.msra.mxu0 %v2150_v58  ;;  %2040 = vmatprep.subr.bf16.mxu1 %v2183_v1 }
 0x117   : > { %2064 = vmatprep.subr.bf16.mxu0 %v2183_v1  ;;  %2042 = vmatprep.mubr.msk.bf16.mxu1 %vm2184_vm0, %v2183_v1 }
 0x118   : > { %2066 = vmatprep.mubr.msk.bf16.mxu0 %vm2184_vm0, %v2183_v1 }
 0x119   : > { %2041 = vmatpush3.bf16.msra.mxu1 %v2151_v60 }
 0x11a   : > { %2065 = vmatpush3.bf16.msra.mxu0 %v2152_v61  ;;  %2054 = vmatprep.subr.bf16.mxu1 %v2183_v1 }
 0x11b   : > { %2078 = vmatprep.subr.bf16.mxu0 %v2183_v1 }
 0x11c   : > { %2043 = vmatmul.mubr.msk.bf16.vlgmr.msra.gmra.mrb[16].mxu1 %vm892_vm4, %v1081_v4 }
 0x11d   : > { %2055 = vmatpush3.bf16.msra.mxu1 %v2155_v3  ;;  %2067 = vmatmul.mubr.msk.bf16.vlgmr.msra.gmra.mrb[16].mxu0 %vm892_vm4, %v1309_v6 }
 0x11e   : > { %2079 = vmatpush3.bf16.msra.mxu0 %v2158_v5  ;;  %2056 = vmatprep.subr.bf16.mxu1 %v2183_v1 }
 0x11f   : > { %2080 = vmatprep.subr.bf16.mxu0 %v2183_v1  ;;  %2058 = vmatprep.mubr.msk.bf16.mxu1 %vm2184_vm0, %v2183_v1 }
 0x120   : > { %2082 = vmatprep.mubr.msk.bf16.mxu0 %vm2184_vm0, %v2183_v1 }
 0x121   : > { %2057 = vmatpush3.bf16.msra.mxu1 %v2159_v7 }
 0x122   : > { %2081 = vmatpush3.bf16.msra.mxu0 %v2160_v8  ;;  %2070 = vmatprep.subr.bf16.mxu1 %v2183_v1 }
 0x123   : > { %2094 = vmatprep.subr.bf16.mxu0 %v2183_v1 }
 0x124   : > { %2059 = vmatmul.mubr.msk.bf16.vlgmr.msra.gmra.mrb[20].mxu1 %vm892_vm4, %v1233_v14 }
 0x125   : > { %2071 = vmatpush3.bf16.msra.mxu1 %v2163_v13  ;;  %2083 = vmatmul.mubr.msk.bf16.vlgmr.msra.gmra.mrb[20].mxu0 %vm892_vm4, %v1461_v15 }
 0x126   : > { %2072 = vmatprep.subr.bf16.mxu1 %v2183_v1  ;;  %2074 = vmatprep.mubr.msk.bf16.mxu1 %vm2184_vm0, %v2183_v1 }
 0x127   : > { %2102 = vmatprep.mubr.msk.bf16.mxu0 %vm2184_vm0, %v2183_v1  ;;  %2095 = vmatpush3.bf16.msra.mxu0 %v2169_v20 }
 0x128   : > { %2096 = vmatprep.subr.bf16.mxu0 %v2183_v1 }
 0x129   : > { %2073 = vmatpush3.bf16.msra.mxu1 %v2166_v16 }
 0x12a   : > { %2086 = vmatprep.subr.bf16.mxu1 %v2183_v1 }
 0x12b   : > { %2097 = vmatpush3.bf16.msra.mxu0 %v2170_v21 }
 0x12c   : > { %2075 = vmatmul.mubr.msk.bf16.vlgmr.msra.gmra.mrb[24].mxu1 %vm892_vm4, %v1385_v19  ;;  %2098 = vmatprep.subr.bf16.mxu0 %v2183_v1 }
 0x12d   : > { %2090 = vmatprep.mubr.msk.bf16.mxu1 %vm2184_vm0, %v2183_v1  ;;  %2087 = vmatpush3.bf16.msra.mxu1 %v2171_v22 }
 0x12e   : > { %2088 = vmatprep.subr.bf16.mxu1 %v2183_v1 }
 0x12f   : > { %2099 = vmatpush3.bf16.msra.mxu0 %v2172_v23 }
 0x130   : > { %2100 = vmatprep.subr.bf16.mxu0 %v2183_v1 }
 0x131   : > { %2089 = vmatpush3.bf16.msra.mxu1 %v2173_v24 }
 0x133   : > { %2101 = vmatpush3.bf16.msra.mxu0 %v2174_v28 }
 0x136   : > { %2103 = vmatmul.mubr.msk.bf16.vlgmr.msra.gmra.mrb[24].mxu0 %vm419_vm2, %v1636_v35 }
 0x1df   : > { %v930_v36 = vpop.f32.mrb[8].mxu1 }
 0x1e0   : > { %v2020_v37 = vpop.f32.mrb[9].mxu1  ;;  %v1060_v38 = vpop.f32.mrb[8].mxu0 }
 0x1e1   : > { %v933_v39 = vpop.f32.mrb[10].mxu1  ;;  %v2036_v40 = vpop.f32.mrb[9].mxu0 }
 0x1e2   : > { %v2021_v41 = vpop.f32.mrb[11].mxu1  ;;  %v1063_v42 = vpop.f32.mrb[10].mxu0 }
 0x1e3   : > { %v2037_v43 = vpop.f32.mrb[11].mxu0 }
 0x1e7   : > { %v986_v44 = vpop.f32.mrb[12].mxu1 }
 0x1e8   : > { %v987_v1 = vadd.f32 %v986_v44, %v930_v36  ;;  %v1212_v45 = vpop.f32.mrb[12].mxu0  ;;  %v2028_v46 = vpop.f32.mrb[13].mxu1 }
 0x1e9   : > { %v2052_v47 = vpop.f32.mrb[13].mxu0  ;;  %v989_v48 = vpop.f32.mrb[14].mxu1 }
 0x1ea   : > { %v990_v26 = vadd.f32 %v989_v48, %v933_v39  ;;  %v1215_v49 = vpop.f32.mrb[14].mxu0  ;;  %v2029_v50 = vpop.f32.mrb[15].mxu1  ;;  %v1067_v51 = vadd.f32 %v1060_v38, %v987_v1  ;;  %v1897_v38 = vld [vmem:[%s2568_s8] ss:$0 sm:$0xff] }
 0x1eb   : > { %v2053_v52 = vpop.f32.mrb[15].mxu0 }
 0x1ec   : > { %v1068_v53 = vadd.f32 %v1063_v42, %v990_v26 }
 0x1ef   : > { %v1136_v54 = vpop.f32.mrb[16].mxu1 }
 0x1f0   : > { %v1143_v55 = vadd.f32 %v1136_v54, %v1067_v51  ;;  %v1364_v56 = vpop.f32.mrb[16].mxu0  ;;  %v2044_v57 = vpop.f32.mrb[17].mxu1 }
 0x1f1   : > { %v2068_v58 = vpop.f32.mrb[17].mxu0  ;;  %v1139_v59 = vpop.f32.mrb[18].mxu1 }
 0x1f2   : > { %v1144_v60 = vadd.f32 %v1139_v59, %v1068_v53  ;;  %v1367_v61 = vpop.f32.mrb[18].mxu0  ;;  %v2045_v62 = vpop.f32.mrb[19].mxu1  ;;  %v1219_v63 = vadd.f32 %v1212_v45, %v1143_v55 }
 0x1f3   : > { %v2069_v0 = vpop.f32.mrb[19].mxu0 }
 0x1f4   : > { %v1220_v2 = vadd.f32 %v1215_v49, %v1144_v60 }
 0x1f7   : > { %v1288_v3 = vpop.f32.mrb[20].mxu1 }
 0x1f8   : > { %v1295_v4 = vadd.f32 %v1288_v3, %v1219_v63  ;;  %v1516_v5 = vpop.f32.mrb[20].mxu0  ;;  %v2060_v6 = vpop.f32.mrb[21].mxu1 }
 0x1f9   : > { %v2084_v7 = vpop.f32.mrb[21].mxu0  ;;  %v1291_v8 = vpop.f32.mrb[22].mxu1 }
 0x1fa   : > { %v1296_v9 = vadd.f32 %v1291_v8, %v1220_v2  ;;  %v1519_v10 = vpop.f32.mrb[22].mxu0  ;;  %v2061_v11 = vpop.f32.mrb[23].mxu1  ;;  %v1371_v12 = vadd.f32 %v1364_v56, %v1295_v4 }
 0x1fb   : > { %v2085_v13 = vpop.f32.mrb[23].mxu0 }
 0x1fc   : > { %v1372_v14 = vadd.f32 %v1367_v61, %v1296_v9 }
 0x1ff   : > { %v1440_v15 = vpop.f32.mrb[24].mxu1 }
 0x200   : > { %v1447_v16 = vadd.f32 %v1440_v15, %v1371_v12  ;;  %v2076_v17 = vpop.f32.mrb[25].mxu1 }
 0x201   : > { %v1443_v19 = vpop.f32.mrb[26].mxu1 }
 0x202   : > { %v1523_v20 = vadd.f32 %v1516_v5, %v1447_v16  ;;  %v1448_v21 = vadd.f32 %v1443_v19, %v1372_v14  ;;  %v2077_v22 = vpop.f32.mrb[27].mxu1 }
 0x204   : > { %v1532_v23 = vadd.f32 %v1887_v18, %v1523_v20  ;;  %v1524_v24 = vadd.f32 %v1519_v10, %v1448_v21 }
 0x206   : > { %v1533_v25 = vadd.f32 %v1887_v18, %v1524_v24  ;;  %v1534_v27 = vmax.f32 %v1532_v23, 0.0 }
 0x208   : > { %v1535_v28 = vmax.f32 %v1533_v25, 0.0 }
 0x209   : > { %v1698_v30 = vpop.f32.mrb[24].mxu0 }
 0x20a   : > { %v1536_v29 = vpack.c.bf16 %v1535_v28, %v1534_v27  ;;  %v2104_v31 = vpop.f32.mrb[25].mxu0 }
 0x20b   : > { %v1701_v32 = vpop.f32.mrb[26].mxu0 }
 0x20c   : > { %2091 = vmatmul.mubr.msk.bf16.vlgmr.msra.gmra.mrb[28].mxu1 %vm892_vm4, %v1536_v29  ;;  %v2105_v33 = vpop.f32.mrb[27].mxu0 }
 0x2df   : > { %v1597_v35 = vpop.f32.mrb[28].mxu1 }
 0x2e0   : > { %v1598_v36 = vadd.f32 %v1888_v34, %v1597_v35  ;;  %v2092_v37 = vpop.f32.mrb[29].mxu1 }
 0x2e1   : > { %v1600_v39 = vpop.f32.mrb[30].mxu1 }
 0x2e2   : > { %v1705_v40 = vadd.f32 %v1698_v30, %v1598_v36  ;;  %v1601_v41 = vadd.f32 %v1888_v34, %v1600_v39  ;;  %v2093_v42 = vpop.f32.mrb[31].mxu1 }
 0x2e4   : > { %v1714_v43 = vadd.f32 %v1897_v38, %v1705_v40  ;;  %v1706_v44 = vadd.f32 %v1701_v32, %v1601_v41 }
 0x2e6   : > { %v1715_v1 = vadd.f32 %v1897_v38, %v1706_v44  ;;  %v1716_v45 = vmax.f32 %v1714_v43, 0.0 }
 0x2e8   : > { %v1717_v46 = vmax.f32 %v1715_v1, 0.0 }
 0x2ea   : > { %v1909_v47 = vpack.c.bf16 %v1717_v46, %v1716_v45 }
 0x2ec   : > { %1910 = vst [vmem:[%s332_s14] sm:$0xff] %v1909_v47  }
 0x2ed PF: > { %s19_s30 = sadd.s32 1, %s2181_s30  }
 0x2ee   : > { %p16_p4 = scmp.ge.s32.totalorder %s19_s30, 4  }
 0x2f0   :  { %18 = sbr.rel (!%p16_p4) target bundleno = 1 (0x1), region = 102 }

// kernel: _lambda_.8
= control target key start
LH: loop header
LB: loop body
LE: loop exit
PB: predicated region body
PF: predicated region fallthrough
CT: control target
= control target key end

     0   :  { %s5678_s30 = smov 0   ;;  %s6669_s0 = inlined_call_operand.vmem [shape: bf16[2,16,16,8], index: 0, kind: input, shape index: {}]   ;;  %s6670_s1 = inlined_call_operand.vmem [shape: bf16[8,8], index: 1, kind: input, shape index: {}]   ;;  %s6671_s2 = inlined_call_operand.vmem [shape: f32[1,8], index: 2, kind: input, shape index: {}]   ;;  %s6672_s3 = inlined_call_operand.vmem [shape: bf16[9,8,8], index: 3, kind: input, shape index: {}]   ;;  %s6673_s4 = inlined_call_operand.vmem [shape: f32[1,8], index: 4, kind: input, shape index: {}]   ;;  %s6674_s5 = inlined_call_operand.vmem [shape: bf16[8,32], index: 5, kind: input, shape index: {}]   ;;  %s6675_s6 = inlined_call_operand.vmem [shape: f32[1,32], index: 6, kind: input, shape index: {}]   ;;  %s6676_s7 = inlined_call_operand.vmem [shape: bf16[8,32], index: 7, kind: input, shape index: {}]   ;;  %s6677_s8 = inlined_call_operand.vmem [shape: f32[1,32], index: 8, kind: input, shape index: {}]   ;;  %s6678_s9 = inlined_call_operand.vmem [shape: bf16[2,256,32], index: 9, kind: output, shape index: {}]  }
   0x1 LB: > { %s4321_s10 = sadd.s32 4294967295, %s5625_s30   ;;  %p4325_p0 = scmp.ge.s32.totalorder %s5625_s30, 1  ;;  %s5625_s30 = sphi %s5678_s30, %s19_s30  }
   0x2   : > { %p287_p1 = scmp.lt.s32.totalorder %s5625_s30, 3 }
   0x4   : > { %p288_p2 = pnand %p4325_p0, %p287_p1 }
   0x5   : > { %v422_v0 = vld [vmem:[%s6670_s1] sm:$0xf] (!%p288_p2)  ;;  %vm558_vm0 = vcmask (!%p288_p2), 1043456   ;;  %p5691_p3 = scmp.lt.s32.totalorder (!%p288_p2), %s4321_s10, 1  ;;  %vm334_vm1 = vcmask (!%p288_p2), 64512   ;;  %v5627_v2 = vmov (!%p288_p2), 0.0  }
   0x6   : > { %291 = sbr.rel (%p288_p2) target bundleno = 1137 (0x471), region = 56  ;;  %5566 = vmatprep.subr.msk.bf16.mxu0 (!%p288_p2), %vm558_vm0, %v422_v0  ;;  %v560_v1 = vsel (!%p288_p2), %vm558_vm0, %v422_v0, 0  ;;  %342 = vst.msk [vmem:[#allocation2 + $0x30] sm:$0xff] (!%p288_p2), %vm334_vm1, %v5627_v2  ;;  %343 = vst.msk [vmem:[#allocation2 + $0x38] sm:$0xff] (!%p288_p2), %vm334_vm1, %v5627_v2  ;;  %vm337_vm2 = vcmask (!%p288_p2), 58368   ;;  %vm4233_vm3 = vcmask (!%p288_p2), 257024  }
   0x7   : > { %335 = vst.msk [vmem:[#allocation2] sm:$0xff] (!%p288_p2), %vm334_vm1, %v5627_v2  ;;  %336 = vst.msk [vmem:[#allocation2 + $0x8] sm:$0xff] (!%p288_p2), %vm334_vm1, %v5627_v2  ;;  %4839 = vmatpush3.bf16.msra.mxu0 (!%p288_p2), %v560_v1  ;;  %v4363_v19 = vld [vmem:[%s6672_s3 + $0x4] sm:$0xf] (!%p288_p2)  ;;  %v4413_v20 = vld [vmem:[%s6672_s3 + $0xc] sm:$0xf] (!%p288_p2) }
   0x8   : > { %339 = vst.msk [vmem:[#allocation2 + $0x18] sm:$0xff] (!%p288_p2), %vm334_vm1, %v5627_v2  ;;  %340 = vst.msk [vmem:[#allocation2 + $0x20] sm:$0xff] (!%p288_p2), %vm334_vm1, %v5627_v2  ;;  %5567 = vmatprep.subr.msk.bf16.mxu0 (!%p288_p2), %vm558_vm0, %v4363_v19  ;;  %v936_v21 = vsel (!%p288_p2), %vm558_vm0, %v4363_v19, 0  ;;  %5570 = vmatprep.subr.msk.bf16.mxu1 (!%p288_p2), %vm558_vm0, %v4413_v20  ;;  %v1704_v24 = vsel (!%p288_p2), %vm558_vm0, %v4413_v20, 0  ;;  %v4430_v26 = vld [vmem:[%s6672_s3 + $0x10] sm:$0xf] (!%p288_p2) }
   0x9   : > { %345 = vst.msk [vmem:[#allocation2 + $0x48] sm:$0xff] (!%p288_p2), %vm334_vm1, %v5627_v2  ;;  %346 = vst.msk [vmem:[#allocation2 + $0x50] sm:$0xff] (!%p288_p2), %vm334_vm1, %v5627_v2  ;;  %4975 = vmatpush3.bf16.msra.mxu1 (!%p288_p2), %v1704_v24  ;;  %v836_v27 = vld [vmem:[%s6672_s3] sm:$0xf] (!%p288_p2)  ;;  %v1998_v0 = vsel (!%p288_p2), %vm558_vm0, %v4430_v26, 0 }
   0xa   : > { %348 = vst.msk [vmem:[#allocation2 + $0x60] sm:$0xff] (!%p288_p2), %vm334_vm1, %v5627_v2  ;;  %349 = vst.msk [vmem:[#allocation2 + $0x68] sm:$0xff] (!%p288_p2), %vm334_vm1, %v5627_v2  ;;  %5571 = vmatprep.subr.msk.bf16.mxu1 (!%p288_p2), %vm558_vm0, %v4430_v26  ;;  %v5873_v28 = vld [vmem:[%s6671_s2] ss:$0 sm:$0xff] (!%p288_p2) }
   0xb   : > { %351 = vst.msk [vmem:[#allocation2 + $0x78] sm:$0xff] (!%p288_p2), %vm334_vm1, %v5627_v2  ;;  %352 = vst.msk [vmem:[#allocation2 + $0x80] sm:$0xff] (!%p288_p2), %vm334_vm1, %v5627_v2 }
   0xc   : > { %354 = vst.msk [vmem:[#allocation2 + $0x90] sm:$0xff] (!%p288_p2), %vm334_vm1, %v5627_v2  ;;  %355 = vst.msk [vmem:[#allocation2 + $0x98] sm:$0xff] (!%p288_p2), %vm334_vm1, %v5627_v2 }
   0xd   : > { %357 = vst.msk [vmem:[#allocation2 + $0xa8] sm:$0xff] %vm334_vm1, %v5627_v2  ;;  %358 = vst.msk [vmem:[#allocation2 + $0xb0] sm:$0xff] %vm334_vm1, %v5627_v2  ;;  %s6681_s10 = smov (!%p5691_p3, %s4321_s10), 1 }
   0xe   : > { %360 = vst.msk [vmem:[#allocation2 + $0xc0] sm:$0xff] %vm334_vm1, %v5627_v2  ;;  %361 = vst.msk [vmem:[#allocation2 + $0xc8] sm:$0xff] %vm334_vm1, %v5627_v2  ;;  %s4600_s14 = sshll.u32 %s6681_s10, 7  ;;  %v837_v22 = vld [vmem:[#allocation2 + $0x1] sm:$0xff] }
   0xf   : > { %363 = vst.msk [vmem:[#allocation2 + $0xd8] sm:$0xff] %vm334_vm1, %v5627_v2  ;;  %364 = vst.msk [vmem:[#allocation2 + $0xe0] sm:$0xff] %vm334_vm1, %v5627_v2  ;;  %s5781_s17 = scalar_lea.vmem %s6669_s0, %s4600_s14  ;;  %s6543_s13 = scalar_lea.vmem %s6678_s9, %s4600_s14 }
  0x10   : > { %366 = vst.msk [vmem:[#allocation2 + $0xf0] sm:$0xff] %vm334_vm1, %v5627_v2  ;;  %367 = vst.msk [vmem:[#allocation2 + $0xf8] sm:$0xff] %vm334_vm1, %v5627_v2  ;;  %v5587_v3 = vld [vmem:[%s5781_s17] sm:$0xff]   ;;  %v5588_v4 = vld [vmem:[%s5781_s17 + $0x8] sm:$0xff]  }
  0x11   : > { %369 = vst.msk [vmem:[#allocation2 + $0x108] sm:$0xff] %vm334_vm1, %v5627_v2  ;;  %370 = vst.msk [vmem:[#allocation2 + $0x110] sm:$0xff] %vm334_vm1, %v5627_v2  ;;  %4840 = vmatprep.mubr.msk.bf16.mxu0 %vm334_vm1, %v5587_v3  ;;  %v5589_v5 = vld [vmem:[%s5781_s17 + $0x10] sm:$0xff]   ;;  %v5590_v6 = vld [vmem:[%s5781_s17 + $0x18] sm:$0xff]  }
  0x12   : > { %372 = vst.msk [vmem:[#allocation2 + $0x120] sm:$0xff] %vm334_vm1, %v5627_v2  ;;  %373 = vst.msk [vmem:[#allocation2 + $0x128] sm:$0xff] %vm334_vm1, %v5627_v2  ;;  %4841 = vmatmul.mubr.msk.bf16.vlgmr.msra.gmra.mrb[0].mxu0 %vm334_vm1, %v5588_v4  ;;  %v5591_v7 = vld [vmem:[%s5781_s17 + $0x20] sm:$0xff]   ;;  %v5592_v8 = vld [vmem:[%s5781_s17 + $0x28] sm:$0xff]  }
  0x13   : > { %375 = vst.msk [vmem:[#allocation2 + $0x138] sm:$0xff] %vm334_vm1, %v5627_v2  ;;  %376 = vst.msk [vmem:[#allocation2 + $0x140] sm:$0xff] %vm334_vm1, %v5627_v2  ;;  %4844 = vmatprep.mubr.msk.bf16.mxu0 %vm334_vm1, %v5589_v5  ;;  %v5593_v9 = vld [vmem:[%s5781_s17 + $0x30] sm:$0xff]   ;;  %v5594_v10 = vld [vmem:[%s5781_s17 + $0x38] sm:$0xff]   ;;  %4873 = vmatpush3.bf16.msra.mxu0 %v936_v21  ;;  %v1148_v5 = vsel %vm558_vm0, %v836_v27, 0 }
  0x14   : > { %378 = vst.msk [vmem:[#allocation2 + $0x150] sm:$0xff] %vm334_vm1, %v5627_v2  ;;  %379 = vst.msk [vmem:[#allocation2 + $0x158] sm:$0xff] %vm334_vm1, %v5627_v2  ;;  %v5595_v11 = vld [vmem:[%s5781_s17 + $0x40] sm:$0xff]   ;;  %v5596_v12 = vld [vmem:[%s5781_s17 + $0x48] sm:$0xff]   ;;  %5568 = vmatprep.subr.msk.bf16.mxu0 %vm558_vm0, %v836_v27 }
  0x15   : > { %381 = vst.msk [vmem:[#allocation2 + $0x168] sm:$0xff] %vm334_vm1, %v5627_v2  ;;  %382 = vst.msk [vmem:[#allocation2 + $0x170] sm:$0xff] %vm334_vm1, %v5627_v2  ;;  %v5597_v13 = vld [vmem:[%s5781_s17 + $0x50] sm:$0xff]   ;;  %v5598_v14 = vld [vmem:[%s5781_s17 + $0x58] sm:$0xff]  }
  0x16   : > { %384 = vst.msk [vmem:[#allocation2 + $0x180] sm:$0xff] %vm334_vm1, %v5627_v2  ;;  %385 = vst.msk [vmem:[#allocation2 + $0x188] sm:$0xff] %vm334_vm1, %v5627_v2  ;;  %v5599_v15 = vld [vmem:[%s5781_s17 + $0x60] sm:$0xff]   ;;  %v5600_v16 = vld [vmem:[%s5781_s17 + $0x68] sm:$0xff]  }
  0x17   : > { %387 = vst.msk [vmem:[#allocation2 + $0x198] sm:$0xff] %vm334_vm1, %v5627_v2  ;;  %388 = vst.msk [vmem:[#allocation2 + $0x1a0] sm:$0xff] %vm334_vm1, %v5627_v2  ;;  %v5601_v17 = vld [vmem:[%s5781_s17 + $0x70] sm:$0xff]   ;;  %v5602_v18 = vld [vmem:[%s5781_s17 + $0x78] sm:$0xff]  }
  0x18   : > { %344 = vst.msk [vmem:[#allocation2 + $0x40] sm:$0x3] %vm337_vm2, %v5627_v2  ;;  %338 = vst.msk [vmem:[#allocation2 + $0x10] sm:$0x3] %vm337_vm2, %v5627_v2 }
  0x19   : > { %341 = vst.msk [vmem:[#allocation2 + $0x28] sm:$0x3] %vm337_vm2, %v5627_v2  ;;  %347 = vst.msk [vmem:[#allocation2 + $0x58] sm:$0x3] %vm337_vm2, %v5627_v2 }
  0x1a   : > { %4845 = vmatmul.mubr.msk.bf16.gmra.mrb[4].mxu0 %vm334_vm1, %v5590_v6  ;;  %350 = vst.msk [vmem:[#allocation2 + $0x70] sm:$0x3] %vm337_vm2, %v5627_v2  ;;  %353 = vst.msk [vmem:[#allocation2 + $0x88] sm:$0x3] %vm337_vm2, %v5627_v2 }
  0x1b   : > { %4848 = vmatprep.mubr.msk.bf16.mxu0 %vm334_vm1, %v5591_v7  ;;  %356 = vst.msk [vmem:[#allocation2 + $0xa0] sm:$0x3] %vm337_vm2, %v5627_v2  ;;  %359 = vst.msk [vmem:[#allocation2 + $0xb8] sm:$0x3] %vm337_vm2, %v5627_v2 }
  0x1c   : > { %362 = vst.msk [vmem:[#allocation2 + $0xd0] sm:$0x3] %vm337_vm2, %v5627_v2  ;;  %365 = vst.msk [vmem:[#allocation2 + $0xe8] sm:$0x3] %vm337_vm2, %v5627_v2 }
  0x1d   : > { %368 = vst.msk [vmem:[#allocation2 + $0x100] sm:$0x3] %vm337_vm2, %v5627_v2  ;;  %371 = vst.msk [vmem:[#allocation2 + $0x118] sm:$0x3] %vm337_vm2, %v5627_v2 }
  0x1e   : > { %374 = vst.msk [vmem:[#allocation2 + $0x130] sm:$0x3] %vm337_vm2, %v5627_v2  ;;  %377 = vst.msk [vmem:[#allocation2 + $0x148] sm:$0x3] %vm337_vm2, %v5627_v2 }
  0x1f   : > { %380 = vst.msk [vmem:[#allocation2 + $0x160] sm:$0x3] %vm337_vm2, %v5627_v2  ;;  %383 = vst.msk [vmem:[#allocation2 + $0x178] sm:$0x3] %vm337_vm2, %v5627_v2  ;;  %v838_v23 = vld [vmem:[#allocation2 + $0x9] sm:$0xff] }
  0x20   : > { %386 = vst.msk [vmem:[#allocation2 + $0x190] sm:$0x3] %vm337_vm2, %v5627_v2  ;;  %389 = vst.msk [vmem:[#allocation2 + $0x1a8] sm:$0x3] %vm337_vm2, %v5627_v2  ;;  %v869_v25 = vpack.c.bf16 %v838_v23, %v837_v22 }
  0x22   : > { %4849 = vmatmul.mubr.msk.bf16.gmra.mrb[8].mxu0 %vm334_vm1, %v5592_v8  ;;  %v5910_v8 = vld [vmem:[%s6672_s3 + $0x14] sm:$0xf] }
  0x23   : > { %4852 = vmatprep.mubr.msk.bf16.mxu0 %vm334_vm1, %v5593_v9  ;;  %v5915_v9 = vld [vmem:[%s6672_s3 + $0x8] sm:$0xf] }
  0x2a   : > { %4853 = vmatmul.mubr.msk.bf16.gmra.mrb[12].mxu0 %vm334_vm1, %v5594_v10 }
  0x2b   : > { %4856 = vmatprep.mubr.msk.bf16.mxu0 %vm334_vm1, %v5595_v11 }
  0x32   : > { %4857 = vmatmul.mubr.msk.bf16.gmra.mrb[16].mxu0 %vm334_vm1, %v5596_v12 }
  0x33   : > { %4860 = vmatprep.mubr.msk.bf16.mxu0 %vm334_vm1, %v5597_v13 }
  0x3a   : > { %4861 = vmatmul.mubr.msk.bf16.gmra.mrb[20].mxu0 %vm334_vm1, %v5598_v14 }
  0x3b   : > { %4864 = vmatprep.mubr.msk.bf16.mxu0 %vm334_vm1, %v5599_v15 }
  0x42   : > { %4865 = vmatmul.mubr.msk.bf16.gmra.mrb[24].mxu0 %vm334_vm1, %v5600_v16 }
  0x43   : > { %4868 = vmatprep.mubr.msk.bf16.mxu0 %vm334_vm1, %v5601_v17 }
  0x4a   : > { %4869 = vmatmul.mubr.msk.bf16.gmra.mrb[28].mxu0 %vm334_vm1, %v5602_v18 }
  0x4b   : > { %4874 = vmatprep.mubr.msk.bf16.mxu0 %vm334_vm1, %v869_v25 }
  0xe5   : > { %v4842_v29 = vpop.f32.mrb[0].mxu0 }
  0xe6   : > { %v605_v30 = vadd.f32 %v4842_v29, %v5873_v28  ;;  %v596_v31 = vpop.f32.mrb[1].mxu0 }
  0xe7   : > { %v597_v32 = vadd.f32 %v5873_v28, %v596_v31  ;;  %v4843_v33 = vpop.f32.mrb[2].mxu0 }
  0xe8   : > { %v725_v34 = vmax.f32 %v605_v30, 0.0  ;;  %v608_v35 = vadd.f32 %v4843_v33, %v5873_v28  ;;  %v599_v36 = vpop.f32.mrb[3].mxu0 }
  0xe9   : > { %v723_v37 = vmax.f32 %v597_v32, 0.0  ;;  %v600_v38 = vadd.f32 %v5873_v28, %v599_v36 }
  0xea   : > { %758 = vst.msk [vmem:[#allocation2 + $0x31] sm:$0xff] %vm334_vm1, %v725_v34  ;;  %v726_v39 = vmax.f32 %v608_v35, 0.0 }
  0xeb   : > { %756 = vst.msk [vmem:[#allocation2 + $0x19] sm:$0xff] %vm334_vm1, %v723_v37  ;;  %v724_v40 = vmax.f32 %v600_v38, 0.0 }
  0xec   : > { %759 = vst.msk [vmem:[#allocation2 + $0x39] sm:$0xff] %vm334_vm1, %v726_v39 }
  0xed   : > { %757 = vst.msk [vmem:[#allocation2 + $0x21] sm:$0xff] %vm334_vm1, %v724_v40  ;;  %v4846_v41 = vpop.f32.mrb[4].mxu0 }
  0xee   : > { %v621_v42 = vadd.f32 %v4846_v41, %v5873_v28  ;;  %v612_v43 = vpop.f32.mrb[5].mxu0 }
  0xef   : > { %v613_v44 = vadd.f32 %v5873_v28, %v612_v43  ;;  %v4847_v45 = vpop.f32.mrb[6].mxu0 }
  0xf0   : > { %v729_v46 = vmax.f32 %v621_v42, 0.0  ;;  %v624_v47 = vadd.f32 %v4847_v45, %v5873_v28  ;;  %v615_v48 = vpop.f32.mrb[7].mxu0 }
  0xf1   : > { %v727_v49 = vmax.f32 %v613_v44, 0.0  ;;  %v616_v50 = vadd.f32 %v5873_v28, %v615_v48  ;;  %v841_v62 = vld [vmem:[#allocation2 + $0x31] sm:$0xff] }
  0xf2   : > { %762 = vst.msk [vmem:[#allocation2 + $0x61] sm:$0xff] %vm334_vm1, %v729_v46  ;;  %v730_v51 = vmax.f32 %v624_v47, 0.0  ;;  %v839_v53 = vld [vmem:[#allocation2 + $0x19] sm:$0xff]  ;;  %v1607_v63 = vld [vmem:[#allocation2 + $0x30] sm:$0xff] }
  0xf3   : > { %760 = vst.msk [vmem:[#allocation2 + $0x49] sm:$0xff] %vm334_vm1, %v727_v49  ;;  %v728_v52 = vmax.f32 %v616_v50, 0.0  ;;  %v842_v54 = vld [vmem:[#allocation2 + $0x39] sm:$0xff] }
  0xf4   : > { %v1608_v55 = vld [vmem:[#allocation2 + $0x38] sm:$0xff]  ;;  %763 = vst.msk [vmem:[#allocation2 + $0x69] sm:$0xff] %vm334_vm1, %v730_v51  ;;  %v840_v56 = vld [vmem:[#allocation2 + $0x21] sm:$0xff]  ;;  %v5897_v3 = vpack.c.bf16 %v842_v54, %v841_v62 }
  0xf5   : > { %v1605_v57 = vld [vmem:[#allocation2 + $0x18] sm:$0xff]  ;;  %v1606_v58 = vld [vmem:[#allocation2 + $0x20] sm:$0xff]  ;;  %761 = vst.msk [vmem:[#allocation2 + $0x51] sm:$0xff] %vm334_vm1, %v728_v52  ;;  %v4850_v59 = vpop.f32.mrb[8].mxu0  ;;  %v5891_v60 = vpack.c.bf16 %v840_v56, %v839_v53  ;;  %v5899_v4 = vpack.c.bf16 %v1608_v55, %v1607_v63 }
  0xf6   : > { %v5893_v61 = vpack.c.bf16 %v1606_v58, %v1605_v57  ;;  %v637_v1 = vadd.f32 %v4850_v59, %v5873_v28  ;;  %v628_v2 = vpop.f32.mrb[9].mxu0 }
  0xf7   : > { %v629_v6 = vadd.f32 %v5873_v28, %v628_v2  ;;  %v4851_v7 = vpop.f32.mrb[10].mxu0  ;;  %4875 = vmatmul.mubr.msk.bf16.vlgmr.msra.gmra.mrb[32].mxu0 %vm334_vm1, %v5891_v60 }
  0xf8   : > { %4976 = vmatprep.mubr.msk.bf16.mxu1 %vm334_vm1, %v5893_v61  ;;  %v733_v10 = vmax.f32 %v637_v1, 0.0  ;;  %v640_v11 = vadd.f32 %v4851_v7, %v5873_v28  ;;  %v631_v12 = vpop.f32.mrb[11].mxu0  ;;  %4878 = vmatprep.mubr.msk.bf16.mxu0 %vm334_vm1, %v5897_v3 }
  0xf9   : > { %4977 = vmatmul.mubr.msk.bf16.vlgmr.msra.gmra.mrb[0].mxu1 %vm334_vm1, %v5899_v4  ;;  %v731_v13 = vmax.f32 %v629_v6, 0.0  ;;  %v632_v14 = vadd.f32 %v5873_v28, %v631_v12  ;;  %4907 = vmatpush3.bf16.msra.mxu0 %v1148_v5  ;;  %v845_v26 = vld [vmem:[#allocation2 + $0x61] sm:$0xff] }
  0xfa   : > { %5009 = vmatpush3.bf16.msra.mxu1 %v1998_v0  ;;  %766 = vst.msk [vmem:[#allocation2 + $0x91] sm:$0xff] %vm334_vm1, %v733_v10  ;;  %v734_v15 = vmax.f32 %v640_v11, 0.0  ;;  %5569 = vmatprep.subr.msk.bf16.mxu0 %vm558_vm0, %v5915_v9  ;;  %v843_v17 = vld [vmem:[#allocation2 + $0x49] sm:$0xff]  ;;  %v1611_v27 = vld [vmem:[#allocation2 + $0x60] sm:$0xff] }
  0xfb   : > { %5572 = vmatprep.subr.msk.bf16.mxu1 %vm558_vm0, %v5910_v8  ;;  %764 = vst.msk [vmem:[#allocation2 + $0x79] sm:$0xff] %vm334_vm1, %v731_v13  ;;  %v732_v16 = vmax.f32 %v632_v14, 0.0  ;;  %v846_v18 = vld [vmem:[#allocation2 + $0x69] sm:$0xff] }
  0xfc   : > { %v1612_v19 = vld [vmem:[#allocation2 + $0x68] sm:$0xff]  ;;  %767 = vst.msk [vmem:[#allocation2 + $0x99] sm:$0xff] %vm334_vm1, %v734_v15  ;;  %v844_v20 = vld [vmem:[#allocation2 + $0x51] sm:$0xff]  ;;  %v5936_v31 = vpack.c.bf16 %v846_v18, %v845_v26 }
  0xfd   : > { %v1609_v21 = vld [vmem:[#allocation2 + $0x48] sm:$0xff]  ;;  %v1610_v22 = vld [vmem:[#allocation2 + $0x50] sm:$0xff]  ;;  %765 = vst.msk [vmem:[#allocation2 + $0x81] sm:$0xff] %vm334_vm1, %v732_v16  ;;  %v4854_v23 = vpop.f32.mrb[12].mxu0  ;;  %v5931_v24 = vpack.c.bf16 %v844_v20, %v843_v17  ;;  %v5938_v32 = vpack.c.bf16 %v1612_v19, %v1611_v27 }
  0xfe   : > { %v5933_v25 = vpack.c.bf16 %v1610_v22, %v1609_v21  ;;  %v653_v29 = vadd.f32 %v4854_v23, %v5873_v28  ;;  %v644_v30 = vpop.f32.mrb[13].mxu0 }
  0xff   : > { %v645_v33 = vadd.f32 %v5873_v28, %v644_v30  ;;  %v4855_v34 = vpop.f32.mrb[14].mxu0  ;;  %4879 = vmatmul.mubr.msk.bf16.gmra.mrb[36].mxu0 %vm334_vm1, %v5931_v24 }
 0x100   : > { %4980 = vmatprep.mubr.msk.bf16.mxu1 %vm334_vm1, %v5933_v25  ;;  %v737_v35 = vmax.f32 %v653_v29, 0.0  ;;  %v656_v36 = vadd.f32 %v4855_v34, %v5873_v28  ;;  %v647_v37 = vpop.f32.mrb[15].mxu0  ;;  %4882 = vmatprep.mubr.msk.bf16.mxu0 %vm334_vm1, %v5936_v31 }
 0x101   : > { %4981 = vmatmul.mubr.msk.bf16.gmra.mrb[4].mxu1 %vm334_vm1, %v5938_v32  ;;  %v735_v38 = vmax.f32 %v645_v33, 0.0  ;;  %v648_v39 = vadd.f32 %v5873_v28, %v647_v37  ;;  %v849_v51 = vld [vmem:[#allocation2 + $0x91] sm:$0xff] }
 0x102   : > { %770 = vst.msk [vmem:[#allocation2 + $0xc1] sm:$0xff] %vm334_vm1, %v737_v35  ;;  %v738_v40 = vmax.f32 %v656_v36, 0.0  ;;  %v847_v42 = vld [vmem:[#allocation2 + $0x79] sm:$0xff]  ;;  %v1615_v52 = vld [vmem:[#allocation2 + $0x90] sm:$0xff] }
 0x103   : > { %768 = vst.msk [vmem:[#allocation2 + $0xa9] sm:$0xff] %vm334_vm1, %v735_v38  ;;  %v736_v41 = vmax.f32 %v648_v39, 0.0  ;;  %v850_v43 = vld [vmem:[#allocation2 + $0x99] sm:$0xff] }
 0x104   : > { %v1616_v44 = vld [vmem:[#allocation2 + $0x98] sm:$0xff]  ;;  %771 = vst.msk [vmem:[#allocation2 + $0xc9] sm:$0xff] %vm334_vm1, %v738_v40  ;;  %v848_v45 = vld [vmem:[#allocation2 + $0x81] sm:$0xff]  ;;  %v5960_v55 = vpack.c.bf16 %v850_v43, %v849_v51 }
 0x105   : > { %v1613_v46 = vld [vmem:[#allocation2 + $0x78] sm:$0xff]  ;;  %v1614_v47 = vld [vmem:[#allocation2 + $0x80] sm:$0xff]  ;;  %769 = vst.msk [vmem:[#allocation2 + $0xb1] sm:$0xff] %vm334_vm1, %v736_v41  ;;  %v4858_v48 = vpop.f32.mrb[16].mxu0  ;;  %v5955_v49 = vpack.c.bf16 %v848_v45, %v847_v42  ;;  %v5962_v56 = vpack.c.bf16 %v1616_v44, %v1615_v52 }
 0x106   : > { %v5957_v50 = vpack.c.bf16 %v1614_v47, %v1613_v46  ;;  %v669_v53 = vadd.f32 %v4858_v48, %v5873_v28  ;;  %v660_v54 = vpop.f32.mrb[17].mxu0 }
 0x107   : > { %v661_v57 = vadd.f32 %v5873_v28, %v660_v54  ;;  %v4859_v58 = vpop.f32.mrb[18].mxu0  ;;  %4883 = vmatmul.mubr.msk.bf16.gmra.mrb[40].mxu0 %vm334_vm1, %v5955_v49 }
 0x108   : > { %4984 = vmatprep.mubr.msk.bf16.mxu1 %vm334_vm1, %v5957_v50  ;;  %v741_v59 = vmax.f32 %v669_v53, 0.0  ;;  %v672_v62 = vadd.f32 %v4859_v58, %v5873_v28  ;;  %v663_v63 = vpop.f32.mrb[19].mxu0  ;;  %4886 = vmatprep.mubr.msk.bf16.mxu0 %vm334_vm1, %v5960_v55 }
 0x109   : > { %4985 = vmatmul.mubr.msk.bf16.gmra.mrb[8].mxu1 %vm334_vm1, %v5962_v56  ;;  %v739_v0 = vmax.f32 %v661_v57, 0.0  ;;  %v664_v1 = vadd.f32 %v5873_v28, %v663_v63  ;;  %v853_v17 = vld [vmem:[#allocation2 + $0xc1] sm:$0xff] }
 0x10a   : > { %774 = vst.msk [vmem:[#allocation2 + $0xf1] sm:$0xff] %vm334_vm1, %v741_v59  ;;  %v742_v2 = vmax.f32 %v672_v62, 0.0  ;;  %v851_v6 = vld [vmem:[#allocation2 + $0xa9] sm:$0xff]  ;;  %v1619_v18 = vld [vmem:[#allocation2 + $0xc0] sm:$0xff] }
 0x10b   : > { %772 = vst.msk [vmem:[#allocation2 + $0xd9] sm:$0xff] %vm334_vm1, %v739_v0  ;;  %v740_v5 = vmax.f32 %v664_v1, 0.0  ;;  %v854_v7 = vld [vmem:[#allocation2 + $0xc9] sm:$0xff] }
 0x10c   : > { %v1620_v10 = vld [vmem:[#allocation2 + $0xc8] sm:$0xff]  ;;  %775 = vst.msk [vmem:[#allocation2 + $0xf9] sm:$0xff] %vm334_vm1, %v742_v2  ;;  %v852_v11 = vld [vmem:[#allocation2 + $0xb1] sm:$0xff]  ;;  %v5984_v21 = vpack.c.bf16 %v854_v7, %v853_v17 }
 0x10d   : > { %v1617_v12 = vld [vmem:[#allocation2 + $0xa8] sm:$0xff]  ;;  %v1618_v13 = vld [vmem:[#allocation2 + $0xb0] sm:$0xff]  ;;  %773 = vst.msk [vmem:[#allocation2 + $0xe1] sm:$0xff] %vm334_vm1, %v740_v5  ;;  %v4862_v14 = vpop.f32.mrb[20].mxu0  ;;  %v5979_v15 = vpack.c.bf16 %v852_v11, %v851_v6  ;;  %v5986_v22 = vpack.c.bf16 %v1620_v10, %v1619_v18 }
 0x10e   : > { %v5981_v16 = vpack.c.bf16 %v1618_v13, %v1617_v12  ;;  %v685_v19 = vadd.f32 %v4862_v14, %v5873_v28  ;;  %v676_v20 = vpop.f32.mrb[21].mxu0 }
 0x10f   : > { %v677_v23 = vadd.f32 %v5873_v28, %v676_v20  ;;  %v4863_v26 = vpop.f32.mrb[22].mxu0  ;;  %4887 = vmatmul.mubr.msk.bf16.gmra.mrb[44].mxu0 %vm334_vm1, %v5979_v15 }
 0x110   : > { %4988 = vmatprep.mubr.msk.bf16.mxu1 %vm334_vm1, %v5981_v16  ;;  %v745_v27 = vmax.f32 %v685_v19, 0.0  ;;  %v688_v29 = vadd.f32 %v4863_v26, %v5873_v28  ;;  %v679_v30 = vpop.f32.mrb[23].mxu0  ;;  %4890 = vmatprep.mubr.msk.bf16.mxu0 %vm334_vm1, %v5984_v21 }
 0x111   : > { %4989 = vmatmul.mubr.msk.bf16.gmra.mrb[12].mxu1 %vm334_vm1, %v5986_v22  ;;  %v743_v33 = vmax.f32 %v677_v23, 0.0  ;;  %v680_v34 = vadd.f32 %v5873_v28, %v679_v30  ;;  %v857_v46 = vld [vmem:[#allocation2 + $0xf1] sm:$0xff] }
 0x112   : > { %778 = vst.msk [vmem:[#allocation2 + $0x121] sm:$0xff] %vm334_vm1, %v745_v27  ;;  %v746_v35 = vmax.f32 %v688_v29, 0.0  ;;  %v855_v37 = vld [vmem:[#allocation2 + $0xd9] sm:$0xff]  ;;  %v1623_v47 = vld [vmem:[#allocation2 + $0xf0] sm:$0xff] }
 0x113   : > { %776 = vst.msk [vmem:[#allocation2 + $0x109] sm:$0xff] %vm334_vm1, %v743_v33  ;;  %v744_v36 = vmax.f32 %v680_v34, 0.0  ;;  %v858_v38 = vld [vmem:[#allocation2 + $0xf9] sm:$0xff] }
 0x114   : > { %v1624_v39 = vld [vmem:[#allocation2 + $0xf8] sm:$0xff]  ;;  %779 = vst.msk [vmem:[#allocation2 + $0x129] sm:$0xff] %vm334_vm1, %v746_v35  ;;  %v856_v40 = vld [vmem:[#allocation2 + $0xe1] sm:$0xff]  ;;  %v6008_v52 = vpack.c.bf16 %v858_v38, %v857_v46 }
 0x115   : > { %v1621_v41 = vld [vmem:[#allocation2 + $0xd8] sm:$0xff]  ;;  %v1622_v42 = vld [vmem:[#allocation2 + $0xe0] sm:$0xff]  ;;  %777 = vst.msk [vmem:[#allocation2 + $0x111] sm:$0xff] %vm334_vm1, %v744_v36  ;;  %v4866_v43 = vpop.f32.mrb[24].mxu0  ;;  %v6003_v44 = vpack.c.bf16 %v856_v40, %v855_v37  ;;  %v6010_v53 = vpack.c.bf16 %v1624_v39, %v1623_v47 }
 0x116   : > { %v6005_v45 = vpack.c.bf16 %v1622_v42, %v1621_v41  ;;  %v701_v48 = vadd.f32 %v4866_v43, %v5873_v28  ;;  %v692_v51 = vpop.f32.mrb[25].mxu0 }
 0x117   : > { %v693_v54 = vadd.f32 %v5873_v28, %v692_v51  ;;  %v4867_v57 = vpop.f32.mrb[26].mxu0  ;;  %4891 = vmatmul.mubr.msk.bf16.gmra.mrb[48].mxu0 %vm334_vm1, %v6003_v44 }
 0x118   : > { %4992 = vmatprep.mubr.msk.bf16.mxu1 %vm334_vm1, %v6005_v45  ;;  %v749_v58 = vmax.f32 %v701_v48, 0.0  ;;  %v704_v59 = vadd.f32 %v4867_v57, %v5873_v28  ;;  %v695_v62 = vpop.f32.mrb[27].mxu0  ;;  %4894 = vmatprep.mubr.msk.bf16.mxu0 %vm334_vm1, %v6008_v52 }
 0x119   : > { %4993 = vmatmul.mubr.msk.bf16.gmra.mrb[16].mxu1 %vm334_vm1, %v6010_v53  ;;  %v747_v63 = vmax.f32 %v693_v54, 0.0  ;;  %v696_v0 = vadd.f32 %v5873_v28, %v695_v62  ;;  %v861_v18 = vld [vmem:[#allocation2 + $0x121] sm:$0xff] }
 0x11a   : > { %782 = vst.msk [vmem:[#allocation2 + $0x151] sm:$0xff] %vm334_vm1, %v749_v58  ;;  %v750_v1 = vmax.f32 %v704_v59, 0.0  ;;  %v859_v5 = vld [vmem:[#allocation2 + $0x109] sm:$0xff]  ;;  %v1627_v19 = vld [vmem:[#allocation2 + $0x120] sm:$0xff] }
 0x11b   : > { %780 = vst.msk [vmem:[#allocation2 + $0x139] sm:$0xff] %vm334_vm1, %v747_v63  ;;  %v748_v2 = vmax.f32 %v696_v0, 0.0  ;;  %v862_v6 = vld [vmem:[#allocation2 + $0x129] sm:$0xff]  ;;  %v788_v59 = vld [vmem:[#allocation2] sm:$0xff] }
 0x11c   : > { %v1628_v7 = vld [vmem:[#allocation2 + $0x128] sm:$0xff]  ;;  %783 = vst.msk [vmem:[#allocation2 + $0x159] sm:$0xff] %vm334_vm1, %v750_v1  ;;  %v860_v10 = vld [vmem:[#allocation2 + $0x111] sm:$0xff]  ;;  %v6032_v26 = vpack.c.bf16 %v862_v6, %v861_v18  ;;  %v1410_v18 = vsel %vm558_vm0, %v5915_v9, 0 }
 0x11d   : > { %v1625_v11 = vld [vmem:[#allocation2 + $0x108] sm:$0xff]  ;;  %v1626_v12 = vld [vmem:[#allocation2 + $0x110] sm:$0xff]  ;;  %781 = vst.msk [vmem:[#allocation2 + $0x141] sm:$0xff] %vm334_vm1, %v748_v2  ;;  %v4870_v13 = vpop.f32.mrb[28].mxu0  ;;  %v6027_v14 = vpack.c.bf16 %v860_v10, %v859_v5  ;;  %v6034_v27 = vpack.c.bf16 %v1628_v7, %v1627_v19  ;;  %v4464_v19 = vld [vmem:[%s6672_s3 + $0x18] sm:$0xf] }
 0x11e   : > { %v6029_v17 = vpack.c.bf16 %v1626_v12, %v1625_v11  ;;  %v717_v20 = vadd.f32 %v4870_v13, %v5873_v28  ;;  %v708_v23 = vpop.f32.mrb[29].mxu0  ;;  %v789_v62 = vld [vmem:[#allocation2 + $0x8] sm:$0xff]  ;;  %v2292_v13 = vsel %vm558_vm0, %v5910_v8, 0  ;;  %v2193_v8 = vld [vmem:[#allocation2 + $0x1a] sm:$0xff] }
 0x11f   : > { %v709_v29 = vadd.f32 %v5873_v28, %v708_v23  ;;  %v4871_v30 = vpop.f32.mrb[30].mxu0  ;;  %4895 = vmatmul.mubr.msk.bf16.gmra.mrb[52].mxu0 %vm334_vm1, %v6027_v14  ;;  %v820_v6 = vpack.c.bf16 %v789_v62, %v788_v59  ;;  %v2194_v9 = vld [vmem:[#allocation2 + $0x22] sm:$0xff]  ;;  %v2206_v59 = vld [vmem:[#allocation2 + $0xb2] sm:$0xff] }
 0x120   : > { %4996 = vmatprep.mubr.msk.bf16.mxu1 %vm334_vm1, %v6029_v17  ;;  %v753_v33 = vmax.f32 %v717_v20, 0.0  ;;  %v720_v34 = vadd.f32 %v4871_v30, %v5873_v28  ;;  %v711_v35 = vpop.f32.mrb[31].mxu0  ;;  %4898 = vmatprep.mubr.msk.bf16.mxu0 %vm334_vm1, %v6032_v26  ;;  %v2225_v23 = vpack.c.bf16 %v2194_v9, %v2193_v8  ;;  %v1316_v30 = vld [vmem:[#allocation2 + $0x3a] sm:$0xff]  ;;  %v1335_v8 = vld [vmem:[#allocation2 + $0x122] sm:$0xff]  ;;  %v1336_v9 = vld [vmem:[#allocation2 + $0x12a] sm:$0xff] }
 0x121   : > { %4997 = vmatmul.mubr.msk.bf16.gmra.mrb[20].mxu1 %vm334_vm1, %v6034_v27  ;;  %v751_v36 = vmax.f32 %v709_v29, 0.0  ;;  %v712_v37 = vadd.f32 %v5873_v28, %v711_v35  ;;  %v865_v28 = vld [vmem:[#allocation2 + $0x151] sm:$0xff] }
 0x122   : > { %786 = vst.msk [vmem:[#allocation2 + $0x181] sm:$0xff] %vm334_vm1, %v753_v33  ;;  %v754_v38 = vmax.f32 %v720_v34, 0.0  ;;  %v863_v40 = vld [vmem:[#allocation2 + $0x139] sm:$0xff]  ;;  %v1631_v54 = vld [vmem:[#allocation2 + $0x150] sm:$0xff] }
 0x123   : > { %784 = vst.msk [vmem:[#allocation2 + $0x169] sm:$0xff] %vm334_vm1, %v751_v36  ;;  %v752_v39 = vmax.f32 %v712_v37, 0.0  ;;  %v866_v41 = vld [vmem:[#allocation2 + $0x159] sm:$0xff]  ;;  %v2197_v33 = vld [vmem:[#allocation2 + $0x4a] sm:$0xff]  ;;  %v2587_v36 = vsel %vm558_vm0, %v4464_v19, 0 }
 0x124   : > { %v1632_v42 = vld [vmem:[#allocation2 + $0x158] sm:$0xff]  ;;  %787 = vst.msk [vmem:[#allocation2 + $0x189] sm:$0xff] %vm334_vm1, %v754_v38  ;;  %v864_v43 = vld [vmem:[#allocation2 + $0x141] sm:$0xff]  ;;  %v6055_v57 = vpack.c.bf16 %v866_v41, %v865_v28 }
 0x125   : > { %v1629_v46 = vld [vmem:[#allocation2 + $0x138] sm:$0xff]  ;;  %v1630_v47 = vld [vmem:[#allocation2 + $0x140] sm:$0xff]  ;;  %785 = vst.msk [vmem:[#allocation2 + $0x171] sm:$0xff] %vm334_vm1, %v752_v39  ;;  %v6051_v48 = vpack.c.bf16 %v864_v43, %v863_v40  ;;  %v6057_v58 = vpack.c.bf16 %v1632_v42, %v1631_v54  ;;  %v1320_v40 = vld [vmem:[#allocation2 + $0x6a] sm:$0xff] }
 0x126   : > { %v6053_v51 = vpack.c.bf16 %v1630_v47, %v1629_v46  ;;  %v1315_v29 = vld [vmem:[#allocation2 + $0x32] sm:$0xff]  ;;  %v6163_v38 = vld [vmem:[%s6672_s3 + $0x1c] sm:$0xf]  ;;  %v1319_v39 = vld [vmem:[#allocation2 + $0x62] sm:$0xff] }
 0x127   : > { %4899 = vmatmul.mubr.msk.bf16.gmra.mrb[56].mxu0 %vm334_vm1, %v6051_v48  ;;  %v2198_v34 = vld [vmem:[#allocation2 + $0x52] sm:$0xff]  ;;  %v6154_v35 = vpack.c.bf16 %v1316_v30, %v1315_v29  ;;  %v2201_v41 = vld [vmem:[#allocation2 + $0x7a] sm:$0xff]  ;;  %v2202_v42 = vld [vmem:[#allocation2 + $0x82] sm:$0xff]  ;;  %v6173_v43 = vpack.c.bf16 %v1320_v40, %v1319_v39 }
 0x128   : > { %5000 = vmatprep.mubr.msk.bf16.mxu1 %vm334_vm1, %v6053_v51  ;;  %4902 = vmatprep.mubr.msk.bf16.mxu0 %vm334_vm1, %v6055_v57  ;;  %v6158_v37 = vpack.c.bf16 %v2198_v34, %v2197_v33  ;;  %v6177_v46 = vpack.c.bf16 %v2202_v42, %v2201_v41  ;;  %v1323_v47 = vld [vmem:[#allocation2 + $0x92] sm:$0xff]  ;;  %v1324_v28 = vld [vmem:[#allocation2 + $0x9a] sm:$0xff]  ;;  %v2205_v54 = vld [vmem:[#allocation2 + $0xaa] sm:$0xff] }
 0x129   : > { %5001 = vmatmul.mubr.msk.bf16.gmra.mrb[24].mxu1 %vm334_vm1, %v6057_v58  ;;  %v1635_v11 = vld [vmem:[#allocation2 + $0x180] sm:$0xff]  ;;  %v6185_v62 = vpack.c.bf16 %v1324_v28, %v1323_v47  ;;  %v1339_v30 = vld [vmem:[#allocation2 + $0x152] sm:$0xff]  ;;  %v2881_v28 = vsel %vm558_vm0, %v6163_v38, 0 }
 0x12a   : > { %v867_v63 = vld [vmem:[#allocation2 + $0x169] sm:$0xff]  ;;  %v1340_v33 = vld [vmem:[#allocation2 + $0x15a] sm:$0xff] }
 0x12b   : > { %v1636_v0 = vld [vmem:[#allocation2 + $0x188] sm:$0xff]  ;;  %v6233_v39 = vpack.c.bf16 %v1340_v33, %v1339_v30  ;;  %v3709_v30 = vld [vmem:[%s6676_s7] sm:$0xf] }
 0x12c   : > { %v868_v1 = vld [vmem:[#allocation2 + $0x171] sm:$0xff]  ;;  %v1633_v2 = vld [vmem:[#allocation2 + $0x168] sm:$0xff]  ;;  %v6071_v12 = vpack.c.bf16 %v1636_v0, %v1635_v11 }
 0x12d   : > { %v1634_v5 = vld [vmem:[#allocation2 + $0x170] sm:$0xff]  ;;  %v6067_v7 = vpack.c.bf16 %v868_v1, %v867_v63  ;;  %v6189_v63 = vpack.c.bf16 %v2206_v59, %v2205_v54  ;;  %v1327_v0 = vld [vmem:[#allocation2 + $0xc2] sm:$0xff] }
 0x12e   : > { %v6069_v10 = vpack.c.bf16 %v1634_v5, %v1633_v2  ;;  %v1328_v1 = vld [vmem:[#allocation2 + $0xca] sm:$0xff]  ;;  %v2209_v2 = vld [vmem:[#allocation2 + $0xda] sm:$0xff]  ;;  %v2210_v5 = vld [vmem:[#allocation2 + $0xe2] sm:$0xff] }
 0x12f   : > { %4903 = vmatmul.mubr.msk.bf16.gmra.mrb[60].mxu0 %vm334_vm1, %v6067_v7  ;;  %v6201_v11 = vpack.c.bf16 %v2210_v5, %v2209_v2  ;;  %v2221_v34 = vld [vmem:[#allocation2 + $0x16a] sm:$0xff]  ;;  %v2223_v41 = vld [vmem:[#allocation2 + $0x182] sm:$0xff] }
 0x130   : > { %5004 = vmatprep.mubr.msk.bf16.mxu1 %vm334_vm1, %v6069_v10  ;;  %4908 = vmatprep.mubr.msk.bf16.mxu0 %vm334_vm1, %v820_v6  ;;  %v6197_v6 = vpack.c.bf16 %v1328_v1, %v1327_v0  ;;  %v2224_v42 = vld [vmem:[#allocation2 + $0x18a] sm:$0xff]  ;;  %v4498_v54 = vld [vmem:[%s6672_s3 + $0x20] sm:$0xf] }
 0x131   : > { %5005 = vmatmul.mubr.msk.bf16.gmra.mrb[28].mxu1 %vm334_vm1, %v6071_v12  ;;  %v6245_v47 = vpack.c.bf16 %v2224_v42, %v2223_v41  ;;  %v3107_v0 = vld [vmem:[#allocation2 + $0x1a2] sm:$0xff] }
 0x132   : > { %5010 = vmatprep.mubr.msk.bf16.mxu1 %vm334_vm1, %v5891_v60  ;;  %v1311_v60 = vld [vmem:[#allocation2 + $0x2] sm:$0xff] }
 0x137   : > { %4909 = vmatmul.mubr.msk.bf16.vlgmr.msra.gmra.mrb[32].mxu0 %vm334_vm1, %v5893_v61  ;;  %v1312_v61 = vld [vmem:[#allocation2 + $0xa] sm:$0xff] }
 0x138   : > { %4912 = vmatprep.mubr.msk.bf16.mxu0 %vm334_vm1, %v5899_v4  ;;  %4941 = vmatpush3.bf16.msra.mxu0 %v1410_v18  ;;  %v1332_v18 = vld [vmem:[#allocation2 + $0xfa] sm:$0xff] }
 0x139   : > { %5011 = vmatmul.mubr.msk.bf16.vlgmr.msra.gmra.mrb[0].mxu1 %vm334_vm1, %v5897_v3  ;;  %v1930_v3 = vld [vmem:[#allocation2 + $0x189] sm:$0xff] }
 0x13a   : > { %5043 = vmatpush3.bf16.msra.mxu1 %v2292_v13  ;;  %5014 = vmatprep.mubr.msk.bf16.mxu1 %vm334_vm1, %v5931_v24  ;;  %v1343_v24 = vpack.c.bf16 %v1312_v61, %v1311_v60  ;;  %v1331_v13 = vld [vmem:[#allocation2 + $0xf2] sm:$0xff] }
 0x13b   : > { %5573 = vmatprep.subr.msk.bf16.mxu1 %vm558_vm0, %v4464_v19  ;;  %v2213_v19 = vld [vmem:[#allocation2 + $0x10a] sm:$0xff]  ;;  %v2214_v60 = vld [vmem:[#allocation2 + $0x112] sm:$0xff]  ;;  %v6209_v61 = vpack.c.bf16 %v1332_v18, %v1331_v13 }
 0x13f   : > { %4913 = vmatmul.mubr.msk.bf16.gmra.mrb[36].mxu0 %vm334_vm1, %v5933_v25 }
 0x140   : > { %4916 = vmatprep.mubr.msk.bf16.mxu0 %vm334_vm1, %v5938_v32 }
 0x141   : > { %5015 = vmatmul.mubr.msk.bf16.gmra.mrb[4].mxu1 %vm334_vm1, %v5936_v31  ;;  %v1929_v31 = vld [vmem:[#allocation2 + $0x181] sm:$0xff] }
 0x142   : > { %5018 = vmatprep.mubr.msk.bf16.mxu1 %vm334_vm1, %v5955_v49  ;;  %v6146_v20 = vpack.c.bf16 %v1930_v3, %v1929_v31  ;;  %v6213_v3 = vpack.c.bf16 %v2214_v60, %v2213_v19  ;;  %v2218_v31 = vld [vmem:[#allocation2 + $0x142] sm:$0xff] }
 0x147   : > { %4917 = vmatmul.mubr.msk.bf16.gmra.mrb[40].mxu0 %vm334_vm1, %v5957_v50 }
 0x148   : > { %4920 = vmatprep.mubr.msk.bf16.mxu0 %vm334_vm1, %v5962_v56 }
 0x149   : > { %5019 = vmatmul.mubr.msk.bf16.gmra.mrb[8].mxu1 %vm334_vm1, %v5960_v55 }
 0x14a   : > { %5022 = vmatprep.mubr.msk.bf16.mxu1 %vm334_vm1, %v5979_v15 }
 0x14f   : > { %4921 = vmatmul.mubr.msk.bf16.gmra.mrb[44].mxu0 %vm334_vm1, %v5981_v16 }
 0x150   : > { %4924 = vmatprep.mubr.msk.bf16.mxu0 %vm334_vm1, %v5986_v22 }
 0x151   : > { %5023 = vmatmul.mubr.msk.bf16.gmra.mrb[12].mxu1 %vm334_vm1, %v5984_v21 }
 0x152   : > { %5026 = vmatprep.mubr.msk.bf16.mxu1 %vm334_vm1, %v6003_v44 }
 0x157   : > { %4925 = vmatmul.mubr.msk.bf16.gmra.mrb[48].mxu0 %vm334_vm1, %v6005_v45 }
 0x158   : > { %4928 = vmatprep.mubr.msk.bf16.mxu0 %vm334_vm1, %v6010_v53 }
 0x159   : > { %5027 = vmatmul.mubr.msk.bf16.gmra.mrb[16].mxu1 %vm334_vm1, %v6008_v52 }
 0x15a   : > { %5030 = vmatprep.mubr.msk.bf16.mxu1 %vm334_vm1, %v6027_v14 }
 0x15f   : > { %4929 = vmatmul.mubr.msk.bf16.gmra.mrb[52].mxu0 %vm334_vm1, %v6029_v17 }
 0x160   : > { %4932 = vmatprep.mubr.msk.bf16.mxu0 %vm334_vm1, %v6034_v27 }
 0x161   : > { %5031 = vmatmul.mubr.msk.bf16.gmra.mrb[20].mxu1 %vm334_vm1, %v6032_v26 }
 0x162   : > { %5034 = vmatprep.mubr.msk.bf16.mxu1 %vm334_vm1, %v6051_v48 }
 0x167   : > { %4933 = vmatmul.mubr.msk.bf16.gmra.mrb[56].mxu0 %vm334_vm1, %v6053_v51 }
 0x168   : > { %4936 = vmatprep.mubr.msk.bf16.mxu0 %vm334_vm1, %v6057_v58 }
 0x169   : > { %5035 = vmatmul.mubr.msk.bf16.gmra.mrb[24].mxu1 %vm334_vm1, %v6055_v57 }
 0x16a   : > { %5038 = vmatprep.mubr.msk.bf16.mxu1 %vm334_vm1, %v6067_v7 }
 0x16f   : > { %4937 = vmatmul.mubr.msk.bf16.gmra.mrb[60].mxu0 %vm334_vm1, %v6069_v10 }
 0x170   : > { %4942 = vmatprep.mubr.msk.bf16.mxu0 %vm334_vm1, %v1343_v24  ;;  %v2217_v24 = vld [vmem:[#allocation2 + $0x13a] sm:$0xff] }
 0x171   : > { %5039 = vmatmul.mubr.msk.bf16.gmra.mrb[28].mxu1 %vm334_vm1, %v6146_v20  ;;  %v6225_v29 = vpack.c.bf16 %v2218_v31, %v2217_v24 }
 0x172   : > { %5044 = vmatprep.mubr.msk.bf16.mxu1 %vm334_vm1, %v2225_v23 }
 0x177   : > { %4943 = vmatmul.mubr.msk.bf16.vlgmr.msra.gmra.mrb[32].mxu0 %vm334_vm1, %v2225_v23  ;;  %v6221_v23 = vpack.c.bf16 %v1336_v9, %v1335_v8 }
 0x178   : > { %4946 = vmatprep.mubr.msk.bf16.mxu0 %vm334_vm1, %v6154_v35 }
 0x179   : > { %5045 = vmatmul.mubr.msk.bf16.vlgmr.msra.gmra.mrb[0].mxu1 %vm334_vm1, %v6154_v35 }
 0x17a   : > { %5077 = vmatpush3.bf16.msra.mxu1 %v2587_v36  ;;  %5048 = vmatprep.mubr.msk.bf16.mxu1 %vm334_vm1, %v6158_v37  ;;  %v2222_v36 = vld [vmem:[#allocation2 + $0x172] sm:$0xff] }
 0x17b   : > { %5574 = vmatprep.subr.msk.bf16.mxu1 %vm558_vm0, %v6163_v38  ;;  %v6237_v40 = vpack.c.bf16 %v2222_v36, %v2221_v34  ;;  %v6412_v34 = vld [vmem:[%s6673_s4] ss:$0 sm:$0xff] }
 0x17f   : > { %4947 = vmatmul.mubr.msk.bf16.gmra.mrb[36].mxu0 %vm334_vm1, %v6158_v37 }
 0x180   : > { %4950 = vmatprep.mubr.msk.bf16.mxu0 %vm334_vm1, %v6173_v43 }
 0x181   : > { %5049 = vmatmul.mubr.msk.bf16.gmra.mrb[4].mxu1 %vm334_vm1, %v6173_v43 }
 0x182   : > { %5052 = vmatprep.mubr.msk.bf16.mxu1 %vm334_vm1, %v6177_v46 }
 0x187   : > { %4951 = vmatmul.mubr.msk.bf16.gmra.mrb[40].mxu0 %vm334_vm1, %v6177_v46 }
 0x188   : > { %4954 = vmatprep.mubr.msk.bf16.mxu0 %vm334_vm1, %v6185_v62 }
 0x189   : > { %5053 = vmatmul.mubr.msk.bf16.gmra.mrb[8].mxu1 %vm334_vm1, %v6185_v62 }
 0x18a   : > { %5056 = vmatprep.mubr.msk.bf16.mxu1 %vm334_vm1, %v6189_v63 }
 0x18f   : > { %4955 = vmatmul.mubr.msk.bf16.gmra.mrb[44].mxu0 %vm334_vm1, %v6189_v63 }
 0x190   : > { %4958 = vmatprep.mubr.msk.bf16.mxu0 %vm334_vm1, %v6197_v6 }
 0x191   : > { %5057 = vmatmul.mubr.msk.bf16.gmra.mrb[12].mxu1 %vm334_vm1, %v6197_v6 }
 0x192   : > { %5060 = vmatprep.mubr.msk.bf16.mxu1 %vm334_vm1, %v6201_v11 }
 0x197   : > { %4959 = vmatmul.mubr.msk.bf16.gmra.mrb[48].mxu0 %vm334_vm1, %v6201_v11 }
 0x198   : > { %4962 = vmatprep.mubr.msk.bf16.mxu0 %vm334_vm1, %v6209_v61 }
 0x199   : > { %5061 = vmatmul.mubr.msk.bf16.gmra.mrb[16].mxu1 %vm334_vm1, %v6209_v61 }
 0x19a   : > { %5064 = vmatprep.mubr.msk.bf16.mxu1 %vm334_vm1, %v6213_v3 }
 0x19f   : > { %4963 = vmatmul.mubr.msk.bf16.gmra.mrb[52].mxu0 %vm334_vm1, %v6213_v3 }
 0x1a0   : > { %4966 = vmatprep.mubr.msk.bf16.mxu0 %vm334_vm1, %v6221_v23 }
 0x1a1   : > { %5065 = vmatmul.mubr.msk.bf16.gmra.mrb[20].mxu1 %vm334_vm1, %v6221_v23 }
 0x1a2   : > { %5068 = vmatprep.mubr.msk.bf16.mxu1 %vm334_vm1, %v6225_v29 }
 0x1a7   : > { %4967 = vmatmul.mubr.msk.bf16.gmra.mrb[56].mxu0 %vm334_vm1, %v6225_v29 }
 0x1a8   : > { %4970 = vmatprep.mubr.msk.bf16.mxu0 %vm334_vm1, %v6233_v39 }
 0x1a9   : > { %5069 = vmatmul.mubr.msk.bf16.gmra.mrb[24].mxu1 %vm334_vm1, %v6233_v39 }
 0x1aa   : > { %5072 = vmatprep.mubr.msk.bf16.mxu1 %vm334_vm1, %v6237_v40 }
 0x1af   : > { %4971 = vmatmul.mubr.msk.bf16.gmra.mrb[60].mxu0 %vm334_vm1, %v6237_v40 }
 0x1b1   : > { %5073 = vmatmul.mubr.msk.bf16.gmra.mrb[28].mxu1 %vm334_vm1, %v6245_v47 }
 0x1b2   : > { %5078 = vmatprep.mubr.msk.bf16.mxu1 %vm334_vm1, %v5899_v4  ;;  %v2518_v4 = vld [vmem:[#allocation2 + $0x198] sm:$0xff] }
 0x1b9   : > { %5079 = vmatmul.mubr.msk.bf16.vlgmr.msra.gmra.mrb[0].mxu1 %vm334_vm1, %v5933_v25  ;;  %v2519_v25 = vld [vmem:[#allocation2 + $0x1a0] sm:$0xff] }
 0x1ba   : > { %5111 = vmatpush3.bf16.msra.mxu1 %v2881_v28  ;;  %5082 = vmatprep.mubr.msk.bf16.mxu1 %vm334_vm1, %v5938_v32  ;;  %v2535_v32 = vpack.c.bf16 %v2519_v25, %v2518_v4 }
 0x1bb   : > { %5575 = vmatprep.subr.msk.bf16.mxu1 %vm558_vm0, %v4498_v54 }
 0x1c1   : > { %5083 = vmatmul.mubr.msk.bf16.gmra.mrb[4].mxu1 %vm334_vm1, %v5957_v50  ;;  %v2783_v50 = vld [vmem:[#allocation2 + $0x39] sm:$0xff] }
 0x1c2   : > { %5086 = vmatprep.mubr.msk.bf16.mxu1 %vm334_vm1, %v5962_v56  ;;  %v2782_v56 = vld [vmem:[#allocation2 + $0x31] sm:$0xff] }
 0x1c9   : > { %5087 = vmatmul.mubr.msk.bf16.gmra.mrb[8].mxu1 %vm334_vm1, %v5981_v16  ;;  %v2814_v16 = vpack.c.bf16 %v2783_v50, %v2782_v56 }
 0x1ca   : > { %5090 = vmatprep.mubr.msk.bf16.mxu1 %vm334_vm1, %v5986_v22  ;;  %v2785_v22 = vld [vmem:[#allocation2 + $0x51] sm:$0xff] }
 0x1d1   : > { %5091 = vmatmul.mubr.msk.bf16.gmra.mrb[12].mxu1 %vm334_vm1, %v6005_v45  ;;  %v2787_v45 = vld [vmem:[#allocation2 + $0x69] sm:$0xff] }
 0x1d2   : > { %5094 = vmatprep.mubr.msk.bf16.mxu1 %vm334_vm1, %v6010_v53  ;;  %v2784_v53 = vld [vmem:[#allocation2 + $0x49] sm:$0xff] }
 0x1d9   : > { %5095 = vmatmul.mubr.msk.bf16.gmra.mrb[16].mxu1 %vm334_vm1, %v6029_v17  ;;  %v2815_v17 = vpack.c.bf16 %v2785_v22, %v2784_v53 }
 0x1da   : > { %5098 = vmatprep.mubr.msk.bf16.mxu1 %vm334_vm1, %v6034_v27  ;;  %v3175_v27 = vsel %vm558_vm0, %v4498_v54, 0 }
 0x1e1   : > { %5099 = vmatmul.mubr.msk.bf16.gmra.mrb[20].mxu1 %vm334_vm1, %v6053_v51  ;;  %v2786_v51 = vld [vmem:[#allocation2 + $0x61] sm:$0xff] }
 0x1e2   : > { %5102 = vmatprep.mubr.msk.bf16.mxu1 %vm334_vm1, %v6057_v58  ;;  %v2816_v58 = vpack.c.bf16 %v2787_v45, %v2786_v51 }
 0x1e9   : > { %5103 = vmatmul.mubr.msk.bf16.gmra.mrb[24].mxu1 %vm334_vm1, %v6069_v10  ;;  %v3457_v10 = vld [vmem:[%s6674_s5] sm:$0xf] }
 0x1ea   : > { %5106 = vmatprep.mubr.msk.bf16.mxu1 %vm334_vm1, %v6071_v12  ;;  %5576 = vmatprep.subr.msk.bf16.mxu0 %vm558_vm0, %v3457_v10  ;;  %v3514_v12 = vsel %vm558_vm0, %v3457_v10, 0 }
 0x1eb   : > { %5179 = vmatpush3.bf16.msra.mxu0 %v3514_v12 }
 0x1ec   : > { %5577 = vmatprep.subr.msk.bf16.mxu0 %vm558_vm0, %v3709_v30 }
 0x1f1   : > { %5107 = vmatmul.mubr.msk.bf16.gmra.mrb[28].mxu1 %vm334_vm1, %v2535_v32 }
 0x1f2   : > { %5112 = vmatprep.mubr.msk.bf16.mxu1 %vm334_vm1, %v2814_v16 }
 0x1f9   : > { %5113 = vmatmul.mubr.msk.bf16.vlgmr.msra.gmra.mrb[0].mxu1 %vm334_vm1, %v2815_v17 }
 0x1fa   : > { %5145 = vmatpush3.bf16.msra.mxu1 %v3175_v27  ;;  %5116 = vmatprep.mubr.msk.bf16.mxu1 %vm334_vm1, %v2816_v58 }
 0x201   : > { %5117 = vmatmul.mubr.msk.bf16.gmra.mrb[4].mxu1 %vm334_vm1, %v5955_v49  ;;  %v2812_v49 = vld [vmem:[#allocation2 + $0x199] sm:$0xff] }
 0x202   : > { %5120 = vmatprep.mubr.msk.bf16.mxu1 %vm334_vm1, %v5960_v55  ;;  %v2813_v55 = vld [vmem:[#allocation2 + $0x1a1] sm:$0xff] }
 0x209   : > { %5121 = vmatmul.mubr.msk.bf16.gmra.mrb[8].mxu1 %vm334_vm1, %v5979_v15  ;;  %v2829_v15 = vpack.c.bf16 %v2813_v55, %v2812_v49 }
 0x20a   : > { %5124 = vmatprep.mubr.msk.bf16.mxu1 %vm334_vm1, %v5984_v21 }
 0x211   : > { %5125 = vmatmul.mubr.msk.bf16.gmra.mrb[12].mxu1 %vm334_vm1, %v6003_v44 }
 0x212   : > { %5128 = vmatprep.mubr.msk.bf16.mxu1 %vm334_vm1, %v6008_v52 }
 0x219   : > { %5129 = vmatmul.mubr.msk.bf16.gmra.mrb[16].mxu1 %vm334_vm1, %v6027_v14 }
 0x21a   : > { %5132 = vmatprep.mubr.msk.bf16.mxu1 %vm334_vm1, %v6032_v26 }
 0x221   : > { %5133 = vmatmul.mubr.msk.bf16.gmra.mrb[20].mxu1 %vm334_vm1, %v6051_v48 }
 0x222   : > { %5136 = vmatprep.mubr.msk.bf16.mxu1 %vm334_vm1, %v6055_v57 }
 0x229   : > { %5137 = vmatmul.mubr.msk.bf16.gmra.mrb[24].mxu1 %vm334_vm1, %v6067_v7 }
 0x22a   : > { %5140 = vmatprep.mubr.msk.bf16.mxu1 %vm334_vm1, %v6146_v20 }
 0x231   : > { %5141 = vmatmul.mubr.msk.bf16.gmra.mrb[28].mxu1 %vm334_vm1, %v2829_v15  ;;  %v3839_v15 = vsel %vm558_vm0, %v3709_v30, 0 }
 0x232   : > { %5146 = vmatprep.mubr.msk.bf16.mxu1 %vm334_vm1, %v6154_v35 }
 0x239   : > { %5147 = vmatmul.mubr.msk.bf16.vlgmr.msra.gmra.mrb[0].mxu1 %vm334_vm1, %v6158_v37 }
 0x23a   : > { %5150 = vmatprep.mubr.msk.bf16.mxu1 %vm334_vm1, %v6173_v43 }
 0x241   : > { %5151 = vmatmul.mubr.msk.bf16.gmra.mrb[4].mxu1 %vm334_vm1, %v6177_v46 }
 0x242   : > { %5154 = vmatprep.mubr.msk.bf16.mxu1 %vm334_vm1, %v6185_v62 }
 0x249   : > { %5155 = vmatmul.mubr.msk.bf16.gmra.mrb[8].mxu1 %vm334_vm1, %v6189_v63  ;;  %v3106_v63 = vld [vmem:[#allocation2 + $0x19a] sm:$0xff] }
 0x24a   : > { %5158 = vmatprep.mubr.msk.bf16.mxu1 %vm334_vm1, %v6197_v6  ;;  %v4944_v21 = vpop.f32.mrb[32].mxu0  ;;  %v3123_v6 = vpack.c.bf16 %v3107_v0, %v3106_v63 }
 0x24b   : > { %v1446_v44 = vpop.f32.mrb[33].mxu0 }
 0x24c   : > { %v4945_v52 = vpop.f32.mrb[34].mxu0 }
 0x24d   : > { %v1449_v14 = vpop.f32.mrb[35].mxu0 }
 0x251   : > { %5159 = vmatmul.mubr.msk.bf16.gmra.mrb[12].mxu1 %vm334_vm1, %v6201_v11 }
 0x252   : > { %5162 = vmatprep.mubr.msk.bf16.mxu1 %vm334_vm1, %v6209_v61  ;;  %v4948_v26 = vpop.f32.mrb[36].mxu0 }
 0x253   : > { %v1462_v48 = vpop.f32.mrb[37].mxu0 }
 0x254   : > { %v6340_v57 = vpop.f32.mrb[38].mxu0 }
 0x255   : > { %v6342_v7 = vpop.f32.mrb[39].mxu0 }
 0x259   : > { %5163 = vmatmul.mubr.msk.bf16.gmra.mrb[16].mxu1 %vm334_vm1, %v6213_v3 }
 0x25a   : > { %5166 = vmatprep.mubr.msk.bf16.mxu1 %vm334_vm1, %v6221_v23  ;;  %v6348_v20 = vpop.f32.mrb[40].mxu0 }
 0x25b   : > { %v6350_v35 = vpop.f32.mrb[41].mxu0 }
 0x25c   : > { %v6352_v37 = vpop.f32.mrb[42].mxu0 }
 0x25d   : > { %v6354_v38 = vpop.f32.mrb[43].mxu0 }
 0x261   : > { %5167 = vmatmul.mubr.msk.bf16.gmra.mrb[20].mxu1 %vm334_vm1, %v6225_v29 }
 0x262   : > { %5170 = vmatprep.mubr.msk.bf16.mxu1 %vm334_vm1, %v6233_v39  ;;  %v6360_v43 = vpop.f32.mrb[44].mxu0 }
 0x263   : > { %v6362_v46 = vpop.f32.mrb[45].mxu0 }
 0x264   : > { %v6364_v59 = vpop.f32.mrb[46].mxu0 }
 0x265   : > { %v6366_v62 = vpop.f32.mrb[47].mxu0 }
 0x269   : > { %5171 = vmatmul.mubr.msk.bf16.gmra.mrb[24].mxu1 %vm334_vm1, %v6237_v40 }
 0x26a   : > { %5174 = vmatprep.mubr.msk.bf16.mxu1 %vm334_vm1, %v6245_v47  ;;  %v6372_v1 = vpop.f32.mrb[48].mxu0 }
 0x26b   : > { %v6374_v2 = vpop.f32.mrb[49].mxu0 }
 0x26c   : > { %v6376_v5 = vpop.f32.mrb[50].mxu0 }
 0x26d   : > { %v6378_v11 = vpop.f32.mrb[51].mxu0 }
 0x271   : > { %5175 = vmatmul.mubr.msk.bf16.gmra.mrb[28].mxu1 %vm334_vm1, %v3123_v6 }
 0x272   : > { %v6381_v13 = vpop.f32.mrb[52].mxu0 }
 0x273   : > { %v6383_v18 = vpop.f32.mrb[53].mxu0 }
 0x274   : > { %v6385_v19 = vpop.f32.mrb[54].mxu0 }
 0x275   : > { %v6387_v60 = vpop.f32.mrb[55].mxu0 }
 0x27a   : > { %v6389_v61 = vpop.f32.mrb[56].mxu0 }
 0x27b   : > { %v6391_v3 = vpop.f32.mrb[57].mxu0 }
 0x27c   : > { %v6393_v8 = vpop.f32.mrb[58].mxu0 }
 0x27d   : > { %v6395_v9 = vpop.f32.mrb[59].mxu0 }
 0x282   : > { %v6397_v24 = vpop.f32.mrb[60].mxu0 }
 0x283   : > { %v6399_v31 = vpop.f32.mrb[61].mxu0 }
 0x284   : > { %v6401_v23 = vpop.f32.mrb[62].mxu0 }
 0x285   : > { %v6403_v29 = vpop.f32.mrb[63].mxu0 }
 0x30c   : > { %v5148_v33 = vpop.f32.mrb[0].mxu1 }
 0x30d   : > { %v5246_v36 = vadd.f32 %v5148_v33, %v4944_v21  ;;  %v3211_v39 = vpop.f32.mrb[1].mxu1 }
 0x30e   : > { %v5247_v40 = vadd.f32 %v3211_v39, %v1446_v44  ;;  %v5149_v41 = vpop.f32.mrb[2].mxu1 }
 0x30f   : > { %v3379_v42 = vadd.f32 %v5246_v36, %v6412_v34  ;;  %v5248_v47 = vadd.f32 %v5149_v41, %v4945_v52  ;;  %v3214_v28 = vpop.f32.mrb[3].mxu1 }
 0x310   : > { %v3377_v54 = vadd.f32 %v5247_v40, %v6412_v34  ;;  %v5249_v4 = vadd.f32 %v3214_v28, %v1449_v14 }
 0x311   : > { %v3380_v25 = vadd.f32 %v5248_v47, %v6412_v34  ;;  %v3411_v50 = vmax.f32 %v3379_v42, 0.0 }
 0x312   : > { %v3378_v32 = vadd.f32 %v5249_v4, %v6412_v34  ;;  %v3409_v16 = vmax.f32 %v3377_v54, 0.0 }
 0x313   : > { %v3412_v56 = vmax.f32 %v3380_v25, 0.0 }
 0x314   : > { %v3410_v22 = vmax.f32 %v3378_v32, 0.0  ;;  %v5152_v45 = vpop.f32.mrb[4].mxu1 }
 0x315   : > { %v3442_v53 = vpack.c.bf16 %v3412_v56, %v3411_v50  ;;  %v5250_v17 = vadd.f32 %v5152_v45, %v4948_v26  ;;  %v3227_v27 = vpop.f32.mrb[5].mxu1 }
 0x316   : > { %v3441_v51 = vpack.c.bf16 %v3410_v22, %v3409_v16  ;;  %v5251_v58 = vadd.f32 %v3227_v27, %v1462_v48  ;;  %v5153_v10 = vpop.f32.mrb[6].mxu1 }
 0x317   : > { %v3383_v12 = vadd.f32 %v5250_v17, %v6412_v34  ;;  %v5252_v49 = vadd.f32 %v5153_v10, %v6340_v57  ;;  %v3230_v55 = vpop.f32.mrb[7].mxu1 }
 0x318   : > { %v3381_v21 = vadd.f32 %v5251_v58, %v6412_v34  ;;  %v5253_v44 = vadd.f32 %v3230_v55, %v6342_v7  ;;  %5180 = vmatprep.mubr.msk.bf16.mxu0 %vm334_vm1, %v3441_v51 }
 0x319   : > { %v3384_v52 = vadd.f32 %v5252_v49, %v6412_v34  ;;  %5181 = vmatmul.mubr.msk.bf16.vlgmr.msra.gmra.mrb[64].mxu0 %vm334_vm1, %v3442_v53  ;;  %v3415_v26 = vmax.f32 %v3383_v12, 0.0 }
 0x31a   : > { %v3382_v14 = vadd.f32 %v5253_v44, %v6412_v34  ;;  %5213 = vmatpush3.bf16.msra.mxu0 %v3839_v15  ;;  %v3413_v63 = vmax.f32 %v3381_v21, 0.0 }
 0x31b   : > { %v3416_v48 = vmax.f32 %v3384_v52, 0.0 }
 0x31c   : > { %v3414_v57 = vmax.f32 %v3382_v14, 0.0  ;;  %v5156_v0 = vpop.f32.mrb[8].mxu1 }
 0x31d   : > { %v3444_v6 = vpack.c.bf16 %v3416_v48, %v3415_v26  ;;  %v5254_v30 = vadd.f32 %v5156_v0, %v6348_v20  ;;  %v3243_v33 = vpop.f32.mrb[9].mxu1 }
 0x31e   : > { %v3443_v36 = vpack.c.bf16 %v3414_v57, %v3413_v63  ;;  %v5255_v7 = vadd.f32 %v3243_v33, %v6350_v35  ;;  %v5157_v39 = vpop.f32.mrb[10].mxu1 }
 0x31f   : > { %v3387_v40 = vadd.f32 %v5254_v30, %v6412_v34  ;;  %v5256_v41 = vadd.f32 %v5157_v39, %v6352_v37  ;;  %v3246_v42 = vpop.f32.mrb[11].mxu1 }
 0x320   : > { %v3385_v47 = vadd.f32 %v5255_v7, %v6412_v34  ;;  %v5257_v28 = vadd.f32 %v3246_v42, %v6354_v38  ;;  %5184 = vmatprep.mubr.msk.bf16.mxu0 %vm334_vm1, %v3443_v36 }
 0x321   : > { %v3388_v54 = vadd.f32 %v5256_v41, %v6412_v34  ;;  %5185 = vmatmul.mubr.msk.bf16.gmra.mrb[68].mxu0 %vm334_vm1, %v3444_v6  ;;  %v3419_v4 = vmax.f32 %v3387_v40, 0.0 }
 0x322   : > { %v3386_v20 = vadd.f32 %v5257_v28, %v6412_v34  ;;  %v3417_v25 = vmax.f32 %v3385_v47, 0.0 }
 0x323   : > { %v3420_v35 = vmax.f32 %v3388_v54, 0.0 }
 0x324   : > { %v3418_v32 = vmax.f32 %v3386_v20, 0.0  ;;  %v5160_v50 = vpop.f32.mrb[12].mxu1 }
 0x325   : > { %v3446_v56 = vpack.c.bf16 %v3420_v35, %v3419_v4  ;;  %v5258_v37 = vadd.f32 %v5160_v50, %v6360_v43  ;;  %v3259_v16 = vpop.f32.mrb[13].mxu1 }
 0x326   : > { %v3445_v22 = vpack.c.bf16 %v3418_v32, %v3417_v25  ;;  %v5259_v38 = vadd.f32 %v3259_v16, %v6362_v46  ;;  %v5161_v45 = vpop.f32.mrb[14].mxu1 }
 0x327   : > { %v3391_v53 = vadd.f32 %v5258_v37, %v6412_v34  ;;  %v5260_v17 = vadd.f32 %v5161_v45, %v6364_v59  ;;  %v3262_v27 = vpop.f32.mrb[15].mxu1 }
 0x328   : > { %v3389_v51 = vadd.f32 %v5259_v38, %v6412_v34  ;;  %v5261_v58 = vadd.f32 %v3262_v27, %v6366_v62  ;;  %5188 = vmatprep.mubr.msk.bf16.mxu0 %vm334_vm1, %v3445_v22 }
 0x329   : > { %v3392_v10 = vadd.f32 %v5260_v17, %v6412_v34  ;;  %5189 = vmatmul.mubr.msk.bf16.gmra.mrb[72].mxu0 %vm334_vm1, %v3446_v56  ;;  %v3423_v12 = vmax.f32 %v3391_v53, 0.0 }
 0x32a   : > { %v3390_v43 = vadd.f32 %v5261_v58, %v6412_v34  ;;  %v3421_v49 = vmax.f32 %v3389_v51, 0.0 }
 0x32b   : > { %v3424_v46 = vmax.f32 %v3392_v10, 0.0 }
 0x32c   : > { %v3422_v55 = vmax.f32 %v3390_v43, 0.0  ;;  %v5164_v15 = vpop.f32.mrb[16].mxu1 }
 0x32d   : > { %v3448_v21 = vpack.c.bf16 %v3424_v46, %v3423_v12  ;;  %v5262_v59 = vadd.f32 %v5164_v15, %v6372_v1  ;;  %v3275_v44 = vpop.f32.mrb[17].mxu1 }
 0x32e   : > { %v3447_v52 = vpack.c.bf16 %v3422_v55, %v3421_v49  ;;  %v5263_v62 = vadd.f32 %v3275_v44, %v6374_v2  ;;  %v5165_v14 = vpop.f32.mrb[18].mxu1 }
 0x32f   : > { %v3395_v26 = vadd.f32 %v5262_v59, %v6412_v34  ;;  %v5264_v48 = vadd.f32 %v5165_v14, %v6376_v5  ;;  %v3278_v63 = vpop.f32.mrb[19].mxu1 }
 0x330   : > { %v3393_v57 = vadd.f32 %v5263_v62, %v6412_v34  ;;  %v5265_v0 = vadd.f32 %v3278_v63, %v6378_v11  ;;  %5192 = vmatprep.mubr.msk.bf16.mxu0 %vm334_vm1, %v3447_v52 }
 0x331   : > { %v3396_v6 = vadd.f32 %v5264_v48, %v6412_v34  ;;  %5193 = vmatmul.mubr.msk.bf16.gmra.mrb[76].mxu0 %vm334_vm1, %v3448_v21  ;;  %v3427_v30 = vmax.f32 %v3395_v26, 0.0 }
 0x332   : > { %v3394_v1 = vadd.f32 %v5265_v0, %v6412_v34  ;;  %v3425_v33 = vmax.f32 %v3393_v57, 0.0 }
 0x333   : > { %v3428_v2 = vmax.f32 %v3396_v6, 0.0  ;;  %v5604_v6 = vld [vmem:[%s5781_s17 + $0x8] sm:$0xff]  }
 0x334   : > { %v3426_v36 = vmax.f32 %v3394_v1, 0.0  ;;  %v5168_v7 = vpop.f32.mrb[20].mxu1  ;;  %v5606_v1 = vld [vmem:[%s5781_s17 + $0x18] sm:$0xff]  }
 0x335   : > { %v3450_v39 = vpack.c.bf16 %v3428_v2, %v3427_v30  ;;  %v5266_v5 = vadd.f32 %v5168_v7, %v6381_v13  ;;  %v3291_v40 = vpop.f32.mrb[21].mxu1  ;;  %v5607_v30 = vld [vmem:[%s5781_s17 + $0x20] sm:$0xff]   ;;  %v5608_v2 = vld [vmem:[%s5781_s17 + $0x28] sm:$0xff]  }
 0x336   : > { %v3449_v41 = vpack.c.bf16 %v3426_v36, %v3425_v33  ;;  %v5267_v11 = vadd.f32 %v3291_v40, %v6383_v18  ;;  %v5169_v42 = vpop.f32.mrb[22].mxu1  ;;  %v5609_v33 = vld [vmem:[%s5781_s17 + $0x30] sm:$0xff]   ;;  %v5610_v36 = vld [vmem:[%s5781_s17 + $0x38] sm:$0xff]   ;;  %v5611_v7 = vld [vmem:[%s5781_s17 + $0x40] sm:$0xff]  }
 0x337   : > { %v3399_v47 = vadd.f32 %v5266_v5, %v6412_v34  ;;  %v5268_v28 = vadd.f32 %v5169_v42, %v6385_v19  ;;  %v3294_v54 = vpop.f32.mrb[23].mxu1  ;;  %v5613_v5 = vld [vmem:[%s5781_s17 + $0x50] sm:$0xff]   ;;  %v5614_v40 = vld [vmem:[%s5781_s17 + $0x58] sm:$0xff]  }
 0x338   : > { %v3397_v20 = vadd.f32 %v5267_v11, %v6412_v34  ;;  %v5269_v4 = vadd.f32 %v3294_v54, %v6387_v60  ;;  %5196 = vmatprep.mubr.msk.bf16.mxu0 %vm334_vm1, %v3449_v41  ;;  %v5615_v41 = vld [vmem:[%s5781_s17 + $0x60] sm:$0xff]   ;;  %v5616_v11 = vld [vmem:[%s5781_s17 + $0x68] sm:$0xff]   ;;  %v5617_v42 = vld [vmem:[%s5781_s17 + $0x70] sm:$0xff]  }
 0x339   : > { %v3400_v35 = vadd.f32 %v5268_v28, %v6412_v34  ;;  %5197 = vmatmul.mubr.msk.bf16.gmra.mrb[80].mxu0 %vm334_vm1, %v3450_v39  ;;  %v3431_v25 = vmax.f32 %v3399_v47, 0.0  ;;  %v5612_v39 = vld [vmem:[%s5781_s17 + $0x48] sm:$0xff]   ;;  %v5618_v47 = vld [vmem:[%s5781_s17 + $0x78] sm:$0xff]   ;;  %v6524_v28 = vld [vmem:[%s6675_s6] ss:$0 sm:$0xff] }
 0x33a   : > { %v3398_v13 = vadd.f32 %v5269_v4, %v6412_v34  ;;  %v3429_v32 = vmax.f32 %v3397_v20, 0.0  ;;  %v6529_v20 = vld [vmem:[%s6677_s8] ss:$0 sm:$0xff] }
 0x33b   : > { %v3432_v18 = vmax.f32 %v3400_v35, 0.0 }
 0x33c   : > { %v3430_v50 = vmax.f32 %v3398_v13, 0.0  ;;  %v5172_v56 = vpop.f32.mrb[24].mxu1 }
 0x33d   : > { %v3452_v37 = vpack.c.bf16 %v3432_v18, %v3431_v25  ;;  %v5270_v19 = vadd.f32 %v5172_v56, %v6389_v61  ;;  %v3307_v16 = vpop.f32.mrb[25].mxu1 }
 0x33e   : > { %v3451_v22 = vpack.c.bf16 %v3430_v50, %v3429_v32  ;;  %v5271_v60 = vadd.f32 %v3307_v16, %v6391_v3  ;;  %v5173_v38 = vpop.f32.mrb[26].mxu1 }
 0x33f   : > { %v3403_v45 = vadd.f32 %v5270_v19, %v6412_v34  ;;  %v5272_v53 = vadd.f32 %v5173_v38, %v6393_v8  ;;  %v3310_v17 = vpop.f32.mrb[27].mxu1 }
 0x340   : > { %v3401_v27 = vadd.f32 %v5271_v60, %v6412_v34  ;;  %v5273_v51 = vadd.f32 %v3310_v17, %v6395_v9  ;;  %5200 = vmatprep.mubr.msk.bf16.mxu0 %vm334_vm1, %v3451_v22 }
 0x341   : > { %v3404_v58 = vadd.f32 %v5272_v53, %v6412_v34  ;;  %5201 = vmatmul.mubr.msk.bf16.gmra.mrb[84].mxu0 %vm334_vm1, %v3452_v37  ;;  %v3435_v10 = vmax.f32 %v3403_v45, 0.0 }
 0x342   : > { %v3402_v61 = vadd.f32 %v5273_v51, %v6412_v34  ;;  %v3433_v43 = vmax.f32 %v3401_v27, 0.0 }
 0x343   : > { %v3436_v3 = vmax.f32 %v3404_v58, 0.0 }
 0x344   : > { %v3434_v12 = vmax.f32 %v3402_v61, 0.0  ;;  %v5176_v46 = vpop.f32.mrb[28].mxu1 }
 0x345   : > { %v3454_v49 = vpack.c.bf16 %v3436_v3, %v3435_v10  ;;  %v5274_v8 = vadd.f32 %v5176_v46, %v6397_v24  ;;  %v3323_v55 = vpop.f32.mrb[29].mxu1 }
 0x346   : > { %v3453_v15 = vpack.c.bf16 %v3434_v12, %v3433_v43  ;;  %v5275_v9 = vadd.f32 %v3323_v55, %v6399_v31  ;;  %v5177_v21 = vpop.f32.mrb[30].mxu1 }
 0x347   : > { %v3407_v59 = vadd.f32 %v5274_v8, %v6412_v34  ;;  %v5276_v44 = vadd.f32 %v5177_v21, %v6401_v23  ;;  %v3326_v52 = vpop.f32.mrb[31].mxu1 }
 0x348   : > { %v3405_v62 = vadd.f32 %v5275_v9, %v6412_v34  ;;  %v5277_v14 = vadd.f32 %v3326_v52, %v6403_v29  ;;  %5204 = vmatprep.mubr.msk.bf16.mxu0 %vm334_vm1, %v3453_v15  ;;  %v5603_v29 = vld [vmem:[%s5781_s17] sm:$0xff]  }
 0x349   : > { %v3408_v24 = vadd.f32 %v5276_v44, %v6412_v34  ;;  %5205 = vmatmul.mubr.msk.bf16.gmra.mrb[88].mxu0 %vm334_vm1, %v3454_v49  ;;  %v3439_v26 = vmax.f32 %v3407_v59, 0.0 }
 0x34a   : > { %v3406_v31 = vadd.f32 %v5277_v14, %v6412_v34  ;;  %v3437_v23 = vmax.f32 %v3405_v62, 0.0  ;;  %v5605_v34 = vld [vmem:[%s5781_s17 + $0x10] sm:$0xff]  }
 0x34b   : > { %v3440_v48 = vmax.f32 %v3408_v24, 0.0 }
 0x34c   : > { %v3438_v63 = vmax.f32 %v3406_v31, 0.0 }
 0x34d   : > { %v3456_v57 = vpack.c.bf16 %v3440_v48, %v3439_v26 }
 0x34e   : > { %v3455_v0 = vpack.c.bf16 %v3438_v63, %v3437_v23 }
 0x350   : > { %5208 = vmatprep.mubr.msk.bf16.mxu0 %vm334_vm1, %v3455_v0 }
 0x351   : > { %5209 = vmatmul.mubr.msk.bf16.gmra.mrb[92].mxu0 %vm334_vm1, %v3456_v57 }
 0x352   : > { %5214 = vmatprep.mubr.msk.bf16.mxu0 %vm334_vm1, %v5603_v29 }
 0x359   : > { %5215 = vmatmul.mubr.msk.bf16.vlgmr.msra.gmra.mrb[64].mxu0 %vm334_vm1, %v5604_v6 }
 0x35a   : > { %5218 = vmatprep.mubr.msk.bf16.mxu0 %vm334_vm1, %v5605_v34 }
 0x361   : > { %5219 = vmatmul.mubr.msk.bf16.gmra.mrb[68].mxu0 %vm334_vm1, %v5606_v1 }
 0x362   : > { %5222 = vmatprep.mubr.msk.bf16.mxu0 %vm334_vm1, %v5607_v30 }
 0x369   : > { %5223 = vmatmul.mubr.msk.bf16.gmra.mrb[72].mxu0 %vm334_vm1, %v5608_v2 }
 0x36a   : > { %5226 = vmatprep.mubr.msk.bf16.mxu0 %vm334_vm1, %v5609_v33 }
 0x371   : > { %5227 = vmatmul.mubr.msk.bf16.gmra.mrb[76].mxu0 %vm334_vm1, %v5610_v36 }
 0x372   : > { %5230 = vmatprep.mubr.msk.bf16.mxu0 %vm334_vm1, %v5611_v7 }
 0x379   : > { %5231 = vmatmul.mubr.msk.bf16.gmra.mrb[80].mxu0 %vm334_vm1, %v5612_v39 }
 0x37a   : > { %5234 = vmatprep.mubr.msk.bf16.mxu0 %vm334_vm1, %v5613_v5 }
 0x381   : > { %5235 = vmatmul.mubr.msk.bf16.gmra.mrb[84].mxu0 %vm334_vm1, %v5614_v40 }
 0x382   : > { %5238 = vmatprep.mubr.msk.bf16.mxu0 %vm334_vm1, %v5615_v41 }
 0x389   : > { %5239 = vmatmul.mubr.msk.bf16.gmra.mrb[88].mxu0 %vm334_vm1, %v5616_v11 }
 0x38a   : > { %5242 = vmatprep.mubr.msk.bf16.mxu0 %vm334_vm1, %v5617_v42 }
 0x391   : > { %5243 = vmatmul.mubr.msk.bf16.gmra.mrb[92].mxu0 %vm334_vm1, %v5618_v47 }
 0x42c   : > { %v5216_v54 = vpop.f32.mrb[64].mxu0 }
 0x42d   : > { %v5278_v4 = vadd.f32 %v5216_v54, %v6524_v28  ;;  %v3875_v35 = vpop.f32.mrb[65].mxu0 }
 0x42e   : > { %v5279_v13 = vadd.f32 %v6524_v28, %v3875_v35  ;;  %v5217_v25 = vpop.f32.mrb[66].mxu0 }
 0x42f   : > { %v4043_v18 = vadd.f32 %v5278_v4, %v6529_v20  ;;  %v5280_v32 = vadd.f32 %v5217_v25, %v6524_v28  ;;  %v3878_v50 = vpop.f32.mrb[67].mxu0 }
 0x430   : > { %v4041_v56 = vadd.f32 %v5279_v13, %v6529_v20  ;;  %v5281_v37 = vadd.f32 %v6524_v28, %v3878_v50 }
 0x431   : > { %v4075_v19 = vmax.f32 %v4043_v18, 0.0  ;;  %v4044_v16 = vadd.f32 %v5280_v32, %v6529_v20 }
 0x432   : > { %v4073_v22 = vmax.f32 %v4041_v56, 0.0  ;;  %v4042_v60 = vadd.f32 %v5281_v37, %v6529_v20 }
 0x433   : > { %v4604_v38 = vpack.c.bf16 %v4075_v19, %v4075_v19  ;;  %v4076_v45 = vmax.f32 %v4044_v16, 0.0 }
 0x434   : > { %v4602_v53 = vpack.c.bf16 %v4073_v22, %v4073_v22  ;;  %v4074_v17 = vmax.f32 %v4042_v60, 0.0  ;;  %v5220_v27 = vpop.f32.mrb[68].mxu0 }
 0x435   : > { %4236 = vst.msk [vmem:[%s6543_s13 + $0x8] sm:$0xf] %vm4233_vm3, %v4604_v38  ;;  %v4605_v51 = vpack.c.bf16 %v4076_v45, %v4076_v45  ;;  %v5282_v58 = vadd.f32 %v5220_v27, %v6524_v28  ;;  %v3891_v61 = vpop.f32.mrb[69].mxu0 }
 0x436   : > { %4234 = vst.msk [vmem:[%s6543_s13] sm:$0xf] %vm4233_vm3, %v4602_v53  ;;  %v4603_v10 = vpack.c.bf16 %v4074_v17, %v4074_v17  ;;  %v5283_v3 = vadd.f32 %v6524_v28, %v3891_v61  ;;  %v5221_v43 = vpop.f32.mrb[70].mxu0 }
 0x437   : > { %4237 = vst.msk [vmem:[%s6543_s13 + $0xc] sm:$0xf] %vm4233_vm3, %v4605_v51  ;;  %v4047_v12 = vadd.f32 %v5282_v58, %v6529_v20  ;;  %v5284_v46 = vadd.f32 %v5221_v43, %v6524_v28  ;;  %v3894_v49 = vpop.f32.mrb[71].mxu0 }
 0x438   : > { %4235 = vst.msk [vmem:[%s6543_s13 + $0x4] sm:$0xf] %vm4233_vm3, %v4603_v10  ;;  %v4045_v8 = vadd.f32 %v5283_v3, %v6529_v20  ;;  %v5285_v55 = vadd.f32 %v6524_v28, %v3894_v49 }
 0x439   : > { %v4079_v15 = vmax.f32 %v4047_v12, 0.0  ;;  %v4048_v9 = vadd.f32 %v5284_v46, %v6529_v20 }
 0x43a   : > { %v4077_v21 = vmax.f32 %v4045_v8, 0.0  ;;  %v4046_v59 = vadd.f32 %v5285_v55, %v6529_v20 }
 0x43b   : > { %v4608_v44 = vpack.c.bf16 %v4079_v15, %v4079_v15  ;;  %v4080_v52 = vmax.f32 %v4048_v9, 0.0 }
 0x43c   : > { %v4606_v62 = vpack.c.bf16 %v4077_v21, %v4077_v21  ;;  %v4078_v14 = vmax.f32 %v4046_v59, 0.0  ;;  %v5224_v24 = vpop.f32.mrb[72].mxu0 }
 0x43d   : > { %4240 = vst.msk [vmem:[%s6543_s13 + $0x18] sm:$0xf] %vm4233_vm3, %v4608_v44  ;;  %v4609_v31 = vpack.c.bf16 %v4080_v52, %v4080_v52  ;;  %v5286_v26 = vadd.f32 %v5224_v24, %v6524_v28  ;;  %v3907_v48 = vpop.f32.mrb[73].mxu0 }
 0x43e   : > { %4238 = vst.msk [vmem:[%s6543_s13 + $0x10] sm:$0xf] %vm4233_vm3, %v4606_v62  ;;  %v4607_v23 = vpack.c.bf16 %v4078_v14, %v4078_v14  ;;  %v5287_v63 = vadd.f32 %v6524_v28, %v3907_v48  ;;  %v5225_v57 = vpop.f32.mrb[74].mxu0 }
 0x43f   : > { %4241 = vst.msk [vmem:[%s6543_s13 + $0x1c] sm:$0xf] %vm4233_vm3, %v4609_v31  ;;  %v4051_v0 = vadd.f32 %v5286_v26, %v6529_v20  ;;  %v5288_v29 = vadd.f32 %v5225_v57, %v6524_v28  ;;  %v3910_v6 = vpop.f32.mrb[75].mxu0 }
 0x440   : > { %4239 = vst.msk [vmem:[%s6543_s13 + $0x14] sm:$0xf] %vm4233_vm3, %v4607_v23  ;;  %v4049_v34 = vadd.f32 %v5287_v63, %v6529_v20  ;;  %v5289_v1 = vadd.f32 %v6524_v28, %v3910_v6 }
 0x441   : > { %v4083_v30 = vmax.f32 %v4051_v0, 0.0  ;;  %v4052_v2 = vadd.f32 %v5288_v29, %v6529_v20 }
 0x442   : > { %v4081_v33 = vmax.f32 %v4049_v34, 0.0  ;;  %v4050_v36 = vadd.f32 %v5289_v1, %v6529_v20 }
 0x443   : > { %v4612_v7 = vpack.c.bf16 %v4083_v30, %v4083_v30  ;;  %v4084_v39 = vmax.f32 %v4052_v2, 0.0 }
 0x444   : > { %v4610_v5 = vpack.c.bf16 %v4081_v33, %v4081_v33  ;;  %v4082_v40 = vmax.f32 %v4050_v36, 0.0  ;;  %v5228_v41 = vpop.f32.mrb[76].mxu0 }
 0x445   : > { %4244 = vst.msk [vmem:[%s6543_s13 + $0x28] sm:$0xf] %vm4233_vm3, %v4612_v7  ;;  %v4613_v11 = vpack.c.bf16 %v4084_v39, %v4084_v39  ;;  %v5290_v42 = vadd.f32 %v5228_v41, %v6524_v28  ;;  %v3923_v47 = vpop.f32.mrb[77].mxu0 }
 0x446   : > { %4242 = vst.msk [vmem:[%s6543_s13 + $0x20] sm:$0xf] %vm4233_vm3, %v4610_v5  ;;  %v4611_v54 = vpack.c.bf16 %v4082_v40, %v4082_v40  ;;  %v5291_v4 = vadd.f32 %v6524_v28, %v3923_v47  ;;  %v5229_v35 = vpop.f32.mrb[78].mxu0 }
 0x447   : > { %4245 = vst.msk [vmem:[%s6543_s13 + $0x2c] sm:$0xf] %vm4233_vm3, %v4613_v11  ;;  %v4055_v13 = vadd.f32 %v5290_v42, %v6529_v20  ;;  %v5292_v25 = vadd.f32 %v5229_v35, %v6524_v28  ;;  %v3926_v18 = vpop.f32.mrb[79].mxu0 }
 0x448   : > { %4243 = vst.msk [vmem:[%s6543_s13 + $0x24] sm:$0xf] %vm4233_vm3, %v4611_v54  ;;  %v4053_v32 = vadd.f32 %v5291_v4, %v6529_v20  ;;  %v5293_v50 = vadd.f32 %v6524_v28, %v3926_v18 }
 0x449   : > { %v4087_v56 = vmax.f32 %v4055_v13, 0.0  ;;  %v4056_v37 = vadd.f32 %v5292_v25, %v6529_v20 }
 0x44a   : > { %v4085_v19 = vmax.f32 %v4053_v32, 0.0  ;;  %v4054_v16 = vadd.f32 %v5293_v50, %v6529_v20 }
 0x44b   : > { %v4616_v22 = vpack.c.bf16 %v4087_v56, %v4087_v56  ;;  %v4088_v60 = vmax.f32 %v4056_v37, 0.0 }
 0x44c   : > { %v4614_v38 = vpack.c.bf16 %v4085_v19, %v4085_v19  ;;  %v4086_v45 = vmax.f32 %v4054_v16, 0.0  ;;  %v5232_v53 = vpop.f32.mrb[80].mxu0 }
 0x44d   : > { %4248 = vst.msk [vmem:[%s6543_s13 + $0x38] sm:$0xf] %vm4233_vm3, %v4616_v22  ;;  %v4617_v17 = vpack.c.bf16 %v4088_v60, %v4088_v60  ;;  %v5294_v27 = vadd.f32 %v5232_v53, %v6524_v28  ;;  %v3939_v51 = vpop.f32.mrb[81].mxu0 }
 0x44e   : > { %4246 = vst.msk [vmem:[%s6543_s13 + $0x30] sm:$0xf] %vm4233_vm3, %v4614_v38  ;;  %v4615_v58 = vpack.c.bf16 %v4086_v45, %v4086_v45  ;;  %v5295_v61 = vadd.f32 %v6524_v28, %v3939_v51  ;;  %v5233_v10 = vpop.f32.mrb[82].mxu0 }
 0x44f   : > { %4249 = vst.msk [vmem:[%s6543_s13 + $0x3c] sm:$0xf] %vm4233_vm3, %v4617_v17  ;;  %v4059_v3 = vadd.f32 %v5294_v27, %v6529_v20  ;;  %v5296_v43 = vadd.f32 %v5233_v10, %v6524_v28  ;;  %v3942_v12 = vpop.f32.mrb[83].mxu0 }
 0x450   : > { %4247 = vst.msk [vmem:[%s6543_s13 + $0x34] sm:$0xf] %vm4233_vm3, %v4615_v58  ;;  %v4057_v46 = vadd.f32 %v5295_v61, %v6529_v20  ;;  %v5297_v49 = vadd.f32 %v6524_v28, %v3942_v12 }
 0x451   : > { %v4091_v8 = vmax.f32 %v4059_v3, 0.0  ;;  %v4060_v55 = vadd.f32 %v5296_v43, %v6529_v20 }
 0x452   : > { %v4089_v15 = vmax.f32 %v4057_v46, 0.0  ;;  %v4058_v9 = vadd.f32 %v5297_v49, %v6529_v20 }
 0x453   : > { %v4620_v21 = vpack.c.bf16 %v4091_v8, %v4091_v8  ;;  %v4092_v59 = vmax.f32 %v4060_v55, 0.0 }
 0x454   : > { %v4618_v44 = vpack.c.bf16 %v4089_v15, %v4089_v15  ;;  %v4090_v52 = vmax.f32 %v4058_v9, 0.0  ;;  %v5236_v62 = vpop.f32.mrb[84].mxu0 }
 0x455   : > { %4252 = vst.msk [vmem:[%s6543_s13 + $0x48] sm:$0xf] %vm4233_vm3, %v4620_v21  ;;  %v4621_v14 = vpack.c.bf16 %v4092_v59, %v4092_v59  ;;  %v5298_v24 = vadd.f32 %v5236_v62, %v6524_v28  ;;  %v3955_v31 = vpop.f32.mrb[85].mxu0 }
 0x456   : > { %4250 = vst.msk [vmem:[%s6543_s13 + $0x40] sm:$0xf] %vm4233_vm3, %v4618_v44  ;;  %v4619_v26 = vpack.c.bf16 %v4090_v52, %v4090_v52  ;;  %v5299_v48 = vadd.f32 %v6524_v28, %v3955_v31  ;;  %v5237_v23 = vpop.f32.mrb[86].mxu0 }
 0x457   : > { %4253 = vst.msk [vmem:[%s6543_s13 + $0x4c] sm:$0xf] %vm4233_vm3, %v4621_v14  ;;  %v4063_v63 = vadd.f32 %v5298_v24, %v6529_v20  ;;  %v5300_v57 = vadd.f32 %v5237_v23, %v6524_v28  ;;  %v3958_v0 = vpop.f32.mrb[87].mxu0 }
 0x458   : > { %4251 = vst.msk [vmem:[%s6543_s13 + $0x44] sm:$0xf] %vm4233_vm3, %v4619_v26  ;;  %v4061_v29 = vadd.f32 %v5299_v48, %v6529_v20  ;;  %v5301_v6 = vadd.f32 %v6524_v28, %v3958_v0 }
 0x459   : > { %v4095_v34 = vmax.f32 %v4063_v63, 0.0  ;;  %v4064_v1 = vadd.f32 %v5300_v57, %v6529_v20 }
 0x45a   : > { %v4093_v30 = vmax.f32 %v4061_v29, 0.0  ;;  %v4062_v2 = vadd.f32 %v5301_v6, %v6529_v20 }
 0x45b   : > { %v4624_v33 = vpack.c.bf16 %v4095_v34, %v4095_v34  ;;  %v4096_v36 = vmax.f32 %v4064_v1, 0.0 }
 0x45c   : > { %v4622_v7 = vpack.c.bf16 %v4093_v30, %v4093_v30  ;;  %v4094_v39 = vmax.f32 %v4062_v2, 0.0  ;;  %v5240_v5 = vpop.f32.mrb[88].mxu0 }
 0x45d   : > { %4256 = vst.msk [vmem:[%s6543_s13 + $0x58] sm:$0xf] %vm4233_vm3, %v4624_v33  ;;  %v4625_v40 = vpack.c.bf16 %v4096_v36, %v4096_v36  ;;  %v5302_v41 = vadd.f32 %v5240_v5, %v6524_v28  ;;  %v3971_v11 = vpop.f32.mrb[89].mxu0 }
 0x45e   : > { %4254 = vst.msk [vmem:[%s6543_s13 + $0x50] sm:$0xf] %vm4233_vm3, %v4622_v7  ;;  %v4623_v42 = vpack.c.bf16 %v4094_v39, %v4094_v39  ;;  %v5303_v47 = vadd.f32 %v6524_v28, %v3971_v11  ;;  %v5241_v54 = vpop.f32.mrb[90].mxu0 }
 0x45f   : > { %4257 = vst.msk [vmem:[%s6543_s13 + $0x5c] sm:$0xf] %vm4233_vm3, %v4625_v40  ;;  %v4067_v4 = vadd.f32 %v5302_v41, %v6529_v20  ;;  %v5304_v35 = vadd.f32 %v5241_v54, %v6524_v28  ;;  %v3974_v13 = vpop.f32.mrb[91].mxu0 }
 0x460   : > { %4255 = vst.msk [vmem:[%s6543_s13 + $0x54] sm:$0xf] %vm4233_vm3, %v4623_v42  ;;  %v4065_v25 = vadd.f32 %v5303_v47, %v6529_v20  ;;  %v5305_v18 = vadd.f32 %v6524_v28, %v3974_v13 }
 0x461   : > { %v4099_v32 = vmax.f32 %v4067_v4, 0.0  ;;  %v4068_v50 = vadd.f32 %v5304_v35, %v6529_v20 }
 0x462   : > { %v4097_v56 = vmax.f32 %v4065_v25, 0.0  ;;  %v4066_v37 = vadd.f32 %v5305_v18, %v6529_v20 }
 0x463   : > { %v4628_v19 = vpack.c.bf16 %v4099_v32, %v4099_v32  ;;  %v4100_v16 = vmax.f32 %v4068_v50, 0.0 }
 0x464   : > { %v4626_v22 = vpack.c.bf16 %v4097_v56, %v4097_v56  ;;  %v4098_v60 = vmax.f32 %v4066_v37, 0.0  ;;  %v5244_v38 = vpop.f32.mrb[92].mxu0 }
 0x465   : > { %4260 = vst.msk [vmem:[%s6543_s13 + $0x68] sm:$0xf] %vm4233_vm3, %v4628_v19  ;;  %v4629_v45 = vpack.c.bf16 %v4100_v16, %v4100_v16  ;;  %v5306_v53 = vadd.f32 %v5244_v38, %v6524_v28  ;;  %v3987_v17 = vpop.f32.mrb[93].mxu0 }
 0x466   : > { %4258 = vst.msk [vmem:[%s6543_s13 + $0x60] sm:$0xf] %vm4233_vm3, %v4626_v22  ;;  %v4627_v27 = vpack.c.bf16 %v4098_v60, %v4098_v60  ;;  %v5307_v51 = vadd.f32 %v6524_v28, %v3987_v17  ;;  %v5245_v58 = vpop.f32.mrb[94].mxu0 }
 0x467   : > { %4261 = vst.msk [vmem:[%s6543_s13 + $0x6c] sm:$0xf] %vm4233_vm3, %v4629_v45  ;;  %v4071_v61 = vadd.f32 %v5306_v53, %v6529_v20  ;;  %v5308_v10 = vadd.f32 %v5245_v58, %v6524_v28  ;;  %v3990_v3 = vpop.f32.mrb[95].mxu0 }
 0x468   : > { %4259 = vst.msk [vmem:[%s6543_s13 + $0x64] sm:$0xf] %vm4233_vm3, %v4627_v27  ;;  %v4069_v43 = vadd.f32 %v5307_v51, %v6529_v20  ;;  %v5309_v12 = vadd.f32 %v6524_v28, %v3990_v3 }
 0x469   : > { %v4103_v46 = vmax.f32 %v4071_v61, 0.0  ;;  %v4072_v49 = vadd.f32 %v5308_v10, %v6529_v20 }
 0x46a   : > { %v4101_v8 = vmax.f32 %v4069_v43, 0.0  ;;  %v4070_v55 = vadd.f32 %v5309_v12, %v6529_v20 }
 0x46b   : > { %v4632_v15 = vpack.c.bf16 %v4103_v46, %v4103_v46  ;;  %v4104_v9 = vmax.f32 %v4072_v49, 0.0 }
 0x46c   : > { %v4630_v21 = vpack.c.bf16 %v4101_v8, %v4101_v8  ;;  %v4102_v59 = vmax.f32 %v4070_v55, 0.0 }
 0x46d   : > { %4264 = vst.msk [vmem:[%s6543_s13 + $0x78] sm:$0xf] %vm4233_vm3, %v4632_v15  ;;  %v4633_v44 = vpack.c.bf16 %v4104_v9, %v4104_v9 }
 0x46e   : > { %4262 = vst.msk [vmem:[%s6543_s13 + $0x70] sm:$0xf] %vm4233_vm3, %v4630_v21  ;;  %v4631_v52 = vpack.c.bf16 %v4102_v59, %v4102_v59 }
 0x46f   : > { %4265 = vst.msk [vmem:[%s6543_s13 + $0x7c] sm:$0xf] %vm4233_vm3, %v4633_v44 }
 0x470   : > { %4263 = vst.msk [vmem:[%s6543_s13 + $0x74] sm:$0xf] %vm4233_vm3, %v4631_v52 }
 0x471 PF: > { %s19_s30 = sadd.s32 1, %s5625_s30  }
 0x472   : > { %p16_p4 = scmp.ge.s32.totalorder %s19_s30, 4  }
 0x474   :  { %18 = sbr.rel (!%p16_p4) target bundleno = 1 (0x1), region = 96 }

// kernel: _lambda_.9
= control target key start
LH: loop header
LB: loop body
LE: loop exit
PB: predicated region body
PF: predicated region fallthrough
CT: control target
= control target key end

     0   :  { %s2903_s30 = smov 0   ;;  %s3385_s0 = inlined_call_operand.vmem [shape: bf16[2,4,8,8,32], index: 0, kind: input, shape index: {}]   ;;  %s3386_s1 = inlined_call_operand.vmem [shape: bf16[32,16], index: 1, kind: input, shape index: {}]   ;;  %s3387_s2 = inlined_call_operand.vmem [shape: f32[1,16], index: 2, kind: input, shape index: {}]   ;;  %s3388_s3 = inlined_call_operand.vmem [shape: bf16[9,16,16], index: 3, kind: input, shape index: {}]   ;;  %s3389_s4 = inlined_call_operand.vmem [shape: f32[1,16], index: 4, kind: input, shape index: {}]   ;;  %s3390_s5 = inlined_call_operand.vmem [shape: bf16[16,64], index: 5, kind: input, shape index: {}]   ;;  %s3391_s6 = inlined_call_operand.vmem [shape: f32[1,64], index: 6, kind: input, shape index: {}]   ;;  %s3392_s7 = inlined_call_operand.vmem [shape: bf16[32,64], index: 7, kind: input, shape index: {}]   ;;  %s3393_s8 = inlined_call_operand.vmem [shape: f32[1,64], index: 8, kind: input, shape index: {}]   ;;  %s3394_s9 = inlined_call_operand.vmem [shape: bf16[2,64,64], index: 9, kind: output, shape index: {}]  }
   0x1 LB: > { %s2297_s10 = sadd.s32 4294967295, %s2850_s30   ;;  %p2301_p0 = scmp.ge.s32.totalorder %s2850_s30, 1  ;;  %s2850_s30 = sphi %s2903_s30, %s19_s30  }
   0x2   : > { %p287_p1 = scmp.lt.s32.totalorder %s2850_s30, 3 }
   0x4   : > { %p288_p2 = pnand %p2301_p0, %p287_p1 }
   0x5   : > { %v2804_v0 = vld [vmem:[%s3386_s1] sm:$0xff] (!%p288_p2)   ;;  %p323_p3 = scmp.lt.s32.totalorder (!%p288_p2), %s2297_s10, 1  ;;  %v2805_v1 = vld [vmem:[%s3386_s1 + $0x8] sm:$0xff] (!%p288_p2)   ;;  %vm334_vm0 = vcmask (!%p288_p2), 130048   ;;  %vm459_vm1 = vcmask (!%p288_p2), 261120   ;;  %v2852_v5 = vmov (!%p288_p2), 0.0  }
   0x6   : > { %291 = sbr.rel (%p288_p2) target bundleno = 876 (0x36c), region = 56  ;;  %2553 = vmatprep.subr.bf16.mxu1 (!%p288_p2), %v2804_v0  ;;  %v2808_v2 = vld [vmem:[%s3386_s1] sm:$0xff] (!%p288_p2)   ;;  %v2811_v4 = vld [vmem:[%s3386_s1 + $0x8] sm:$0xff] (!%p288_p2)   ;;  %394 = vst.msk [vmem:[#allocation2 + $0x1d0] sm:$0xff] (!%p288_p2), %vm334_vm0, %v2852_v5  ;;  %335 = vst.msk [vmem:[#allocation2] sm:$0xff] (!%p288_p2), %vm334_vm0, %v2852_v5  ;;  %vm336_vm2 = vcmask (!%p288_p2), 122880  }
   0x7   : > { %2554 = vmatpush3.bf16.msra.mxu1 (!%p288_p2), %v2804_v0  ;;  %338 = vst.msk [vmem:[#allocation2 + $0x10] sm:$0xff] (!%p288_p2), %vm334_vm0, %v2852_v5  ;;  %340 = vst.msk [vmem:[#allocation2 + $0x20] sm:$0xff] (!%p288_p2), %vm334_vm0, %v2852_v5  ;;  %v2814_v8 = vld [vmem:[%s3386_s1] sm:$0xff] (!%p288_p2)   ;;  %v2817_v12 = vld [vmem:[%s3386_s1 + $0x8] sm:$0xff] (!%p288_p2)   ;;  %vm2233_vm3 = vcmask (!%p288_p2), 519168  }
   0x8   : > { %2555 = vmatprep.subr.bf16.mxu1 (!%p288_p2), %v2805_v1  ;;  %342 = vst.msk [vmem:[#allocation2 + $0x30] sm:$0xff] (!%p288_p2), %vm334_vm0, %v2852_v5  ;;  %344 = vst.msk [vmem:[#allocation2 + $0x40] sm:$0xff] (!%p288_p2), %vm334_vm0, %v2852_v5  ;;  %v2820_v14 = vld [vmem:[%s3386_s1] sm:$0xff] (!%p288_p2)   ;;  %v2823_v19 = vld [vmem:[%s3386_s1 + $0x8] sm:$0xff] (!%p288_p2)  }
   0x9   : > { %346 = vst.msk [vmem:[#allocation2 + $0x50] sm:$0xff] (!%p288_p2), %vm334_vm0, %v2852_v5  ;;  %348 = vst.msk [vmem:[#allocation2 + $0x60] sm:$0xff] (!%p288_p2), %vm334_vm0, %v2852_v5  ;;  %v2828_v25 = vld [vmem:[%s3388_s3 + $0x8] sm:$0xff] (!%p288_p2)   ;;  %v3083_v26 = vld [vmem:[%s3388_s3] sm:$0xff] (!%p288_p2)  }
   0xa   : > { %350 = vst.msk [vmem:[#allocation2 + $0x70] sm:$0xff] (!%p288_p2), %vm334_vm0, %v2852_v5  ;;  %352 = vst.msk [vmem:[#allocation2 + $0x80] sm:$0xff] (!%p288_p2), %vm334_vm0, %v2852_v5  ;;  %2611 = vmatprep.subr.bf16.mxu0 (!%p288_p2), %v3083_v26  ;;  %v3091_v27 = vld [vmem:[%s3388_s3 + $0x10] sm:$0xff] (!%p288_p2)   ;;  %v3097_v28 = vld [vmem:[%s3387_s2] ss:$0 sm:$0xff] (!%p288_p2) }
   0xb   : > { %354 = vst.msk [vmem:[#allocation2 + $0x90] sm:$0xff] (!%p288_p2), %vm334_vm0, %v2852_v5  ;;  %356 = vst.msk [vmem:[#allocation2 + $0xa0] sm:$0xff] (!%p288_p2), %vm334_vm0, %v2852_v5  ;;  %2556 = vmatpush3.bf16.msra.mxu1 (!%p288_p2), %v2805_v1  ;;  %2612 = vmatpush3.bf16.msra.mxu0 (!%p288_p2), %v3083_v26 }
   0xc   : > { %358 = vst.msk [vmem:[#allocation2 + $0xb0] sm:$0xff] (!%p288_p2), %vm334_vm0, %v2852_v5  ;;  %360 = vst.msk [vmem:[#allocation2 + $0xc0] sm:$0xff] (!%p288_p2), %vm334_vm0, %v2852_v5  ;;  %2565 = vmatprep.subr.bf16.mxu1 (!%p288_p2), %v2808_v2  ;;  %2621 = vmatprep.subr.bf16.mxu0 (!%p288_p2), %v3091_v27 }
   0xd   : > { %s3396_s10 = smov (!%p323_p3, %s2297_s10), 1  ;;  %362 = vst.msk [vmem:[#allocation2 + $0xd0] sm:$0xff] %vm334_vm0, %v2852_v5  ;;  %364 = vst.msk [vmem:[#allocation2 + $0xe0] sm:$0xff] %vm334_vm0, %v2852_v5 }
   0xe   : > { %s2463_s15 = sshll.u32 %s3396_s10, 7  ;;  %366 = vst.msk [vmem:[#allocation2 + $0xf0] sm:$0xff] %vm334_vm0, %v2852_v5  ;;  %368 = vst.msk [vmem:[#allocation2 + $0x100] sm:$0xff] %vm334_vm0, %v2852_v5  ;;  %s2464_s27 = sshll.u32 %s3396_s10, 5 }
   0xf   : > { %s2926_s20 = scalar_lea.vmem %s3385_s0, %s2463_s15  ;;  %370 = vst.msk [vmem:[#allocation2 + $0x110] sm:$0xff] %vm334_vm0, %v2852_v5  ;;  %372 = vst.msk [vmem:[#allocation2 + $0x120] sm:$0xff] %vm334_vm0, %v2852_v5  ;;  %s3364_s29 = scalar_lea.vmem %s3394_s9, %s2464_s27 }
  0x10   : > { %v2806_v3 = vld [vmem:[%s2926_s20] sm:$0xff]   ;;  %374 = vst.msk [vmem:[#allocation2 + $0x130] sm:$0xff] %vm334_vm0, %v2852_v5  ;;  %376 = vst.msk [vmem:[#allocation2 + $0x140] sm:$0xff] %vm334_vm0, %v2852_v5  ;;  %v2807_v6 = vld [vmem:[%s2926_s20 + $0x8] sm:$0xff]  }
  0x11   : > { %378 = vst.msk [vmem:[#allocation2 + $0x150] sm:$0xff] %vm334_vm0, %v2852_v5  ;;  %380 = vst.msk [vmem:[#allocation2 + $0x160] sm:$0xff] %vm334_vm0, %v2852_v5  ;;  %2557 = vmatprep.mubr.msk.bf16.mxu1 %vm459_vm1, %v2806_v3  ;;  %v2809_v7 = vld [vmem:[%s2926_s20 + $0x10] sm:$0xff]   ;;  %v2810_v9 = vld [vmem:[%s2926_s20 + $0x18] sm:$0xff]  }
  0x12   : > { %382 = vst.msk [vmem:[#allocation2 + $0x170] sm:$0xff] %vm334_vm0, %v2852_v5  ;;  %384 = vst.msk [vmem:[#allocation2 + $0x180] sm:$0xff] %vm334_vm0, %v2852_v5  ;;  %2558 = vmatmul.mubr.msk.bf16.vlgmr.msra.gmra.mrb[0].mxu1 %vm459_vm1, %v2807_v6  ;;  %v2812_v10 = vld [vmem:[%s2926_s20 + $0x20] sm:$0xff]   ;;  %v2813_v11 = vld [vmem:[%s2926_s20 + $0x28] sm:$0xff]  }
  0x13   : > { %386 = vst.msk [vmem:[#allocation2 + $0x190] sm:$0xff] %vm334_vm0, %v2852_v5  ;;  %390 = vst.msk [vmem:[#allocation2 + $0x1b0] sm:$0xff] %vm334_vm0, %v2852_v5  ;;  %2566 = vmatpush3.bf16.msra.mxu1 %v2808_v2  ;;  %2561 = vmatprep.mubr.msk.bf16.mxu1 %vm459_vm1, %v2809_v7  ;;  %v2815_v13 = vld [vmem:[%s2926_s20 + $0x30] sm:$0xff]   ;;  %v2816_v15 = vld [vmem:[%s2926_s20 + $0x38] sm:$0xff]  }
  0x14   : > { %392 = vst.msk [vmem:[#allocation2 + $0x1c0] sm:$0xff] %vm334_vm0, %v2852_v5  ;;  %396 = vst.msk [vmem:[#allocation2 + $0x1e0] sm:$0xff] %vm334_vm0, %v2852_v5  ;;  %2567 = vmatprep.subr.bf16.mxu1 %v2811_v4  ;;  %v2818_v16 = vld [vmem:[%s2926_s20 + $0x40] sm:$0xff]   ;;  %v2819_v17 = vld [vmem:[%s2926_s20 + $0x48] sm:$0xff]  }
  0x15   : > { %398 = vst.msk [vmem:[#allocation2 + $0x1f0] sm:$0xff] %vm334_vm0, %v2852_v5  ;;  %400 = vst.msk [vmem:[#allocation2 + $0x200] sm:$0xff] %vm334_vm0, %v2852_v5  ;;  %v2821_v18 = vld [vmem:[%s2926_s20 + $0x50] sm:$0xff]   ;;  %v2822_v20 = vld [vmem:[%s2926_s20 + $0x58] sm:$0xff]  }
  0x16   : > { %402 = vst.msk [vmem:[#allocation2 + $0x210] sm:$0xff] %vm334_vm0, %v2852_v5  ;;  %404 = vst.msk [vmem:[#allocation2 + $0x220] sm:$0xff] %vm334_vm0, %v2852_v5  ;;  %v2824_v21 = vld [vmem:[%s2926_s20 + $0x60] sm:$0xff]   ;;  %v2825_v22 = vld [vmem:[%s2926_s20 + $0x68] sm:$0xff]  }
  0x17   : > { %2568 = vmatpush3.bf16.msra.mxu1 %v2811_v4  ;;  %v2826_v23 = vld [vmem:[%s2926_s20 + $0x70] sm:$0xff]   ;;  %v2827_v24 = vld [vmem:[%s2926_s20 + $0x78] sm:$0xff]   ;;  %377 = vst.msk [vmem:[#allocation2 + $0x148] sm:$0x1] %vm336_vm2, %v2852_v5  ;;  %337 = vst.msk [vmem:[#allocation2 + $0x8] sm:$0x1] %vm336_vm2, %v2852_v5 }
  0x18   : > { %2577 = vmatprep.subr.bf16.mxu1 %v2814_v8  ;;  %339 = vst.msk [vmem:[#allocation2 + $0x18] sm:$0x1] %vm336_vm2, %v2852_v5  ;;  %341 = vst.msk [vmem:[#allocation2 + $0x28] sm:$0x1] %vm336_vm2, %v2852_v5 }
  0x19   : > { %343 = vst.msk [vmem:[#allocation2 + $0x38] sm:$0x1] %vm336_vm2, %v2852_v5  ;;  %345 = vst.msk [vmem:[#allocation2 + $0x48] sm:$0x1] %vm336_vm2, %v2852_v5 }
  0x1a   : > { %2562 = vmatmul.mubr.msk.bf16.gmra.mrb[4].mxu1 %vm459_vm1, %v2810_v9  ;;  %347 = vst.msk [vmem:[#allocation2 + $0x58] sm:$0x1] %vm336_vm2, %v2852_v5  ;;  %349 = vst.msk [vmem:[#allocation2 + $0x68] sm:$0x1] %vm336_vm2, %v2852_v5 }
  0x1b   : > { %2569 = vmatprep.mubr.msk.bf16.mxu1 %vm459_vm1, %v2812_v10  ;;  %351 = vst.msk [vmem:[#allocation2 + $0x78] sm:$0x1] %vm336_vm2, %v2852_v5  ;;  %353 = vst.msk [vmem:[#allocation2 + $0x88] sm:$0x1] %vm336_vm2, %v2852_v5 }
  0x1c   : > { %373 = vst.msk [vmem:[#allocation2 + $0x128] sm:$0x1] %vm336_vm2, %v2852_v5  ;;  %375 = vst.msk [vmem:[#allocation2 + $0x138] sm:$0x1] %vm336_vm2, %v2852_v5 }
  0x1d   : > { %379 = vst.msk [vmem:[#allocation2 + $0x158] sm:$0x1] %vm336_vm2, %v2852_v5  ;;  %381 = vst.msk [vmem:[#allocation2 + $0x168] sm:$0x1] %vm336_vm2, %v2852_v5 }
  0x1e   : > { %383 = vst.msk [vmem:[#allocation2 + $0x178] sm:$0x1] %vm336_vm2, %v2852_v5  ;;  %385 = vst.msk [vmem:[#allocation2 + $0x188] sm:$0x1] %vm336_vm2, %v2852_v5 }
  0x1f   : > { %387 = vst.msk [vmem:[#allocation2 + $0x198] sm:$0x1] %vm336_vm2, %v2852_v5 }
  0x22   : > { %2570 = vmatmul.mubr.msk.bf16.vlgmr.msra.gmra.mrb[8].mxu1 %vm459_vm1, %v2813_v11 }
  0x23   : > { %2578 = vmatpush3.bf16.msra.mxu1 %v2814_v8  ;;  %2573 = vmatprep.mubr.msk.bf16.mxu1 %vm459_vm1, %v2815_v13 }
  0x24   : > { %2579 = vmatprep.subr.bf16.mxu1 %v2817_v12 }
  0x27   : > { %2580 = vmatpush3.bf16.msra.mxu1 %v2817_v12 }
  0x28   : > { %2589 = vmatprep.subr.bf16.mxu1 %v2820_v14 }
  0x2a   : > { %2574 = vmatmul.mubr.msk.bf16.gmra.mrb[12].mxu1 %vm459_vm1, %v2816_v15 }
  0x2b   : > { %2581 = vmatprep.mubr.msk.bf16.mxu1 %vm459_vm1, %v2818_v16 }
  0x32   : > { %2582 = vmatmul.mubr.msk.bf16.vlgmr.msra.gmra.mrb[16].mxu1 %vm459_vm1, %v2819_v17 }
  0x33   : > { %2590 = vmatpush3.bf16.msra.mxu1 %v2820_v14  ;;  %2585 = vmatprep.mubr.msk.bf16.mxu1 %vm459_vm1, %v2821_v18 }
  0x34   : > { %2591 = vmatprep.subr.bf16.mxu1 %v2823_v19 }
  0x37   : > { %2592 = vmatpush3.bf16.msra.mxu1 %v2823_v19 }
  0x38   : > { %2601 = vmatprep.subr.bf16.mxu1 %v2828_v25 }
  0x3a   : > { %2586 = vmatmul.mubr.msk.bf16.gmra.mrb[20].mxu1 %vm459_vm1, %v2822_v20 }
  0x3b   : > { %2593 = vmatprep.mubr.msk.bf16.mxu1 %vm459_vm1, %v2824_v21 }
  0x42   : > { %2594 = vmatmul.mubr.msk.bf16.vlgmr.msra.gmra.mrb[24].mxu1 %vm459_vm1, %v2825_v22 }
  0x43   : > { %2597 = vmatprep.mubr.msk.bf16.mxu1 %vm459_vm1, %v2826_v23  ;;  %2602 = vmatpush3.bf16.msra.mxu1 %v2828_v25 }
  0x44   : > { %2713 = vmatprep.subr.bf16.mxu1 %v3083_v26 }
  0x4a   : > { %2598 = vmatmul.mubr.msk.bf16.gmra.mrb[28].mxu1 %vm459_vm1, %v2827_v24 }
  0xe5   : > { %v2559_v29 = vpop.f32.mrb[0].mxu1 }
  0xe6   : > { %v515_v30 = vadd.f32 %v2559_v29, %v3097_v28  ;;  %v506_v31 = vpop.f32.mrb[1].mxu1 }
  0xe7   : > { %v507_v32 = vadd.f32 %v3097_v28, %v506_v31  ;;  %v2560_v33 = vpop.f32.mrb[2].mxu1 }
  0xe8   : > { %v539_v34 = vmax.f32 %v515_v30, 0.0  ;;  %v518_v35 = vadd.f32 %v2560_v33, %v3097_v28  ;;  %v509_v36 = vpop.f32.mrb[3].mxu1 }
  0xe9   : > { %v537_v37 = vmax.f32 %v507_v32, 0.0  ;;  %v510_v38 = vadd.f32 %v3097_v28, %v509_v36  ;;  %v1007_v36 = vld [vmem:[#allocation2 + $0x90] sm:$0xff] }
  0xea   : > { %548 = vst.msk [vmem:[#allocation2 + $0x1d0] sm:$0xff] %vm334_vm0, %v539_v34  ;;  %v540_v39 = vmax.f32 %v518_v35, 0.0 }
  0xeb   : > { %546 = vst.msk [vmem:[#allocation2 + $0x1b0] sm:$0xff] %vm334_vm0, %v537_v37  ;;  %v538_v40 = vmax.f32 %v510_v38, 0.0 }
  0xec   : > { %549 = vst.msk [vmem:[#allocation2 + $0x1e0] sm:$0xff] %vm334_vm0, %v540_v39 }
  0xed   : > { %547 = vst.msk [vmem:[#allocation2 + $0x1c0] sm:$0xff] %vm334_vm0, %v538_v40  ;;  %v2563_v41 = vpop.f32.mrb[4].mxu1 }
  0xee   : > { %v531_v42 = vadd.f32 %v2563_v41, %v3097_v28  ;;  %v522_v43 = vpop.f32.mrb[5].mxu1 }
  0xef   : > { %v523_v44 = vadd.f32 %v3097_v28, %v522_v43  ;;  %v2564_v45 = vpop.f32.mrb[6].mxu1 }
  0xf0   : > { %v543_v46 = vmax.f32 %v531_v42, 0.0  ;;  %v534_v47 = vadd.f32 %v2564_v45, %v3097_v28  ;;  %v525_v48 = vpop.f32.mrb[7].mxu1 }
  0xf1   : > { %v541_v49 = vmax.f32 %v523_v44, 0.0  ;;  %v526_v50 = vadd.f32 %v3097_v28, %v525_v48 }
  0xf2   : > { %552 = vst.msk [vmem:[#allocation2 + $0x210] sm:$0xff] %vm334_vm0, %v543_v46  ;;  %v544_v51 = vmax.f32 %v534_v47, 0.0 }
  0xf3   : > { %550 = vst.msk [vmem:[#allocation2 + $0x1f0] sm:$0xff] %vm334_vm0, %v541_v49  ;;  %v542_v52 = vmax.f32 %v526_v50, 0.0 }
  0xf4   : > { %553 = vst.msk [vmem:[#allocation2 + $0x220] sm:$0xff] %vm334_vm0, %v544_v51 }
  0xf5   : > { %551 = vst.msk [vmem:[#allocation2 + $0x200] sm:$0xff] %vm334_vm0, %v542_v52  ;;  %v2571_v53 = vpop.f32.mrb[8].mxu1 }
  0xf6   : > { %v661_v54 = vadd.f32 %v2571_v53, %v3097_v28  ;;  %v652_v55 = vpop.f32.mrb[9].mxu1 }
  0xf7   : > { %v653_v56 = vadd.f32 %v3097_v28, %v652_v55  ;;  %v2572_v57 = vpop.f32.mrb[10].mxu1 }
  0xf8   : > { %v685_v58 = vmax.f32 %v661_v54, 0.0  ;;  %v664_v59 = vadd.f32 %v2572_v57, %v3097_v28  ;;  %v655_v60 = vpop.f32.mrb[11].mxu1 }
  0xf9   : > { %v683_v61 = vmax.f32 %v653_v56, 0.0  ;;  %v656_v62 = vadd.f32 %v3097_v28, %v655_v60 }
  0xfa   : > { %694 = vst.msk [vmem:[#allocation2 + $0x141] sm:$0xff] %vm334_vm0, %v685_v58  ;;  %v686_v63 = vmax.f32 %v664_v59, 0.0 }
  0xfb   : > { %692 = vst.msk [vmem:[#allocation2 + $0x121] sm:$0xff] %vm334_vm0, %v683_v61  ;;  %v684_v0 = vmax.f32 %v656_v62, 0.0 }
  0xfc   : > { %695 = vst.msk [vmem:[#allocation2 + $0x151] sm:$0xff] %vm334_vm0, %v686_v63 }
  0xfd   : > { %693 = vst.msk [vmem:[#allocation2 + $0x131] sm:$0xff] %vm334_vm0, %v684_v0  ;;  %v2575_v1 = vpop.f32.mrb[12].mxu1 }
  0xfe   : > { %v677_v2 = vadd.f32 %v2575_v1, %v3097_v28  ;;  %v668_v3 = vpop.f32.mrb[13].mxu1 }
  0xff   : > { %v669_v4 = vadd.f32 %v3097_v28, %v668_v3  ;;  %v2576_v5 = vpop.f32.mrb[14].mxu1 }
 0x100   : > { %v689_v6 = vmax.f32 %v677_v2, 0.0  ;;  %v680_v7 = vadd.f32 %v2576_v5, %v3097_v28  ;;  %v671_v8 = vpop.f32.mrb[15].mxu1 }
 0x101   : > { %v687_v9 = vmax.f32 %v669_v4, 0.0  ;;  %v672_v10 = vadd.f32 %v3097_v28, %v671_v8 }
 0x102   : > { %698 = vst.msk [vmem:[#allocation2 + $0x181] sm:$0xff] %vm334_vm0, %v689_v6  ;;  %v690_v11 = vmax.f32 %v680_v7, 0.0 }
 0x103   : > { %696 = vst.msk [vmem:[#allocation2 + $0x161] sm:$0xff] %vm334_vm0, %v687_v9  ;;  %v688_v12 = vmax.f32 %v672_v10, 0.0  ;;  %v992_v10 = vld [vmem:[#allocation2] sm:$0xff] }
 0x104   : > { %699 = vst.msk [vmem:[#allocation2 + $0x191] sm:$0xff] %vm334_vm0, %v690_v11 }
 0x105   : > { %697 = vst.msk [vmem:[#allocation2 + $0x171] sm:$0xff] %vm334_vm0, %v688_v12  ;;  %v2583_v13 = vpop.f32.mrb[16].mxu1 }
 0x106   : > { %v807_v14 = vadd.f32 %v2583_v13, %v3097_v28  ;;  %v798_v15 = vpop.f32.mrb[17].mxu1  ;;  %v1188_v13 = vld [vmem:[#allocation2 + $0x1] sm:$0xff] }
 0x107   : > { %v799_v16 = vadd.f32 %v3097_v28, %v798_v15  ;;  %v2584_v17 = vpop.f32.mrb[18].mxu1 }
 0x108   : > { %v831_v18 = vmax.f32 %v807_v14, 0.0  ;;  %v810_v19 = vadd.f32 %v2584_v17, %v3097_v28  ;;  %v801_v20 = vpop.f32.mrb[19].mxu1 }
 0x109   : > { %v829_v21 = vmax.f32 %v799_v16, 0.0  ;;  %v802_v22 = vadd.f32 %v3097_v28, %v801_v20 }
 0x10a   : > { %840 = vst.msk [vmem:[#allocation2 + $0xc0] sm:$0xff] %vm334_vm0, %v831_v18  ;;  %v832_v23 = vmax.f32 %v810_v19, 0.0 }
 0x10b   : > { %838 = vst.msk [vmem:[#allocation2 + $0xa0] sm:$0xff] %vm334_vm0, %v829_v21  ;;  %v830_v24 = vmax.f32 %v802_v22, 0.0 }
 0x10c   : > { %841 = vst.msk [vmem:[#allocation2 + $0xd0] sm:$0xff] %vm334_vm0, %v832_v23 }
 0x10d   : > { %839 = vst.msk [vmem:[#allocation2 + $0xb0] sm:$0xff] %vm334_vm0, %v830_v24  ;;  %v2587_v25 = vpop.f32.mrb[20].mxu1 }
 0x10e   : > { %v823_v29 = vadd.f32 %v2587_v25, %v3097_v28  ;;  %v814_v30 = vpop.f32.mrb[21].mxu1 }
 0x10f   : > { %v815_v31 = vadd.f32 %v3097_v28, %v814_v30  ;;  %v2588_v32 = vpop.f32.mrb[22].mxu1  ;;  %v2831_v30 = vld [vmem:[%s3388_s3 + $0x18] sm:$0xff]  }
 0x110   : > { %v835_v33 = vmax.f32 %v823_v29, 0.0  ;;  %v826_v34 = vadd.f32 %v2588_v32, %v3097_v28  ;;  %v817_v35 = vpop.f32.mrb[23].mxu1 }
 0x111   : > { %v833_v37 = vmax.f32 %v815_v31, 0.0  ;;  %v818_v38 = vadd.f32 %v3097_v28, %v817_v35  ;;  %v3148_v43 = vld [vmem:[#allocation2 + $0xc0] sm:$0xff] }
 0x112   : > { %844 = vst.msk [vmem:[#allocation2 + $0x100] sm:$0xff] %vm334_vm0, %v835_v33  ;;  %v836_v39 = vmax.f32 %v826_v34, 0.0  ;;  %v3144_v40 = vld [vmem:[#allocation2 + $0xa0] sm:$0xff] }
 0x113   : > { %842 = vst.msk [vmem:[#allocation2 + $0xe0] sm:$0xff] %vm334_vm0, %v833_v37  ;;  %v834_v41 = vmax.f32 %v818_v38, 0.0  ;;  %v1015_v42 = vpack.c.bf16 %v3144_v40, %v1007_v36  ;;  %v3150_v44 = vld [vmem:[#allocation2 + $0xd0] sm:$0xff] }
 0x114   : > { %845 = vst.msk [vmem:[#allocation2 + $0x110] sm:$0xff] %vm334_vm0, %v836_v39  ;;  %v3153_v45 = vld [vmem:[#allocation2 + $0xb0] sm:$0xff]  ;;  %v1727_v46 = vpack.c.bf16 %v3150_v44, %v3148_v43 }
 0x115   : > { %843 = vst.msk [vmem:[#allocation2 + $0xf0] sm:$0xff] %vm334_vm0, %v834_v41  ;;  %v2595_v47 = vpop.f32.mrb[24].mxu1  ;;  %2603 = vmatprep.mubr.msk.bf16.mxu1 %vm334_vm0, %v1015_v42  ;;  %v1016_v48 = vpack.c.bf16 %v3148_v43, %v3153_v45  ;;  %v1726_v49 = vpack.c.bf16 %v3153_v45, %v3144_v40 }
 0x116   : > { %v953_v50 = vadd.f32 %v2595_v47, %v3097_v28  ;;  %v944_v51 = vpop.f32.mrb[25].mxu1 }
 0x117   : > { %v945_v52 = vadd.f32 %v3097_v28, %v944_v51  ;;  %v2596_v53 = vpop.f32.mrb[26].mxu1  ;;  %2604 = vmatmul.mubr.msk.bf16.vlgmr.msra.gmra.mrb[32].mxu1 %vm334_vm0, %v1016_v48  ;;  %v2832_v48 = vld [vmem:[%s3388_s3 + $0x20] sm:$0xff]  }
 0x118   : > { %v977_v54 = vmax.f32 %v953_v50, 0.0  ;;  %v956_v55 = vadd.f32 %v2596_v53, %v3097_v28  ;;  %v947_v56 = vpop.f32.mrb[27].mxu1  ;;  %2714 = vmatpush3.bf16.msra.mxu1 %v3083_v26 }
 0x119   : > { %v975_v57 = vmax.f32 %v945_v52, 0.0  ;;  %v948_v58 = vadd.f32 %v3097_v28, %v947_v56  ;;  %v3178_v0 = vld [vmem:[#allocation2 + $0x100] sm:$0xff]  ;;  %v1295_v52 = vld [vmem:[#allocation2 + $0x130] sm:$0xff] }
 0x11a   : > { %986 = vst.msk [vmem:[#allocation2 + $0x31] sm:$0xff] %vm334_vm0, %v977_v54  ;;  %v978_v59 = vmax.f32 %v956_v55, 0.0  ;;  %v3170_v60 = vld [vmem:[#allocation2 + $0xe0] sm:$0xff]  ;;  %v1297_v56 = vld [vmem:[#allocation2 + $0x150] sm:$0xff] }
 0x11b   : > { %984 = vst.msk [vmem:[#allocation2 + $0x11] sm:$0xff] %vm334_vm0, %v975_v57  ;;  %v976_v61 = vmax.f32 %v948_v58, 0.0  ;;  %v1017_v62 = vpack.c.bf16 %v3170_v60, %v3150_v44  ;;  %v1294_v54 = vld [vmem:[#allocation2 + $0x120] sm:$0xff]  ;;  %v1299_v57 = vld [vmem:[#allocation2 + $0x170] sm:$0xff] }
 0x11c   : > { %987 = vst.msk [vmem:[#allocation2 + $0x41] sm:$0xff] %vm334_vm0, %v978_v59  ;;  %v3176_v63 = vld [vmem:[#allocation2 + $0xf0] sm:$0xff]  ;;  %v1302_v55 = vpack.c.bf16 %v1295_v52, %v1294_v54  ;;  %v1296_v58 = vld [vmem:[#allocation2 + $0x140] sm:$0xff] }
 0x11d   : > { %985 = vst.msk [vmem:[#allocation2 + $0x21] sm:$0xff] %vm334_vm0, %v976_v61  ;;  %v2599_v26 = vpop.f32.mrb[28].mxu1  ;;  %2607 = vmatprep.mubr.msk.bf16.mxu1 %vm334_vm0, %v1017_v62  ;;  %v1018_v1 = vpack.c.bf16 %v3178_v0, %v3176_v63  ;;  %v1728_v2 = vpack.c.bf16 %v3176_v63, %v3170_v60  ;;  %v1303_v59 = vpack.c.bf16 %v1297_v56, %v1296_v58  ;;  %v1298_v61 = vld [vmem:[#allocation2 + $0x160] sm:$0xff]  ;;  %v2833_v62 = vld [vmem:[%s3388_s3 + $0x28] sm:$0xff]  }
 0x11e   : > { %v969_v3 = vadd.f32 %v2599_v26, %v3097_v28  ;;  %v960_v4 = vpop.f32.mrb[29].mxu1  ;;  %v1304_v26 = vpack.c.bf16 %v1299_v57, %v1298_v61  ;;  %v1510_v52 = vld [vmem:[#allocation2 + $0x161] sm:$0xff] }
 0x11f   : > { %v961_v5 = vadd.f32 %v3097_v28, %v960_v4  ;;  %v2600_v6 = vpop.f32.mrb[30].mxu1  ;;  %2608 = vmatmul.mubr.msk.bf16.gmra.mrb[36].mxu1 %vm334_vm0, %v1018_v1  ;;  %v1301_v1 = vld [vmem:[#allocation2 + $0x190] sm:$0xff]  ;;  %v1300_v4 = vld [vmem:[#allocation2 + $0x180] sm:$0xff] }
 0x120   : > { %v981_v7 = vmax.f32 %v969_v3, 0.0  ;;  %v972_v8 = vadd.f32 %v2600_v6, %v3097_v28  ;;  %v963_v9 = vpop.f32.mrb[31].mxu1  ;;  %v1401_v3 = vld [vmem:[#allocation2 + $0x1c0] sm:$0xff]  ;;  %v1400_v6 = vld [vmem:[#allocation2 + $0x1b0] sm:$0xff] }
 0x121   : > { %v979_v11 = vmax.f32 %v961_v5, 0.0  ;;  %v964_v12 = vadd.f32 %v3097_v28, %v963_v9  ;;  %v3194_v16 = vld [vmem:[#allocation2 + $0x30] sm:$0xff]  ;;  %v1305_v5 = vpack.c.bf16 %v1301_v1, %v1300_v4  ;;  %v1405_v9 = vld [vmem:[#allocation2 + $0x200] sm:$0xff] }
 0x122   : > { %990 = vst.msk [vmem:[#allocation2 + $0x71] sm:$0xff] %vm334_vm0, %v981_v7  ;;  %v982_v14 = vmax.f32 %v972_v8, 0.0  ;;  %v3192_v15 = vld [vmem:[#allocation2 + $0x10] sm:$0xff]  ;;  %v1408_v7 = vpack.c.bf16 %v1401_v3, %v1400_v6  ;;  %v1403_v8 = vld [vmem:[#allocation2 + $0x1e0] sm:$0xff] }
 0x123   : > { %v3196_v17 = vld [vmem:[#allocation2 + $0x31] sm:$0xff]  ;;  %988 = vst.msk [vmem:[#allocation2 + $0x51] sm:$0xff] %vm334_vm0, %v979_v11  ;;  %v980_v18 = vmax.f32 %v964_v12, 0.0  ;;  %v1000_v19 = vpack.c.bf16 %v3192_v15, %v992_v10  ;;  %v3202_v21 = vld [vmem:[#allocation2 + $0x40] sm:$0xff] }
 0x124   : > { %v3200_v20 = vld [vmem:[#allocation2 + $0x11] sm:$0xff]  ;;  %v3204_v28 = vld [vmem:[#allocation2 + $0x41] sm:$0xff]  ;;  %991 = vst.msk [vmem:[#allocation2 + $0x81] sm:$0xff] %vm334_vm0, %v982_v14  ;;  %v1621_v24 = vpack.c.bf16 %v3202_v21, %v3194_v16 }
 0x125   : > { %v3207_v22 = vld [vmem:[#allocation2 + $0x20] sm:$0xff]  ;;  %v1833_v25 = vpack.c.bf16 %v3204_v28, %v3196_v17  ;;  %989 = vst.msk [vmem:[#allocation2 + $0x61] sm:$0xff] %vm334_vm0, %v980_v18  ;;  %2613 = vmatprep.mubr.msk.bf16.mxu0 %vm334_vm0, %v1000_v19  ;;  %v1196_v33 = vpack.c.bf16 %v3200_v20, %v1188_v13  ;;  %v1402_v10 = vld [vmem:[#allocation2 + $0x1d0] sm:$0xff] }
 0x126   : > { %v3209_v23 = vld [vmem:[#allocation2 + $0x21] sm:$0xff]  ;;  %v1001_v29 = vpack.c.bf16 %v3194_v16, %v3207_v22  ;;  %v1620_v31 = vpack.c.bf16 %v3207_v22, %v3192_v15  ;;  %v1409_v11 = vpack.c.bf16 %v1403_v8, %v1402_v10  ;;  %v1404_v12 = vld [vmem:[#allocation2 + $0x1f0] sm:$0xff]  ;;  %v2435_v22 = vld [vmem:[%s3389_s4] ss:$0 sm:$0xff] }
 0x127   : > { %v1832_v32 = vpack.c.bf16 %v3209_v23, %v3200_v20  ;;  %v1197_v47 = vpack.c.bf16 %v3196_v17, %v3209_v23  ;;  %v2834_v13 = vld [vmem:[%s3388_s3 + $0x30] sm:$0xff]   ;;  %v1410_v14 = vpack.c.bf16 %v1405_v9, %v1404_v12  ;;  %v1407_v18 = vld [vmem:[#allocation2 + $0x220] sm:$0xff] }
 0x128   : > { %2614 = vmatmul.mubr.msk.bf16.vlgmr.msra.gmra.mrb[0].mxu0 %vm334_vm0, %v1001_v29  ;;  %v1507_v19 = vld [vmem:[#allocation2 + $0x131] sm:$0xff]  ;;  %v1512_v56 = vld [vmem:[#allocation2 + $0x181] sm:$0xff] }
 0x129   : > { %2622 = vmatpush3.bf16.msra.mxu0 %v3091_v27  ;;  %2623 = vmatprep.mubr.msk.bf16.mxu0 %vm334_vm0, %v1196_v33  ;;  %v3232_v35 = vld [vmem:[#allocation2 + $0x70] sm:$0xff]  ;;  %v1506_v33 = vld [vmem:[#allocation2 + $0x121] sm:$0xff] }
 0x12a   : > { %2631 = vmatprep.subr.bf16.mxu0 %v2831_v30  ;;  %v3230_v34 = vld [vmem:[#allocation2 + $0x50] sm:$0xff]  ;;  %v2836_v58 = vld [vmem:[%s3388_s3 + $0x40] sm:$0xff]  }
 0x12b   : > { %v1002_v36 = vpack.c.bf16 %v3230_v34, %v3202_v21  ;;  %v3238_v38 = vld [vmem:[#allocation2 + $0x51] sm:$0xff]  ;;  %v1831_v40 = vld [vmem:[#allocation2 + $0x81] sm:$0xff] }
 0x12c   : > { %v3236_v37 = vld [vmem:[#allocation2 + $0x60] sm:$0xff]  ;;  %v1198_v50 = vpack.c.bf16 %v3238_v38, %v3204_v28  ;;  %v3259_v51 = vld [vmem:[#allocation2 + $0x71] sm:$0xff] }
 0x12d   : > { %v3240_v39 = vld [vmem:[#allocation2 + $0x61] sm:$0xff]  ;;  %2617 = vmatprep.mubr.msk.bf16.mxu1 %vm334_vm0, %v1002_v36  ;;  %v1003_v27 = vpack.c.bf16 %v3232_v35, %v3236_v37  ;;  %v1622_v41 = vpack.c.bf16 %v3236_v37, %v3230_v34  ;;  %v1406_v29 = vld [vmem:[#allocation2 + $0x210] sm:$0xff]  ;;  %v1514_v36 = vpack.c.bf16 %v1507_v19, %v1506_v33  ;;  %v1835_v43 = vpack.c.bf16 %v1831_v40, %v3259_v51 }
 0x12e   : > { %v1834_v42 = vpack.c.bf16 %v3240_v39, %v3238_v38  ;;  %v1199_v53 = vpack.c.bf16 %v3259_v51, %v3240_v39  ;;  %v1725_v16 = vld [vmem:[#allocation2 + $0x110] sm:$0xff]  ;;  %v2837_v60 = vld [vmem:[%s3390_s5] sm:$0xff]  }
 0x12f   : > { %2618 = vmatmul.mubr.msk.bf16.vlgmr.msra.gmra.mrb[36].mxu1 %vm334_vm0, %v1003_v27  ;;  %v1509_v27 = vld [vmem:[#allocation2 + $0x151] sm:$0xff]  ;;  %v1729_v21 = vpack.c.bf16 %v1725_v16, %v3178_v0  ;;  %2691 = vmatprep.subr.bf16.mxu1 %v2837_v60  ;;  %v2838_v63 = vld [vmem:[%s3392_s7] sm:$0xff]  }
 0x130   : > { %2692 = vmatpush3.bf16.msra.mxu1 %v2837_v60 }
 0x131   : > { %2701 = vmatprep.subr.bf16.mxu1 %v2838_v63 }
 0x134   : > { %2624 = vmatmul.mubr.msk.bf16.vlgmr.msra.gmra.mrb[0].mxu0 %vm334_vm0, %v1197_v47  ;;  %v1511_v47 = vld [vmem:[#allocation2 + $0x171] sm:$0xff] }
 0x135   : > { %2627 = vmatprep.mubr.msk.bf16.mxu0 %vm334_vm0, %v1198_v50  ;;  %2632 = vmatpush3.bf16.msra.mxu0 %v2831_v30  ;;  %v1411_v30 = vpack.c.bf16 %v1407_v18, %v1406_v29  ;;  %v1516_v54 = vpack.c.bf16 %v1511_v47, %v1510_v52  ;;  %v2840_v47 = vld [vmem:[%s2926_s20] sm:$0xff]   ;;  %v2843_v52 = vld [vmem:[%s2926_s20 + $0x18] sm:$0xff]  }
 0x136   : > { %2641 = vmatprep.subr.bf16.mxu0 %v2832_v48 }
 0x13c   : > { %2628 = vmatmul.mubr.msk.bf16.gmra.mrb[4].mxu0 %vm334_vm0, %v1199_v53  ;;  %v2835_v53 = vld [vmem:[%s3388_s3 + $0x38] sm:$0xff]  }
 0x13d   : > { %2633 = vmatprep.mubr.msk.bf16.mxu0 %vm334_vm0, %v1302_v55  ;;  %v1513_v55 = vld [vmem:[#allocation2 + $0x191] sm:$0xff] }
 0x13e   : > { %v1517_v57 = vpack.c.bf16 %v1513_v55, %v1512_v56  ;;  %v2452_v55 = vld [vmem:[%s3393_s8] ss:$0 sm:$0xff] }
 0x144   : > { %2634 = vmatmul.mubr.msk.bf16.vlgmr.msra.gmra.mrb[0].mxu0 %vm334_vm0, %v1303_v59  ;;  %v1619_v59 = vld [vmem:[#allocation2 + $0x80] sm:$0xff] }
 0x145   : > { %2637 = vmatprep.mubr.msk.bf16.mxu0 %vm334_vm0, %v1304_v26  ;;  %2642 = vmatpush3.bf16.msra.mxu0 %v2832_v48  ;;  %v1508_v48 = vld [vmem:[#allocation2 + $0x141] sm:$0xff]  ;;  %v1623_v15 = vpack.c.bf16 %v1619_v59, %v3232_v35 }
 0x146   : > { %2651 = vmatprep.subr.bf16.mxu0 %v2833_v62  ;;  %v1515_v50 = vpack.c.bf16 %v1509_v27, %v1508_v48  ;;  %v2841_v48 = vld [vmem:[%s2926_s20 + $0x8] sm:$0xff]  }
 0x14c   : > { %2638 = vmatmul.mubr.msk.bf16.gmra.mrb[4].mxu0 %vm334_vm0, %v1305_v5 }
 0x14d   : > { %2643 = vmatprep.mubr.msk.bf16.mxu0 %vm334_vm0, %v1408_v7 }
 0x154   : > { %2644 = vmatmul.mubr.msk.bf16.vlgmr.msra.gmra.mrb[0].mxu0 %vm334_vm0, %v1409_v11  ;;  %v2839_v11 = vld [vmem:[%s3392_s7 + $0x8] sm:$0xff]  }
 0x155   : > { %2647 = vmatprep.mubr.msk.bf16.mxu0 %vm334_vm0, %v1410_v14  ;;  %2652 = vmatpush3.bf16.msra.mxu0 %v2833_v62 }
 0x156   : > { %2661 = vmatprep.subr.bf16.mxu0 %v2834_v13 }
 0x15c   : > { %2648 = vmatmul.mubr.msk.bf16.gmra.mrb[4].mxu0 %vm334_vm0, %v1411_v30 }
 0x15d   : > { %2653 = vmatprep.mubr.msk.bf16.mxu0 %vm334_vm0, %v1514_v36 }
 0x164   : > { %2654 = vmatmul.mubr.msk.bf16.vlgmr.msra.gmra.mrb[0].mxu0 %vm334_vm0, %v1515_v50  ;;  %v2842_v50 = vld [vmem:[%s2926_s20 + $0x10] sm:$0xff]  }
 0x165   : > { %2657 = vmatprep.mubr.msk.bf16.mxu0 %vm334_vm0, %v1516_v54  ;;  %2662 = vmatpush3.bf16.msra.mxu0 %v2834_v13 }
 0x166   : > { %2671 = vmatprep.subr.bf16.mxu0 %v2835_v53 }
 0x16c   : > { %2658 = vmatmul.mubr.msk.bf16.gmra.mrb[4].mxu0 %vm334_vm0, %v1517_v57 }
 0x16d   : > { %2663 = vmatprep.mubr.msk.bf16.mxu0 %vm334_vm0, %v1620_v31 }
 0x174   : > { %2664 = vmatmul.mubr.msk.bf16.vlgmr.msra.gmra.mrb[0].mxu0 %vm334_vm0, %v1621_v24 }
 0x175   : > { %2667 = vmatprep.mubr.msk.bf16.mxu0 %vm334_vm0, %v1622_v41  ;;  %2672 = vmatpush3.bf16.msra.mxu0 %v2835_v53  ;;  %v2436_v53 = vld [vmem:[%s3391_s6] ss:$0 sm:$0xff] }
 0x176   : > { %2681 = vmatprep.subr.bf16.mxu0 %v2836_v58 }
 0x17c   : > { %2668 = vmatmul.mubr.msk.bf16.gmra.mrb[4].mxu0 %vm334_vm0, %v1623_v15 }
 0x17d   : > { %2673 = vmatprep.mubr.msk.bf16.mxu0 %vm334_vm0, %v1726_v49 }
 0x184   : > { %2674 = vmatmul.mubr.msk.bf16.vlgmr.msra.gmra.mrb[0].mxu0 %vm334_vm0, %v1727_v46 }
 0x185   : > { %2677 = vmatprep.mubr.msk.bf16.mxu0 %vm334_vm0, %v1728_v2  ;;  %2682 = vmatpush3.bf16.msra.mxu0 %v2836_v58 }
 0x18c   : > { %2678 = vmatmul.mubr.msk.bf16.gmra.mrb[4].mxu0 %vm334_vm0, %v1729_v21 }
 0x18d   : > { %2683 = vmatprep.mubr.msk.bf16.mxu0 %vm334_vm0, %v1832_v32 }
 0x194   : > { %2684 = vmatmul.mubr.msk.bf16.vlgmr.msra.gmra.mrb[0].mxu0 %vm334_vm0, %v1833_v25 }
 0x195   : > { %2687 = vmatprep.mubr.msk.bf16.mxu0 %vm334_vm0, %v1834_v42 }
 0x19c   : > { %2688 = vmatmul.mubr.msk.bf16.gmra.mrb[4].mxu0 %vm334_vm0, %v1835_v43 }
 0x1ea   : > { %v2605_v44 = vpop.f32.mrb[32].mxu1 }
 0x1eb   : > { %v1074_v45 = vpop.f32.mrb[33].mxu1 }
 0x1ec   : > { %v2606_v46 = vpop.f32.mrb[34].mxu1 }
 0x1ed   : > { %v1077_v49 = vpop.f32.mrb[35].mxu1 }
 0x202   : > { %v2619_v0 = vpop.f32.mrb[36].mxu1 }
 0x203   : > { %v1173_v2 = vpop.f32.mrb[37].mxu1 }
 0x204   : > { %v2620_v17 = vpop.f32.mrb[38].mxu1 }
 0x205   : > { %v1176_v20 = vpop.f32.mrb[39].mxu1 }
 0x267   : > { %v2685_v28 = vpop.f32.mrb[0].mxu0 }
 0x268   : > { %v2715_v23 = vadd.f32 %v2685_v28, %v2605_v44  ;;  %v1891_v24 = vpop.f32.mrb[1].mxu0 }
 0x269   : > { %v2716_v25 = vadd.f32 %v1891_v24, %v1074_v45  ;;  %v2686_v31 = vpop.f32.mrb[2].mxu0 }
 0x26a   : > { %v1939_v32 = vadd.f32 %v2715_v23, %v2435_v22  ;;  %v2717_v34 = vadd.f32 %v2686_v31, %v2606_v46  ;;  %v1894_v35 = vpop.f32.mrb[3].mxu0 }
 0x26b   : > { %v1937_v37 = vadd.f32 %v2716_v25, %v2435_v22  ;;  %v2718_v38 = vadd.f32 %v1894_v35, %v1077_v49 }
 0x26c   : > { %v1940_v39 = vadd.f32 %v2717_v34, %v2435_v22  ;;  %v1947_v42 = vmax.f32 %v1939_v32, 0.0 }
 0x26d   : > { %v1938_v41 = vadd.f32 %v2718_v38, %v2435_v22  ;;  %v1945_v61 = vmax.f32 %v1937_v37, 0.0 }
 0x26e   : > { %v1948_v51 = vmax.f32 %v1940_v39, 0.0 }
 0x26f   : > { %v1946_v62 = vmax.f32 %v1938_v41, 0.0  ;;  %v2689_v26 = vpop.f32.mrb[4].mxu0 }
 0x270   : > { %v1954_v1 = vpack.c.bf16 %v1948_v51, %v1947_v42  ;;  %v2719_v3 = vadd.f32 %v2689_v26, %v2619_v0  ;;  %v1907_v4 = vpop.f32.mrb[5].mxu0 }
 0x271   : > { %v1953_v5 = vpack.c.bf16 %v1946_v62, %v1945_v61  ;;  %v2720_v6 = vadd.f32 %v1907_v4, %v1173_v2  ;;  %v2690_v7 = vpop.f32.mrb[6].mxu0 }
 0x272   : > { %v1943_v8 = vadd.f32 %v2719_v3, %v2435_v22  ;;  %v2721_v9 = vadd.f32 %v2690_v7, %v2620_v17  ;;  %v1910_v10 = vpop.f32.mrb[7].mxu0 }
 0x273   : > { %v1941_v12 = vadd.f32 %v2720_v6, %v2435_v22  ;;  %v2722_v13 = vadd.f32 %v1910_v10, %v1176_v20  ;;  %2693 = vmatprep.mubr.msk.bf16.mxu1 %vm334_vm0, %v1953_v5 }
 0x274   : > { %v1944_v14 = vadd.f32 %v2721_v9, %v2435_v22  ;;  %2694 = vmatmul.mubr.msk.bf16.vlgmr.msra.gmra.mrb[40].mxu1 %vm334_vm0, %v1954_v1  ;;  %v1951_v19 = vmax.f32 %v1943_v8, 0.0 }
 0x275   : > { %v1942_v18 = vadd.f32 %v2722_v13, %v2435_v22  ;;  %2702 = vmatpush3.bf16.msra.mxu1 %v2838_v63  ;;  %v1949_v30 = vmax.f32 %v1941_v12, 0.0 }
 0x276   : > { %v1952_v29 = vmax.f32 %v1944_v14, 0.0  ;;  %2703 = vmatprep.subr.bf16.mxu1 %v2839_v11 }
 0x277   : > { %v1950_v33 = vmax.f32 %v1942_v18, 0.0 }
 0x278   : > { %v1956_v36 = vpack.c.bf16 %v1952_v29, %v1951_v19 }
 0x279   : > { %v1955_v27 = vpack.c.bf16 %v1950_v33, %v1949_v30  ;;  %2704 = vmatpush3.bf16.msra.mxu1 %v2839_v11 }
 0x27b   : > { %2697 = vmatprep.mubr.msk.bf16.mxu1 %vm334_vm0, %v1955_v27 }
 0x27c   : > { %2698 = vmatmul.mubr.msk.bf16.gmra.mrb[44].mxu1 %vm334_vm0, %v1956_v36 }
 0x27d   : > { %2705 = vmatprep.mubr.msk.bf16.mxu1 %vm459_vm1, %v2840_v47 }
 0x284   : > { %2706 = vmatmul.mubr.msk.bf16.vlgmr.msra.gmra.mrb[40].mxu1 %vm459_vm1, %v2841_v48 }
 0x285   : > { %2709 = vmatprep.mubr.msk.bf16.mxu1 %vm459_vm1, %v2842_v50 }
 0x28c   : > { %2710 = vmatmul.mubr.msk.bf16.gmra.mrb[44].mxu1 %vm459_vm1, %v2843_v52 }
 0x357   : > { %v2707_v54 = vpop.f32.mrb[40].mxu1 }
 0x358   : > { %v2723_v56 = vadd.f32 %v2707_v54, %v2436_v53  ;;  %v2139_v57 = vpop.f32.mrb[41].mxu1 }
 0x359   : > { %v2724_v58 = vadd.f32 %v2436_v53, %v2139_v57  ;;  %v2708_v59 = vpop.f32.mrb[42].mxu1 }
 0x35a   : > { %v2187_v15 = vadd.f32 %v2723_v56, %v2452_v55  ;;  %v2725_v16 = vadd.f32 %v2708_v59, %v2436_v53  ;;  %v2142_v21 = vpop.f32.mrb[43].mxu1 }
 0x35b   : > { %v2185_v40 = vadd.f32 %v2724_v58, %v2452_v55  ;;  %v2726_v43 = vadd.f32 %v2436_v53, %v2142_v21 }
 0x35c   : > { %v2195_v44 = vmax.f32 %v2187_v15, 0.0  ;;  %v2188_v45 = vadd.f32 %v2725_v16, %v2452_v55 }
 0x35d   : > { %v2193_v46 = vmax.f32 %v2185_v40, 0.0  ;;  %v2186_v49 = vadd.f32 %v2726_v43, %v2452_v55 }
 0x35e   : > { %v2467_v60 = vpack.c.bf16 %v2195_v44, %v2195_v44  ;;  %v2196_v63 = vmax.f32 %v2188_v45, 0.0 }
 0x35f   : > { %v2465_v0 = vpack.c.bf16 %v2193_v46, %v2193_v46  ;;  %v2194_v2 = vmax.f32 %v2186_v49, 0.0  ;;  %v2711_v17 = vpop.f32.mrb[44].mxu1 }
 0x360   : > { %2236 = vst.msk [vmem:[%s3364_s29 + $0x8] sm:$0xf] %vm2233_vm3, %v2467_v60  ;;  %v2468_v20 = vpack.c.bf16 %v2196_v63, %v2196_v63  ;;  %v2727_v28 = vadd.f32 %v2711_v17, %v2436_v53  ;;  %v2155_v22 = vpop.f32.mrb[45].mxu1 }
 0x361   : > { %2234 = vst.msk [vmem:[%s3364_s29] sm:$0xf] %vm2233_vm3, %v2465_v0  ;;  %v2466_v23 = vpack.c.bf16 %v2194_v2, %v2194_v2  ;;  %v2728_v24 = vadd.f32 %v2436_v53, %v2155_v22  ;;  %v2712_v25 = vpop.f32.mrb[46].mxu1 }
 0x362   : > { %2237 = vst.msk [vmem:[%s3364_s29 + $0xc] sm:$0xf] %vm2233_vm3, %v2468_v20  ;;  %v2191_v31 = vadd.f32 %v2727_v28, %v2452_v55  ;;  %v2729_v32 = vadd.f32 %v2712_v25, %v2436_v53  ;;  %v2158_v34 = vpop.f32.mrb[47].mxu1 }
 0x363   : > { %2235 = vst.msk [vmem:[%s3364_s29 + $0x4] sm:$0xf] %vm2233_vm3, %v2466_v23  ;;  %v2189_v35 = vadd.f32 %v2728_v24, %v2452_v55  ;;  %v2730_v37 = vadd.f32 %v2436_v53, %v2158_v34 }
 0x364   : > { %v2199_v38 = vmax.f32 %v2191_v31, 0.0  ;;  %v2192_v39 = vadd.f32 %v2729_v32, %v2452_v55 }
 0x365   : > { %v2197_v41 = vmax.f32 %v2189_v35, 0.0  ;;  %v2190_v42 = vadd.f32 %v2730_v37, %v2452_v55 }
 0x366   : > { %v2471_v51 = vpack.c.bf16 %v2199_v38, %v2199_v38  ;;  %v2200_v61 = vmax.f32 %v2192_v39, 0.0 }
 0x367   : > { %v2469_v62 = vpack.c.bf16 %v2197_v41, %v2197_v41  ;;  %v2198_v26 = vmax.f32 %v2190_v42, 0.0 }
 0x368   : > { %2240 = vst.msk [vmem:[%s3364_s29 + $0x18] sm:$0xf] %vm2233_vm3, %v2471_v51  ;;  %v2472_v1 = vpack.c.bf16 %v2200_v61, %v2200_v61 }
 0x369   : > { %2238 = vst.msk [vmem:[%s3364_s29 + $0x10] sm:$0xf] %vm2233_vm3, %v2469_v62  ;;  %v2470_v3 = vpack.c.bf16 %v2198_v26, %v2198_v26 }
 0x36a   : > { %2241 = vst.msk [vmem:[%s3364_s29 + $0x1c] sm:$0xf] %vm2233_vm3, %v2472_v1 }
 0x36b   : > { %2239 = vst.msk [vmem:[%s3364_s29 + $0x14] sm:$0xf] %vm2233_vm3, %v2470_v3 }
 0x36c PF: > { %s19_s30 = sadd.s32 1, %s2850_s30  }
 0x36d   : > { %p16_p4 = scmp.ge.s32.totalorder %s19_s30, 4  }
 0x36f   :  { %18 = sbr.rel (!%p16_p4) target bundleno = 1 (0x1), region = 102 }

// kernel: _lambda_.11
= control target key start
LH: loop header
LB: loop body
LE: loop exit
PB: predicated region body
PF: predicated region fallthrough
CT: control target
= control target key end

     0   :  { %s2765_s30 = smov 0   ;;  %s3236_s0 = inlined_call_operand.vmem [shape: bf16[2,4,2,2,128], index: 0, kind: input, shape index: {}]   ;;  %s3237_s1 = inlined_call_operand.vmem [shape: bf16[128,64], index: 1, kind: input, shape index: {}]   ;;  %s3238_s2 = inlined_call_operand.vmem [shape: f32[1,64], index: 2, kind: input, shape index: {}]   ;;  %s3239_s3 = inlined_call_operand.vmem [shape: bf16[9,64,64], index: 3, kind: input, shape index: {}]   ;;  %s3240_s4 = inlined_call_operand.vmem [shape: f32[1,64], index: 4, kind: input, shape index: {}]   ;;  %s3241_s5 = inlined_call_operand.vmem [shape: bf16[64,256], index: 5, kind: input, shape index: {}]   ;;  %s3242_s6 = inlined_call_operand.vmem [shape: f32[1,256], index: 6, kind: input, shape index: {}]   ;;  %s3243_s7 = inlined_call_operand.vmem [shape: bf16[128,256], index: 7, kind: input, shape index: {}]   ;;  %s3244_s8 = inlined_call_operand.vmem [shape: f32[1,256], index: 8, kind: input, shape index: {}]   ;;  %s3245_s9 = inlined_call_operand.vmem [shape: bf16[2,4,256], index: 9, kind: output, shape index: {}]  }
   0x1 LB: > { %s2108_s10 = sadd.s32 4294967295, %s2708_s30   ;;  %p2112_p0 = scmp.ge.s32.totalorder %s2708_s30, 1  ;;  %s2708_s30 = sphi %s2765_s30, %s19_s30  }
   0x2   : > { %p286_p1 = scmp.lt.s32.totalorder %s2708_s30, 3 }
   0x4   : > { %p287_p2 = pnand %p2112_p0, %p286_p1 }
   0x5   : > { %v2580_v0 = vld [vmem:[%s3237_s1] sm:$0xff] (!%p287_p2)   ;;  %v2710_v1 = vmov (!%p287_p2), 0.0   ;;  %v2582_v3 = vld [vmem:[%s3237_s1 + $0x8] sm:$0xff] (!%p287_p2)   ;;  %vm2711_vm0 = vmmov (!%p287_p2), 0   ;;  %p2792_p3 = scmp.lt.s32.totalorder (!%p287_p2), %s2108_s10, 1  ;;  %vm331_vm1 = vcmask (!%p287_p2), 518144   ;;  %v375_v9 = vlaneseq (!%p287_p2) }
   0x6   : > { %290 = sbr.rel (%p287_p2) target bundleno = 808 (0x328), region = 56  ;;  %2379 = vmatprep.subr.bf16.mxu0 (!%p287_p2), %v2710_v1  ;;  %2399 = vmatprep.subr.bf16.mxu1 (!%p287_p2), %v2710_v1  ;;  %v2581_v2 = vld [vmem:[%s3237_s1] sm:$0xff] (!%p287_p2)   ;;  %v2583_v4 = vld [vmem:[%s3237_s1 + $0x8] sm:$0xff] (!%p287_p2)   ;;  %v2584_v5 = vld [vmem:[%s3237_s1 + $0x10] sm:$0xff] (!%p287_p2)   ;;  %341 = vst.msk [vmem:[#allocation2 + $0x24] sm:$0x7] (!%p287_p2), %vm331_vm1, %v2710_v1 }
   0x7   : > { %2380 = vmatpush3.bf16.msra.mxu0 (!%p287_p2), %v2580_v0  ;;  %2395 = vmatprep.mubr.msk.bf16.mxu0 (!%p287_p2), %vm2711_vm0, %v2710_v1  ;;  %342 = vst.msk [vmem:[#allocation2 + $0x28] sm:$0x7] (!%p287_p2), %vm331_vm1, %v2710_v1  ;;  %332 = vst.msk [vmem:[#allocation2] sm:$0x7] (!%p287_p2), %vm331_vm1, %v2710_v1  ;;  %v2585_v6 = vld [vmem:[%s3237_s1 + $0x10] sm:$0xff] (!%p287_p2)   ;;  %v2586_v7 = vld [vmem:[%s3237_s1 + $0x18] sm:$0xff] (!%p287_p2)  }
   0x8   : > { %2400 = vmatpush3.bf16.msra.mxu1 (!%p287_p2), %v2581_v2  ;;  %2381 = vmatprep.subr.bf16.mxu0 (!%p287_p2), %v2710_v1  ;;  %333 = vst.msk [vmem:[#allocation2 + $0x4] sm:$0x7] (!%p287_p2), %vm331_vm1, %v2710_v1  ;;  %334 = vst.msk [vmem:[#allocation2 + $0x8] sm:$0x7] (!%p287_p2), %vm331_vm1, %v2710_v1  ;;  %v2587_v8 = vld [vmem:[%s3237_s1 + $0x18] sm:$0xff] (!%p287_p2)   ;;  %v2588_v10 = vld [vmem:[%s3237_s1 + $0x20] sm:$0xff] (!%p287_p2)  }
   0x9   : > { %2401 = vmatprep.subr.bf16.mxu1 (!%p287_p2), %v2710_v1  ;;  %2415 = vmatprep.mubr.msk.bf16.mxu1 (!%p287_p2), %vm2711_vm0, %v2710_v1  ;;  %335 = vst.msk [vmem:[#allocation2 + $0xc] sm:$0x7] (!%p287_p2), %vm331_vm1, %v2710_v1  ;;  %336 = vst.msk [vmem:[#allocation2 + $0x10] sm:$0x7] (!%p287_p2), %vm331_vm1, %v2710_v1  ;;  %v2589_v11 = vld [vmem:[%s3237_s1 + $0x20] sm:$0xff] (!%p287_p2)   ;;  %v2590_v12 = vld [vmem:[%s3237_s1 + $0x28] sm:$0xff] (!%p287_p2)  }
   0xa   : > { %337 = vst.msk [vmem:[#allocation2 + $0x14] sm:$0x7] (!%p287_p2), %vm331_vm1, %v2710_v1  ;;  %338 = vst.msk [vmem:[#allocation2 + $0x18] sm:$0x7] (!%p287_p2), %vm331_vm1, %v2710_v1  ;;  %v2591_v13 = vld [vmem:[%s3237_s1 + $0x28] sm:$0xff] (!%p287_p2)   ;;  %v2853_v18 = vshrl.u32 (!%p287_p2), %v375_v9, 7 }
   0xb   : > { %2382 = vmatpush3.bf16.msra.mxu0 (!%p287_p2), %v2582_v3  ;;  %339 = vst.msk [vmem:[#allocation2 + $0x1c] sm:$0x7] (!%p287_p2), %vm331_vm1, %v2710_v1  ;;  %v2712_v16 = vmov (!%p287_p2), 1966171168   ;;  %v2592_v24 = vld [vmem:[%s3237_s1 + $0x30] sm:$0xff] (!%p287_p2)   ;;  %v2594_v28 = vld [vmem:[%s3237_s1 + $0x38] sm:$0xff] (!%p287_p2)  }
   0xc   : > { %2402 = vmatpush3.bf16.msra.mxu1 (!%p287_p2), %v2583_v4  ;;  %2383 = vmatprep.subr.bf16.mxu0 (!%p287_p2), %v2710_v1  ;;  %v373_v17 = vunpack.c.l.s4 (!%p287_p2), %v2712_v16  ;;  %v2593_v26 = vld [vmem:[%s3237_s1 + $0x30] sm:$0xff] (!%p287_p2)   ;;  %v2595_v30 = vld [vmem:[%s3237_s1 + $0x38] sm:$0xff] (!%p287_p2)   ;;  %v2596_v33 = vld [vmem:[%s3237_s1] sm:$0xff] (!%p287_p2)   ;;  %v2713_v4 = vmov (!%p287_p2), 1983009808   ;;  %vm488_vm2 = vcmask (!%p287_p2), 517120  }
   0xd   : > { %s3248_s10 = smov (!%p2792_p3, %s2108_s10), 1  ;;  %2403 = vmatprep.subr.bf16.mxu1 %v2710_v1  ;;  %v2597_v34 = vld [vmem:[%s3237_s1] sm:$0xff]   ;;  %v2598_v35 = vld [vmem:[%s3237_s1 + $0x8] sm:$0xff]   ;;  %v2600_v37 = vld [vmem:[%s3237_s1 + $0x10] sm:$0xff]   ;;  %vm1002_vm3 = vcmask 523264  }
   0xe   : > { %s2113_s28 = sshll.u32 %s3248_s10, 3  ;;  %v374_v20 = vunpack.c.0.s8 %v373_v17  ;;  %v2599_v36 = vld [vmem:[%s3237_s1 + $0x8] sm:$0xff]   ;;  %v2601_v38 = vld [vmem:[%s3237_s1 + $0x10] sm:$0xff]   ;;  %v2602_v39 = vld [vmem:[%s3237_s1 + $0x18] sm:$0xff]   ;;  %s2297_s26 = sshll.u32 %s3248_s10, 2 }
   0xf   : > { %2384 = vmatpush3.bf16.msra.mxu0 %v2584_v5  ;;  %s2838_s14 = scalar_lea.vmem %s3236_s0, %s2113_s28  ;;  %v2603_v40 = vld [vmem:[%s3237_s1 + $0x18] sm:$0xff]   ;;  %v2604_v41 = vld [vmem:[%s3237_s1 + $0x20] sm:$0xff]   ;;  %v2606_v43 = vld [vmem:[%s3237_s1 + $0x28] sm:$0xff]   ;;  %v478_v5 = vunpack.c.l.s4 %v2713_v4  ;;  %s329_s29 = scalar_lea.vmem %s3245_s9, %s2297_s26 }
  0x10   : > { %2404 = vmatpush3.bf16.msra.mxu1 %v2585_v6  ;;  %2385 = vmatprep.subr.bf16.mxu0 %v2710_v1  ;;  %v344_v14 = vld [vmem:[%s2838_s14] sm:$0x1]  ;;  %v345_v15 = vld [vmem:[%s2838_s14 + $0x1] sm:$0x1]  ;;  %v2125_v19 = vld [vmem:[%s2838_s14 + $0x2] sm:$0x1]  ;;  %v2860_v23 = vsub.s32 %v374_v20, %v2853_v18 }
  0x11   : > { %2405 = vmatprep.subr.bf16.mxu1 %v2710_v1  ;;  %v2126_v21 = vld [vmem:[%s2838_s14 + $0x3] sm:$0x1]  ;;  %v371_v22 = vcombine.low %v344_v14, %v345_v15  ;;  %v2136_v44 = vld [vmem:[%s2838_s14 + $0x4] sm:$0x1]  ;;  %v2137_v45 = vld [vmem:[%s2838_s14 + $0x5] sm:$0x1]  ;;  %v479_v6 = vunpack.c.0.s8 %v478_v5 }
  0x12   : > { %v519_v25 = vcombine.low %v2125_v19, %v2126_v21  ;;  %v2605_v42 = vld [vmem:[%s3237_s1 + $0x20] sm:$0xff]   ;;  %v2607_v46 = vld [vmem:[%s3237_s1 + $0x28] sm:$0xff]   ;;  %v2608_v49 = vld [vmem:[%s3237_s1 + $0x30] sm:$0xff]   ;;  %v666_v51 = vcombine.low %v2136_v44, %v2137_v45 }
  0x13   : > { %2386 = vmatpush3.bf16.msra.mxu0 %v2586_v7  ;;  %v378_v27 = vrot.slane %v371_v22, %v2860_v23  ;;  %v2147_v47 = vld [vmem:[%s2838_s14 + $0x6] sm:$0x1]  ;;  %v2148_v48 = vld [vmem:[%s2838_s14 + $0x7] sm:$0x1]  ;;  %v2609_v50 = vld [vmem:[%s3237_s1 + $0x30] sm:$0xff]   ;;  %v482_v9 = vsub.s32 %v479_v6, %v2853_v18 }
  0x14   : > { %2406 = vmatpush3.bf16.msra.mxu1 %v2587_v8  ;;  %2387 = vmatprep.subr.bf16.mxu0 %v2710_v1  ;;  %v526_v29 = vrot.slane %v519_v25, %v2860_v23  ;;  %v813_v52 = vcombine.low %v2147_v47, %v2148_v48  ;;  %v2610_v53 = vld [vmem:[%s3237_s1 + $0x38] sm:$0xff]   ;;  %v673_v55 = vrot.slane %v666_v51, %v2860_v23  ;;  %v2612_v59 = vld [vmem:[%s3239_s3 + $0x20] sm:$0xff]   ;;  %v2614_v61 = vld [vmem:[%s3239_s3 + $0x28] sm:$0xff]  }
  0x15   : > { %2407 = vmatprep.subr.bf16.mxu1 %v2710_v1  ;;  %v385_v31 = vrot.slane %v378_v27, %v2860_v23  ;;  %v2611_v54 = vld [vmem:[%s3237_s1 + $0x38] sm:$0xff]   ;;  %v2613_v60 = vld [vmem:[%s3239_s3 + $0x40] sm:$0xff]   ;;  %v2615_v62 = vld [vmem:[%s3239_s3 + $0x48] sm:$0xff]  }
  0x16   : > { %v533_v32 = vrot.slane %v526_v29, %v2860_v23  ;;  %v820_v56 = vrot.slane %v813_v52, %v2860_v23  ;;  %v680_v57 = vrot.slane %v673_v55, %v2860_v23  ;;  %v2616_v63 = vld [vmem:[%s3239_s3 + $0x30] sm:$0xff]   ;;  %v2618_v2 = vld [vmem:[%s3239_s3 + $0x38] sm:$0xff]   ;;  %v2116_v7 = vld [vmem:[%s3238_s2] ss:$0 sm:$0xff] }
  0x17   : > { %2388 = vmatpush3.bf16.msra.mxu0 %v2588_v10  ;;  %v2617_v0 = vld [vmem:[%s3239_s3 + $0x50] sm:$0xff]   ;;  %v2619_v3 = vld [vmem:[%s3239_s3 + $0x58] sm:$0xff]   ;;  %v2621_v45 = vld [vmem:[%s3239_s3] sm:$0xff]  }
  0x18   : > { %2408 = vmatpush3.bf16.msra.mxu1 %v2589_v11  ;;  %2389 = vmatprep.subr.bf16.mxu0 %v2710_v1  ;;  %v827_v58 = vrot.slane %v820_v56, %v2860_v23  ;;  %v2623_v47 = vld [vmem:[%s3239_s3 + $0x80] sm:$0xff]   ;;  %v2626_v52 = vld [vmem:[%s3239_s3 + $0x10] sm:$0xff]   ;;  %v2628_v55 = vld [vmem:[%s3239_s3 + $0x18] sm:$0xff]  }
  0x19   : > { %2409 = vmatprep.subr.bf16.mxu1 %v2710_v1  ;;  %v2629_v56 = vld [vmem:[%s3239_s3 + $0x98] sm:$0xff]   ;;  %v2642_v6 = vld [vmem:[%s3239_s3 + $0xa0] sm:$0xff]  }
  0x1a   : > { %v2638_v4 = vld [vmem:[%s3239_s3 + $0x78] sm:$0xff]  }
  0x1b   : > { %2390 = vmatpush3.bf16.msra.mxu0 %v2590_v12  ;;  %v2639_v5 = vld [vmem:[%s3239_s3 + $0xd8] sm:$0xff]  }
  0x1c   : > { %2410 = vmatpush3.bf16.msra.mxu1 %v2591_v13  ;;  %2391 = vmatprep.subr.bf16.mxu0 %v2710_v1 }
  0x1d   : > { %2411 = vmatprep.subr.bf16.mxu1 %v2710_v1 }
  0x1f   : > { %2392 = vmatpush3.bf16.msra.mxu0 %v2592_v24 }
  0x20   : > { %2412 = vmatpush3.bf16.msra.mxu1 %v2593_v26  ;;  %2393 = vmatprep.subr.bf16.mxu0 %v2710_v1 }
  0x21   : > { %2413 = vmatprep.subr.bf16.mxu1 %v2710_v1 }
  0x23   : > { %2394 = vmatpush3.bf16.msra.mxu0 %v2594_v28 }
  0x24   : > { %2414 = vmatpush3.bf16.msra.mxu1 %v2595_v30  ;;  %2419 = vmatprep.subr.bf16.mxu0 %v2710_v1 }
  0x25   : > { %2439 = vmatprep.subr.bf16.mxu1 %v2710_v1 }
  0x26   : > { %2396 = vmatmul.mubr.bf16.vlgmr.msra.gmra.mrb[0].mxu0 %v385_v31 }
  0x27   : > { %2416 = vmatmul.mubr.bf16.vlgmr.msra.gmra.mrb[0].mxu1 %v533_v32  ;;  %2420 = vmatpush3.bf16.msra.mxu0 %v2596_v33 }
  0x28   : > { %2440 = vmatpush3.bf16.msra.mxu1 %v2597_v34  ;;  %2421 = vmatprep.subr.bf16.mxu0 %v2710_v1 }
  0x29   : > { %2441 = vmatprep.subr.bf16.mxu1 %v2710_v1  ;;  %2435 = vmatprep.mubr.msk.bf16.mxu0 %vm2711_vm0, %v2710_v1 }
  0x2a   : > { %2455 = vmatprep.mubr.msk.bf16.mxu1 %vm2711_vm0, %v2710_v1 }
  0x2b   : > { %2422 = vmatpush3.bf16.msra.mxu0 %v2598_v35 }
  0x2c   : > { %2442 = vmatpush3.bf16.msra.mxu1 %v2599_v36  ;;  %2423 = vmatprep.subr.bf16.mxu0 %v2710_v1 }
  0x2d   : > { %2443 = vmatprep.subr.bf16.mxu1 %v2710_v1 }
  0x2f   : > { %2424 = vmatpush3.bf16.msra.mxu0 %v2600_v37 }
  0x30   : > { %2444 = vmatpush3.bf16.msra.mxu1 %v2601_v38  ;;  %2425 = vmatprep.subr.bf16.mxu0 %v2710_v1 }
  0x31   : > { %2445 = vmatprep.subr.bf16.mxu1 %v2710_v1 }
  0x33   : > { %2426 = vmatpush3.bf16.msra.mxu0 %v2602_v39 }
  0x34   : > { %2446 = vmatpush3.bf16.msra.mxu1 %v2603_v40  ;;  %2427 = vmatprep.subr.bf16.mxu0 %v2710_v1 }
  0x35   : > { %2447 = vmatprep.subr.bf16.mxu1 %v2710_v1 }
  0x37   : > { %2428 = vmatpush3.bf16.msra.mxu0 %v2604_v41 }
  0x38   : > { %2448 = vmatpush3.bf16.msra.mxu1 %v2605_v42  ;;  %2429 = vmatprep.subr.bf16.mxu0 %v2710_v1 }
  0x39   : > { %2449 = vmatprep.subr.bf16.mxu1 %v2710_v1 }
  0x3b   : > { %2430 = vmatpush3.bf16.msra.mxu0 %v2606_v43 }
  0x3c   : > { %2450 = vmatpush3.bf16.msra.mxu1 %v2607_v46  ;;  %2431 = vmatprep.subr.bf16.mxu0 %v2710_v1 }
  0x3d   : > { %2451 = vmatprep.subr.bf16.mxu1 %v2710_v1 }
  0x3f   : > { %2432 = vmatpush3.bf16.msra.mxu0 %v2608_v49  ;;  %v2624_v49 = vld [vmem:[%s3239_s3 + $0x8] sm:$0xff]  }
  0x40   : > { %2452 = vmatpush3.bf16.msra.mxu1 %v2609_v50  ;;  %2433 = vmatprep.subr.bf16.mxu0 %v2710_v1  ;;  %v2625_v50 = vld [vmem:[%s3239_s3 + $0x88] sm:$0xff]  }
  0x41   : > { %2453 = vmatprep.subr.bf16.mxu1 %v2710_v1 }
  0x43   : > { %2434 = vmatpush3.bf16.msra.mxu0 %v2610_v53  ;;  %v2627_v53 = vld [vmem:[%s3239_s3 + $0x90] sm:$0xff]  }
  0x44   : > { %2454 = vmatpush3.bf16.msra.mxu1 %v2611_v54  ;;  %2483 = vmatprep.subr.bf16.mxu0 %v2710_v1 }
  0x45   : > { %2459 = vmatprep.subr.bf16.mxu1 %v2710_v1 }
  0x46   : > { %2436 = vmatmul.mubr.bf16.vlgmr.msra.gmra.mrb[4].mxu0 %v680_v57 }
  0x47   : > { %2456 = vmatmul.mubr.bf16.vlgmr.msra.gmra.mrb[4].mxu1 %v827_v58  ;;  %2491 = vmatprep.mubr.msk.bf16.mxu0 %vm2711_vm0, %v2710_v1  ;;  %v2632_v58 = vld [vmem:[%s3239_s3 + $0x60] sm:$0xff]  }
  0x48   : > { %2467 = vmatprep.mubr.msk.bf16.mxu1 %vm2711_vm0, %v2710_v1  ;;  %2460 = vmatpush3.bf16.msra.mxu1 %v2612_v59  ;;  %v2633_v59 = vld [vmem:[%s3239_s3 + $0xc0] sm:$0xff]  }
  0x49   : > { %2484 = vmatpush3.bf16.msra.mxu0 %v2613_v60  ;;  %2461 = vmatprep.subr.bf16.mxu1 %v2710_v1 }
  0x4a   : > { %2485 = vmatprep.subr.bf16.mxu0 %v2710_v1 }
  0x4c   : > { %2462 = vmatpush3.bf16.msra.mxu1 %v2614_v61  ;;  %v2634_v61 = vld [vmem:[%s3239_s3 + $0x68] sm:$0xff]  }
  0x4d   : > { %2486 = vmatpush3.bf16.msra.mxu0 %v2615_v62  ;;  %2463 = vmatprep.subr.bf16.mxu1 %v2710_v1  ;;  %v2635_v62 = vld [vmem:[%s3239_s3 + $0xc8] sm:$0xff]  }
  0x4e   : > { %2487 = vmatprep.subr.bf16.mxu0 %v2710_v1 }
  0x50   : > { %2464 = vmatpush3.bf16.msra.mxu1 %v2616_v63  ;;  %v2636_v63 = vld [vmem:[%s3239_s3 + $0x70] sm:$0xff]  }
  0x51   : > { %2488 = vmatpush3.bf16.msra.mxu0 %v2617_v0  ;;  %2465 = vmatprep.subr.bf16.mxu1 %v2710_v1  ;;  %v2637_v0 = vld [vmem:[%s3239_s3 + $0xd0] sm:$0xff]  }
  0x52   : > { %2489 = vmatprep.subr.bf16.mxu0 %v2710_v1 }
  0x54   : > { %2466 = vmatpush3.bf16.msra.mxu1 %v2618_v2 }
  0x55   : > { %2490 = vmatpush3.bf16.msra.mxu0 %v2619_v3  ;;  %2471 = vmatprep.subr.bf16.mxu1 %v2710_v1 }
  0x56   : > { %2507 = vmatprep.subr.bf16.mxu0 %v2710_v1 }
  0xf9   : > { %v469_v8 = vpop.f32.mrb[0].mxu0 }
  0xfa   : > { %v470_v10 = vadd.f32 %v2116_v7, %v469_v8  ;;  %v2397_v11 = vpop.f32.mrb[1].mxu0  ;;  %v617_v12 = vpop.f32.mrb[0].mxu1  ;;  %v2643_v8 = vld [vmem:[%s3239_s3 + $0x100] sm:$0xff]  }
  0xfb   : > { %v472_v13 = vpop.f32.mrb[2].mxu0  ;;  %v618_v14 = vadd.f32 %v2116_v7, %v617_v12  ;;  %v2417_v15 = vpop.f32.mrb[1].mxu1  ;;  %v2645_v11 = vld [vmem:[%s3239_s3 + $0x108] sm:$0xff]   ;;  %v2646_v12 = vld [vmem:[%s3239_s3 + $0xb0] sm:$0xff]  }
  0xfc   : > { %v475_v16 = vmax.f32 %v470_v10, 0.0  ;;  %v2398_v17 = vpop.f32.mrb[3].mxu0  ;;  %v620_v19 = vpop.f32.mrb[2].mxu1  ;;  %v2644_v10 = vld [vmem:[%s3239_s3 + $0xa8] sm:$0xff]   ;;  %v2647_v13 = vld [vmem:[%s3239_s3 + $0x110] sm:$0xff]  }
  0xfd   : > { %v623_v20 = vmax.f32 %v618_v14, 0.0  ;;  %v2418_v21 = vpop.f32.mrb[3].mxu1  ;;  %v2649_v17 = vld [vmem:[%s3239_s3 + $0x118] sm:$0xff]   ;;  %v2652_v19 = vld [vmem:[%s3239_s3 + $0xe0] sm:$0xff]  }
  0xfe   : > { %v483_v22 = vrot.slane %v475_v16, %v482_v9  ;;  %v2648_v16 = vld [vmem:[%s3239_s3 + $0xb8] sm:$0xff]  }
  0xff   : > { %v631_v24 = vrot.slane %v623_v20, %v482_v9 }
 0x100   : > { %v484_v25 = vcombine.high %v483_v22, %v483_v22  ;;  %489 = vst.msk [vmem:[#allocation2 + $0x24] sm:$0x3] %vm488_vm2, %v483_v22  ;;  %v2653_v22 = vld [vmem:[%s3239_s3 + $0xe8] sm:$0xff]  }
 0x101   : > { %v632_v26 = vcombine.high %v631_v24, %v631_v24  ;;  %636 = vst.msk [vmem:[#allocation2 + $0x19] sm:$0x3] %vm488_vm2, %v631_v24  ;;  %v2654_v24 = vld [vmem:[%s3239_s3 + $0xf0] sm:$0xff]  }
 0x102   : > { %490 = vst.msk [vmem:[#allocation2 + $0x28] sm:$0x3] %vm488_vm2, %v484_v25 }
 0x103   : > { %637 = vst.msk [vmem:[#allocation2 + $0x1d] sm:$0x3] %vm488_vm2, %v632_v26  ;;  %v2655_v26 = vld [vmem:[%s3239_s3 + $0xf8] sm:$0xff]  }
 0x109   : > { %v2696_v54 = vld.sshfl [vmem:[#allocation2 + $0x24] sm:$0xf pattern:$0x76325410] }
 0x10a   : > { %v1308_v60 = vpack.c.bf16 %v2696_v54, %v2696_v54  ;;  %v2697_v2 = vld.sshfl [vmem:[#allocation2 + $0x18] sm:$0xf pattern:$0x76325410] }
 0x10b   : > { %v2699_v14 = vld.sshfl [vmem:[#allocation2 + $0x19] sm:$0xf pattern:$0x76325410] }
 0x10c   : > { %v1399_v20 = vpack.c.bf16 %v2699_v14, %v2699_v14 }
 0x119   : > { %v764_v27 = vpop.f32.mrb[4].mxu0 }
 0x11a   : > { %v765_v28 = vadd.f32 %v2116_v7, %v764_v27  ;;  %v911_v29 = vpop.f32.mrb[4].mxu1  ;;  %v2437_v30 = vpop.f32.mrb[5].mxu0 }
 0x11b   : > { %v912_v31 = vadd.f32 %v2116_v7, %v911_v29  ;;  %v767_v32 = vpop.f32.mrb[6].mxu0  ;;  %v2457_v33 = vpop.f32.mrb[5].mxu1  ;;  %v1217_v7 = vpack.c.bf16 %v2697_v2, %v2697_v2  ;;  %v2659_v29 = vld [vmem:[%s3243_s7 + $0x4] ss:$8 sps:$4 sm:$0xff]   ;;  %v2662_v30 = vld [vmem:[%s3243_s7 + $0x14] ss:$8 sps:$4 sm:$0xff]  }
 0x11c   : > { %v770_v34 = vmax.f32 %v765_v28, 0.0  ;;  %v2438_v35 = vpop.f32.mrb[7].mxu0  ;;  %v914_v36 = vpop.f32.mrb[6].mxu1  ;;  %v2657_v28 = vld [vmem:[%s3243_s7] ss:$8 sps:$4 sm:$0xff]  }
 0x11d   : > { %v917_v37 = vmax.f32 %v912_v31, 0.0  ;;  %v2458_v38 = vpop.f32.mrb[7].mxu1  ;;  %v2665_v31 = vld [vmem:[%s3243_s7 + $0x24] ss:$8 sps:$4 sm:$0xff]   ;;  %v2663_v32 = vld [vmem:[%s3243_s7 + $0x20] ss:$8 sps:$4 sm:$0xff]  }
 0x11e   : > { %v778_v39 = vrot.slane %v770_v34, %v482_v9  ;;  %v2666_v33 = vld [vmem:[%s3243_s7 + $0x30] ss:$8 sps:$4 sm:$0xff]   ;;  %v2668_v34 = vld [vmem:[%s3243_s7 + $0x34] ss:$8 sps:$4 sm:$0xff]   ;;  %v2671_v35 = vld [vmem:[%s3243_s7 + $0x44] ss:$8 sps:$4 sm:$0xff]  }
 0x11f   : > { %v925_v40 = vrot.slane %v917_v37, %v482_v9  ;;  %v2672_v36 = vld [vmem:[%s3241_s5] ss:$8 sps:$4 sm:$0xff]   ;;  %v2674_v37 = vld [vmem:[%s3241_s5 + $0x4] ss:$8 sps:$4 sm:$0xff]   ;;  %v2680_v38 = vld [vmem:[%s3241_s5 + $0x14] ss:$8 sps:$4 sm:$0xff]  }
 0x120   : > { %v779_v41 = vcombine.high %v778_v39, %v778_v39  ;;  %783 = vst.msk [vmem:[#allocation2 + $0x10] sm:$0x3] %vm488_vm2, %v778_v39  ;;  %v2669_v39 = vld [vmem:[%s3243_s7 + $0x40] ss:$8 sps:$4 sm:$0xff]  }
 0x121   : > { %v926_v42 = vcombine.high %v925_v40, %v925_v40  ;;  %930 = vst.msk [vmem:[#allocation2 + $0x5] sm:$0x3] %vm488_vm2, %v925_v40  ;;  %v2678_v40 = vld [vmem:[%s3241_s5 + $0x10] ss:$8 sps:$4 sm:$0xff]  }
 0x122   : > { %784 = vst.msk [vmem:[#allocation2 + $0x14] sm:$0x3] %vm488_vm2, %v779_v41  ;;  %v2677_v41 = vld [vmem:[%s3243_s7 + $0x54] ss:$8 sps:$4 sm:$0xff]  }
 0x123   : > { %931 = vst.msk [vmem:[#allocation2 + $0x9] sm:$0x3] %vm488_vm2, %v926_v42  ;;  %v2675_v42 = vld [vmem:[%s3243_s7 + $0x50] ss:$8 sps:$4 sm:$0xff]  }
 0x127   : > { %v2693_v43 = vld.sshfl [vmem:[#allocation2 + $0xc] sm:$0xf pattern:$0x76325410] }
 0x128   : > { %v2694_v44 = vld.sshfl [vmem:[#allocation2 + $0x1] sm:$0xf pattern:$0x76325410]  ;;  %v968_v46 = vpack.c.bf16 %v2693_v43, %v2693_v43 }
 0x129   : > { %v1126_v48 = vpack.c.bf16 %v2694_v44, %v2694_v44  ;;  %v2695_v51 = vld.sshfl [vmem:[#allocation2] sm:$0xf pattern:$0x76325410] }
 0x12a   : > { %2468 = vmatmul.mubr.msk.bf16.vlgmr.msra.gmra.mrb[8].mxu1 %vm1002_vm3, %v968_v46  ;;  %v945_v57 = vpack.c.bf16 %v2695_v51, %v2695_v51  ;;  %v2698_v3 = vld.sshfl [vmem:[#allocation2 + $0x4] sm:$0xf pattern:$0x76325410]  ;;  %v2687_v51 = vld [vmem:[%s3243_s7 + $0x70] ss:$8 sps:$4 sm:$0xff]  }
 0x12b   : > { %2472 = vmatpush3.bf16.msra.mxu1 %v2621_v45  ;;  %2492 = vmatmul.mubr.msk.bf16.vlgmr.msra.gmra.mrb[8].mxu0 %vm1002_vm3, %v1126_v48  ;;  %v1490_v9 = vpack.c.bf16 %v2698_v3, %v2698_v3  ;;  %v2700_v15 = vld.sshfl [vmem:[#allocation2 + $0x5] sm:$0xf pattern:$0x76325410]  ;;  %v1865_v48 = vld [vmem:[%s2838_s14 + $0x1] sm:$0x1] }
 0x12c   : > { %2508 = vmatpush3.bf16.msra.mxu0 %v2623_v47  ;;  %2473 = vmatprep.subr.bf16.mxu1 %v2710_v1  ;;  %v1672_v21 = vpack.c.bf16 %v2700_v15, %v2700_v15  ;;  %v2701_v25 = vld.sshfl [vmem:[#allocation2 + $0x10] sm:$0xf pattern:$0x76325410]  ;;  %v2683_v43 = vld [vmem:[%s3243_s7 + $0x64] ss:$8 sps:$4 sm:$0xff]  }
 0x12d   : > { %2509 = vmatprep.subr.bf16.mxu0 %v2710_v1  ;;  %2479 = vmatprep.mubr.msk.bf16.mxu1 %vm2711_vm0, %v2710_v1  ;;  %v1581_v27 = vpack.c.bf16 %v2701_v25, %v2701_v25  ;;  %v2681_v44 = vld [vmem:[%s3243_s7 + $0x60] ss:$8 sps:$4 sm:$0xff]   ;;  %v2686_v45 = vld [vmem:[%s3241_s5 + $0x24] ss:$8 sps:$4 sm:$0xff]  }
 0x12e   : > { %2515 = vmatprep.mubr.msk.bf16.mxu0 %vm2711_vm0, %v2710_v1  ;;  %v2684_v46 = vld [vmem:[%s3241_s5 + $0x20] ss:$8 sps:$4 sm:$0xff]  }
 0x12f   : > { %2474 = vmatpush3.bf16.msra.mxu1 %v2624_v49  ;;  %v1864_v47 = vld [vmem:[%s2838_s14] sm:$0x1]  ;;  %v2689_v49 = vld [vmem:[%s3243_s7 + $0x74] ss:$8 sps:$4 sm:$0xff]  }
 0x130   : > { %2510 = vmatpush3.bf16.msra.mxu0 %v2625_v50  ;;  %2475 = vmatprep.subr.bf16.mxu1 %v2710_v1  ;;  %v1884_v50 = vcombine.low %v1864_v47, %v1865_v48  ;;  %v1768_v47 = vld [vmem:[%s3242_s6] sm:$0x3]  ;;  %v1776_v48 = vsub.s32 1, %v2853_v18 }
 0x131   : > { %2511 = vmatprep.subr.bf16.mxu0 %v2710_v1 }
 0x132   : > { %v1891_v54 = vrot.slane %v1884_v50, %v2860_v23  ;;  %v2023_v50 = vld [vmem:[%s3244_s8] sm:$0x3] }
 0x133   : > { %2476 = vmatpush3.bf16.msra.mxu1 %v2626_v52  ;;  %v2692_v52 = vld [vmem:[%s3241_s5 + $0x34] ss:$8 sps:$4 sm:$0xff]  }
 0x134   : > { %2512 = vmatpush3.bf16.msra.mxu0 %v2627_v53  ;;  %2477 = vmatprep.subr.bf16.mxu1 %v2710_v1  ;;  %v2690_v53 = vld [vmem:[%s3241_s5 + $0x30] ss:$8 sps:$4 sm:$0xff]  }
 0x135   : > { %2513 = vmatprep.subr.bf16.mxu0 %v2710_v1 }
 0x137   : > { %2478 = vmatpush3.bf16.msra.mxu1 %v2628_v55  ;;  %v1898_v55 = vrot.slane %v1891_v54, %v2860_v23 }
 0x138   : > { %2514 = vmatpush3.bf16.msra.mxu0 %v2629_v56  ;;  %2495 = vmatprep.subr.bf16.mxu1 %v2710_v1  ;;  %v2714_v56 = vmov 0  }
 0x139   : > { %2531 = vmatprep.subr.bf16.mxu0 %v2710_v1 }
 0x13a   : > { %2480 = vmatmul.mubr.msk.bf16.vlgmr.msra.gmra.mrb[12].mxu1 %vm1002_vm3, %v945_v57 }
 0x13b   : > { %2516 = vmatmul.mubr.msk.bf16.vlgmr.msra.gmra.mrb[12].mxu0 %vm1002_vm3, %v1308_v60  ;;  %2496 = vmatpush3.bf16.msra.mxu1 %v2632_v58 }
 0x13c   : > { %2532 = vmatpush3.bf16.msra.mxu0 %v2633_v59  ;;  %2497 = vmatprep.subr.bf16.mxu1 %v2710_v1 }
 0x13d   : > { %2533 = vmatprep.subr.bf16.mxu0 %v2710_v1  ;;  %2503 = vmatprep.mubr.msk.bf16.mxu1 %vm2711_vm0, %v2710_v1 }
 0x13e   : > { %2539 = vmatprep.mubr.msk.bf16.mxu0 %vm2711_vm0, %v2710_v1 }
 0x13f   : > { %2498 = vmatpush3.bf16.msra.mxu1 %v2634_v61 }
 0x140   : > { %2534 = vmatpush3.bf16.msra.mxu0 %v2635_v62  ;;  %2499 = vmatprep.subr.bf16.mxu1 %v2710_v1 }
 0x141   : > { %2535 = vmatprep.subr.bf16.mxu0 %v2710_v1 }
 0x143   : > { %2500 = vmatpush3.bf16.msra.mxu1 %v2636_v63 }
 0x144   : > { %2536 = vmatpush3.bf16.msra.mxu0 %v2637_v0  ;;  %2501 = vmatprep.subr.bf16.mxu1 %v2710_v1 }
 0x145   : > { %2537 = vmatprep.subr.bf16.mxu0 %v2710_v1 }
 0x147   : > { %2502 = vmatpush3.bf16.msra.mxu1 %v2638_v4 }
 0x148   : > { %2538 = vmatpush3.bf16.msra.mxu0 %v2639_v5  ;;  %2519 = vmatprep.subr.bf16.mxu1 %v2710_v1 }
 0x149   : > { %2555 = vmatprep.subr.bf16.mxu0 %v2710_v1 }
 0x14a   : > { %2504 = vmatmul.mubr.msk.bf16.vlgmr.msra.gmra.mrb[16].mxu1 %vm1002_vm3, %v1217_v7 }
 0x14b   : > { %2540 = vmatmul.mubr.msk.bf16.vlgmr.msra.gmra.mrb[16].mxu0 %vm1002_vm3, %v1490_v9  ;;  %2520 = vmatpush3.bf16.msra.mxu1 %v2642_v6 }
 0x14c   : > { %2556 = vmatpush3.bf16.msra.mxu0 %v2643_v8  ;;  %2521 = vmatprep.subr.bf16.mxu1 %v2710_v1 }
 0x14d   : > { %2557 = vmatprep.subr.bf16.mxu0 %v2710_v1  ;;  %2527 = vmatprep.mubr.msk.bf16.mxu1 %vm2711_vm0, %v2710_v1 }
 0x14e   : > { %2563 = vmatprep.mubr.msk.bf16.mxu0 %vm2711_vm0, %v2710_v1 }
 0x14f   : > { %2522 = vmatpush3.bf16.msra.mxu1 %v2644_v10 }
 0x150   : > { %2558 = vmatpush3.bf16.msra.mxu0 %v2645_v11  ;;  %2523 = vmatprep.subr.bf16.mxu1 %v2710_v1 }
 0x151   : > { %2559 = vmatprep.subr.bf16.mxu0 %v2710_v1 }
 0x153   : > { %2524 = vmatpush3.bf16.msra.mxu1 %v2646_v12 }
 0x154   : > { %2560 = vmatpush3.bf16.msra.mxu0 %v2647_v13  ;;  %2525 = vmatprep.subr.bf16.mxu1 %v2710_v1 }
 0x155   : > { %2561 = vmatprep.subr.bf16.mxu0 %v2710_v1 }
 0x157   : > { %2526 = vmatpush3.bf16.msra.mxu1 %v2648_v16 }
 0x158   : > { %2562 = vmatpush3.bf16.msra.mxu0 %v2649_v17  ;;  %2543 = vmatprep.subr.bf16.mxu1 %v2710_v1 }
 0x159   : > { %1980 = vmatprep.subr.bf16.mxu0 %v2659_v29 }
 0x15a   : > { %2528 = vmatmul.mubr.msk.bf16.vlgmr.msra.gmra.mrb[20].mxu1 %vm1002_vm3, %v1399_v20 }
 0x15b   : > { %2564 = vmatmul.mubr.msk.bf16.vlgmr.msra.gmra.mrb[20].mxu0 %vm1002_vm3, %v1672_v21  ;;  %2544 = vmatpush3.bf16.msra.mxu1 %v2652_v19 }
 0x15c   : > { %2545 = vmatprep.subr.bf16.mxu1 %v2710_v1  ;;  %2551 = vmatprep.mubr.msk.bf16.mxu1 %vm2711_vm0, %v2710_v1 }
 0x15d   : > { %1981 = vmatpush1.bf16.msra.mxu0 %v2657_v28  ;;  %2012 = vmatprep.mubr.bf16.mxu0 %v2714_v56 }
 0x15e   : > { %1982 = vmatprep.subr.bf16.mxu0 %v2662_v30 }
 0x15f   : > { %2546 = vmatpush3.bf16.msra.mxu1 %v2653_v22 }
 0x160   : > { %2547 = vmatprep.subr.bf16.mxu1 %v2710_v1 }
 0x163   : > { %2548 = vmatpush3.bf16.msra.mxu1 %v2654_v24 }
 0x164   : > { %2549 = vmatprep.subr.bf16.mxu1 %v2710_v1  ;;  %v2660_v1 = vld [vmem:[%s3243_s7 + $0x10] ss:$8 sps:$4 sm:$0xff]  }
 0x165   : > { %1983 = vmatpush1.bf16.msra.mxu0 %v2660_v1 }
 0x166   : > { %1984 = vmatprep.subr.bf16.mxu0 %v2665_v31 }
 0x167   : > { %2550 = vmatpush3.bf16.msra.mxu1 %v2655_v26 }
 0x168   : > { %1823 = vmatprep.subr.bf16.mxu1 %v2674_v37 }
 0x169   : > { %1985 = vmatpush1.bf16.msra.mxu0 %v2663_v32 }
 0x16a   : > { %2552 = vmatmul.mubr.msk.bf16.vlgmr.msra.gmra.mrb[24].mxu1 %vm1002_vm3, %v1581_v27  ;;  %1986 = vmatprep.subr.bf16.mxu0 %v2668_v34 }
 0x16b   : > { %1824 = vmatpush1.bf16.msra.mxu1 %v2672_v36  ;;  %1855 = vmatprep.mubr.bf16.mxu1 %v2714_v56 }
 0x16c   : > { %1825 = vmatprep.subr.bf16.mxu1 %v2680_v38 }
 0x16d   : > { %1987 = vmatpush1.bf16.msra.mxu0 %v2666_v33 }
 0x16e   : > { %1988 = vmatprep.subr.bf16.mxu0 %v2671_v35  ;;  %v2267_v35 = vld [vmem:[%s3240_s4] ss:$0 sm:$0xff] }
 0x16f   : > { %1826 = vmatpush1.bf16.msra.mxu1 %v2678_v40 }
 0x170   : > { %1827 = vmatprep.subr.bf16.mxu1 %v2686_v45 }
 0x171   : > { %1989 = vmatpush1.bf16.msra.mxu0 %v2669_v39 }
 0x172   : > { %1990 = vmatprep.subr.bf16.mxu0 %v2677_v41 }
 0x173   : > { %1828 = vmatpush1.bf16.msra.mxu1 %v2684_v46  ;;  %v1772_v46 = vsub.s32 0, %v2853_v18 }
 0x174   : > { %1829 = vmatprep.subr.bf16.mxu1 %v2692_v52 }
 0x175   : > { %1991 = vmatpush1.bf16.msra.mxu0 %v2675_v42  ;;  %v2028_v54 = vrot.slane %v2023_v50, %v1772_v46 }
 0x176   : > { %1992 = vmatprep.subr.bf16.mxu0 %v2683_v43 }
 0x177   : > { %1830 = vmatpush1.bf16.msra.mxu1 %v2690_v53 }
 0x179   : > { %1993 = vmatpush1.bf16.msra.mxu0 %v2681_v44 }
 0x17a   : > { %1994 = vmatprep.subr.bf16.mxu0 %v2689_v49  ;;  %v1773_v49 = vrot.slane %v1768_v47, %v1772_v46 }
 0x17d   : > { %1995 = vmatpush1.bf16.msra.mxu0 %v2687_v51  ;;  %v1777_v51 = vrot.slane %v1768_v47, %v1776_v48 }
 0x180   : > { %2013 = vmatmul.mubr.bf16.vlgmr.msra.gmra.mrb[24].mxu0 %v1898_v55 }
 0x1fd   : > { %v1040_v57 = vpop.f32.mrb[8].mxu1 }
 0x1fe   : > { %v2469_v58 = vpop.f32.mrb[9].mxu1  ;;  %v1197_v59 = vpop.f32.mrb[8].mxu0 }
 0x1ff   : > { %v1043_v60 = vpop.f32.mrb[10].mxu1  ;;  %v2493_v61 = vpop.f32.mrb[9].mxu0 }
 0x200   : > { %v2470_v62 = vpop.f32.mrb[11].mxu1  ;;  %v1200_v63 = vpop.f32.mrb[10].mxu0 }
 0x201   : > { %v2494_v0 = vpop.f32.mrb[11].mxu0 }
 0x20d   : > { %v1107_v2 = vpop.f32.mrb[12].mxu1 }
 0x20e   : > { %v1108_v3 = vadd.f32 %v1107_v2, %v1040_v57  ;;  %v1379_v4 = vpop.f32.mrb[12].mxu0  ;;  %v2481_v5 = vpop.f32.mrb[13].mxu1  ;;  %v2032_v57 = vrot.slane %v2023_v50, %v1776_v48 }
 0x20f   : > { %v2517_v6 = vpop.f32.mrb[13].mxu0  ;;  %v1110_v7 = vpop.f32.mrb[14].mxu1 }
 0x210   : > { %v1382_v8 = vpop.f32.mrb[14].mxu0  ;;  %v2482_v23 = vpop.f32.mrb[15].mxu1  ;;  %v1203_v9 = vadd.f32 %v1197_v59, %v1108_v3 }
 0x211   : > { %v2518_v10 = vpop.f32.mrb[15].mxu0 }
 0x21d   : > { %v1288_v11 = vpop.f32.mrb[16].mxu1 }
 0x21e   : > { %v1294_v12 = vadd.f32 %v1288_v11, %v1203_v9  ;;  %v1561_v13 = vpop.f32.mrb[16].mxu0  ;;  %v2505_v14 = vpop.f32.mrb[17].mxu1 }
 0x21f   : > { %v2541_v15 = vpop.f32.mrb[17].mxu0  ;;  %v1291_v16 = vpop.f32.mrb[18].mxu1 }
 0x220   : > { %v1564_v17 = vpop.f32.mrb[18].mxu0  ;;  %v2506_v19 = vpop.f32.mrb[19].mxu1  ;;  %v1385_v20 = vadd.f32 %v1379_v4, %v1294_v12 }
 0x221   : > { %v2542_v21 = vpop.f32.mrb[19].mxu0 }
 0x22d   : > { %v1470_v22 = vpop.f32.mrb[20].mxu1 }
 0x22e   : > { %v1476_v24 = vadd.f32 %v1470_v22, %v1385_v20  ;;  %v1743_v25 = vpop.f32.mrb[20].mxu0  ;;  %v2529_v26 = vpop.f32.mrb[21].mxu1 }
 0x22f   : > { %v2565_v27 = vpop.f32.mrb[21].mxu0  ;;  %v1473_v28 = vpop.f32.mrb[22].mxu1 }
 0x230   : > { %v1746_v29 = vpop.f32.mrb[22].mxu0  ;;  %v2530_v30 = vpop.f32.mrb[23].mxu1  ;;  %v1567_v1 = vadd.f32 %v1561_v13, %v1476_v24 }
 0x231   : > { %v2566_v31 = vpop.f32.mrb[23].mxu0 }
 0x23d   : > { %v1652_v32 = vpop.f32.mrb[24].mxu1 }
 0x23e   : > { %v1658_v33 = vadd.f32 %v1652_v32, %v1567_v1  ;;  %v2553_v34 = vpop.f32.mrb[25].mxu1 }
 0x23f   : > { %v1655_v36 = vpop.f32.mrb[26].mxu1 }
 0x240   : > { %v1749_v37 = vadd.f32 %v1743_v25, %v1658_v33  ;;  %v2554_v38 = vpop.f32.mrb[27].mxu1 }
 0x242   : > { %v1757_v39 = vadd.f32 %v2267_v35, %v1749_v37 }
 0x244   : > { %v1758_v40 = vmax.f32 %v1757_v39, 0.0 }
 0x246   : > { %v1759_v41 = vpack.c.bf16 %v1758_v40, %v1758_v40 }
 0x248   : > { %2276 = vmatmul.mubr.msk.bf16.vlgmr.msra.gmra.mrb[28].mxu1 %vm1002_vm3, %v1759_v41 }
 0x253   : > { %v2014_v42 = vpop.f32.mrb[24].mxu0 }
 0x254   : > { %v2016_v43 = vpop.f32.mrb[25].mxu0 }
 0x255   : > { %v2018_v44 = vpop.f32.mrb[26].mxu0 }
 0x256   : > { %v2019_v45 = vpop.f32.mrb[27].mxu0 }
 0x31b   : > { %v1857_v52 = vpop.f32.mrb[28].mxu1 }
 0x31c   : > { %v1858_v53 = vadd.f32 %v1857_v52, %v1773_v49  ;;  %v1859_v55 = vpop.f32.mrb[29].mxu1 }
 0x31d   : > { %v1860_v56 = vadd.f32 %v1859_v55, %v1777_v51  ;;  %v1861_v58 = vpop.f32.mrb[30].mxu1 }
 0x31e   : > { %v2021_v59 = vadd.f32 %v2014_v42, %v1858_v53  ;;  %v1862_v60 = vpop.f32.mrb[31].mxu1 }
 0x31f   : > { %v2022_v61 = vadd.f32 %v2016_v43, %v1860_v56 }
 0x320   : > { %v2035_v62 = vadd.f32 %v2028_v54, %v2021_v59 }
 0x321   : > { %v2036_v63 = vadd.f32 %v2032_v57, %v2022_v61 }
 0x322   : > { %v2037_v18 = vmax.f32 %v2035_v62, 0.0 }
 0x323   : > { %v2038_v0 = vmax.f32 %v2036_v63, 0.0 }
 0x325   : > { %v2293_v2 = vpack.c.bf16 %v2038_v0, %v2037_v18 }
 0x327   : > { %2294 = vst.sshfl [vmem:[%s329_s29] sm:$0x33 pattern:$0x76325410] %v2293_v2 }
 0x328 PF: > { %s19_s30 = sadd.s32 1, %s2708_s30  }
 0x329   : > { %p16_p4 = scmp.ge.s32.totalorder %s19_s30, 4  }
 0x32b   :  { %18 = sbr.rel (!%p16_p4) target bundleno = 1 (0x1), region = 102 }

</bundles_post_ra>
